<compile_context>
chip_gen: v7x
topology: tpu7x:2x2x1
jax: 0.10.0
libtpu: 0.0.40
codegen_flags: <defaults>
</compile_context>

<pallas_src>
import functools

import jax
import jax.numpy as jnp
from jax.experimental import pallas as pl
from jax.experimental.pallas import tpu as pltpu

_SQRT2 = 1.4142135623730951
_EPS = 1e-6
_VMEM_LIMIT = 48 * 1024 * 1024      # explicit scoped-VMEM cap (safe on v5e..v7x)
_STRIP_BUDGET = 6 * 1024 * 1024     # per-grid-step working-set target

# Newer JAX: pltpu.CompilerParams; older: pltpu.TPUCompilerParams.
_CompilerParams = getattr(pltpu, "CompilerParams", None) or getattr(
    pltpu, "TPUCompilerParams")


def _cparams():
    return _CompilerParams(dimension_semantics=("parallel", "parallel"),
                           vmem_limit_bytes=_VMEM_LIMIT)


def _gelu(x):
    # exact GELU (erf form), matches torch.nn.GELU()
    return 0.5 * x * (1.0 + jax.lax.erf(x / _SQRT2))


def _pick_strip_rows(H, bytes_per_row, p, budget=_STRIP_BUDGET):
    """Largest divisor of H that fits the VMEM budget, is >= the conv halo,
    and (preferably) leaves >=2 strips so the megacore grid has >=2 steps."""
    divs = [d for d in range(1, H + 1) if H % d == 0]
    fits = lambda d: d * bytes_per_row <= budget
    cand = [d for d in divs if fits(d) and d >= p and H // d >= 2]
    if not cand:
        cand = [d for d in divs if fits(d) and d >= p]
    if not cand:
        cand = [d for d in divs if d >= p] or [H]
    cand.sort(key=lambda d: (d % 8 == 0, d))   # prefer multiples of 8, largest
    return cand[-1]


def _strip_halo(img, th, p):
    """(B, H, W, C) -> (B, (H//th)*2p, W, C): for strip i, the p rows above it
    followed by the p rows below it (zeros at the image border)."""
    B, H, W, C = img.shape
    nH = H // th
    if nH == 1:
        return jnp.zeros((B, 2 * p, W, C), img.dtype)
    s = img.reshape(B, nH, th, W, C)
    z = jnp.zeros((B, 1, p, W, C), img.dtype)
    top = jnp.concatenate([z, s[:, :-1, th - p:]], axis=1)   # (B, nH, p, W, C)
    bot = jnp.concatenate([s[:, 1:, :p], z], axis=1)         # (B, nH, p, W, C)
    return jnp.concatenate([top, bot], axis=2).reshape(B, nH * 2 * p, W, C)


# ---------------------------------------------------------------------------
# In-kernel depthwise-conv helpers (window scratch + tap accumulation)
# ---------------------------------------------------------------------------
def _dw_window(win_ref, main, halo, p, W):
    """Assemble the SAME-padded working window in the VMEM scratch.
    Border columns are re-zeroed each step (cheap) so no cross-step or
    cross-core init dependence exists."""
    rows = win_ref.shape[0]
    C = win_ref.shape[-1]
    th = main.shape[0]
    if p > 0:
        zc = jnp.zeros((rows, p, C), win_ref.dtype)
        win_ref[:, :p] = zc
        win_ref[:, p + W:] = zc
        win_ref[:p, p:p + W] = halo[:p]
        win_ref[p + th:, p:p + W] = halo[p:]
    win_ref[p:p + th, p:p + W] = main
    return win_ref[...]


def _dw_conv(win, w, b, th, W, K):
    """Depthwise KxK conv on the assembled window (bf16 window, f32 accum)."""
    C = w.shape[-1]
    acc = jnp.zeros((th, W, C), jnp.float32)
    for ki in range(K):
        for kj in range(K):
            acc = acc + win[ki:ki + th, kj:kj + W].astype(jnp.float32) * w[ki, kj]
    return acc + b


# ---------------------------------------------------------------------------
# Kernel 1: ConvMod front = LayerNorm(channels) + fused (a|v) 1x1 conv,
#           GELU applied only to the `a` half (static slice).
# ---------------------------------------------------------------------------
def _convmod_front_kernel(x_ref, g_ref, bt_ref, wav_ref, bav_ref, a_ref, v_ref):
    _, th, W, C = x_ref.shape
    x = x_ref[0].reshape(th * W, C)                      # (M, C) f32
    u = jnp.mean(x, axis=-1, keepdims=True)
    s = jnp.mean((x - u) ** 2, axis=-1, keepdims=True)
    xn = (x - u) * jax.lax.rsqrt(s + _EPS) * g_ref[...] + bt_ref[...]
    av = jnp.dot(xn.astype(jnp.bfloat16), wav_ref[...],
                 preferred_element_type=jnp.float32) + bav_ref[...]   # (M, 2C)
    a_ref[0] = _gelu(av[:, :C]).reshape(th, W, C).astype(a_ref.dtype)
    v_ref[0] = av[:, C:].reshape(th, W, C).astype(v_ref.dtype)


def convmod_front(x_img, gamma, beta, wav, bav, th):
    B, H, W, C = x_img.shape
    C2 = wav.shape[1]
    nH = H // th
    strip = lambda b, i: (b, i, 0, 0)
    full2 = lambda b, i: (0, 0)
    return pl.pallas_call(
        _convmod_front_kernel,
        out_shape=(jax.ShapeDtypeStruct((B, H, W, C), jnp.bfloat16),
                   jax.ShapeDtypeStruct((B, H, W, C), jnp.bfloat16)),
        grid=(B, nH),
        in_specs=[pl.BlockSpec((1, th, W, C), strip),
                  pl.BlockSpec((1, C), full2),
                  pl.BlockSpec((1, C), full2),
                  pl.BlockSpec((C, C2), full2),
                  pl.BlockSpec((1, C2), full2)],
        out_specs=(pl.BlockSpec((1, th, W, C), strip),
                   pl.BlockSpec((1, th, W, C), strip)),
        compiler_params=_cparams(),
    )(x_img, gamma, beta, wav, bav)


# ---------------------------------------------------------------------------
# Kernel 2 (fused): depthwise KxK conv on `a` (halo strips) + a*v + proj 1x1 +
#                   layer-scale-1 + residual; then MLP LayerNorm + fc1 + GELU.
# ---------------------------------------------------------------------------
def _attn_back_mlp_front_kernel(a_ref, ah_ref, v_ref, x_ref, dww_ref, dwb_ref,
                                wp_ref, bp_ref, ls1_ref, g_ref, bt_ref,
                                w1_ref, b1_ref, xo_ref, h_ref, win_ref, *, K):
    _, th, W, C = a_ref.shape
    Ch = h_ref.shape[-1]
    p = K // 2
    win = _dw_window(win_ref, a_ref[0], ah_ref[0], p, W)
    a_img = _dw_conv(win, dww_ref[...], dwb_ref[...], th, W, K)   # (th, W, C) f32
    av = (a_img * v_ref[0].astype(jnp.float32)).reshape(th * W, C)
    y = jnp.dot(av.astype(jnp.bfloat16), wp_ref[...],
                preferred_element_type=jnp.float32) + bp_ref[...]
    xr = x_ref[0].reshape(th * W, C) + ls1_ref[...] * y           # residual, f32
    xo_ref[0] = xr.reshape(th, W, C)
    u = jnp.mean(xr, axis=-1, keepdims=True)
    s = jnp.mean((xr - u) ** 2, axis=-1, keepdims=True)
    xn = (xr - u) * jax.lax.rsqrt(s + _EPS) * g_ref[...] + bt_ref[...]
    hh = jnp.dot(xn.astype(jnp.bfloat16), w1_ref[...],
                 preferred_element_type=jnp.float32) + b1_ref[...]
    h_ref[0] = _gelu(hh).reshape(th, W, Ch).astype(h_ref.dtype)


def attn_back_mlp_front(a_img, a_halo, v_img, x_img, dw_w, dw_b, wp, bp, ls1,
                        ln_g, ln_b, w1, b1, th, K):
    B, H, W, C = x_img.shape
    Ch = w1.shape[1]
    nH = H // th
    p = K // 2
    strip = lambda b, i: (b, i, 0, 0)
    full2 = lambda b, i: (0, 0)
    full3 = lambda b, i: (0, 0, 0)
    return pl.pallas_call(
        functools.partial(_attn_back_mlp_front_kernel, K=K),
        out_shape=(jax.ShapeDtypeStruct((B, H, W, C), jnp.float32),
                   jax.ShapeDtypeStruct((B, H, W, Ch), jnp.bfloat16)),
        grid=(B, nH),
        in_specs=[pl.BlockSpec((1, th, W, C), strip),        # a strip
                  pl.BlockSpec((1, 2 * p, W, C), strip),     # a halo (2p rows)
                  pl.BlockSpec((1, th, W, C), strip),        # v strip
                  pl.BlockSpec((1, th, W, C), strip),        # residual x strip
                  pl.BlockSpec((K, K, C), full3),            # dw weight
                  pl.BlockSpec((1, C), full2),               # dw bias
                  pl.BlockSpec((C, C), full2),               # proj weight
                  pl.BlockSpec((1, C), full2),               # proj bias
                  pl.BlockSpec((1, C), full2),               # layer-scale 1
                  pl.BlockSpec((1, C), full2),               # mlp LN gamma
                  pl.BlockSpec((1, C), full2),               # mlp LN beta
                  pl.BlockSpec((C, Ch), full2),              # fc1 weight
                  pl.BlockSpec((1, Ch), full2)],             # fc1 bias
        out_specs=(pl.BlockSpec((1, th, W, C), strip),
                   pl.BlockSpec((1, th, W, Ch), strip)),
        scratch_shapes=[pltpu.VMEM((th + 2 * p, W + 2 * p, C), jnp.bfloat16)],
        compiler_params=_cparams(),
    )(a_img, a_halo, v_img, x_img, dw_w, dw_b, wp, bp, ls1, ln_g, ln_b, w1, b1)


# ---------------------------------------------------------------------------
# Kernel 3 (fused): pos depthwise 3x3 (merged) + GELU + (h + GELU(pos)) @ W2
#                   + bias, layer-scale-2, residual add.
# ---------------------------------------------------------------------------
def _mlp_back_kernel(h_ref, hh_ref, x_ref, pw_ref, pb_ref, w2_ref, b2_ref,
                     ls2_ref, o_ref, win_ref):
    _, th, W, Ch = h_ref.shape
    C = o_ref.shape[-1]
    p = 1
    win = _dw_window(win_ref, h_ref[0], hh_ref[0], p, W)
    d = _dw_conv(win, pw_ref[...], pb_ref[...], th, W, 3)         # (th, W, Ch)
    h2 = (h_ref[0].astype(jnp.float32) + _gelu(d)).reshape(th * W, Ch)
    y = jnp.dot(h2.astype(jnp.bfloat16), w2_ref[...],
                preferred_element_type=jnp.float32) + b2_ref[...]
    o_ref[0] = x_ref[0] + (ls2_ref[...] * y).reshape(th, W, C)


def mlp_back(h_img, h_halo, x_img, pos_w, pos_b, w2, b2, ls2, th):
    B, H, W, C = x_img.shape
    Ch = h_img.shape[-1]
    nH = H // th
    strip = lambda b, i: (b, i, 0, 0)
    full2 = lambda b, i: (0, 0)
    full3 = lambda b, i: (0, 0, 0)
    return pl.pallas_call(
        _mlp_back_kernel,
        out_shape=jax.ShapeDtypeStruct((B, H, W, C), jnp.float32),
        grid=(B, nH),
        in_specs=[pl.BlockSpec((1, th, W, Ch), strip),       # h strip
                  pl.BlockSpec((1, 2, W, Ch), strip),        # h halo (2 rows)
                  pl.BlockSpec((1, th, W, C), strip),        # residual x strip
                  pl.BlockSpec((3, 3, Ch), full3),           # merged pos weight
                  pl.BlockSpec((1, Ch), full2),              # merged pos bias
                  pl.BlockSpec((Ch, C), full2),              # fc2 weight
                  pl.BlockSpec((1, C), full2),               # fc2 bias
                  pl.BlockSpec((1, C), full2)],              # layer-scale 2
        out_specs=pl.BlockSpec((1, th, W, C), strip),
        scratch_shapes=[pltpu.VMEM((th + 2, W + 2, Ch), jnp.bfloat16)],
        compiler_params=_cparams(),
    )(h_img, h_halo, x_img, pos_w, pos_b, w2, b2, ls2)


# ---------------------------------------------------------------------------
# Parameter construction (deterministic, matches module __init__ shapes).
# ---------------------------------------------------------------------------
def make_block_params(key, dim, dw_size, mlp_ratio=4):
    hid = dim * mlp_ratio
    ks = jax.random.split(key, 16)

    def rnd(k, shape, scale=0.1):
        return jax.random.normal(k, shape, jnp.float32) * scale

    p = {}
    # ConvMod
    p["attn_ln_g"] = jnp.ones((1, dim), jnp.float32)
    p["attn_ln_b"] = jnp.zeros((1, dim), jnp.float32)
    p["attn_wa"] = rnd(ks[0], (dim, dim))            # a[0]: 1x1 conv (Cin, Cout)
    p["attn_ba"] = rnd(ks[1], (1, dim), 0.01)
    p["attn_dw_w"] = rnd(ks[2], (dw_size, dw_size, dim))   # LargeKernelConv (dw)
    p["attn_dw_b"] = rnd(ks[3], (dim,), 0.01)
    p["attn_wv"] = rnd(ks[4], (dim, dim))            # v: 1x1 conv
    p["attn_bv"] = rnd(ks[5], (1, dim), 0.01)
    p["attn_wp"] = rnd(ks[6], (dim, dim))            # proj: 1x1 conv
    p["attn_bp"] = rnd(ks[7], (1, dim), 0.01)
    # MLP
    p["mlp_ln_g"] = jnp.ones((1, dim), jnp.float32)
    p["mlp_ln_b"] = jnp.zeros((1, dim), jnp.float32)
    p["mlp_w1"] = rnd(ks[8], (dim, hid))
    p["mlp_b1"] = rnd(ks[9], (1, hid), 0.01)
    pos_w = rnd(ks[10], (3, 3, hid))                 # pos: depthwise 3x3
    pos_b = rnd(ks[11], (hid,), 0.01)
    # fixed sobel / laplacian masks (same values as the torch buffers)
    m_sx = jnp.zeros((3, 3), jnp.float32)
    m_sx = m_sx.at[0, 1].set(1.0).at[1, 0].set(2.0).at[2, 0].set(1.0)
    m_sx = m_sx.at[0, 2].set(-1.0).at[1, 2].set(-2.0).at[2, 2].set(-1.0)
    m_sy = jnp.zeros((3, 3), jnp.float32)
    m_sy = m_sy.at[0, 0].set(1.0).at[0, 1].set(2.0).at[0, 2].set(1.0)
    m_sy = m_sy.at[2, 0].set(-1.0).at[2, 1].set(-2.0).at[2, 2].set(-1.0)
    m_lp = jnp.zeros((3, 3), jnp.float32)
    m_lp = m_lp.at[0, 0].set(1.0).at[1, 0].set(1.0).at[1, 2].set(1.0)
    m_lp = m_lp.at[2, 1].set(1.0).at[1, 1].set(-4.0)
    kk = jax.random.split(ks[12], 6)
    sc_sx = rnd(kk[0], (hid,), 0.001)
    b_sx = rnd(kk[1], (hid,), 0.001)
    sc_sy = rnd(kk[2], (hid,), 0.001)
    b_sy = rnd(kk[3], (hid,), 0.001)
    sc_lp = rnd(kk[4], (hid,), 0.001)
    b_lp = rnd(kk[5], (hid,), 0.001)
    # merge (conv is linear in its weights -> identical to un-merged forward)
    p["mlp_pos_w"] = (pos_w
                      + m_sx[:, :, None] * sc_sx[None, None, :]
                      + m_sy[:, :, None] * sc_sy[None, None, :]
                      + m_lp[:, :, None] * sc_lp[None, None, :])
    p["mlp_pos_b"] = pos_b + b_sx + b_sy + b_lp
    p["mlp_w2"] = rnd(ks[13], (hid, dim))
    p["mlp_b2"] = rnd(ks[14], (1, dim), 0.01)
    # layer scales
    p["ls1"] = jnp.full((1, dim), 1e-6, jnp.float32)
    p["ls2"] = jnp.full((1, dim), 1e-6, jnp.float32)
    return p


# ---------------------------------------------------------------------------
# Block forward (wrapper glue; all heavy math runs in the Pallas kernels).
# ---------------------------------------------------------------------------
@jax.jit
def block_forward(x_nchw, params):
    B, C, H, W = x_nchw.shape
    # TODO(synk): fuse the NCHW<->NHWC transposes into the edge kernels.
    x = jnp.transpose(x_nchw, (0, 2, 3, 1)).astype(jnp.float32)   # -> NHWC

    K = params["attn_dw_w"].shape[0]
    assert K % 2 == 1 and K >= 3, "odd depthwise kernel >= 3 expected"
    Ch = params["mlp_w1"].shape[1]
    p1 = K // 2

    # VMEM-budget-aware strip height (divisor of H, prefers >=2 strips).
    bpr_b = 2 * W * (2 * C + 2 * C + 4 * C + 4 * C + 2 * Ch) + 2 * W * C
    bpr_c = 2 * W * (2 * Ch + 4 * C + 4 * C) + 2 * W * Ch
    th = _pick_strip_rows(H, max(bpr_b, bpr_c), p1)

    # fused (a|v) 1x1 weight -> one lane-dense matmul; bf16 MXU operands
    wav = jnp.concatenate([params["attn_wa"], params["attn_wv"]],
                          axis=1).astype(jnp.bfloat16)            # (C, 2C)
    bav = jnp.concatenate([params["attn_ba"], params["attn_bv"]], axis=1)
    wp = params["attn_wp"].astype(jnp.bfloat16)
    w1 = params["mlp_w1"].astype(jnp.bfloat16)
    w2 = params["mlp_w2"].astype(jnp.bfloat16)

    # K1: LN + fused a|v 1x1 (GELU on the a-half only)
    a, v = convmod_front(x, params["attn_ln_g"], params["attn_ln_b"], wav, bav,
                         th)

    # K2: DW conv (halo strips) + a*v + proj + ls1 + residual + LN + fc1 + GELU
    a_halo = _strip_halo(a, th, p1)
    x1, h = attn_back_mlp_front(a, a_halo, v, x,
                                params["attn_dw_w"],
                                params["attn_dw_b"].reshape(1, C),
                                wp, params["attn_bp"], params["ls1"],
                                params["mlp_ln_g"], params["mlp_ln_b"],
                                w1, params["mlp_b1"], th, K)

    # K3: merged pos 3x3 DW conv + GELU + fc2 + ls2 + residual (fused)
    h_halo = _strip_halo(h, th, 1)
    out = mlp_back(h, h_halo, x1, params["mlp_pos_w"],
                   params["mlp_pos_b"].reshape(1, Ch),
                   w2, params["mlp_b2"], params["ls2"], th)

    return jnp.transpose(out, (0, 3, 1, 2))                       # -> NCHW


# ---------------------------------------------------------------------------
# Pure-JAX reference (f32) for the numerical self-check.
# ---------------------------------------------------------------------------
def _reference_forward(x_nchw, params):
    with jax.default_matmul_precision("highest"):
        x = jnp.transpose(x_nchw, (0, 2, 3, 1)).astype(jnp.float32)

        def ln(t, g, b):
            u = t.mean(-1, keepdims=True)
            s = ((t - u) ** 2).mean(-1, keepdims=True)
            return (t - u) * jax.lax.rsqrt(s + _EPS) * g.reshape(-1) + b.reshape(-1)

        def dw(t, w, b):
            Kk = w.shape[0]
            Cc = w.shape[-1]
            y = jax.lax.conv_general_dilated(
                t, w.reshape(Kk, Kk, 1, Cc), window_strides=(1, 1),
                padding="SAME", dimension_numbers=("NHWC", "HWIO", "NHWC"),
                feature_group_count=Cc)
            return y + b

        xn = ln(x, params["attn_ln_g"], params["attn_ln_b"])
        a = _gelu(xn @ params["attn_wa"] + params["attn_ba"])
        a = dw(a, params["attn_dw_w"], params["attn_dw_b"])
        vv = xn @ params["attn_wv"] + params["attn_bv"]
        y = (a * vv) @ params["attn_wp"] + params["attn_bp"]
        x = x + params["ls1"].reshape(-1) * y

        xn = ln(x, params["mlp_ln_g"], params["mlp_ln_b"])
        h = _gelu(xn @ params["mlp_w1"] + params["mlp_b1"])
        d = dw(h, params["mlp_pos_w"], params["mlp_pos_b"])
        h2 = h + _gelu(d)
        x = x + params["ls2"].reshape(-1) * (h2 @ params["mlp_w2"]
                                             + params["mlp_b2"])
        return jnp.transpose(x, (0, 3, 1, 2))


if __name__ == "__main__":
    B, dim, H, W = 2, 4, 16, 16
    dw_size = 5
    mlp_ratio = 4

    key = jax.random.PRNGKey(0)
    kx, kp = jax.random.split(key)
    x = jax.random.normal(kx, (B, dim, H, W), jnp.float32)   # NCHW, torch-style
    params = make_block_params(kp, dim, dw_size, mlp_ratio)

    out = block_forward(x, params)
    jax.block_until_ready(out)
    assert out.shape == (B, dim, H, W) and out.dtype == jnp.float32
    assert bool(jnp.all(jnp.isfinite(out)))

    # Numerical self-check with layer-scale = 1 so the branch math is visible
    # above f32 residual rounding (bf16 intermediates => ~1% expected error).
    params_chk = dict(params)
    params_chk["ls1"] = jnp.ones((1, dim), jnp.float32)
    params_chk["ls2"] = jnp.ones((1, dim), jnp.float32)
    out_chk = block_forward(x, params_chk)
    ref_chk = _reference_forward(x, params_chk)
    rel = float(jnp.linalg.norm(out_chk - ref_chk)
                / (jnp.linalg.norm(ref_chk - x) + 1e-12))
    assert rel < 0.08, f"numerical mismatch vs reference: rel={rel}"

    print("KERNEL_OK")
</pallas_src>

<mosaic_0001>
module attributes {stable_mosaic.version = 11 : i64} {
  func.func @_convmod_front_kernel(%arg0: i32, %arg1: i32, %arg2: memref<1x8x16x4xf32, #tpu.memory_space<vmem>>, %arg3: memref<1x4xf32, #tpu.memory_space<vmem>>, %arg4: memref<1x4xf32, #tpu.memory_space<vmem>>, %arg5: memref<4x8xbf16, #tpu.memory_space<vmem>>, %arg6: memref<1x8xf32, #tpu.memory_space<vmem>>, %arg7: memref<1x8x16x4xbf16, #tpu.memory_space<vmem>>, %arg8: memref<1x8x16x4xbf16, #tpu.memory_space<vmem>>) attributes {dimension_semantics = [#tpu.dimension_semantics<parallel>, #tpu.dimension_semantics<parallel>], iteration_bounds = array<i64: 2, 2>, scalar_prefetch = 0 : i64, scratch_operands = 0 : i64, tpu.core_type = #tpu.core_type<tc>, window_params = [{transform_indices = @transform_0, window_bounds = array<i64: 1, 8, 16, 4>}, {pipeline_mode = #tpu.pipeline_mode<synchronous>, transform_indices = @transform_1, window_bounds = array<i64: 1, 4>}, {pipeline_mode = #tpu.pipeline_mode<synchronous>, transform_indices = @transform_2, window_bounds = array<i64: 1, 4>}, {pipeline_mode = #tpu.pipeline_mode<synchronous>, transform_indices = @transform_3, window_bounds = array<i64: 4, 8>}, {pipeline_mode = #tpu.pipeline_mode<synchronous>, transform_indices = @transform_4, window_bounds = array<i64: 1, 8>}, {transform_indices = @transform_5, window_bounds = array<i64: 1, 8, 16, 4>}, {transform_indices = @transform_6, window_bounds = array<i64: 1, 8, 16, 4>}]} {
    %c0 = arith.constant 0 : index
    %c0_0 = arith.constant 0 : index
    %c0_1 = arith.constant 0 : index
    %c0_2 = arith.constant 0 : index
    %0 = vector.load %arg2[%c0, %c0_0, %c0_1, %c0_2] : memref<1x8x16x4xf32, #tpu.memory_space<vmem>>, vector<1x8x16x4xf32>
    %1 = vector.shape_cast %0 : vector<1x8x16x4xf32> to vector<8x16x4xf32>
    %2 = vector.shape_cast %1 : vector<8x16x4xf32> to vector<128x4xf32>
    %cst = arith.constant dense<0.000000e+00> : vector<128xf32>
    %3 = vector.multi_reduction <add>, %2, %cst [1] : vector<128x4xf32> to vector<128xf32>
    %4 = vector.shape_cast %3 : vector<128xf32> to vector<128x1xf32>
    %cst_3 = arith.constant 4.000000e+00 : f32
    %5 = vector.broadcast %cst_3 : f32 to vector<128x1xf32>
    %6 = arith.divf %4, %5 : vector<128x1xf32>
    %7 = vector.broadcast %6 : vector<128x1xf32> to vector<128x4xf32>
    %8 = arith.subf %2, %7 : vector<128x4xf32>
    %9 = arith.mulf %8, %8 : vector<128x4xf32>
    %cst_4 = arith.constant dense<0.000000e+00> : vector<128xf32>
    %10 = vector.multi_reduction <add>, %9, %cst_4 [1] : vector<128x4xf32> to vector<128xf32>
    %11 = vector.shape_cast %10 : vector<128xf32> to vector<128x1xf32>
    %cst_5 = arith.constant 4.000000e+00 : f32
    %12 = vector.broadcast %cst_5 : f32 to vector<128x1xf32>
    %13 = arith.divf %11, %12 : vector<128x1xf32>
    %14 = vector.broadcast %6 : vector<128x1xf32> to vector<128x4xf32>
    %15 = arith.subf %2, %14 : vector<128x4xf32>
    %cst_6 = arith.constant 9.99999997E-7 : f32
    %16 = vector.broadcast %cst_6 : f32 to vector<128x1xf32>
    %17 = arith.addf %13, %16 : vector<128x1xf32>
    %18 = math.rsqrt %17 : vector<128x1xf32>
    %19 = vector.broadcast %18 : vector<128x1xf32> to vector<128x4xf32>
    %20 = arith.mulf %15, %19 : vector<128x4xf32>
    %c0_7 = arith.constant 0 : index
    %c0_8 = arith.constant 0 : index
    %21 = vector.load %arg3[%c0_7, %c0_8] : memref<1x4xf32, #tpu.memory_space<vmem>>, vector<1x4xf32>
    %22 = vector.broadcast %21 : vector<1x4xf32> to vector<128x4xf32>
    %23 = arith.mulf %20, %22 : vector<128x4xf32>
    %c0_9 = arith.constant 0 : index
    %c0_10 = arith.constant 0 : index
    %24 = vector.load %arg4[%c0_9, %c0_10] : memref<1x4xf32, #tpu.memory_space<vmem>>, vector<1x4xf32>
    %25 = vector.broadcast %24 : vector<1x4xf32> to vector<128x4xf32>
    %26 = arith.addf %23, %25 : vector<128x4xf32>
    %27 = arith.truncf %26 : vector<128x4xf32> to vector<128x4xbf16>
    %c0_11 = arith.constant 0 : index
    %c0_12 = arith.constant 0 : index
    %28 = vector.load %arg5[%c0_11, %c0_12] : memref<4x8xbf16, #tpu.memory_space<vmem>>, vector<4x8xbf16>
    %cst_13 = arith.constant dense<0.000000e+00> : vector<128x8xf32>
    %29 = tpu.matmul %27, %28, %cst_13 {dimension_numbers = #tpu.dot_dimension_numbers<[1], [0], [0], [1], [0, 0, 1, 1], [], []>} : vector<128x4xbf16>, vector<4x8xbf16>, vector<128x8xf32> -> vector<128x8xf32>
    %c0_14 = arith.constant 0 : index
    %c0_15 = arith.constant 0 : index
    %30 = vector.load %arg6[%c0_14, %c0_15] : memref<1x8xf32, #tpu.memory_space<vmem>>, vector<1x8xf32>
    %31 = vector.broadcast %30 : vector<1x8xf32> to vector<128x8xf32>
    %32 = arith.addf %29, %31 : vector<128x8xf32>
    %33 = vector.extract_strided_slice %32 {offsets = [0, 0], sizes = [128, 4], strides = [1, 1]} : vector<128x8xf32> to vector<128x4xf32>
    %cst_16 = arith.constant 5.000000e-01 : f32
    %34 = vector.broadcast %cst_16 : f32 to vector<128x4xf32>
    %35 = arith.mulf %34, %33 : vector<128x4xf32>
    %cst_17 = arith.constant 1.41421354 : f32
    %36 = vector.broadcast %cst_17 : f32 to vector<128x4xf32>
    %37 = arith.divf %33, %36 : vector<128x4xf32>
    %38 = math.erf %37 : vector<128x4xf32>
    %cst_18 = arith.constant 1.000000e+00 : f32
    %39 = vector.broadcast %cst_18 : f32 to vector<128x4xf32>
    %40 = arith.addf %39, %38 : vector<128x4xf32>
    %41 = arith.mulf %35, %40 : vector<128x4xf32>
    %42 = vector.shape_cast %41 : vector<128x4xf32> to vector<8x16x4xf32>
    %43 = arith.truncf %42 : vector<8x16x4xf32> to vector<8x16x4xbf16>
    %c0_19 = arith.constant 0 : index
    %c0_20 = arith.constant 0 : index
    %c0_21 = arith.constant 0 : index
    %c0_22 = arith.constant 0 : index
    %44 = vector.load %arg7[%c0_19, %c0_20, %c0_21, %c0_22] : memref<1x8x16x4xbf16, #tpu.memory_space<vmem>>, vector<1x8x16x4xbf16>
    %45 = vector.shape_cast %44 : vector<1x8x16x4xbf16> to vector<8x16x4xbf16>
    %46 = vector.shape_cast %43 : vector<8x16x4xbf16> to vector<1x8x16x4xbf16>
    tpu.vector_store %arg7[%c0_19, %c0_20, %c0_21, %c0_22], %46 {strides = array<i32>} : memref<1x8x16x4xbf16, #tpu.memory_space<vmem>>, vector<1x8x16x4xbf16>,
    %47 = vector.extract_strided_slice %32 {offsets = [0, 4], sizes = [128, 4], strides = [1, 1]} : vector<128x8xf32> to vector<128x4xf32>
    %48 = vector.shape_cast %47 : vector<128x4xf32> to vector<8x16x4xf32>
    %49 = arith.truncf %48 : vector<8x16x4xf32> to vector<8x16x4xbf16>
    %c0_23 = arith.constant 0 : index
    %c0_24 = arith.constant 0 : index
    %c0_25 = arith.constant 0 : index
    %c0_26 = arith.constant 0 : index
    %50 = vector.load %arg8[%c0_23, %c0_24, %c0_25, %c0_26] : memref<1x8x16x4xbf16, #tpu.memory_space<vmem>>, vector<1x8x16x4xbf16>
    %51 = vector.shape_cast %50 : vector<1x8x16x4xbf16> to vector<8x16x4xbf16>
    %52 = vector.shape_cast %49 : vector<8x16x4xbf16> to vector<1x8x16x4xbf16>
    tpu.vector_store %arg8[%c0_23, %c0_24, %c0_25, %c0_26], %52 {strides = array<i32>} : memref<1x8x16x4xbf16, #tpu.memory_space<vmem>>, vector<1x8x16x4xbf16>,
    return
  }
  func.func @transform_0(%arg0: i32, %arg1: i32) -> (i32, i32, i32, i32) {
    %c0_i32 = arith.constant 0 : i32
    %c0_i32_0 = arith.constant 0 : i32
    %c0_i32_1 = arith.constant 0 : i32
    return %arg0, %arg1, %c0_i32, %c0_i32_0 : i32, i32, i32, i32
  }
  func.func @transform_1(%arg0: i32, %arg1: i32) -> (i32, i32) {
    %c0_i32 = arith.constant 0 : i32
    %c0_i32_0 = arith.constant 0 : i32
    %c0_i32_1 = arith.constant 0 : i32
    return %c0_i32, %c0_i32_0 : i32, i32
  }
  func.func @transform_2(%arg0: i32, %arg1: i32) -> (i32, i32) {
    %c0_i32 = arith.constant 0 : i32
    %c0_i32_0 = arith.constant 0 : i32
    %c0_i32_1 = arith.constant 0 : i32
    return %c0_i32, %c0_i32_0 : i32, i32
  }
  func.func @transform_3(%arg0: i32, %arg1: i32) -> (i32, i32) {
    %c0_i32 = arith.constant 0 : i32
    %c0_i32_0 = arith.constant 0 : i32
    %c0_i32_1 = arith.constant 0 : i32
    return %c0_i32, %c0_i32_0 : i32, i32
  }
  func.func @transform_4(%arg0: i32, %arg1: i32) -> (i32, i32) {
    %c0_i32 = arith.constant 0 : i32
    %c0_i32_0 = arith.constant 0 : i32
    %c0_i32_1 = arith.constant 0 : i32
    return %c0_i32, %c0_i32_0 : i32, i32
  }
  func.func @transform_5(%arg0: i32, %arg1: i32) -> (i32, i32, i32, i32) {
    %c0_i32 = arith.constant 0 : i32
    %c0_i32_0 = arith.constant 0 : i32
    %c0_i32_1 = arith.constant 0 : i32
    return %arg0, %arg1, %c0_i32, %c0_i32_0 : i32, i32, i32, i32
  }
  func.func @transform_6(%arg0: i32, %arg1: i32) -> (i32, i32, i32, i32) {
    %c0_i32 = arith.constant 0 : i32
    %c0_i32_0 = arith.constant 0 : i32
    %c0_i32_1 = arith.constant 0 : i32
    return %arg0, %arg1, %c0_i32, %c0_i32_0 : i32, i32, i32, i32
  }
}

module attributes {stable_mosaic.version = 11 : i64} {
  func.func @_attn_back_mlp_front_kernel(%arg0: i32, %arg1: i32, %arg2: memref<1x8x16x4xbf16, #tpu.memory_space<vmem>>, %arg3: memref<1x4x16x4xbf16, #tpu.memory_space<vmem>>, %arg4: memref<1x8x16x4xbf16, #tpu.memory_space<vmem>>, %arg5: memref<1x8x16x4xf32, #tpu.memory_space<vmem>>, %arg6: memref<5x5x4xf32, #tpu.memory_space<vmem>>, %arg7: memref<1x4xf32, #tpu.memory_space<vmem>>, %arg8: memref<4x4xbf16, #tpu.memory_space<vmem>>, %arg9: memref<1x4xf32, #tpu.memory_space<vmem>>, %arg10: memref<1x4xf32, #tpu.memory_space<vmem>>, %arg11: memref<1x4xf32, #tpu.memory_space<vmem>>, %arg12: memref<1x4xf32, #tpu.memory_space<vmem>>, %arg13: memref<4x16xbf16, #tpu.memory_space<vmem>>, %arg14: memref<1x16xf32, #tpu.memory_space<vmem>>, %arg15: memref<1x8x16x4xf32, #tpu.memory_space<vmem>>, %arg16: memref<1x8x16x16xbf16, #tpu.memory_space<vmem>>, %arg17: memref<12x20x4xbf16, #tpu.memory_space<vmem>>) attributes {dimension_semantics = [#tpu.dimension_semantics<parallel>, #tpu.dimension_semantics<parallel>], iteration_bounds = array<i64: 2, 2>, scalar_prefetch = 0 : i64, scratch_operands = 1 : i64, tpu.core_type = #tpu.core_type<tc>, window_params = [{transform_indices = @transform_0, window_bounds = array<i64: 1, 8, 16, 4>}, {transform_indices = @transform_1, window_bounds = array<i64: 1, 4, 16, 4>}, {transform_indices = @transform_2, window_bounds = array<i64: 1, 8, 16, 4>}, {transform_indices = @transform_3, window_bounds = array<i64: 1, 8, 16, 4>}, {pipeline_mode = #tpu.pipeline_mode<synchronous>, transform_indices = @transform_4, window_bounds = array<i64: 5, 5, 4>}, {pipeline_mode = #tpu.pipeline_mode<synchronous>, transform_indices = @transform_5, window_bounds = array<i64: 1, 4>}, {pipeline_mode = #tpu.pipeline_mode<synchronous>, transform_indices = @transform_6, window_bounds = array<i64: 4, 4>}, {pipeline_mode = #tpu.pipeline_mode<synchronous>, transform_indices = @transform_7, window_bounds = array<i64: 1, 4>}, {pipeline_mode = #tpu.pipeline_mode<synchronous>, transform_indices = @transform_8, window_bounds = array<i64: 1, 4>}, {pipeline_mode = #tpu.pipeline_mode<synchronous>, transform_indices = @transform_9, window_bounds = array<i64: 1, 4>}, {pipeline_mode = #tpu.pipeline_mode<synchronous>, transform_indices = @transform_10, window_bounds = array<i64: 1, 4>}, {pipeline_mode = #tpu.pipeline_mode<synchronous>, transform_indices = @transform_11, window_bounds = array<i64: 4, 16>}, {pipeline_mode = #tpu.pipeline_mode<synchronous>, transform_indices = @transform_12, window_bounds = array<i64: 1, 16>}, {transform_indices = @transform_13, window_bounds = array<i64: 1, 8, 16, 4>}, {transform_indices = @transform_14, window_bounds = array<i64: 1, 8, 16, 16>}]} {
    %c0 = arith.constant 0 : index
    %c0_0 = arith.constant 0 : index
    %c0_1 = arith.constant 0 : index
    %c0_2 = arith.constant 0 : index
    %0 = vector.load %arg2[%c0, %c0_0, %c0_1, %c0_2] : memref<1x8x16x4xbf16, #tpu.memory_space<vmem>>, vector<1x8x16x4xbf16>
    %1 = vector.shape_cast %0 : vector<1x8x16x4xbf16> to vector<8x16x4xbf16>
    %c0_3 = arith.constant 0 : index
    %c0_4 = arith.constant 0 : index
    %c0_5 = arith.constant 0 : index
    %c0_6 = arith.constant 0 : index
    %2 = vector.load %arg3[%c0_3, %c0_4, %c0_5, %c0_6] : memref<1x4x16x4xbf16, #tpu.memory_space<vmem>>, vector<1x4x16x4xbf16>
    %3 = vector.shape_cast %2 : vector<1x4x16x4xbf16> to vector<4x16x4xbf16>
    %cst = arith.constant 0.000000e+00 : bf16
    %4 = vector.broadcast %cst : bf16 to vector<12x2x4xbf16>
    %c0_7 = arith.constant 0 : index
    %c0_8 = arith.constant 0 : index
    %c0_9 = arith.constant 0 : index
    %5 = vector.load %arg17[%c0_7, %c0_8, %c0_9] : memref<12x20x4xbf16, #tpu.memory_space<vmem>>, vector<12x2x4xbf16>
    tpu.vector_store %arg17[%c0_7, %c0_8, %c0_9], %4 {strides = array<i32>} : memref<12x20x4xbf16, #tpu.memory_space<vmem>>, vector<12x2x4xbf16>,
    %c0_10 = arith.constant 0 : index
    %c18 = arith.constant 18 : index
    %c0_11 = arith.constant 0 : index
    %6 = vector.load %arg17[%c0_10, %c18, %c0_11] : memref<12x20x4xbf16, #tpu.memory_space<vmem>>, vector<12x2x4xbf16>
    tpu.vector_store %arg17[%c0_10, %c18, %c0_11], %4 {strides = array<i32>} : memref<12x20x4xbf16, #tpu.memory_space<vmem>>, vector<12x2x4xbf16>,
    %7 = vector.extract_strided_slice %3 {offsets = [0, 0, 0], sizes = [2, 16, 4], strides = [1, 1, 1]} : vector<4x16x4xbf16> to vector<2x16x4xbf16>
    %c0_12 = arith.constant 0 : index
    %c2 = arith.constant 2 : index
    %c0_13 = arith.constant 0 : index
    %8 = vector.load %arg17[%c0_12, %c2, %c0_13] : memref<12x20x4xbf16, #tpu.memory_space<vmem>>, vector<2x16x4xbf16>
    tpu.vector_store %arg17[%c0_12, %c2, %c0_13], %7 {strides = array<i32>} : memref<12x20x4xbf16, #tpu.memory_space<vmem>>, vector<2x16x4xbf16>,
    %9 = vector.extract_strided_slice %3 {offsets = [2, 0, 0], sizes = [2, 16, 4], strides = [1, 1, 1]} : vector<4x16x4xbf16> to vector<2x16x4xbf16>
    %c10 = arith.constant 10 : index
    %c2_14 = arith.constant 2 : index
    %c0_15 = arith.constant 0 : index
    %10 = vector.load %arg17[%c10, %c2_14, %c0_15] : memref<12x20x4xbf16, #tpu.memory_space<vmem>>, vector<2x16x4xbf16>
    tpu.vector_store %arg17[%c10, %c2_14, %c0_15], %9 {strides = array<i32>} : memref<12x20x4xbf16, #tpu.memory_space<vmem>>, vector<2x16x4xbf16>,
    %c2_16 = arith.constant 2 : index
    %c2_17 = arith.constant 2 : index
    %c0_18 = arith.constant 0 : index
    %11 = vector.load %arg17[%c2_16, %c2_17, %c0_18] : memref<12x20x4xbf16, #tpu.memory_space<vmem>>, vector<8x16x4xbf16>
    tpu.vector_store %arg17[%c2_16, %c2_17, %c0_18], %1 {strides = array<i32>} : memref<12x20x4xbf16, #tpu.memory_space<vmem>>, vector<8x16x4xbf16>,
    %c0_19 = arith.constant 0 : index
    %c0_20 = arith.constant 0 : index
    %c0_21 = arith.constant 0 : index
    %12 = vector.load %arg17[%c0_19, %c0_20, %c0_21] : memref<12x20x4xbf16, #tpu.memory_space<vmem>>, vector<12x20x4xbf16>
    %c0_22 = arith.constant 0 : index
    %c0_23 = arith.constant 0 : index
    %c0_24 = arith.constant 0 : index
    %13 = vector.load %arg6[%c0_22, %c0_23, %c0_24] : memref<5x5x4xf32, #tpu.memory_space<vmem>>, vector<5x5x4xf32>
    %c0_25 = arith.constant 0 : index
    %c0_26 = arith.constant 0 : index
    %14 = vector.load %arg7[%c0_25, %c0_26] : memref<1x4xf32, #tpu.memory_space<vmem>>, vector<1x4xf32>
    %cst_27 = arith.constant 0.000000e+00 : f32
    %15 = vector.broadcast %cst_27 : f32 to vector<8x16x4xf32>
    %16 = vector.extract_strided_slice %12 {offsets = [0, 0, 0], sizes = [8, 16, 4], strides = [1, 1, 1]} : vector<12x20x4xbf16> to vector<8x16x4xbf16>
    %17 = arith.extf %16 : vector<8x16x4xbf16> to vector<8x16x4xf32>
    %18 = vector.extract_strided_slice %13 {offsets = [0, 0, 0], sizes = [1, 1, 4], strides = [1, 1, 1]} : vector<5x5x4xf32> to vector<1x1x4xf32>
    %19 = vector.shape_cast %18 : vector<1x1x4xf32> to vector<4xf32>
    %20 = vector.shape_cast %19 : vector<4xf32> to vector<1x1x4xf32>
    %21 = vector.broadcast %20 : vector<1x1x4xf32> to vector<8x16x4xf32>
    %22 = arith.mulf %17, %21 : vector<8x16x4xf32>
    %23 = arith.addf %15, %22 : vector<8x16x4xf32>
    %24 = vector.extract_strided_slice %12 {offsets = [0, 1, 0], sizes = [8, 16, 4], strides = [1, 1, 1]} : vector<12x20x4xbf16> to vector<8x16x4xbf16>
    %25 = arith.extf %24 : vector<8x16x4xbf16> to vector<8x16x4xf32>
    %26 = vector.extract_strided_slice %13 {offsets = [0, 1, 0], sizes = [1, 1, 4], strides = [1, 1, 1]} : vector<5x5x4xf32> to vector<1x1x4xf32>
    %27 = vector.shape_cast %26 : vector<1x1x4xf32> to vector<4xf32>
    %28 = vector.shape_cast %27 : vector<4xf32> to vector<1x1x4xf32>
    %29 = vector.broadcast %28 : vector<1x1x4xf32> to vector<8x16x4xf32>
    %30 = arith.mulf %25, %29 : vector<8x16x4xf32>
    %31 = arith.addf %23, %30 : vector<8x16x4xf32>
    %32 = vector.extract_strided_slice %12 {offsets = [0, 2, 0], sizes = [8, 16, 4], strides = [1, 1, 1]} : vector<12x20x4xbf16> to vector<8x16x4xbf16>
    %33 = arith.extf %32 : vector<8x16x4xbf16> to vector<8x16x4xf32>
    %34 = vector.extract_strided_slice %13 {offsets = [0, 2, 0], sizes = [1, 1, 4], strides = [1, 1, 1]} : vector<5x5x4xf32> to vector<1x1x4xf32>
    %35 = vector.shape_cast %34 : vector<1x1x4xf32> to vector<4xf32>
    %36 = vector.shape_cast %35 : vector<4xf32> to vector<1x1x4xf32>
    %37 = vector.broadcast %36 : vector<1x1x4xf32> to vector<8x16x4xf32>
    %38 = arith.mulf %33, %37 : vector<8x16x4xf32>
    %39 = arith.addf %31, %38 : vector<8x16x4xf32>
    %40 = vector.extract_strided_slice %12 {offsets = [0, 3, 0], sizes = [8, 16, 4], strides = [1, 1, 1]} : vector<12x20x4xbf16> to vector<8x16x4xbf16>
    %41 = arith.extf %40 : vector<8x16x4xbf16> to vector<8x16x4xf32>
    %42 = vector.extract_strided_slice %13 {offsets = [0, 3, 0], sizes = [1, 1, 4], strides = [1, 1, 1]} : vector<5x5x4xf32> to vector<1x1x4xf32>
    %43 = vector.shape_cast %42 : vector<1x1x4xf32> to vector<4xf32>
    %44 = vector.shape_cast %43 : vector<4xf32> to vector<1x1x4xf32>
    %45 = vector.broadcast %44 : vector<1x1x4xf32> to vector<8x16x4xf32>
    %46 = arith.mulf %41, %45 : vector<8x16x4xf32>
    %47 = arith.addf %39, %46 : vector<8x16x4xf32>
    %48 = vector.extract_strided_slice %12 {offsets = [0, 4, 0], sizes = [8, 16, 4], strides = [1, 1, 1]} : vector<12x20x4xbf16> to vector<8x16x4xbf16>
    %49 = arith.extf %48 : vector<8x16x4xbf16> to vector<8x16x4xf32>
    %50 = vector.extract_strided_slice %13 {offsets = [0, 4, 0], sizes = [1, 1, 4], strides = [1, 1, 1]} : vector<5x5x4xf32> to vector<1x1x4xf32>
    %51 = vector.shape_cast %50 : vector<1x1x4xf32> to vector<4xf32>
    %52 = vector.shape_cast %51 : vector<4xf32> to vector<1x1x4xf32>
    %53 = vector.broadcast %52 : vector<1x1x4xf32> to vector<8x16x4xf32>
    %54 = arith.mulf %49, %53 : vector<8x16x4xf32>
    %55 = arith.addf %47, %54 : vector<8x16x4xf32>
    %56 = vector.extract_strided_slice %12 {offsets = [1, 0, 0], sizes = [8, 16, 4], strides = [1, 1, 1]} : vector<12x20x4xbf16> to vector<8x16x4xbf16>
    %57 = arith.extf %56 : vector<8x16x4xbf16> to vector<8x16x4xf32>
    %58 = vector.extract_strided_slice %13 {offsets = [1, 0, 0], sizes = [1, 1, 4], strides = [1, 1, 1]} : vector<5x5x4xf32> to vector<1x1x4xf32>
    %59 = vector.shape_cast %58 : vector<1x1x4xf32> to vector<4xf32>
    %60 = vector.shape_cast %59 : vector<4xf32> to vector<1x1x4xf32>
    %61 = vector.broadcast %60 : vector<1x1x4xf32> to vector<8x16x4xf32>
    %62 = arith.mulf %57, %61 : vector<8x16x4xf32>
    %63 = arith.addf %55, %62 : vector<8x16x4xf32>
    %64 = vector.extract_strided_slice %12 {offsets = [1, 1, 0], sizes = [8, 16, 4], strides = [1, 1, 1]} : vector<12x20x4xbf16> to vector<8x16x4xbf16>
    %65 = arith.extf %64 : vector<8x16x4xbf16> to vector<8x16x4xf32>
    %66 = vector.extract_strided_slice %13 {offsets = [1, 1, 0], sizes = [1, 1, 4], strides = [1, 1, 1]} : vector<5x5x4xf32> to vector<1x1x4xf32>
    %67 = vector.shape_cast %66 : vector<1x1x4xf32> to vector<4xf32>
    %68 = vector.shape_cast %67 : vector<4xf32> to vector<1x1x4xf32>
    %69 = vector.broadcast %68 : vector<1x1x4xf32> to vector<8x16x4xf32>
    %70 = arith.mulf %65, %69 : vector<8x16x4xf32>
    %71 = arith.addf %63, %70 : vector<8x16x4xf32>
    %72 = vector.extract_strided_slice %12 {offsets = [1, 2, 0], sizes = [8, 16, 4], strides = [1, 1, 1]} : vector<12x20x4xbf16> to vector<8x16x4xbf16>
    %73 = arith.extf %72 : vector<8x16x4xbf16> to vector<8x16x4xf32>
    %74 = vector.extract_strided_slice %13 {offsets = [1, 2, 0], sizes = [1, 1, 4], strides = [1, 1, 1]} : vector<5x5x4xf32> to vector<1x1x4xf32>
    %75 = vector.shape_cast %74 : vector<1x1x4xf32> to vector<4xf32>
    %76 = vector.shape_cast %75 : vector<4xf32> to vector<1x1x4xf32>
    %77 = vector.broadcast %76 : vector<1x1x4xf32> to vector<8x16x4xf32>
    %78 = arith.mulf %73, %77 : vector<8x16x4xf32>
    %79 = arith.addf %71, %78 : vector<8x16x4xf32>
    %80 = vector.extract_strided_slice %12 {offsets = [1, 3, 0], sizes = [8, 16, 4], strides = [1, 1, 1]} : vector<12x20x4xbf16> to vector<8x16x4xbf16>
    %81 = arith.extf %80 : vector<8x16x4xbf16> to vector<8x16x4xf32>
    %82 = vector.extract_strided_slice %13 {offsets = [1, 3, 0], sizes = [1, 1, 4], strides = [1, 1, 1]} : vector<5x5x4xf32> to vector<1x1x4xf32>
    %83 = vector.shape_cast %82 : vector<1x1x4xf32> to vector<4xf32>
    %84 = vector.shape_cast %83 : vector<4xf32> to vector<1x1x4xf32>
    %85 = vector.broadcast %84 : vector<1x1x4xf32> to vector<8x16x4xf32>
    %86 = arith.mulf %81, %85 : vector<8x16x4xf32>
    %87 = arith.addf %79, %86 : vector<8x16x4xf32>
    %88 = vector.extract_strided_slice %12 {offsets = [1, 4, 0], sizes = [8, 16, 4], strides = [1, 1, 1]} : vector<12x20x4xbf16> to vector<8x16x4xbf16>
    %89 = arith.extf %88 : vector<8x16x4xbf16> to vector<8x16x4xf32>
    %90 = vector.extract_strided_slice %13 {offsets = [1, 4, 0], sizes = [1, 1, 4], strides = [1, 1, 1]} : vector<5x5x4xf32> to vector<1x1x4xf32>
    %91 = vector.shape_cast %90 : vector<1x1x4xf32> to vector<4xf32>
    %92 = vector.shape_cast %91 : vector<4xf32> to vector<1x1x4xf32>
    %93 = vector.broadcast %92 : vector<1x1x4xf32> to vector<8x16x4xf32>
    %94 = arith.mulf %89, %93 : vector<8x16x4xf32>
    %95 = arith.addf %87, %94 : vector<8x16x4xf32>
    %96 = vector.extract_strided_slice %12 {offsets = [2, 0, 0], sizes = [8, 16, 4], strides = [1, 1, 1]} : vector<12x20x4xbf16> to vector<8x16x4xbf16>
    %97 = arith.extf %96 : vector<8x16x4xbf16> to vector<8x16x4xf32>
    %98 = vector.extract_strided_slice %13 {offsets = [2, 0, 0], sizes = [1, 1, 4], strides = [1, 1, 1]} : vector<5x5x4xf32> to vector<1x1x4xf32>
    %99 = vector.shape_cast %98 : vector<1x1x4xf32> to vector<4xf32>
    %100 = vector.shape_cast %99 : vector<4xf32> to vector<1x1x4xf32>
    %101 = vector.broadcast %100 : vector<1x1x4xf32> to vector<8x16x4xf32>
    %102 = arith.mulf %97, %101 : vector<8x16x4xf32>
    %103 = arith.addf %95, %102 : vector<8x16x4xf32>
    %104 = vector.extract_strided_slice %12 {offsets = [2, 1, 0], sizes = [8, 16, 4], strides = [1, 1, 1]} : vector<12x20x4xbf16> to vector<8x16x4xbf16>
    %105 = arith.extf %104 : vector<8x16x4xbf16> to vector<8x16x4xf32>
    %106 = vector.extract_strided_slice %13 {offsets = [2, 1, 0], sizes = [1, 1, 4], strides = [1, 1, 1]} : vector<5x5x4xf32> to vector<1x1x4xf32>
    %107 = vector.shape_cast %106 : vector<1x1x4xf32> to vector<4xf32>
    %108 = vector.shape_cast %107 : vector<4xf32> to vector<1x1x4xf32>
    %109 = vector.broadcast %108 : vector<1x1x4xf32> to vector<8x16x4xf32>
    %110 = arith.mulf %105, %109 : vector<8x16x4xf32>
    %111 = arith.addf %103, %110 : vector<8x16x4xf32>
    %112 = vector.extract_strided_slice %12 {offsets = [2, 2, 0], sizes = [8, 16, 4], strides = [1, 1, 1]} : vector<12x20x4xbf16> to vector<8x16x4xbf16>
    %113 = arith.extf %112 : vector<8x16x4xbf16> to vector<8x16x4xf32>
    %114 = vector.extract_strided_slice %13 {offsets = [2, 2, 0], sizes = [1, 1, 4], strides = [1, 1, 1]} : vector<5x5x4xf32> to vector<1x1x4xf32>
    %115 = vector.shape_cast %114 : vector<1x1x4xf32> to vector<4xf32>
    %116 = vector.shape_cast %115 : vector<4xf32> to vector<1x1x4xf32>
    %117 = vector.broadcast %116 : vector<1x1x4xf32> to vector<8x16x4xf32>
    %118 = arith.mulf %113, %117 : vector<8x16x4xf32>
    %119 = arith.addf %111, %118 : vector<8x16x4xf32>
    %120 = vector.extract_strided_slice %12 {offsets = [2, 3, 0], sizes = [8, 16, 4], strides = [1, 1, 1]} : vector<12x20x4xbf16> to vector<8x16x4xbf16>
    %121 = arith.extf %120 : vector<8x16x4xbf16> to vector<8x16x4xf32>
    %122 = vector.extract_strided_slice %13 {offsets = [2, 3, 0], sizes = [1, 1, 4], strides = [1, 1, 1]} : vector<5x5x4xf32> to vector<1x1x4xf32>
    %123 = vector.shape_cast %122 : vector<1x1x4xf32> to vector<4xf32>
    %124 = vector.shape_cast %123 : vector<4xf32> to vector<1x1x4xf32>
    %125 = vector.broadcast %124 : vector<1x1x4xf32> to vector<8x16x4xf32>
    %126 = arith.mulf %121, %125 : vector<8x16x4xf32>
    %127 = arith.addf %119, %126 : vector<8x16x4xf32>
    %128 = vector.extract_strided_slice %12 {offsets = [2, 4, 0], sizes = [8, 16, 4], strides = [1, 1, 1]} : vector<12x20x4xbf16> to vector<8x16x4xbf16>
    %129 = arith.extf %128 : vector<8x16x4xbf16> to vector<8x16x4xf32>
    %130 = vector.extract_strided_slice %13 {offsets = [2, 4, 0], sizes = [1, 1, 4], strides = [1, 1, 1]} : vector<5x5x4xf32> to vector<1x1x4xf32>
    %131 = vector.shape_cast %130 : vector<1x1x4xf32> to vector<4xf32>
    %132 = vector.shape_cast %131 : vector<4xf32> to vector<1x1x4xf32>
    %133 = vector.broadcast %132 : vector<1x1x4xf32> to vector<8x16x4xf32>
    %134 = arith.mulf %129, %133 : vector<8x16x4xf32>
    %135 = arith.addf %127, %134 : vector<8x16x4xf32>
    %136 = vector.extract_strided_slice %12 {offsets = [3, 0, 0], sizes = [8, 16, 4], strides = [1, 1, 1]} : vector<12x20x4xbf16> to vector<8x16x4xbf16>
    %137 = arith.extf %136 : vector<8x16x4xbf16> to vector<8x16x4xf32>
    %138 = vector.extract_strided_slice %13 {offsets = [3, 0, 0], sizes = [1, 1, 4], strides = [1, 1, 1]} : vector<5x5x4xf32> to vector<1x1x4xf32>
    %139 = vector.shape_cast %138 : vector<1x1x4xf32> to vector<4xf32>
    %140 = vector.shape_cast %139 : vector<4xf32> to vector<1x1x4xf32>
    %141 = vector.broadcast %140 : vector<1x1x4xf32> to vector<8x16x4xf32>
    %142 = arith.mulf %137, %141 : vector<8x16x4xf32>
    %143 = arith.addf %135, %142 : vector<8x16x4xf32>
    %144 = vector.extract_strided_slice %12 {offsets = [3, 1, 0], sizes = [8, 16, 4], strides = [1, 1, 1]} : vector<12x20x4xbf16> to vector<8x16x4xbf16>
    %145 = arith.extf %144 : vector<8x16x4xbf16> to vector<8x16x4xf32>
    %146 = vector.extract_strided_slice %13 {offsets = [3, 1, 0], sizes = [1, 1, 4], strides = [1, 1, 1]} : vector<5x5x4xf32> to vector<1x1x4xf32>
    %147 = vector.shape_cast %146 : vector<1x1x4xf32> to vector<4xf32>
    %148 = vector.shape_cast %147 : vector<4xf32> to vector<1x1x4xf32>
    %149 = vector.broadcast %148 : vector<1x1x4xf32> to vector<8x16x4xf32>
    %150 = arith.mulf %145, %149 : vector<8x16x4xf32>
    %151 = arith.addf %143, %150 : vector<8x16x4xf32>
    %152 = vector.extract_strided_slice %12 {offsets = [3, 2, 0], sizes = [8, 16, 4], strides = [1, 1, 1]} : vector<12x20x4xbf16> to vector<8x16x4xbf16>
    %153 = arith.extf %152 : vector<8x16x4xbf16> to vector<8x16x4xf32>
    %154 = vector.extract_strided_slice %13 {offsets = [3, 2, 0], sizes = [1, 1, 4], strides = [1, 1, 1]} : vector<5x5x4xf32> to vector<1x1x4xf32>
    %155 = vector.shape_cast %154 : vector<1x1x4xf32> to vector<4xf32>
    %156 = vector.shape_cast %155 : vector<4xf32> to vector<1x1x4xf32>
    %157 = vector.broadcast %156 : vector<1x1x4xf32> to vector<8x16x4xf32>
    %158 = arith.mulf %153, %157 : vector<8x16x4xf32>
    %159 = arith.addf %151, %158 : vector<8x16x4xf32>
    %160 = vector.extract_strided_slice %12 {offsets = [3, 3, 0], sizes = [8, 16, 4], strides = [1, 1, 1]} : vector<12x20x4xbf16> to vector<8x16x4xbf16>
    %161 = arith.extf %160 : vector<8x16x4xbf16> to vector<8x16x4xf32>
    %162 = vector.extract_strided_slice %13 {offsets = [3, 3, 0], sizes = [1, 1, 4], strides = [1, 1, 1]} : vector<5x5x4xf32> to vector<1x1x4xf32>
    %163 = vector.shape_cast %162 : vector<1x1x4xf32> to vector<4xf32>
    %164 = vector.shape_cast %163 : vector<4xf32> to vector<1x1x4xf32>
    %165 = vector.broadcast %164 : vector<1x1x4xf32> to vector<8x16x4xf32>
    %166 = arith.mulf %161, %165 : vector<8x16x4xf32>
    %167 = arith.addf %159, %166 : vector<8x16x4xf32>
    %168 = vector.extract_strided_slice %12 {offsets = [3, 4, 0], sizes = [8, 16, 4], strides = [1, 1, 1]} : vector<12x20x4xbf16> to vector<8x16x4xbf16>
    %169 = arith.extf %168 : vector<8x16x4xbf16> to vector<8x16x4xf32>
    %170 = vector.extract_strided_slice %13 {offsets = [3, 4, 0], sizes = [1, 1, 4], strides = [1, 1, 1]} : vector<5x5x4xf32> to vector<1x1x4xf32>
    %171 = vector.shape_cast %170 : vector<1x1x4xf32> to vector<4xf32>
    %172 = vector.shape_cast %171 : vector<4xf32> to vector<1x1x4xf32>
    %173 = vector.broadcast %172 : vector<1x1x4xf32> to vector<8x16x4xf32>
    %174 = arith.mulf %169, %173 : vector<8x16x4xf32>
    %175 = arith.addf %167, %174 : vector<8x16x4xf32>
    %176 = vector.extract_strided_slice %12 {offsets = [4, 0, 0], sizes = [8, 16, 4], strides = [1, 1, 1]} : vector<12x20x4xbf16> to vector<8x16x4xbf16>
    %177 = arith.extf %176 : vector<8x16x4xbf16> to vector<8x16x4xf32>
    %178 = vector.extract_strided_slice %13 {offsets = [4, 0, 0], sizes = [1, 1, 4], strides = [1, 1, 1]} : vector<5x5x4xf32> to vector<1x1x4xf32>
    %179 = vector.shape_cast %178 : vector<1x1x4xf32> to vector<4xf32>
    %180 = vector.shape_cast %179 : vector<4xf32> to vector<1x1x4xf32>
    %181 = vector.broadcast %180 : vector<1x1x4xf32> to vector<8x16x4xf32>
    %182 = arith.mulf %177, %181 : vector<8x16x4xf32>
    %183 = arith.addf %175, %182 : vector<8x16x4xf32>
    %184 = vector.extract_strided_slice %12 {offsets = [4, 1, 0], sizes = [8, 16, 4], strides = [1, 1, 1]} : vector<12x20x4xbf16> to vector<8x16x4xbf16>
    %185 = arith.extf %184 : vector<8x16x4xbf16> to vector<8x16x4xf32>
    %186 = vector.extract_strided_slice %13 {offsets = [4, 1, 0], sizes = [1, 1, 4], strides = [1, 1, 1]} : vector<5x5x4xf32> to vector<1x1x4xf32>
    %187 = vector.shape_cast %186 : vector<1x1x4xf32> to vector<4xf32>
    %188 = vector.shape_cast %187 : vector<4xf32> to vector<1x1x4xf32>
    %189 = vector.broadcast %188 : vector<1x1x4xf32> to vector<8x16x4xf32>
    %190 = arith.mulf %185, %189 : vector<8x16x4xf32>
    %191 = arith.addf %183, %190 : vector<8x16x4xf32>
    %192 = vector.extract_strided_slice %12 {offsets = [4, 2, 0], sizes = [8, 16, 4], strides = [1, 1, 1]} : vector<12x20x4xbf16> to vector<8x16x4xbf16>
    %193 = arith.extf %192 : vector<8x16x4xbf16> to vector<8x16x4xf32>
    %194 = vector.extract_strided_slice %13 {offsets = [4, 2, 0], sizes = [1, 1, 4], strides = [1, 1, 1]} : vector<5x5x4xf32> to vector<1x1x4xf32>
    %195 = vector.shape_cast %194 : vector<1x1x4xf32> to vector<4xf32>
    %196 = vector.shape_cast %195 : vector<4xf32> to vector<1x1x4xf32>
    %197 = vector.broadcast %196 : vector<1x1x4xf32> to vector<8x16x4xf32>
    %198 = arith.mulf %193, %197 : vector<8x16x4xf32>
    %199 = arith.addf %191, %198 : vector<8x16x4xf32>
    %200 = vector.extract_strided_slice %12 {offsets = [4, 3, 0], sizes = [8, 16, 4], strides = [1, 1, 1]} : vector<12x20x4xbf16> to vector<8x16x4xbf16>
    %201 = arith.extf %200 : vector<8x16x4xbf16> to vector<8x16x4xf32>
    %202 = vector.extract_strided_slice %13 {offsets = [4, 3, 0], sizes = [1, 1, 4], strides = [1, 1, 1]} : vector<5x5x4xf32> to vector<1x1x4xf32>
    %203 = vector.shape_cast %202 : vector<1x1x4xf32> to vector<4xf32>
    %204 = vector.shape_cast %203 : vector<4xf32> to vector<1x1x4xf32>
    %205 = vector.broadcast %204 : vector<1x1x4xf32> to vector<8x16x4xf32>
    %206 = arith.mulf %201, %205 : vector<8x16x4xf32>
    %207 = arith.addf %199, %206 : vector<8x16x4xf32>
    %208 = vector.extract_strided_slice %12 {offsets = [4, 4, 0], sizes = [8, 16, 4], strides = [1, 1, 1]} : vector<12x20x4xbf16> to vector<8x16x4xbf16>
    %209 = arith.extf %208 : vector<8x16x4xbf16> to vector<8x16x4xf32>
    %210 = vector.extract_strided_slice %13 {offsets = [4, 4, 0], sizes = [1, 1, 4], strides = [1, 1, 1]} : vector<5x5x4xf32> to vector<1x1x4xf32>
    %211 = vector.shape_cast %210 : vector<1x1x4xf32> to vector<4xf32>
    %212 = vector.shape_cast %211 : vector<4xf32> to vector<1x1x4xf32>
    %213 = vector.broadcast %212 : vector<1x1x4xf32> to vector<8x16x4xf32>
    %214 = arith.mulf %209, %213 : vector<8x16x4xf32>
    %215 = arith.addf %207, %214 : vector<8x16x4xf32>
    %216 = vector.shape_cast %14 : vector<1x4xf32> to vector<1x1x4xf32>
    %217 = vector.broadcast %216 : vector<1x1x4xf32> to vector<8x16x4xf32>
    %218 = arith.addf %215, %217 : vector<8x16x4xf32>
    %c0_28 = arith.constant 0 : index
    %c0_29 = arith.constant 0 : index
    %c0_30 = arith.constant 0 : index
    %c0_31 = arith.constant 0 : index
    %219 = vector.load %arg4[%c0_28, %c0_29, %c0_30, %c0_31] : memref<1x8x16x4xbf16, #tpu.memory_space<vmem>>, vector<1x8x16x4xbf16>
    %220 = vector.shape_cast %219 : vector<1x8x16x4xbf16> to vector<8x16x4xbf16>
    %221 = arith.extf %220 : vector<8x16x4xbf16> to vector<8x16x4xf32>
    %222 = arith.mulf %218, %221 : vector<8x16x4xf32>
    %223 = vector.shape_cast %222 : vector<8x16x4xf32> to vector<128x4xf32>
    %224 = arith.truncf %223 : vector<128x4xf32> to vector<128x4xbf16>
    %c0_32 = arith.constant 0 : index
    %c0_33 = arith.constant 0 : index
    %225 = vector.load %arg8[%c0_32, %c0_33] : memref<4x4xbf16, #tpu.memory_space<vmem>>, vector<4x4xbf16>
    %cst_34 = arith.constant dense<0.000000e+00> : vector<128x4xf32>
    %226 = tpu.matmul %224, %225, %cst_34 {dimension_numbers = #tpu.dot_dimension_numbers<[1], [0], [0], [1], [0, 0, 1, 1], [], []>} : vector<128x4xbf16>, vector<4x4xbf16>, vector<128x4xf32> -> vector<128x4xf32>
    %c0_35 = arith.constant 0 : index
    %c0_36 = arith.constant 0 : index
    %227 = vector.load %arg9[%c0_35, %c0_36] : memref<1x4xf32, #tpu.memory_space<vmem>>, vector<1x4xf32>
    %228 = vector.broadcast %227 : vector<1x4xf32> to vector<128x4xf32>
    %229 = arith.addf %226, %228 : vector<128x4xf32>
    %c0_37 = arith.constant 0 : index
    %c0_38 = arith.constant 0 : index
    %c0_39 = arith.constant 0 : index
    %c0_40 = arith.constant 0 : index
    %230 = vector.load %arg5[%c0_37, %c0_38, %c0_39, %c0_40] : memref<1x8x16x4xf32, #tpu.memory_space<vmem>>, vector<1x8x16x4xf32>
    %231 = vector.shape_cast %230 : vector<1x8x16x4xf32> to vector<8x16x4xf32>
    %232 = vector.shape_cast %231 : vector<8x16x4xf32> to vector<128x4xf32>
    %c0_41 = arith.constant 0 : index
    %c0_42 = arith.constant 0 : index
    %233 = vector.load %arg10[%c0_41, %c0_42] : memref<1x4xf32, #tpu.memory_space<vmem>>, vector<1x4xf32>
    %234 = vector.broadcast %233 : vector<1x4xf32> to vector<128x4xf32>
    %235 = arith.mulf %234, %229 : vector<128x4xf32>
    %236 = arith.addf %232, %235 : vector<128x4xf32>
    %237 = vector.shape_cast %236 : vector<128x4xf32> to vector<8x16x4xf32>
    %c0_43 = arith.constant 0 : index
    %c0_44 = arith.constant 0 : index
    %c0_45 = arith.constant 0 : index
    %c0_46 = arith.constant 0 : index
    %238 = vector.load %arg15[%c0_43, %c0_44, %c0_45, %c0_46] : memref<1x8x16x4xf32, #tpu.memory_space<vmem>>, vector<1x8x16x4xf32>
    %239 = vector.shape_cast %238 : vector<1x8x16x4xf32> to vector<8x16x4xf32>
    %240 = vector.shape_cast %237 : vector<8x16x4xf32> to vector<1x8x16x4xf32>
    tpu.vector_store %arg15[%c0_43, %c0_44, %c0_45, %c0_46], %240 {strides = array<i32>} : memref<1x8x16x4xf32, #tpu.memory_space<vmem>>, vector<1x8x16x4xf32>,
    %cst_47 = arith.constant dense<0.000000e+00> : vector<128xf32>
    %241 = vector.multi_reduction <add>, %236, %cst_47 [1] : vector<128x4xf32> to vector<128xf32>
    %242 = vector.shape_cast %241 : vector<128xf32> to vector<128x1xf32>
    %cst_48 = arith.constant 4.000000e+00 : f32
    %243 = vector.broadcast %cst_48 : f32 to vector<128x1xf32>
    %244 = arith.divf %242, %243 : vector<128x1xf32>
    %245 = vector.broadcast %244 : vector<128x1xf32> to vector<128x4xf32>
    %246 = arith.subf %236, %245 : vector<128x4xf32>
    %247 = arith.mulf %246, %246 : vector<128x4xf32>
    %cst_49 = arith.constant dense<0.000000e+00> : vector<128xf32>
    %248 = vector.multi_reduction <add>, %247, %cst_49 [1] : vector<128x4xf32> to vector<128xf32>
    %249 = vector.shape_cast %248 : vector<128xf32> to vector<128x1xf32>
    %cst_50 = arith.constant 4.000000e+00 : f32
    %250 = vector.broadcast %cst_50 : f32 to vector<128x1xf32>
    %251 = arith.divf %249, %250 : vector<128x1xf32>
    %252 = vector.broadcast %244 : vector<128x1xf32> to vector<128x4xf32>
    %253 = arith.subf %236, %252 : vector<128x4xf32>
    %cst_51 = arith.constant 9.99999997E-7 : f32
    %254 = vector.broadcast %cst_51 : f32 to vector<128x1xf32>
    %255 = arith.addf %251, %254 : vector<128x1xf32>
    %256 = math.rsqrt %255 : vector<128x1xf32>
    %257 = vector.broadcast %256 : vector<128x1xf32> to vector<128x4xf32>
    %258 = arith.mulf %253, %257 : vector<128x4xf32>
    %c0_52 = arith.constant 0 : index
    %c0_53 = arith.constant 0 : index
    %259 = vector.load %arg11[%c0_52, %c0_53] : memref<1x4xf32, #tpu.memory_space<vmem>>, vector<1x4xf32>
    %260 = vector.broadcast %259 : vector<1x4xf32> to vector<128x4xf32>
    %261 = arith.mulf %258, %260 : vector<128x4xf32>
    %c0_54 = arith.constant 0 : index
    %c0_55 = arith.constant 0 : index
    %262 = vector.load %arg12[%c0_54, %c0_55] : memref<1x4xf32, #tpu.memory_space<vmem>>, vector<1x4xf32>
    %263 = vector.broadcast %262 : vector<1x4xf32> to vector<128x4xf32>
    %264 = arith.addf %261, %263 : vector<128x4xf32>
    %265 = arith.truncf %264 : vector<128x4xf32> to vector<128x4xbf16>
    %c0_56 = arith.constant 0 : index
    %c0_57 = arith.constant 0 : index
    %266 = vector.load %arg13[%c0_56, %c0_57] : memref<4x16xbf16, #tpu.memory_space<vmem>>, vector<4x16xbf16>
    %cst_58 = arith.constant dense<0.000000e+00> : vector<128x16xf32>
    %267 = tpu.matmul %265, %266, %cst_58 {dimension_numbers = #tpu.dot_dimension_numbers<[1], [0], [0], [1], [0, 0, 1, 1], [], []>} : vector<128x4xbf16>, vector<4x16xbf16>, vector<128x16xf32> -> vector<128x16xf32>
    %c0_59 = arith.constant 0 : index
    %c0_60 = arith.constant 0 : index
    %268 = vector.load %arg14[%c0_59, %c0_60] : memref<1x16xf32, #tpu.memory_space<vmem>>, vector<1x16xf32>
    %269 = vector.broadcast %268 : vector<1x16xf32> to vector<128x16xf32>
    %270 = arith.addf %267, %269 : vector<128x16xf32>
    %cst_61 = arith.constant 5.000000e-01 : f32
    %271 = vector.broadcast %cst_61 : f32 to vector<128x16xf32>
    %272 = arith.mulf %271, %270 : vector<128x16xf32>
    %cst_62 = arith.constant 1.41421354 : f32
    %273 = vector.broadcast %cst_62 : f32 to vector<128x16xf32>
    %274 = arith.divf %270, %273 : vector<128x16xf32>
    %275 = math.erf %274 : vector<128x16xf32>
    %cst_63 = arith.constant 1.000000e+00 : f32
    %276 = vector.broadcast %cst_63 : f32 to vector<128x16xf32>
    %277 = arith.addf %276, %275 : vector<128x16xf32>
    %278 = arith.mulf %272, %277 : vector<128x16xf32>
    %279 = vector.shape_cast %278 : vector<128x16xf32> to vector<8x16x16xf32>
    %280 = arith.truncf %279 : vector<8x16x16xf32> to vector<8x16x16xbf16>
    %c0_64 = arith.constant 0 : index
    %c0_65 = arith.constant 0 : index
    %c0_66 = arith.constant 0 : index
    %c0_67 = arith.constant 0 : index
    %281 = vector.load %arg16[%c0_64, %c0_65, %c0_66, %c0_67] : memref<1x8x16x16xbf16, #tpu.memory_space<vmem>>, vector<1x8x16x16xbf16>
    %282 = vector.shape_cast %281 : vector<1x8x16x16xbf16> to vector<8x16x16xbf16>
    %283 = vector.shape_cast %280 : vector<8x16x16xbf16> to vector<1x8x16x16xbf16>
    tpu.vector_store %arg16[%c0_64, %c0_65, %c0_66, %c0_67], %283 {strides = array<i32>} : memref<1x8x16x16xbf16, #tpu.memory_space<vmem>>, vector<1x8x16x16xbf16>,
    return
  }
  func.func @transform_0(%arg0: i32, %arg1: i32) -> (i32, i32, i32, i32) {
    %c0_i32 = arith.constant 0 : i32
    %c0_i32_0 = arith.constant 0 : i32
    %c0_i32_1 = arith.constant 0 : i32
    return %arg0, %arg1, %c0_i32, %c0_i32_0 : i32, i32, i32, i32
  }
  func.func @transform_1(%arg0: i32, %arg1: i32) -> (i32, i32, i32, i32) {
    %c0_i32 = arith.constant 0 : i32
    %c0_i32_0 = arith.constant 0 : i32
    %c0_i32_1 = arith.constant 0 : i32
    return %arg0, %arg1, %c0_i32, %c0_i32_0 : i32, i32, i32, i32
  }
  func.func @transform_2(%arg0: i32, %arg1: i32) -> (i32, i32, i32, i32) {
    %c0_i32 = arith.constant 0 : i32
    %c0_i32_0 = arith.constant 0 : i32
    %c0_i32_1 = arith.constant 0 : i32
    return %arg0, %arg1, %c0_i32, %c0_i32_0 : i32, i32, i32, i32
  }
  func.func @transform_3(%arg0: i32, %arg1: i32) -> (i32, i32, i32, i32) {
    %c0_i32 = arith.constant 0 : i32
    %c0_i32_0 = arith.constant 0 : i32
    %c0_i32_1 = arith.constant 0 : i32
    return %arg0, %arg1, %c0_i32, %c0_i32_0 : i32, i32, i32, i32
  }
  func.func @transform_4(%arg0: i32, %arg1: i32) -> (i32, i32, i32) {
    %c0_i32 = arith.constant 0 : i32
    %c0_i32_0 = arith.constant 0 : i32
    %c0_i32_1 = arith.constant 0 : i32
    %c0_i32_2 = arith.constant 0 : i32
    return %c0_i32, %c0_i32_0, %c0_i32_1 : i32, i32, i32
  }
  func.func @transform_5(%arg0: i32, %arg1: i32) -> (i32, i32) {
    %c0_i32 = arith.constant 0 : i32
    %c0_i32_0 = arith.constant 0 : i32
    %c0_i32_1 = arith.constant 0 : i32
    return %c0_i32, %c0_i32_0 : i32, i32
  }
  func.func @transform_6(%arg0: i32, %arg1: i32) -> (i32, i32) {
    %c0_i32 = arith.constant 0 : i32
    %c0_i32_0 = arith.constant 0 : i32
    %c0_i32_1 = arith.constant 0 : i32
    return %c0_i32, %c0_i32_0 : i32, i32
  }
  func.func @transform_7(%arg0: i32, %arg1: i32) -> (i32, i32) {
    %c0_i32 = arith.constant 0 : i32
    %c0_i32_0 = arith.constant 0 : i32
    %c0_i32_1 = arith.constant 0 : i32
    return %c0_i32, %c0_i32_0 : i32, i32
  }
  func.func @transform_8(%arg0: i32, %arg1: i32) -> (i32, i32) {
    %c0_i32 = arith.constant 0 : i32
    %c0_i32_0 = arith.constant 0 : i32
    %c0_i32_1 = arith.constant 0 : i32
    return %c0_i32, %c0_i32_0 : i32, i32
  }
  func.func @transform_9(%arg0: i32, %arg1: i32) -> (i32, i32) {
    %c0_i32 = arith.constant 0 : i32
    %c0_i32_0 = arith.constant 0 : i32
    %c0_i32_1 = arith.constant 0 : i32
    return %c0_i32, %c0_i32_0 : i32, i32
  }
  func.func @transform_10(%arg0: i32, %arg1: i32) -> (i32, i32) {
    %c0_i32 = arith.constant 0 : i32
    %c0_i32_0 = arith.constant 0 : i32
    %c0_i32_1 = arith.constant 0 : i32
    return %c0_i32, %c0_i32_0 : i32, i32
  }
  func.func @transform_11(%arg0: i32, %arg1: i32) -> (i32, i32) {
    %c0_i32 = arith.constant 0 : i32
    %c0_i32_0 = arith.constant 0 : i32
    %c0_i32_1 = arith.constant 0 : i32
    return %c0_i32, %c0_i32_0 : i32, i32
  }
  func.func @transform_12(%arg0: i32, %arg1: i32) -> (i32, i32) {
    %c0_i32 = arith.constant 0 : i32
    %c0_i32_0 = arith.constant 0 : i32
    %c0_i32_1 = arith.constant 0 : i32
    return %c0_i32, %c0_i32_0 : i32, i32
  }
  func.func @transform_13(%arg0: i32, %arg1: i32) -> (i32, i32, i32, i32) {
    %c0_i32 = arith.constant 0 : i32
    %c0_i32_0 = arith.constant 0 : i32
    %c0_i32_1 = arith.constant 0 : i32
    return %arg0, %arg1, %c0_i32, %c0_i32_0 : i32, i32, i32, i32
  }
  func.func @transform_14(%arg0: i32, %arg1: i32) -> (i32, i32, i32, i32) {
    %c0_i32 = arith.constant 0 : i32
    %c0_i32_0 = arith.constant 0 : i32
    %c0_i32_1 = arith.constant 0 : i32
    return %arg0, %arg1, %c0_i32, %c0_i32_0 : i32, i32, i32, i32
  }
}

module attributes {stable_mosaic.version = 11 : i64} {
  func.func @_mlp_back_kernel(%arg0: i32, %arg1: i32, %arg2: memref<1x8x16x16xbf16, #tpu.memory_space<vmem>>, %arg3: memref<1x2x16x16xbf16, #tpu.memory_space<vmem>>, %arg4: memref<1x8x16x4xf32, #tpu.memory_space<vmem>>, %arg5: memref<3x3x16xf32, #tpu.memory_space<vmem>>, %arg6: memref<1x16xf32, #tpu.memory_space<vmem>>, %arg7: memref<16x4xbf16, #tpu.memory_space<vmem>>, %arg8: memref<1x4xf32, #tpu.memory_space<vmem>>, %arg9: memref<1x4xf32, #tpu.memory_space<vmem>>, %arg10: memref<1x8x16x4xf32, #tpu.memory_space<vmem>>, %arg11: memref<10x18x16xbf16, #tpu.memory_space<vmem>>) attributes {dimension_semantics = [#tpu.dimension_semantics<parallel>, #tpu.dimension_semantics<parallel>], iteration_bounds = array<i64: 2, 2>, scalar_prefetch = 0 : i64, scratch_operands = 1 : i64, tpu.core_type = #tpu.core_type<tc>, window_params = [{transform_indices = @transform_0, window_bounds = array<i64: 1, 8, 16, 16>}, {transform_indices = @transform_1, window_bounds = array<i64: 1, 2, 16, 16>}, {transform_indices = @transform_2, window_bounds = array<i64: 1, 8, 16, 4>}, {pipeline_mode = #tpu.pipeline_mode<synchronous>, transform_indices = @transform_3, window_bounds = array<i64: 3, 3, 16>}, {pipeline_mode = #tpu.pipeline_mode<synchronous>, transform_indices = @transform_4, window_bounds = array<i64: 1, 16>}, {pipeline_mode = #tpu.pipeline_mode<synchronous>, transform_indices = @transform_5, window_bounds = array<i64: 16, 4>}, {pipeline_mode = #tpu.pipeline_mode<synchronous>, transform_indices = @transform_6, window_bounds = array<i64: 1, 4>}, {pipeline_mode = #tpu.pipeline_mode<synchronous>, transform_indices = @transform_7, window_bounds = array<i64: 1, 4>}, {transform_indices = @transform_8, window_bounds = array<i64: 1, 8, 16, 4>}]} {
    %c0 = arith.constant 0 : index
    %c0_0 = arith.constant 0 : index
    %c0_1 = arith.constant 0 : index
    %c0_2 = arith.constant 0 : index
    %0 = vector.load %arg2[%c0, %c0_0, %c0_1, %c0_2] : memref<1x8x16x16xbf16, #tpu.memory_space<vmem>>, vector<1x8x16x16xbf16>
    %1 = vector.shape_cast %0 : vector<1x8x16x16xbf16> to vector<8x16x16xbf16>
    %c0_3 = arith.constant 0 : index
    %c0_4 = arith.constant 0 : index
    %c0_5 = arith.constant 0 : index
    %c0_6 = arith.constant 0 : index
    %2 = vector.load %arg3[%c0_3, %c0_4, %c0_5, %c0_6] : memref<1x2x16x16xbf16, #tpu.memory_space<vmem>>, vector<1x2x16x16xbf16>
    %3 = vector.shape_cast %2 : vector<1x2x16x16xbf16> to vector<2x16x16xbf16>
    %cst = arith.constant 0.000000e+00 : bf16
    %4 = vector.broadcast %cst : bf16 to vector<10x1x16xbf16>
    %c0_7 = arith.constant 0 : index
    %c0_8 = arith.constant 0 : index
    %c0_9 = arith.constant 0 : index
    %5 = vector.load %arg11[%c0_7, %c0_8, %c0_9] : memref<10x18x16xbf16, #tpu.memory_space<vmem>>, vector<10x1x16xbf16>
    tpu.vector_store %arg11[%c0_7, %c0_8, %c0_9], %4 {strides = array<i32>} : memref<10x18x16xbf16, #tpu.memory_space<vmem>>, vector<10x1x16xbf16>,
    %c0_10 = arith.constant 0 : index
    %c17 = arith.constant 17 : index
    %c0_11 = arith.constant 0 : index
    %6 = vector.load %arg11[%c0_10, %c17, %c0_11] : memref<10x18x16xbf16, #tpu.memory_space<vmem>>, vector<10x1x16xbf16>
    tpu.vector_store %arg11[%c0_10, %c17, %c0_11], %4 {strides = array<i32>} : memref<10x18x16xbf16, #tpu.memory_space<vmem>>, vector<10x1x16xbf16>,
    %7 = vector.extract_strided_slice %3 {offsets = [0, 0, 0], sizes = [1, 16, 16], strides = [1, 1, 1]} : vector<2x16x16xbf16> to vector<1x16x16xbf16>
    %c0_12 = arith.constant 0 : index
    %c1 = arith.constant 1 : index
    %c0_13 = arith.constant 0 : index
    %8 = vector.load %arg11[%c0_12, %c1, %c0_13] : memref<10x18x16xbf16, #tpu.memory_space<vmem>>, vector<1x16x16xbf16>
    tpu.vector_store %arg11[%c0_12, %c1, %c0_13], %7 {strides = array<i32>} : memref<10x18x16xbf16, #tpu.memory_space<vmem>>, vector<1x16x16xbf16>,
    %9 = vector.extract_strided_slice %3 {offsets = [1, 0, 0], sizes = [1, 16, 16], strides = [1, 1, 1]} : vector<2x16x16xbf16> to vector<1x16x16xbf16>
    %c9 = arith.constant 9 : index
    %c1_14 = arith.constant 1 : index
    %c0_15 = arith.constant 0 : index
    %10 = vector.load %arg11[%c9, %c1_14, %c0_15] : memref<10x18x16xbf16, #tpu.memory_space<vmem>>, vector<1x16x16xbf16>
    tpu.vector_store %arg11[%c9, %c1_14, %c0_15], %9 {strides = array<i32>} : memref<10x18x16xbf16, #tpu.memory_space<vmem>>, vector<1x16x16xbf16>,
    %c1_16 = arith.constant 1 : index
    %c1_17 = arith.constant 1 : index
    %c0_18 = arith.constant 0 : index
    %11 = vector.load %arg11[%c1_16, %c1_17, %c0_18] : memref<10x18x16xbf16, #tpu.memory_space<vmem>>, vector<8x16x16xbf16>
    tpu.vector_store %arg11[%c1_16, %c1_17, %c0_18], %1 {strides = array<i32>} : memref<10x18x16xbf16, #tpu.memory_space<vmem>>, vector<8x16x16xbf16>,
    %c0_19 = arith.constant 0 : index
    %c0_20 = arith.constant 0 : index
    %c0_21 = arith.constant 0 : index
    %12 = vector.load %arg11[%c0_19, %c0_20, %c0_21] : memref<10x18x16xbf16, #tpu.memory_space<vmem>>, vector<10x18x16xbf16>
    %c0_22 = arith.constant 0 : index
    %c0_23 = arith.constant 0 : index
    %c0_24 = arith.constant 0 : index
    %13 = vector.load %arg5[%c0_22, %c0_23, %c0_24] : memref<3x3x16xf32, #tpu.memory_space<vmem>>, vector<3x3x16xf32>
    %c0_25 = arith.constant 0 : index
    %c0_26 = arith.constant 0 : index
    %14 = vector.load %arg6[%c0_25, %c0_26] : memref<1x16xf32, #tpu.memory_space<vmem>>, vector<1x16xf32>
    %cst_27 = arith.constant 0.000000e+00 : f32
    %15 = vector.broadcast %cst_27 : f32 to vector<8x16x16xf32>
    %16 = vector.extract_strided_slice %12 {offsets = [0, 0, 0], sizes = [8, 16, 16], strides = [1, 1, 1]} : vector<10x18x16xbf16> to vector<8x16x16xbf16>
    %17 = arith.extf %16 : vector<8x16x16xbf16> to vector<8x16x16xf32>
    %18 = vector.extract_strided_slice %13 {offsets = [0, 0, 0], sizes = [1, 1, 16], strides = [1, 1, 1]} : vector<3x3x16xf32> to vector<1x1x16xf32>
    %19 = vector.shape_cast %18 : vector<1x1x16xf32> to vector<16xf32>
    %20 = vector.shape_cast %19 : vector<16xf32> to vector<1x1x16xf32>
    %21 = vector.broadcast %20 : vector<1x1x16xf32> to vector<8x16x16xf32>
    %22 = arith.mulf %17, %21 : vector<8x16x16xf32>
    %23 = arith.addf %15, %22 : vector<8x16x16xf32>
    %24 = vector.extract_strided_slice %12 {offsets = [0, 1, 0], sizes = [8, 16, 16], strides = [1, 1, 1]} : vector<10x18x16xbf16> to vector<8x16x16xbf16>
    %25 = arith.extf %24 : vector<8x16x16xbf16> to vector<8x16x16xf32>
    %26 = vector.extract_strided_slice %13 {offsets = [0, 1, 0], sizes = [1, 1, 16], strides = [1, 1, 1]} : vector<3x3x16xf32> to vector<1x1x16xf32>
    %27 = vector.shape_cast %26 : vector<1x1x16xf32> to vector<16xf32>
    %28 = vector.shape_cast %27 : vector<16xf32> to vector<1x1x16xf32>
    %29 = vector.broadcast %28 : vector<1x1x16xf32> to vector<8x16x16xf32>
    %30 = arith.mulf %25, %29 : vector<8x16x16xf32>
    %31 = arith.addf %23, %30 : vector<8x16x16xf32>
    %32 = vector.extract_strided_slice %12 {offsets = [0, 2, 0], sizes = [8, 16, 16], strides = [1, 1, 1]} : vector<10x18x16xbf16> to vector<8x16x16xbf16>
    %33 = arith.extf %32 : vector<8x16x16xbf16> to vector<8x16x16xf32>
    %34 = vector.extract_strided_slice %13 {offsets = [0, 2, 0], sizes = [1, 1, 16], strides = [1, 1, 1]} : vector<3x3x16xf32> to vector<1x1x16xf32>
    %35 = vector.shape_cast %34 : vector<1x1x16xf32> to vector<16xf32>
    %36 = vector.shape_cast %35 : vector<16xf32> to vector<1x1x16xf32>
    %37 = vector.broadcast %36 : vector<1x1x16xf32> to vector<8x16x16xf32>
    %38 = arith.mulf %33, %37 : vector<8x16x16xf32>
    %39 = arith.addf %31, %38 : vector<8x16x16xf32>
    %40 = vector.extract_strided_slice %12 {offsets = [1, 0, 0], sizes = [8, 16, 16], strides = [1, 1, 1]} : vector<10x18x16xbf16> to vector<8x16x16xbf16>
    %41 = arith.extf %40 : vector<8x16x16xbf16> to vector<8x16x16xf32>
    %42 = vector.extract_strided_slice %13 {offsets = [1, 0, 0], sizes = [1, 1, 16], strides = [1, 1, 1]} : vector<3x3x16xf32> to vector<1x1x16xf32>
    %43 = vector.shape_cast %42 : vector<1x1x16xf32> to vector<16xf32>
    %44 = vector.shape_cast %43 : vector<16xf32> to vector<1x1x16xf32>
    %45 = vector.broadcast %44 : vector<1x1x16xf32> to vector<8x16x16xf32>
    %46 = arith.mulf %41, %45 : vector<8x16x16xf32>
    %47 = arith.addf %39, %46 : vector<8x16x16xf32>
    %48 = vector.extract_strided_slice %12 {offsets = [1, 1, 0], sizes = [8, 16, 16], strides = [1, 1, 1]} : vector<10x18x16xbf16> to vector<8x16x16xbf16>
    %49 = arith.extf %48 : vector<8x16x16xbf16> to vector<8x16x16xf32>
    %50 = vector.extract_strided_slice %13 {offsets = [1, 1, 0], sizes = [1, 1, 16], strides = [1, 1, 1]} : vector<3x3x16xf32> to vector<1x1x16xf32>
    %51 = vector.shape_cast %50 : vector<1x1x16xf32> to vector<16xf32>
    %52 = vector.shape_cast %51 : vector<16xf32> to vector<1x1x16xf32>
    %53 = vector.broadcast %52 : vector<1x1x16xf32> to vector<8x16x16xf32>
    %54 = arith.mulf %49, %53 : vector<8x16x16xf32>
    %55 = arith.addf %47, %54 : vector<8x16x16xf32>
    %56 = vector.extract_strided_slice %12 {offsets = [1, 2, 0], sizes = [8, 16, 16], strides = [1, 1, 1]} : vector<10x18x16xbf16> to vector<8x16x16xbf16>
    %57 = arith.extf %56 : vector<8x16x16xbf16> to vector<8x16x16xf32>
    %58 = vector.extract_strided_slice %13 {offsets = [1, 2, 0], sizes = [1, 1, 16], strides = [1, 1, 1]} : vector<3x3x16xf32> to vector<1x1x16xf32>
    %59 = vector.shape_cast %58 : vector<1x1x16xf32> to vector<16xf32>
    %60 = vector.shape_cast %59 : vector<16xf32> to vector<1x1x16xf32>
    %61 = vector.broadcast %60 : vector<1x1x16xf32> to vector<8x16x16xf32>
    %62 = arith.mulf %57, %61 : vector<8x16x16xf32>
    %63 = arith.addf %55, %62 : vector<8x16x16xf32>
    %64 = vector.extract_strided_slice %12 {offsets = [2, 0, 0], sizes = [8, 16, 16], strides = [1, 1, 1]} : vector<10x18x16xbf16> to vector<8x16x16xbf16>
    %65 = arith.extf %64 : vector<8x16x16xbf16> to vector<8x16x16xf32>
    %66 = vector.extract_strided_slice %13 {offsets = [2, 0, 0], sizes = [1, 1, 16], strides = [1, 1, 1]} : vector<3x3x16xf32> to vector<1x1x16xf32>
    %67 = vector.shape_cast %66 : vector<1x1x16xf32> to vector<16xf32>
    %68 = vector.shape_cast %67 : vector<16xf32> to vector<1x1x16xf32>
    %69 = vector.broadcast %68 : vector<1x1x16xf32> to vector<8x16x16xf32>
    %70 = arith.mulf %65, %69 : vector<8x16x16xf32>
    %71 = arith.addf %63, %70 : vector<8x16x16xf32>
    %72 = vector.extract_strided_slice %12 {offsets = [2, 1, 0], sizes = [8, 16, 16], strides = [1, 1, 1]} : vector<10x18x16xbf16> to vector<8x16x16xbf16>
    %73 = arith.extf %72 : vector<8x16x16xbf16> to vector<8x16x16xf32>
    %74 = vector.extract_strided_slice %13 {offsets = [2, 1, 0], sizes = [1, 1, 16], strides = [1, 1, 1]} : vector<3x3x16xf32> to vector<1x1x16xf32>
    %75 = vector.shape_cast %74 : vector<1x1x16xf32> to vector<16xf32>
    %76 = vector.shape_cast %75 : vector<16xf32> to vector<1x1x16xf32>
    %77 = vector.broadcast %76 : vector<1x1x16xf32> to vector<8x16x16xf32>
    %78 = arith.mulf %73, %77 : vector<8x16x16xf32>
    %79 = arith.addf %71, %78 : vector<8x16x16xf32>
    %80 = vector.extract_strided_slice %12 {offsets = [2, 2, 0], sizes = [8, 16, 16], strides = [1, 1, 1]} : vector<10x18x16xbf16> to vector<8x16x16xbf16>
    %81 = arith.extf %80 : vector<8x16x16xbf16> to vector<8x16x16xf32>
    %82 = vector.extract_strided_slice %13 {offsets = [2, 2, 0], sizes = [1, 1, 16], strides = [1, 1, 1]} : vector<3x3x16xf32> to vector<1x1x16xf32>
    %83 = vector.shape_cast %82 : vector<1x1x16xf32> to vector<16xf32>
    %84 = vector.shape_cast %83 : vector<16xf32> to vector<1x1x16xf32>
    %85 = vector.broadcast %84 : vector<1x1x16xf32> to vector<8x16x16xf32>
    %86 = arith.mulf %81, %85 : vector<8x16x16xf32>
    %87 = arith.addf %79, %86 : vector<8x16x16xf32>
    %88 = vector.shape_cast %14 : vector<1x16xf32> to vector<1x1x16xf32>
    %89 = vector.broadcast %88 : vector<1x1x16xf32> to vector<8x16x16xf32>
    %90 = arith.addf %87, %89 : vector<8x16x16xf32>
    %c0_28 = arith.constant 0 : index
    %c0_29 = arith.constant 0 : index
    %c0_30 = arith.constant 0 : index
    %c0_31 = arith.constant 0 : index
    %91 = vector.load %arg2[%c0_28, %c0_29, %c0_30, %c0_31] : memref<1x8x16x16xbf16, #tpu.memory_space<vmem>>, vector<1x8x16x16xbf16>
    %92 = vector.shape_cast %91 : vector<1x8x16x16xbf16> to vector<8x16x16xbf16>
    %93 = arith.extf %92 : vector<8x16x16xbf16> to vector<8x16x16xf32>
    %cst_32 = arith.constant 5.000000e-01 : f32
    %94 = vector.broadcast %cst_32 : f32 to vector<8x16x16xf32>
    %95 = arith.mulf %94, %90 : vector<8x16x16xf32>
    %cst_33 = arith.constant 1.41421354 : f32
    %96 = vector.broadcast %cst_33 : f32 to vector<8x16x16xf32>
    %97 = arith.divf %90, %96 : vector<8x16x16xf32>
    %98 = math.erf %97 : vector<8x16x16xf32>
    %cst_34 = arith.constant 1.000000e+00 : f32
    %99 = vector.broadcast %cst_34 : f32 to vector<8x16x16xf32>
    %100 = arith.addf %99, %98 : vector<8x16x16xf32>
    %101 = arith.mulf %95, %100 : vector<8x16x16xf32>
    %102 = arith.addf %93, %101 : vector<8x16x16xf32>
    %103 = vector.shape_cast %102 : vector<8x16x16xf32> to vector<128x16xf32>
    %104 = arith.truncf %103 : vector<128x16xf32> to vector<128x16xbf16>
    %c0_35 = arith.constant 0 : index
    %c0_36 = arith.constant 0 : index
    %105 = vector.load %arg7[%c0_35, %c0_36] : memref<16x4xbf16, #tpu.memory_space<vmem>>, vector<16x4xbf16>
    %cst_37 = arith.constant dense<0.000000e+00> : vector<128x4xf32>
    %106 = tpu.matmul %104, %105, %cst_37 {dimension_numbers = #tpu.dot_dimension_numbers<[1], [0], [0], [1], [0, 0, 1, 1], [], []>} : vector<128x16xbf16>, vector<16x4xbf16>, vector<128x4xf32> -> vector<128x4xf32>
    %c0_38 = arith.constant 0 : index
    %c0_39 = arith.constant 0 : index
    %107 = vector.load %arg8[%c0_38, %c0_39] : memref<1x4xf32, #tpu.memory_space<vmem>>, vector<1x4xf32>
    %108 = vector.broadcast %107 : vector<1x4xf32> to vector<128x4xf32>
    %109 = arith.addf %106, %108 : vector<128x4xf32>
    %c0_40 = arith.constant 0 : index
    %c0_41 = arith.constant 0 : index
    %c0_42 = arith.constant 0 : index
    %c0_43 = arith.constant 0 : index
    %110 = vector.load %arg4[%c0_40, %c0_41, %c0_42, %c0_43] : memref<1x8x16x4xf32, #tpu.memory_space<vmem>>, vector<1x8x16x4xf32>
    %111 = vector.shape_cast %110 : vector<1x8x16x4xf32> to vector<8x16x4xf32>
    %c0_44 = arith.constant 0 : index
    %c0_45 = arith.constant 0 : index
    %112 = vector.load %arg9[%c0_44, %c0_45] : memref<1x4xf32, #tpu.memory_space<vmem>>, vector<1x4xf32>
    %113 = vector.broadcast %112 : vector<1x4xf32> to vector<128x4xf32>
    %114 = arith.mulf %113, %109 : vector<128x4xf32>
    %115 = vector.shape_cast %114 : vector<128x4xf32> to vector<8x16x4xf32>
    %116 = arith.addf %111, %115 : vector<8x16x4xf32>
    %c0_46 = arith.constant 0 : index
    %c0_47 = arith.constant 0 : index
    %c0_48 = arith.constant 0 : index
    %c0_49 = arith.constant 0 : index
    %117 = vector.load %arg10[%c0_46, %c0_47, %c0_48, %c0_49] : memref<1x8x16x4xf32, #tpu.memory_space<vmem>>, vector<1x8x16x4xf32>
    %118 = vector.shape_cast %117 : vector<1x8x16x4xf32> to vector<8x16x4xf32>
    %119 = vector.shape_cast %116 : vector<8x16x4xf32> to vector<1x8x16x4xf32>
    tpu.vector_store %arg10[%c0_46, %c0_47, %c0_48, %c0_49], %119 {strides = array<i32>} : memref<1x8x16x4xf32, #tpu.memory_space<vmem>>, vector<1x8x16x4xf32>,
    return
  }
  func.func @transform_0(%arg0: i32, %arg1: i32) -> (i32, i32, i32, i32) {
    %c0_i32 = arith.constant 0 : i32
    %c0_i32_0 = arith.constant 0 : i32
    %c0_i32_1 = arith.constant 0 : i32
    return %arg0, %arg1, %c0_i32, %c0_i32_0 : i32, i32, i32, i32
  }
  func.func @transform_1(%arg0: i32, %arg1: i32) -> (i32, i32, i32, i32) {
    %c0_i32 = arith.constant 0 : i32
    %c0_i32_0 = arith.constant 0 : i32
    %c0_i32_1 = arith.constant 0 : i32
    return %arg0, %arg1, %c0_i32, %c0_i32_0 : i32, i32, i32, i32
  }
  func.func @transform_2(%arg0: i32, %arg1: i32) -> (i32, i32, i32, i32) {
    %c0_i32 = arith.constant 0 : i32
    %c0_i32_0 = arith.constant 0 : i32
    %c0_i32_1 = arith.constant 0 : i32
    return %arg0, %arg1, %c0_i32, %c0_i32_0 : i32, i32, i32, i32
  }
  func.func @transform_3(%arg0: i32, %arg1: i32) -> (i32, i32, i32) {
    %c0_i32 = arith.constant 0 : i32
    %c0_i32_0 = arith.constant 0 : i32
    %c0_i32_1 = arith.constant 0 : i32
    %c0_i32_2 = arith.constant 0 : i32
    return %c0_i32, %c0_i32_0, %c0_i32_1 : i32, i32, i32
  }
  func.func @transform_4(%arg0: i32, %arg1: i32) -> (i32, i32) {
    %c0_i32 = arith.constant 0 : i32
    %c0_i32_0 = arith.constant 0 : i32
    %c0_i32_1 = arith.constant 0 : i32
    return %c0_i32, %c0_i32_0 : i32, i32
  }
  func.func @transform_5(%arg0: i32, %arg1: i32) -> (i32, i32) {
    %c0_i32 = arith.constant 0 : i32
    %c0_i32_0 = arith.constant 0 : i32
    %c0_i32_1 = arith.constant 0 : i32
    return %c0_i32, %c0_i32_0 : i32, i32
  }
  func.func @transform_6(%arg0: i32, %arg1: i32) -> (i32, i32) {
    %c0_i32 = arith.constant 0 : i32
    %c0_i32_0 = arith.constant 0 : i32
    %c0_i32_1 = arith.constant 0 : i32
    return %c0_i32, %c0_i32_0 : i32, i32
  }
  func.func @transform_7(%arg0: i32, %arg1: i32) -> (i32, i32) {
    %c0_i32 = arith.constant 0 : i32
    %c0_i32_0 = arith.constant 0 : i32
    %c0_i32_1 = arith.constant 0 : i32
    return %c0_i32, %c0_i32_0 : i32, i32
  }
  func.func @transform_8(%arg0: i32, %arg1: i32) -> (i32, i32, i32, i32) {
    %c0_i32 = arith.constant 0 : i32
    %c0_i32_0 = arith.constant 0 : i32
    %c0_i32_1 = arith.constant 0 : i32
    return %arg0, %arg1, %c0_i32, %c0_i32_0 : i32, i32, i32, i32
  }
}

</mosaic_0001>

<bundles_post_ra>
// kernel: block_forward.3
= control target key start
LH: loop header
LB: loop body
LE: loop exit
PB: predicated region body
PF: predicated region fallthrough
CT: control target
= control target key end

     0   :  { %s1471_s21 = smov 0   ;;  %s1473_s22 = smov 0   ;;  %s1885_s0 = inlined_call_operand.vmem [shape: f32[2,16,16,4], index: 0, kind: input, shape index: {}]   ;;  %s1886_s1 = inlined_call_operand.vmem [shape: f32[1,4], index: 1, kind: input, shape index: {}]   ;;  %s1887_s2 = inlined_call_operand.vmem [shape: f32[1,4], index: 2, kind: input, shape index: {}]   ;;  %s1888_s3 = inlined_call_operand.vmem [shape: bf16[4,8], index: 3, kind: input, shape index: {}]   ;;  %s1889_s4 = inlined_call_operand.vmem [shape: f32[1,8], index: 4, kind: input, shape index: {}]   ;;  %s1890_s5 = inlined_call_operand.vmem [shape: bf16[2,16,16,4], index: 5, kind: output, shape index: {0}]   ;;  %s1891_s6 = inlined_call_operand.vmem [shape: bf16[2,16,16,4], index: 6, kind: output, shape index: {1}]  }
   0x1   :  { %s1475_s23 = smov 0   ;;  %s1477_s24 = smov 0  }
   0x2   :  { %s1479_s25 = smov 0  }
   0x3 LB: > { %s26_s26 = sadd.s32 1, %s1425_s23  ;;  %s29_s27 = sadd.s32 1, %s1429_s24  ;;  %s1433_s25 = sphi %s1479_s25, %s17_s25   ;;  %s1429_s24 = sphi %s1477_s24, %s1895_s24   ;;  %s1425_s23 = sphi %s1475_s23, %s1894_s23   ;;  %s1421_s22 = sphi %s1473_s22, %s1893_s22   ;;  %s1417_s21 = sphi %s1471_s21, %s1892_s21  }
   0x4   : > { %p27_p0 = scmp.ge.s32.totalorder %s26_s26, 2  ;;  %p1169_p1 = scmp.ge.s32.totalorder %s1433_s25, 1 }
   0x5   : > { %p239_p2 = scmp.lt.s32.totalorder %s1433_s25, 5 }
   0x6   : > { %s1897_s26 = smov (%p27_p0, %s26_s26), 0  ;;  %s1899_s27 = smov (!%p27_p0, %s29_s27), %s1429_s24 }
   0x7   : > { %p240_p3 = pnand %p1169_p1, %p239_p2  ;;  %p31_p4 = scmp.ge.s32.totalorder %s1899_s27, 2 }
   0x8   : > { %s1170_s28 = sshll.u32 (!%p240_p3), %s1417_s21, 3  ;;  %p290_p5 = scmp.lt.s32.totalorder (!%p240_p3), %s1421_s22, 1  ;;  %vm339_vm0 = vcmask (!%p240_p3), 31744   ;;  %vm635_vm1 = vcmask (!%p240_p3), 1041408   ;;  %vm881_vm2 = vcmask (!%p240_p3), 27648  }
   0x9   : > { %s1901_s27 = smov (%p31_p4, %s1899_s27), 0  ;;  %243 = sbr.rel (%p240_p3) target bundleno = 718 (0x2ce), region = 40 }
   0xa   : > { %p292_p6 = scmp.lt.s32.totalorder (!%p240_p3), %s1170_s28, 15  ;;  %s1435_s20 = smov (!%p240_p3), 124  }
  0x10   : > { %s1903_s22 = smov (!%p290_p5, %s1421_s22), 1  ;;  %s1905_s28 = smov (!%p292_p6, %s1170_s28), 15 }
  0x11   : > { %s1172_s29 = sshll.u32 %s1903_s22, 5  ;;  %s1171_s30 = sshll.u32 %s1905_s28, 1 }
  0x12   : > { %s1501_s7 = sadd.s32 %s1172_s29, %s1171_s30 }
  0x13   : > { %s1173_s8 = sshll.u32 %s1501_s7, 3  ;;  %s1177_s21 = sshll.u32 %s1501_s7, 2 }
  0x14   : > { %s1507_s11 = scalar_lea.vmem %s1885_s0, %s1173_s8  ;;  %s1769_s29 = scalar_lea.vmem %s1890_s5, %s1177_s21 }
  0x15   : > { %v323_v0 = vld [vmem:[%s1507_s11] sm:$0xff]  ;;  %v324_v2 = vld [vmem:[%s1507_s11 + $0x8] sm:$0xff]  ;;  %v325_v8 = vld [vmem:[%s1507_s11 + $0x10] sm:$0xff]  ;;  %s1836_s9 = scalar_lea.vmem %s1891_s6, %s1177_s21 }
  0x16   : > { %v331_v1 = vld [vmem:[%s1507_s11 + $0x40] sm:$0xff]  ;;  %v340_v3 = vsel %vm339_vm0, %v323_v0, 0.0  ;;  %v332_v5 = vld [vmem:[%s1507_s11 + $0x48] sm:$0xff]  ;;  %v343_v6 = vsel %vm339_vm0, %v324_v2, 0.0  ;;  %v326_v9 = vld [vmem:[%s1507_s11 + $0x18] sm:$0xff]  ;;  %v346_v10 = vsel %vm339_vm0, %v325_v8, 0.0 }
  0x17   : > { %v364_v4 = vsel %vm339_vm0, %v331_v1, 0.0  ;;  %341 = vadd.xlane.f32.xlu0 %v340_v3  ;;  %v367_v7 = vsel %vm339_vm0, %v332_v5, 0.0  ;;  %v349_v11 = vsel %vm339_vm0, %v326_v9, 0.0  ;;  %v1522_v12 = vld [vmem:[%s1507_s11 + $0x50] sm:$0xff]  ;;  %v1525_v13 = vld [vmem:[%s1507_s11 + $0x58] sm:$0xff]  ;;  %v1532_v16 = vld [vmem:[%s1507_s11 + $0x20] sm:$0xff] }
  0x18   : > { %365 = vadd.xlane.f32.xlu1 %v364_v4  ;;  %v370_v14 = vsel %vm339_vm0, %v1522_v12, 0.0  ;;  %v373_v15 = vsel %vm339_vm0, %v1525_v13, 0.0  ;;  %v1535_v17 = vld [vmem:[%s1507_s11 + $0x28] sm:$0xff]  ;;  %v352_v18 = vsel %vm339_vm0, %v1532_v16, 0.0  ;;  %v1542_v20 = vld [vmem:[%s1507_s11 + $0x60] sm:$0xff]  ;;  %v1552_v24 = vld [vmem:[%s1507_s11 + $0x30] sm:$0xff] }
  0x19   : > { %v355_v19 = vsel %vm339_vm0, %v1535_v17, 0.0  ;;  %v1545_v21 = vld [vmem:[%s1507_s11 + $0x68] sm:$0xff]  ;;  %v376_v22 = vsel %vm339_vm0, %v1542_v20, 0.0  ;;  %v1555_v25 = vld [vmem:[%s1507_s11 + $0x38] sm:$0xff]  ;;  %v358_v26 = vsel %vm339_vm0, %v1552_v24, 0.0  ;;  %v1562_v28 = vld [vmem:[%s1507_s11 + $0x70] sm:$0xff] }
  0x1a   : > { %v379_v23 = vsel %vm339_vm0, %v1545_v21, 0.0  ;;  %v361_v27 = vsel %vm339_vm0, %v1555_v25, 0.0  ;;  %v1565_v29 = vld [vmem:[%s1507_s11 + $0x78] sm:$0xff]  ;;  %v382_v30 = vsel %vm339_vm0, %v1562_v28, 0.0 }
  0x1b   : > { %344 = vadd.xlane.f32.xlu0 %v343_v6  ;;  %v385_v31 = vsel %vm339_vm0, %v1565_v29, 0.0 }
  0x1c   : > { %368 = vadd.xlane.f32.xlu1 %v367_v7 }
  0x1f   : > { %347 = vadd.xlane.f32.xlu0 %v346_v10 }
  0x20   : > { %350 = vadd.xlane.f32.xlu1 %v349_v11 }
  0x23   : > { %371 = vadd.xlane.f32.xlu0 %v370_v14 }
  0x24   : > { %374 = vadd.xlane.f32.xlu1 %v373_v15 }
  0x27   : > { %353 = vadd.xlane.f32.xlu0 %v352_v18 }
  0x28   : > { %356 = vadd.xlane.f32.xlu1 %v355_v19 }
  0x2b   : > { %377 = vadd.xlane.f32.xlu0 %v376_v22 }
  0x2c   : > { %380 = vadd.xlane.f32.xlu1 %v379_v23 }
  0x2f   : > { %359 = vadd.xlane.f32.xlu0 %v358_v26 }
  0x30   : > { %362 = vadd.xlane.f32.xlu1 %v361_v27 }
  0x33   : > { %383 = vadd.xlane.f32.xlu0 %v382_v30 }
  0x34   : > { %386 = vadd.xlane.f32.xlu1 %v385_v31 }
  0xa4   : > { %v342_v32 = vpop.xlane.xlu0 %341 }
  0xa5   : > { %v366_v33 = vpop.xlane.xlu1 %365  ;;  %v389_v34 = vmul.f32 0.25, %v342_v32 }
  0xa6   : > { %v397_v35 = vmul.f32 0.25, %v366_v33 }
  0xa7   : > { %v1571_v36 = vsub.f32 %v323_v0, %v389_v34 }
  0xa8   : > { %v1573_v37 = vsub.f32 %v331_v1, %v397_v35  ;;  %v345_v38 = vpop.xlane.xlu0 %344 }
  0xa9   : > { %v369_v39 = vpop.xlane.xlu1 %368  ;;  %v390_v40 = vmul.f32 0.25, %v345_v38  ;;  %v421_v42 = vmul.f32 %v1571_v36, %v1571_v36 }
  0xaa   : > { %v398_v41 = vmul.f32 0.25, %v369_v39  ;;  %v429_v43 = vmul.f32 %v1573_v37, %v1573_v37 }
  0xab   : > { %v1579_v44 = vsub.f32 %v324_v2, %v390_v40  ;;  %v437_v46 = vsel %vm339_vm0, %v421_v42, 0.0 }
  0xac   : > { %v1581_v45 = vsub.f32 %v332_v5, %v398_v41  ;;  %438 = vadd.xlane.f32.xlu0 %v437_v46  ;;  %v348_v47 = vpop.xlane.xlu0 %347  ;;  %v461_v49 = vsel %vm339_vm0, %v429_v43, 0.0 }
  0xad   : > { %v351_v48 = vpop.xlane.xlu1 %350  ;;  %v391_v50 = vmul.f32 0.25, %v348_v47  ;;  %v422_v52 = vmul.f32 %v1579_v44, %v1579_v44 }
  0xae   : > { %v392_v51 = vmul.f32 0.25, %v351_v48  ;;  %v430_v53 = vmul.f32 %v1581_v45, %v1581_v45 }
  0xaf   : > { %v1589_v54 = vsub.f32 %v325_v8, %v391_v50  ;;  %v440_v56 = vsel %vm339_vm0, %v422_v52, 0.0 }
  0xb0   : > { %v1591_v55 = vsub.f32 %v326_v9, %v392_v51  ;;  %462 = vadd.xlane.f32.xlu0 %v461_v49  ;;  %441 = vadd.xlane.f32.xlu1 %v440_v56  ;;  %v372_v57 = vpop.xlane.xlu0 %371  ;;  %v464_v59 = vsel %vm339_vm0, %v430_v53, 0.0 }
  0xb1   : > { %v375_v58 = vpop.xlane.xlu1 %374  ;;  %v399_v60 = vmul.f32 0.25, %v372_v57  ;;  %v423_v62 = vmul.f32 %v1589_v54, %v1589_v54 }
  0xb2   : > { %v400_v61 = vmul.f32 0.25, %v375_v58  ;;  %v424_v63 = vmul.f32 %v1591_v55, %v1591_v55 }
  0xb3   : > { %v1600_v0 = vsub.f32 %v1522_v12, %v399_v60  ;;  %v443_v2 = vsel %vm339_vm0, %v423_v62, 0.0 }
  0xb4   : > { %v1603_v1 = vsub.f32 %v1525_v13, %v400_v61  ;;  %465 = vadd.xlane.f32.xlu1 %v464_v59  ;;  %444 = vadd.xlane.f32.xlu0 %v443_v2  ;;  %v354_v3 = vpop.xlane.xlu0 %353  ;;  %v446_v5 = vsel %vm339_vm0, %v424_v63, 0.0 }
  0xb5   : > { %v357_v4 = vpop.xlane.xlu1 %356  ;;  %v393_v6 = vmul.f32 0.25, %v354_v3  ;;  %v431_v8 = vmul.f32 %v1600_v0, %v1600_v0 }
  0xb6   : > { %v394_v7 = vmul.f32 0.25, %v357_v4  ;;  %v432_v9 = vmul.f32 %v1603_v1, %v1603_v1 }
  0xb7   : > { %v1612_v10 = vsub.f32 %v1532_v16, %v393_v6  ;;  %v467_v12 = vsel %vm339_vm0, %v431_v8, 0.0 }
  0xb8   : > { %v1615_v11 = vsub.f32 %v1535_v17, %v394_v7  ;;  %447 = vadd.xlane.f32.xlu1 %v446_v5  ;;  %468 = vadd.xlane.f32.xlu0 %v467_v12  ;;  %v378_v13 = vpop.xlane.xlu0 %377  ;;  %v470_v15 = vsel %vm339_vm0, %v432_v9, 0.0 }
  0xb9   : > { %v381_v14 = vpop.xlane.xlu1 %380  ;;  %v401_v18 = vmul.f32 0.25, %v378_v13  ;;  %v425_v22 = vmul.f32 %v1612_v10, %v1612_v10 }
  0xba   : > { %v402_v19 = vmul.f32 0.25, %v381_v14  ;;  %v426_v16 = vmul.f32 %v1615_v11, %v1615_v11 }
  0xbb   : > { %v1624_v23 = vsub.f32 %v1542_v20, %v401_v18  ;;  %v449_v26 = vsel %vm339_vm0, %v425_v22, 0.0 }
  0xbc   : > { %v1627_v17 = vsub.f32 %v1545_v21, %v402_v19  ;;  %471 = vadd.xlane.f32.xlu1 %v470_v15  ;;  %450 = vadd.xlane.f32.xlu0 %v449_v26  ;;  %v360_v27 = vpop.xlane.xlu0 %359  ;;  %v452_v31 = vsel %vm339_vm0, %v426_v16, 0.0 }
  0xbd   : > { %v363_v30 = vpop.xlane.xlu1 %362  ;;  %v395_v32 = vmul.f32 0.25, %v360_v27  ;;  %v433_v34 = vmul.f32 %v1624_v23, %v1624_v23 }
  0xbe   : > { %v396_v33 = vmul.f32 0.25, %v363_v30  ;;  %v434_v20 = vmul.f32 %v1627_v17, %v1627_v17 }
  0xbf   : > { %v1636_v35 = vsub.f32 %v1552_v24, %v395_v32  ;;  %v473_v38 = vsel %vm339_vm0, %v433_v34, 0.0 }
  0xc0   : > { %v1639_v21 = vsub.f32 %v1555_v25, %v396_v33  ;;  %453 = vadd.xlane.f32.xlu1 %v452_v31  ;;  %474 = vadd.xlane.f32.xlu0 %v473_v38  ;;  %v384_v39 = vpop.xlane.xlu0 %383  ;;  %v476_v41 = vsel %vm339_vm0, %v434_v20, 0.0  ;;  %v1668_v31 = vld [vmem:[%s1886_s1] ss:$0 sm:$0xff] }
  0xc1   : > { %v387_v40 = vpop.xlane.xlu1 %386  ;;  %v403_v42 = vmul.f32 0.25, %v384_v39  ;;  %v427_v46 = vmul.f32 %v1636_v35, %v1636_v35 }
  0xc2   : > { %v404_v43 = vmul.f32 0.25, %v387_v40  ;;  %v428_v24 = vmul.f32 %v1639_v21, %v1639_v21 }
  0xc3   : > { %v1648_v47 = vsub.f32 %v1562_v28, %v403_v42  ;;  %v455_v48 = vsel %vm339_vm0, %v427_v46, 0.0 }
  0xc4   : > { %v1651_v25 = vsub.f32 %v1565_v29, %v404_v43  ;;  %477 = vadd.xlane.f32.xlu1 %v476_v41  ;;  %456 = vadd.xlane.f32.xlu0 %v455_v48  ;;  %v458_v49 = vsel %vm339_vm0, %v428_v24, 0.0  ;;  %v603_v29 = vld [vmem:[%s1888_s3] sm:$0x3] }
  0xc5   : > { %v435_v50 = vmul.f32 %v1648_v47, %v1648_v47  ;;  %1288 = vmatprep.subr.msk.bf16.mxu0 %vm635_vm1, %v603_v29  ;;  %1289 = vmatprep.subr.msk.bf16.mxu1 %vm635_vm1, %v603_v29  ;;  %v637_v53 = vsel %vm635_vm1, %v603_v29, 0  ;;  %v1675_v43 = vld [vmem:[%s1887_s2] ss:$0 sm:$0xff] }
  0xc6   : > { %v436_v51 = vmul.f32 %v1651_v25, %v1651_v25  ;;  %1269 = vmatpush3.bf16.msra.mxu0 %v637_v53  ;;  %1287 = vmatpush3.bf16.msra.mxu1 %v637_v53 }
  0xc7   : > { %v479_v52 = vsel %vm339_vm0, %v435_v50, 0.0 }
  0xc8   : > { %459 = vadd.xlane.f32.xlu1 %v458_v49  ;;  %480 = vadd.xlane.f32.xlu0 %v479_v52  ;;  %v482_v28 = vsel %vm339_vm0, %v436_v51, 0.0 }
  0xcc   : > { %483 = vadd.xlane.f32.xlu1 %v482_v28 }
 0x139   : > { %v439_v56 = vpop.xlane.xlu0 %438 }
 0x13a   : > { %v485_v57 = vmul.f32 0.25, %v439_v56 }
 0x13c   : > { %v501_v58 = vadd.f32 1e-06, %v485_v57 }
 0x13d   : > { %v442_v59 = vpop.xlane.xlu1 %441  ;;  %v463_v60 = vpop.xlane.xlu0 %462 }
 0x13e   : > { %1331 = vrsqrt.f32 %v501_v58  ;;  %v486_v61 = vmul.f32 0.25, %v442_v59  ;;  %v493_v62 = vmul.f32 0.25, %v463_v60 }
 0x140   : > { %v502_v63 = vadd.f32 1e-06, %v486_v61  ;;  %v509_v2 = vadd.f32 1e-06, %v493_v62 }
 0x141   : > { %v466_v3 = vpop.xlane.xlu1 %465  ;;  %v445_v4 = vpop.xlane.xlu0 %444 }
 0x142   : > { %1333 = vrsqrt.f32 %v502_v63  ;;  %v494_v5 = vmul.f32 0.25, %v466_v3  ;;  %v487_v6 = vmul.f32 0.25, %v445_v4 }
 0x143   : > { %1335 = vrsqrt.f32 %v509_v2 }
 0x144   : > { %v510_v7 = vadd.f32 1e-06, %v494_v5  ;;  %v503_v8 = vadd.f32 1e-06, %v487_v6 }
 0x145   : > { %v448_v9 = vpop.xlane.xlu1 %447  ;;  %v469_v12 = vpop.xlane.xlu0 %468 }
 0x146   : > { %1337 = vrsqrt.f32 %v510_v7  ;;  %v488_v13 = vmul.f32 0.25, %v448_v9  ;;  %v495_v14 = vmul.f32 0.25, %v469_v12 }
 0x147   : > { %1339 = vrsqrt.f32 %v503_v8 }
 0x148   : > { %v1332_v15 = vpop.eup %1331  ;;  %v504_v18 = vadd.f32 1e-06, %v488_v13  ;;  %v511_v19 = vadd.f32 1e-06, %v495_v14 }
 0x149   : > { %v472_v22 = vpop.xlane.xlu1 %471  ;;  %v451_v16 = vpop.xlane.xlu0 %450  ;;  %v533_v26 = vmul.f32 %v1332_v15, %v1571_v36 }
 0x14a   : > { %1341 = vrsqrt.f32 %v504_v18  ;;  %v496_v27 = vmul.f32 0.25, %v472_v22  ;;  %v489_v30 = vmul.f32 0.25, %v451_v16 }
 0x14b   : > { %1343 = vrsqrt.f32 %v511_v19  ;;  %v556_v41 = vmul.f32 %v1668_v31, %v533_v26 }
 0x14c   : > { %v1334_v32 = vpop.eup %1333  ;;  %v512_v33 = vadd.f32 1e-06, %v496_v27  ;;  %v505_v34 = vadd.f32 1e-06, %v489_v30 }
 0x14d   : > { %v1336_v20 = vpop.eup %1335  ;;  %v454_v38 = vpop.xlane.xlu1 %453  ;;  %v534_v40 = vmul.f32 %v1334_v32, %v1579_v44  ;;  %v579_v28 = vadd.f32 %v1675_v43, %v556_v41 }
 0x14e   : > { %v475_v39 = vpop.xlane.xlu0 %474  ;;  %1345 = vrsqrt.f32 %v512_v33  ;;  %v490_v36 = vmul.f32 0.25, %v454_v38  ;;  %v541_v46 = vmul.f32 %v1336_v20, %v1573_v37 }
 0x14f   : > { %v497_v42 = vmul.f32 0.25, %v475_v39  ;;  %1347 = vrsqrt.f32 %v505_v34  ;;  %v557_v24 = vmul.f32 %v1668_v31, %v534_v40 }
 0x150   : > { %v1338_v48 = vpop.eup %1337  ;;  %v506_v49 = vadd.f32 1e-06, %v490_v36  ;;  %v564_v56 = vmul.f32 %v1668_v31, %v541_v46 }
 0x151   : > { %v513_v50 = vadd.f32 1e-06, %v497_v42  ;;  %v1340_v51 = vpop.eup %1339  ;;  %v478_v44 = vpop.xlane.xlu1 %477  ;;  %v580_v29 = vadd.f32 %v1675_v43, %v557_v24  ;;  %v542_v53 = vmul.f32 %v1338_v48, %v1581_v45 }
 0x152   : > { %v457_v52 = vpop.xlane.xlu0 %456  ;;  %v535_v57 = vmul.f32 %v1340_v51, %v1589_v54  ;;  %1349 = vrsqrt.f32 %v506_v49  ;;  %v498_v37 = vmul.f32 0.25, %v478_v44  ;;  %v587_v5 = vadd.f32 %v1675_v43, %v564_v56 }
 0x153   : > { %v491_v58 = vmul.f32 0.25, %v457_v52  ;;  %1351 = vrsqrt.f32 %v513_v50  ;;  %v595_v59 = vpack.c.bf16 %v580_v29, %v579_v28  ;;  %v565_v60 = vmul.f32 %v1668_v31, %v542_v53 }
 0x154   : > { %v1342_v61 = vpop.eup %1341  ;;  %v514_v62 = vadd.f32 1e-06, %v498_v37  ;;  %v558_v6 = vmul.f32 %v1668_v31, %v535_v57 }
 0x155   : > { %v507_v63 = vadd.f32 1e-06, %v491_v58  ;;  %v1344_v2 = vpop.eup %1343  ;;  %v536_v3 = vmul.f32 %v1342_v61, %v1591_v55  ;;  %v460_v4 = vpop.xlane.xlu1 %459  ;;  %1270 = vmatprep.mubr.msk.bf16.mxu0 %vm339_vm0, %v595_v59  ;;  %v588_v54 = vadd.f32 %v1675_v43, %v565_v60 }
 0x156   : > { %v481_v45 = vpop.xlane.xlu0 %480  ;;  %v543_v7 = vmul.f32 %v1344_v2, %v1600_v0  ;;  %1353 = vrsqrt.f32 %v514_v62  ;;  %v492_v8 = vmul.f32 0.25, %v460_v4  ;;  %v581_v16 = vadd.f32 %v1675_v43, %v558_v6 }
 0x157   : > { %v499_v9 = vmul.f32 0.25, %v481_v45  ;;  %1355 = vrsqrt.f32 %v507_v63  ;;  %v599_v12 = vpack.c.bf16 %v588_v54, %v587_v5  ;;  %v559_v13 = vmul.f32 %v1668_v31, %v536_v3 }
 0x158   : > { %v1346_v55 = vpop.eup %1345  ;;  %v508_v14 = vadd.f32 1e-06, %v492_v8  ;;  %v566_v26 = vmul.f32 %v1668_v31, %v543_v7 }
 0x159   : > { %v515_v15 = vadd.f32 1e-06, %v499_v9  ;;  %v1348_v18 = vpop.eup %1347  ;;  %v544_v19 = vmul.f32 %v1346_v55, %v1603_v1  ;;  %v484_v22 = vpop.xlane.xlu1 %483  ;;  %1278 = vmatprep.mubr.msk.bf16.mxu1 %vm339_vm0, %v599_v12  ;;  %v582_v0 = vadd.f32 %v1675_v43, %v559_v13 }
 0x15a   : > { %v537_v27 = vmul.f32 %v1348_v18, %v1612_v10  ;;  %1357 = vrsqrt.f32 %v508_v14  ;;  %v500_v30 = vmul.f32 0.25, %v484_v22  ;;  %v589_v39 = vadd.f32 %v1675_v43, %v566_v26 }
 0x15b   : > { %1359 = vrsqrt.f32 %v515_v15  ;;  %v596_v32 = vpack.c.bf16 %v582_v0, %v581_v16  ;;  %v567_v33 = vmul.f32 %v1668_v31, %v544_v19 }
 0x15c   : > { %v1350_v34 = vpop.eup %1349  ;;  %v516_v20 = vadd.f32 1e-06, %v500_v30  ;;  %v560_v41 = vmul.f32 %v1668_v31, %v537_v27 }
 0x15d   : > { %v1352_v1 = vpop.eup %1351  ;;  %v538_v38 = vmul.f32 %v1350_v34, %v1615_v11  ;;  %1271 = vmatmul.mubr.msk.bf16.vlgmr.msra.gmra.mrb[0].mxu0 %vm339_vm0, %v596_v32  ;;  %v590_v40 = vadd.f32 %v1675_v43, %v567_v33 }
 0x15e   : > { %v545_v10 = vmul.f32 %v1352_v1, %v1624_v23  ;;  %1361 = vrsqrt.f32 %v516_v20  ;;  %v583_v11 = vadd.f32 %v1675_v43, %v560_v41 }
 0x15f   : > { %v600_v36 = vpack.c.bf16 %v590_v40, %v589_v39  ;;  %v561_v42 = vmul.f32 %v1668_v31, %v538_v38 }
 0x160   : > { %v1354_v46 = vpop.eup %1353  ;;  %v568_v50 = vmul.f32 %v1668_v31, %v545_v10 }
 0x161   : > { %v1356_v24 = vpop.eup %1355  ;;  %v546_v48 = vmul.f32 %v1354_v46, %v1627_v17  ;;  %1279 = vmatmul.mubr.msk.bf16.vlgmr.msra.gmra.mrb[0].mxu1 %vm339_vm0, %v600_v36  ;;  %v584_v49 = vadd.f32 %v1675_v43, %v561_v42 }
 0x162   : > { %v539_v51 = vmul.f32 %v1356_v24, %v1636_v35  ;;  %v591_v17 = vadd.f32 %v1675_v43, %v568_v50 }
 0x163   : > { %v597_v44 = vpack.c.bf16 %v584_v49, %v583_v11  ;;  %v569_v23 = vmul.f32 %v1668_v31, %v546_v48 }
 0x164   : > { %v1358_v52 = vpop.eup %1357  ;;  %v562_v56 = vmul.f32 %v1668_v31, %v539_v51 }
 0x165   : > { %v1360_v28 = vpop.eup %1359  ;;  %v540_v29 = vmul.f32 %v1358_v52, %v1639_v21  ;;  %1274 = vmatprep.mubr.msk.bf16.mxu0 %vm339_vm0, %v597_v44  ;;  %v592_v53 = vadd.f32 %v1675_v43, %v569_v23 }
 0x166   : > { %v547_v57 = vmul.f32 %v1360_v28, %v1648_v47  ;;  %v585_v21 = vadd.f32 %v1675_v43, %v562_v56 }
 0x167   : > { %v601_v37 = vpack.c.bf16 %v592_v53, %v591_v17  ;;  %v563_v35 = vmul.f32 %v1668_v31, %v540_v29 }
 0x168   : > { %v1362_v58 = vpop.eup %1361  ;;  %v570_v61 = vmul.f32 %v1668_v31, %v547_v57 }
 0x169   : > { %v548_v59 = vmul.f32 %v1362_v58, %v1651_v25  ;;  %1282 = vmatprep.mubr.msk.bf16.mxu1 %vm339_vm0, %v601_v37  ;;  %v586_v60 = vadd.f32 %v1675_v43, %v563_v35  ;;  %v1733_v25 = vld [vmem:[%s1889_s4] ss:$0 sm:$0xff] }
 0x16a   : > { %v593_v47 = vadd.f32 %v1675_v43, %v570_v61 }
 0x16b   : > { %v598_v62 = vpack.c.bf16 %v586_v60, %v585_v21  ;;  %v571_v63 = vmul.f32 %v1668_v31, %v548_v59 }
 0x16d   : > { %1275 = vmatmul.mubr.msk.bf16.gmra.mrb[4].mxu0 %vm339_vm0, %v598_v62  ;;  %v594_v2 = vadd.f32 %v1675_v43, %v571_v63 }
 0x16f   : > { %v602_v3 = vpack.c.bf16 %v594_v2, %v593_v47 }
 0x171   : > { %1283 = vmatmul.mubr.msk.bf16.gmra.mrb[4].mxu1 %vm339_vm0, %v602_v3 }
 0x230   : > { %v1272_v4 = vpop.f32.mrb[0].mxu0 }
 0x231   : > { %v682_v45 = vadd.f32 %v1272_v4, %v1733_v25  ;;  %v673_v5 = vpop.f32.mrb[1].mxu0 }
 0x232   : > { %v674_v31 = vadd.f32 %v1733_v25, %v673_v5  ;;  %v1273_v54 = vpop.f32.mrb[2].mxu0 }
 0x233   : > { %v755_v6 = vmul.f32 0.70710677, %v682_v45  ;;  %v685_v7 = vadd.f32 %v1273_v54, %v1733_v25  ;;  %v676_v8 = vpop.f32.mrb[3].mxu0  ;;  %v1245_v43 = vpack.c.bf16 %v682_v45, %v682_v45  ;;  %v738_v40 = vmul.f32 0.5, %v682_v45 }
 0x234   : > { %v753_v9 = vmul.f32 0.70710677, %v674_v31  ;;  %v1739_v12 = vadd.f32 %v1733_v25, %v676_v8  ;;  %v1280_v13 = vpop.f32.mrb[0].mxu1  ;;  %v1243_v38 = vpack.c.bf16 %v674_v31, %v674_v31  ;;  %v736_v41 = vmul.f32 0.5, %v674_v31 }
 0x235   : > { %1363 = verf.f32 %v755_v6  ;;  %v756_v55 = vmul.f32 0.70710677, %v685_v7  ;;  %v714_v14 = vadd.f32 %v1280_v13, %v1733_v25  ;;  %950 = vrot.lane.b32.xlu1 %v1245_v43, %s1435_s20  ;;  %v705_v15 = vpop.f32.mrb[1].mxu1  ;;  %v1246_v33 = vpack.c.bf16 %v685_v7, %v685_v7 }
 0x236   : > { %1365 = verf.f32 %v753_v9  ;;  %v754_v18 = vmul.f32 0.70710677, %v1739_v12  ;;  %v706_v19 = vadd.f32 %v1733_v25, %v705_v15  ;;  %v1281_v22 = vpop.f32.mrb[2].mxu1  ;;  %v739_v10 = vmul.f32 0.5, %v685_v7 }
 0x237   : > { %1367 = verf.f32 %v756_v55  ;;  %v763_v16 = vmul.f32 0.70710677, %v714_v14  ;;  %v717_v0 = vadd.f32 %v1281_v22, %v1733_v25  ;;  %v708_v26 = vpop.f32.mrb[3].mxu1  ;;  %v1253_v20 = vpack.c.bf16 %v714_v14, %v714_v14 }
 0x238   : > { %1369 = verf.f32 %v754_v18  ;;  %v761_v27 = vmul.f32 0.70710677, %v706_v19  ;;  %v1747_v30 = vadd.f32 %v1733_v25, %v708_v26  ;;  %v737_v46 = vmul.f32 0.5, %v1739_v12 }
 0x239   : > { %1371 = verf.f32 %v763_v16  ;;  %v764_v32 = vmul.f32 0.70710677, %v717_v0  ;;  %952 = vrot.lane.b32.xlu1 %v1246_v33, %s1435_s20  ;;  %966 = vrot.lane.b32.xlu0 %v1253_v20, %s1435_s20  ;;  %v1254_v1 = vpack.c.bf16 %v717_v0, %v717_v0  ;;  %v746_v24 = vmul.f32 0.5, %v714_v14 }
 0x23a   : > { %1373 = verf.f32 %v761_v27  ;;  %v762_v34 = vmul.f32 0.70710677, %v1747_v30  ;;  %v744_v48 = vmul.f32 0.5, %v706_v19  ;;  %v747_v51 = vmul.f32 0.5, %v717_v0 }
 0x23b   : > { %1375 = verf.f32 %v764_v32  ;;  %v1244_v23 = vpack.c.bf16 %v1739_v12, %v1739_v12  ;;  %v1251_v53 = vpack.c.bf16 %v706_v19, %v706_v19  ;;  %v745_v59 = vmul.f32 0.5, %v1747_v30 }
 0x23c   : > { %1377 = verf.f32 %v762_v34  ;;  %v1252_v3 = vpack.c.bf16 %v1747_v30, %v1747_v30 }
 0x23d   : > { %968 = vrot.lane.b32.xlu1 %v1254_v1, %s1435_s20  ;;  %946 = vrot.lane.b32.xlu0 %v1243_v38, %s1435_s20 }
 0x23f   : > { %v1364_v39 = vpop.eup %1363 }
 0x240   : > { %v1366_v36 = vpop.eup %1365  ;;  %v787_v42 = vadd.f32 1.0, %v1364_v39  ;;  %v1276_v11 = vpop.f32.mrb[4].mxu0 }
 0x241   : > { %v1368_v49 = vpop.eup %1367  ;;  %v785_v50 = vadd.f32 1.0, %v1366_v36  ;;  %v1757_v44 = vadd.f32 %v1276_v11, %v1733_v25  ;;  %v689_v52 = vpop.f32.mrb[5].mxu0  ;;  %948 = vrot.lane.b32.xlu1 %v1244_v23, %s1435_s20  ;;  %962 = vrot.lane.b32.xlu0 %v1251_v53, %s1435_s20 }
 0x242   : > { %v1370_v28 = vpop.eup %1369  ;;  %v803_v29 = vmul.f32 %v787_v42, %v738_v40  ;;  %v788_v17 = vadd.f32 1.0, %v1368_v49  ;;  %v1762_v56 = vadd.f32 %v1733_v25, %v689_v52  ;;  %v1277_v57 = vpop.f32.mrb[6].mxu0 }
 0x243   : > { %v1372_v37 = vpop.eup %1371  ;;  %v801_v35 = vmul.f32 %v785_v50, %v736_v41  ;;  %v786_v58 = vadd.f32 1.0, %v1370_v28  ;;  %v759_v21 = vmul.f32 0.70710677, %v1757_v44  ;;  %v692_v60 = vpop.f32.mrb[7].mxu0  ;;  %v701_v15 = vadd.f32 %v1277_v57, %v1733_v25 }
 0x244   : > { %v1374_v61 = vpop.eup %1373  ;;  %v1229_v62 = vpack.c.bf16 %v803_v29, %v803_v29  ;;  %v804_v63 = vmul.f32 %v788_v17, %v739_v10  ;;  %v795_v47 = vadd.f32 1.0, %v1372_v37  ;;  %v1284_v2 = vpop.f32.mrb[4].mxu1  ;;  %v757_v9 = vmul.f32 0.70710677, %v1762_v56 }
 0x245   : > { %v1376_v4 = vpop.eup %1375  ;;  %v1227_v45 = vpack.c.bf16 %v801_v35, %v801_v35  ;;  %v802_v5 = vmul.f32 %v786_v58, %v737_v46  ;;  %v793_v31 = vadd.f32 1.0, %v1374_v61  ;;  %1379 = verf.f32 %v759_v21  ;;  %v721_v54 = vpop.f32.mrb[5].mxu1  ;;  %964 = vrot.lane.b32.xlu1 %v1252_v3, %s1435_s20 }
 0x246   : > { %v1378_v6 = vpop.eup %1377  ;;  %884 = vst.msk [vmem:[%s1769_s29 + $0x8] sm:$0xf] %vm881_vm2, %v1229_v62  ;;  %v1230_v7 = vpack.c.bf16 %v804_v63, %v804_v63  ;;  %v811_v8 = vmul.f32 %v795_v47, %v746_v24  ;;  %v796_v43 = vadd.f32 1.0, %v1376_v4  ;;  %v1285_v12 = vpop.f32.mrb[6].mxu1  ;;  %1381 = verf.f32 %v757_v9 }
 0x247   : > { %882 = vst.msk [vmem:[%s1769_s29] sm:$0xf] %vm881_vm2, %v1227_v45  ;;  %v1228_v13 = vpack.c.bf16 %v802_v5, %v802_v5  ;;  %v809_v55 = vmul.f32 %v793_v31, %v744_v48  ;;  %v794_v14 = vadd.f32 1.0, %v1378_v6  ;;  %v724_v18 = vpop.f32.mrb[7].mxu1  ;;  %v693_v16 = vadd.f32 %v1733_v25, %v692_v60 }
 0x248   : > { %885 = vst.msk [vmem:[%s1769_s29 + $0xc] sm:$0xf] %vm881_vm2, %v1230_v7  ;;  %v1237_v19 = vpack.c.bf16 %v811_v8, %v811_v8  ;;  %v812_v22 = vmul.f32 %v796_v43, %v747_v51  ;;  %v760_v27 = vmul.f32 0.70710677, %v701_v15  ;;  %v730_v33 = vadd.f32 %v1284_v2, %v1733_v25 }
 0x249   : > { %883 = vst.msk [vmem:[%s1769_s29 + $0x4] sm:$0xf] %vm881_vm2, %v1228_v13  ;;  %v1235_v0 = vpack.c.bf16 %v809_v55, %v809_v55  ;;  %v810_v26 = vmul.f32 %v794_v14, %v745_v59  ;;  %v758_v32 = vmul.f32 0.70710677, %v693_v16  ;;  %v1249_v20 = vpack.c.bf16 %v1757_v44, %v1757_v44 }
 0x24a   : > { %892 = vst.msk [vmem:[%s1769_s29 + $0x28] sm:$0xf] %vm881_vm2, %v1237_v19  ;;  %v1238_v30 = vpack.c.bf16 %v812_v22, %v812_v22  ;;  %1383 = verf.f32 %v760_v27  ;;  %v722_v1 = vadd.f32 %v1733_v25, %v721_v54  ;;  %v767_v38 = vmul.f32 0.70710677, %v730_v33 }
 0x24b   : > { %890 = vst.msk [vmem:[%s1769_s29 + $0x20] sm:$0xf] %vm881_vm2, %v1235_v0  ;;  %v1236_v34 = vpack.c.bf16 %v810_v26, %v810_v26  ;;  %1385 = verf.f32 %v758_v32  ;;  %v733_v39 = vadd.f32 %v1285_v12, %v1733_v25  ;;  %958 = vrot.lane.b32.xlu0 %v1249_v20, %s1435_s20  ;;  %v725_v41 = vadd.f32 %v1733_v25, %v724_v18 }
 0x24c   : > { %893 = vst.msk [vmem:[%s1769_s29 + $0x2c] sm:$0xf] %vm881_vm2, %v1238_v30  ;;  %v765_v40 = vmul.f32 0.70710677, %v722_v1  ;;  %v1250_v10 = vpack.c.bf16 %v701_v15, %v701_v15  ;;  %1387 = verf.f32 %v767_v38  ;;  %v1247_v24 = vpack.c.bf16 %v1762_v56, %v1762_v56 }
 0x24d   : > { %891 = vst.msk [vmem:[%s1769_s29 + $0x24] sm:$0xf] %vm881_vm2, %v1236_v34  ;;  %v768_v36 = vmul.f32 0.70710677, %v733_v39  ;;  %v766_v46 = vmul.f32 0.70710677, %v725_v41  ;;  %v1248_v25 = vpack.c.bf16 %v693_v16, %v693_v16  ;;  %v1255_v52 = vpack.c.bf16 %v722_v1, %v722_v1 }
 0x24e   : > { %1389 = verf.f32 %v765_v40  ;;  %960 = vrot.lane.b32.xlu1 %v1250_v10, %s1435_s20  ;;  %v742_v48 = vmul.f32 0.5, %v1757_v44  ;;  %v740_v51 = vmul.f32 0.5, %v1762_v56  ;;  %v1256_v44 = vpack.c.bf16 %v725_v41, %v725_v41 }
 0x24f   : > { %v1380_v42 = vpop.eup %1379  ;;  %1391 = verf.f32 %v768_v36  ;;  %954 = vrot.lane.b32.xlu0 %v1247_v24, %s1435_s20  ;;  %v743_v57 = vmul.f32 0.5, %v701_v15  ;;  %v741_v58 = vmul.f32 0.5, %v693_v16  ;;  %v1257_v56 = vpack.c.bf16 %v730_v33, %v730_v33 }
 0x250   : > { %v791_v11 = vadd.f32 1.0, %v1380_v42  ;;  %1393 = verf.f32 %v766_v46  ;;  %v1382_v49 = vpop.eup %1381  ;;  %v750_v63 = vmul.f32 0.5, %v730_v33  ;;  %v1258_v2 = vpack.c.bf16 %v733_v39, %v733_v39 }
 0x251   : > { %v789_v23 = vadd.f32 1.0, %v1382_v49  ;;  %v748_v45 = vmul.f32 0.5, %v722_v1  ;;  %v751_v7 = vmul.f32 0.5, %v733_v39  ;;  %v749_v9 = vmul.f32 0.5, %v725_v41 }
 0x252   : > { %v807_v50 = vmul.f32 %v791_v11, %v742_v48  ;;  %956 = vrot.lane.b32.xlu1 %v1248_v25, %s1435_s20 }
 0x253   : > { %v805_v17 = vmul.f32 %v789_v23, %v740_v51  ;;  %970 = vrot.lane.b32.xlu0 %v1255_v52, %s1435_s20 }
 0x254   : > { %v1233_v28 = vpack.c.bf16 %v807_v50, %v807_v50  ;;  %v1384_v29 = vpop.eup %1383 }
 0x255   : > { %v1386_v53 = vpop.eup %1385  ;;  %v792_v37 = vadd.f32 1.0, %v1384_v29  ;;  %v1231_v35 = vpack.c.bf16 %v805_v17, %v805_v17 }
 0x256   : > { %888 = vst.msk [vmem:[%s1769_s29 + $0x18] sm:$0xf] %vm881_vm2, %v1233_v28  ;;  %v790_v59 = vadd.f32 1.0, %v1386_v53  ;;  %972 = vrot.lane.b32.xlu1 %v1256_v44, %s1435_s20  ;;  %v1388_v21 = vpop.eup %1387 }
 0x257   : > { %v808_v60 = vmul.f32 %v792_v37, %v743_v57  ;;  %886 = vst.msk [vmem:[%s1769_s29 + $0x10] sm:$0xf] %vm881_vm2, %v1231_v35  ;;  %v799_v47 = vadd.f32 1.0, %v1388_v21  ;;  %974 = vrot.lane.b32.xlu0 %v1257_v56, %s1435_s20 }
 0x258   : > { %v1390_v61 = vpop.eup %1389  ;;  %v806_v62 = vmul.f32 %v790_v59, %v741_v58 }
 0x259   : > { %v1392_v3 = vpop.eup %1391  ;;  %v1234_v4 = vpack.c.bf16 %v808_v60, %v808_v60  ;;  %v797_v5 = vadd.f32 1.0, %v1390_v61  ;;  %v815_v6 = vmul.f32 %v799_v47, %v750_v63 }
 0x25a   : > { %v1394_v31 = vpop.eup %1393  ;;  %v1232_v54 = vpack.c.bf16 %v806_v62, %v806_v62  ;;  %v800_v8 = vadd.f32 1.0, %v1392_v3  ;;  %976 = vrot.lane.b32.xlu1 %v1258_v2, %s1435_s20 }
 0x25b   : > { %889 = vst.msk [vmem:[%s1769_s29 + $0x1c] sm:$0xf] %vm881_vm2, %v1234_v4  ;;  %v813_v43 = vmul.f32 %v797_v5, %v748_v45  ;;  %v798_v12 = vadd.f32 1.0, %v1394_v31  ;;  %v1241_v13 = vpack.c.bf16 %v815_v6, %v815_v6 }
 0x25c   : > { %887 = vst.msk [vmem:[%s1769_s29 + $0x14] sm:$0xf] %vm881_vm2, %v1232_v54  ;;  %v816_v55 = vmul.f32 %v800_v8, %v751_v7 }
 0x25d   : > { %v1239_v14 = vpack.c.bf16 %v813_v43, %v813_v43  ;;  %v814_v15 = vmul.f32 %v798_v12, %v749_v9  ;;  %896 = vst.msk [vmem:[%s1769_s29 + $0x38] sm:$0xf] %vm881_vm2, %v1241_v13 }
 0x25e   : > { %v1242_v18 = vpack.c.bf16 %v816_v55, %v816_v55 }
 0x25f   : > { %894 = vst.msk [vmem:[%s1769_s29 + $0x30] sm:$0xf] %vm881_vm2, %v1239_v14  ;;  %v1240_v19 = vpack.c.bf16 %v814_v15, %v814_v15 }
 0x260   : > { %897 = vst.msk [vmem:[%s1769_s29 + $0x3c] sm:$0xf] %vm881_vm2, %v1242_v18 }
 0x261   : > { %895 = vst.msk [vmem:[%s1769_s29 + $0x34] sm:$0xf] %vm881_vm2, %v1240_v19 }
 0x2a7   : > { %v951_v22 = vpop.permute.xlu1 %950 }
 0x2a8   : > { %996 = vst.msk [vmem:[%s1836_s9 + $0x8] sm:$0xf] %vm881_vm2, %v951_v22 }
 0x2ab   : > { %v953_v16 = vpop.permute.xlu1 %952  ;;  %v967_v0 = vpop.permute.xlu0 %966 }
 0x2ac   : > { %997 = vst.msk [vmem:[%s1836_s9 + $0xc] sm:$0xf] %vm881_vm2, %v953_v16  ;;  %1004 = vst.msk [vmem:[%s1836_s9 + $0x28] sm:$0xf] %vm881_vm2, %v967_v0 }
 0x2af   : > { %v969_v26 = vpop.permute.xlu1 %968  ;;  %v947_v27 = vpop.permute.xlu0 %946 }
 0x2b0   : > { %1005 = vst.msk [vmem:[%s1836_s9 + $0x2c] sm:$0xf] %vm881_vm2, %v969_v26  ;;  %994 = vst.msk [vmem:[%s1836_s9] sm:$0xf] %vm881_vm2, %v947_v27 }
 0x2b3   : > { %v949_v30 = vpop.permute.xlu1 %948  ;;  %v963_v32 = vpop.permute.xlu0 %962 }
 0x2b4   : > { %995 = vst.msk [vmem:[%s1836_s9 + $0x4] sm:$0xf] %vm881_vm2, %v949_v30  ;;  %1002 = vst.msk [vmem:[%s1836_s9 + $0x20] sm:$0xf] %vm881_vm2, %v963_v32 }
 0x2b7   : > { %v965_v33 = vpop.permute.xlu1 %964 }
 0x2b8   : > { %1003 = vst.msk [vmem:[%s1836_s9 + $0x24] sm:$0xf] %vm881_vm2, %v965_v33 }
 0x2bd   : > { %v959_v34 = vpop.permute.xlu0 %958 }
 0x2be   : > { %1000 = vst.msk [vmem:[%s1836_s9 + $0x18] sm:$0xf] %vm881_vm2, %v959_v34 }
 0x2c0   : > { %v961_v20 = vpop.permute.xlu1 %960 }
 0x2c1   : > { %1001 = vst.msk [vmem:[%s1836_s9 + $0x1c] sm:$0xf] %vm881_vm2, %v961_v20  ;;  %v955_v1 = vpop.permute.xlu0 %954 }
 0x2c2   : > { %998 = vst.msk [vmem:[%s1836_s9 + $0x10] sm:$0xf] %vm881_vm2, %v955_v1 }
 0x2c4   : > { %v957_v38 = vpop.permute.xlu1 %956 }
 0x2c5   : > { %999 = vst.msk [vmem:[%s1836_s9 + $0x14] sm:$0xf] %vm881_vm2, %v957_v38  ;;  %v971_v39 = vpop.permute.xlu0 %970 }
 0x2c6   : > { %1006 = vst.msk [vmem:[%s1836_s9 + $0x30] sm:$0xf] %vm881_vm2, %v971_v39 }
 0x2c8   : > { %v973_v40 = vpop.permute.xlu1 %972 }
 0x2c9   : > { %1007 = vst.msk [vmem:[%s1836_s9 + $0x34] sm:$0xf] %vm881_vm2, %v973_v40  ;;  %v975_v41 = vpop.permute.xlu0 %974 }
 0x2ca   : > { %1008 = vst.msk [vmem:[%s1836_s9 + $0x38] sm:$0xf] %vm881_vm2, %v975_v41 }
 0x2cc   : > { %v977_v10 = vpop.permute.xlu1 %976 }
 0x2cd   : > { %1009 = vst.msk [vmem:[%s1836_s9 + $0x3c] sm:$0xf] %vm881_vm2, %v977_v10 }
 0x2ce PF: > { %s17_s25 = sadd.s32 1, %s1433_s25   ;;  %s1892_s21 = smov %s1425_s23 }
 0x2cf   : > { %p14_p7 = scmp.ge.s32.totalorder %s17_s25, 6   ;;  %s1893_s22 = smov %s1429_s24 }
 0x2d0   : > { %s1894_s23 = smov %s1897_s26  ;;  %s1895_s24 = smov %s1901_s27 }
 0x2d1   :  { %16 = sbr.rel (!%p14_p7) target bundleno = 3 (0x3), region = 82 }

// kernel: block_forward.5
= control target key start
LH: loop header
LB: loop body
LE: loop exit
PB: predicated region body
PF: predicated region fallthrough
CT: control target
= control target key end

     0   :  { %s2504_s27 = smov 0   ;;  %s2506_s28 = smov 0   ;;  %s3592_s0 = inlined_call_operand.vmem [shape: bf16[2,16,16,16], index: 0, kind: input, shape index: {}]   ;;  %s3593_s1 = inlined_call_operand.vmem [shape: bf16[2,4,16,16], index: 1, kind: input, shape index: {}]   ;;  %s3594_s2 = inlined_call_operand.vmem [shape: f32[2,16,16,4], index: 2, kind: input, shape index: {}]   ;;  %s3595_s3 = inlined_call_operand.vmem [shape: f32[3,3,16], index: 3, kind: input, shape index: {}]   ;;  %s3596_s4 = inlined_call_operand.vmem [shape: f32[1,16], index: 4, kind: input, shape index: {}]   ;;  %s3597_s5 = inlined_call_operand.vmem [shape: bf16[16,4], index: 5, kind: input, shape index: {}]   ;;  %s3598_s6 = inlined_call_operand.vmem [shape: f32[1,4], index: 6, kind: input, shape index: {}]   ;;  %s3599_s7 = inlined_call_operand.vmem [shape: f32[1,4], index: 7, kind: input, shape index: {}]   ;;  %s3600_s8 = inlined_call_operand.vmem [shape: f32[2,16,16,4], index: 8, kind: output, shape index: {}]  }
   0x1   :  { %s2508_s29 = smov 0   ;;  %s2510_s30 = smov 0  }
   0x2   :  { %s2512_s9 = smov 0  }
   0x3 LB: > { %s27_s10 = sadd.s32 1, %s2449_s29  ;;  %s30_s11 = sadd.s32 1, %s2453_s30  ;;  %s2457_s9 = sphi %s2512_s9, %s18_s9   ;;  %s2453_s30 = sphi %s2510_s30, %s3644_s30   ;;  %s2449_s29 = sphi %s2508_s29, %s3643_s29   ;;  %s2445_s28 = sphi %s2506_s28, %s3642_s28   ;;  %s2441_s27 = sphi %s2504_s27, %s3641_s27  }
   0x4   : > { %p28_p0 = scmp.ge.s32.totalorder %s27_s10, 2  ;;  %p2222_p1 = scmp.ge.s32.totalorder %s2457_s9, 1 }
   0x5   : > { %p320_p2 = scmp.lt.s32.totalorder %s2457_s9, 5 }
   0x6   : > { %s3646_s10 = smov (%p28_p0, %s27_s10), 0  ;;  %s3648_s11 = smov (!%p28_p0, %s30_s11), %s2453_s30 }
   0x7   : > { %p321_p3 = pnand %p2222_p1, %p320_p2  ;;  %p32_p4 = scmp.ge.s32.totalorder %s3648_s11, 2 }
   0x9   : > { %s3650_s11 = smov (%p32_p4, %s3648_s11), 0  ;;  %324 = sbr.rel (%p321_p3) target bundleno = 497 (0x1f1), region = 52 }
  0x10   : > { %v2385_v0 = vld [vmem:[%s3597_s5] sm:$0xff]   ;;  %s2223_s14 = sshll.u32 %s2441_s27, 3  ;;  %v841_v1 = vlaneseq  ;;  %p385_p5 = scmp.lt.s32.totalorder %s2445_s28, 1  ;;  %vm449_vm0 = vcmask 122880   ;;  %vm450_vm1 = vsmask.f32 256 }
  0x11   : > { %p2543_p6 = scmp.lt.s32.totalorder %s2223_s14, 15  ;;  %2325 = vmatprep.subr.bf16.mxu0 %v2385_v0  ;;  %2343 = vmatprep.subr.bf16.mxu1 %v2385_v0  ;;  %s2227_s16 = sshll.u32 %s2441_s27, 1  ;;  %vm2550_vm2 = vmand %vm449_vm0, %vm450_vm1  ;;  %v452_v3 = vld [vmem:[#allocation2] sm:$0x1]  ;;  %v455_v4 = vld [vmem:[#allocation2 + $0xc] sm:$0x1] }
  0x12   : > { %2326 = vmatpush3.bf16.msra.mxu0 %v2385_v0  ;;  %2344 = vmatpush3.bf16.msra.mxu1 %v2385_v0  ;;  %s3652_s28 = smov (!%p385_p5, %s2445_s28), 1  ;;  %v453_v5 = vsel %vm2550_vm2, 0, %v452_v3  ;;  %v456_v6 = vsel %vm2550_vm2, 0, %v455_v4  ;;  %v458_v7 = vld [vmem:[#allocation2 + $0x18] sm:$0x1]  ;;  %v842_v8 = vshrl.u32 %v841_v1, 7 }
  0x13   : > { %s3654_s14 = smov (!%p2543_p6, %s2223_s14), 15  ;;  %454 = vst [vmem:[#allocation2] sm:$0x1] %v453_v5  ;;  %457 = vst [vmem:[#allocation2 + $0xc] sm:$0x1] %v456_v6  ;;  %v459_v9 = vsel %vm2550_vm2, 0, %v458_v7 }
  0x14   : > { %vm482_vm3 = vsmask.f32 7938  ;;  %v484_v10 = vld [vmem:[#allocation2 + $0x8] sm:$0x1]  ;;  %s2225_s17 = sshll.u32 %s3652_s28, 5  ;;  %s2224_s18 = sshll.u32 %s3654_s14, 1 }
  0x15   : > { %460 = vst [vmem:[#allocation2 + $0x18] sm:$0x1] %v459_v9  ;;  %vm2568_vm4 = vmand %vm449_vm0, %vm482_vm3  ;;  %v487_v12 = vld [vmem:[#allocation2 + $0x14] sm:$0x1]  ;;  %v490_v13 = vld [vmem:[#allocation2 + $0x20] sm:$0x1]  ;;  %s2584_s20 = sadd.s32 %s2225_s17, %s2224_s18 }
  0x16   : > { %p2574_p7 = scmp.lt.s32.totalorder %s2227_s16, 3  ;;  %v485_v14 = vsel %vm2568_vm4, 0, %v484_v10  ;;  %v488_v15 = vsel %vm2568_vm4, 0, %v487_v12  ;;  %v491_v16 = vsel %vm2568_vm4, 0, %v490_v13  ;;  %v843_v17 = vsub.s32 0, %v842_v8  ;;  %s2226_s25 = sshll.u32 %s2584_s20, 2 }
  0x17   : > { %486 = vst [vmem:[#allocation2 + $0x8] sm:$0x1] %v485_v14  ;;  %489 = vst [vmem:[#allocation2 + $0x14] sm:$0x1] %v488_v15  ;;  %v821_v18 = vld [vmem:[%s3595_s3] sm:$0x7]  ;;  %s2599_s15 = scalar_lea.vmem %s3592_s0, %s2226_s25 }
  0x18   : > { %492 = vst [vmem:[#allocation2 + $0x20] sm:$0x1] %v491_v16  ;;  %v822_v19 = vld [vmem:[%s3595_s3 + $0x4] sm:$0x7]  ;;  %v823_v20 = vld [vmem:[%s3595_s3 + $0x8] sm:$0x7]  ;;  %v2602_v22 = vrot.slane %v821_v18, %v843_v17 }
  0x19   : > { %v887_v21 = vsub.s32 1, %v842_v8  ;;  %s2229_s17 = sshll.u32 %s3652_s28, 3  ;;  %vm514_vm5 = vsmask.f32 4368  ;;  %vm536_vm6 = vcmask 125952   ;;  %v1012_v23 = vsub.s32 2, %v842_v8 }
  0x1a   : > { %s3656_s16 = smov (!%p2574_p7, %s2227_s16), 3  ;;  %v429_v24 = vld [vmem:[%s2599_s15] sm:$0xf]  ;;  %v430_v25 = vld [vmem:[%s2599_s15 + $0x4] sm:$0xf]  ;;  %v2612_v27 = vrot.slane %v822_v19, %v843_v17  ;;  %v2616_v29 = vrot.slane %v823_v20, %v843_v17  ;;  %vm2644_vm7 = vmor %vm450_vm1, %vm514_vm5  ;;  %vm937_vm9 = vcmask 1046528  }
  0x1b   : > { %v2610_v26 = vrot.slane %v821_v18, %v887_v21  ;;  %v2614_v28 = vrot.slane %v822_v19, %v887_v21  ;;  %v2619_v30 = vld [vmem:[%s2599_s15] sm:$0xff]   ;;  %v431_v31 = vld [vmem:[%s2599_s15 + $0x8] sm:$0xf]  ;;  %v432_v32 = vld [vmem:[%s2599_s15 + $0xc] sm:$0xf]  ;;  %v2623_v33 = vrot.slane %v821_v18, %v1012_v23  ;;  %v2625_v34 = vrot.slane %v822_v19, %v1012_v23  ;;  %s2228_s27 = sshll.u32 %s3656_s16, 1 }
  0x1c   : > { %v2627_v35 = vrot.slane %v823_v20, %v887_v21  ;;  %v2629_v36 = vrot.slane %v823_v20, %v1012_v23  ;;  %v464_v37 = vld [vmem:[#allocation2 + $0x30] sm:$0x1]  ;;  %v575_v38 = vshrl.u32 %v429_v24, 16  ;;  %v578_v39 = vshll.u32 %v429_v24, 16  ;;  %v2632_v42 = vld [vmem:[%s2599_s15 + $0x20] sm:$0xff]   ;;  %s402_s28 = sadd.s32 %s2229_s17, %s2228_s27  ;;  %vm2654_vm8 = vmand %vm536_vm6, %vm482_vm3  ;;  %s2234_s26 = sshll.u32 %s2584_s20, 3 }
  0x1d   : > { %v583_v40 = vshrl.u32 %v430_v25, 16  ;;  %v586_v41 = vshll.u32 %v430_v25, 16  ;;  %v592_v43 = vshrl.u32 %v431_v31, 16  ;;  %v595_v44 = vshll.u32 %v431_v31, 16  ;;  %s2230_s18 = sshll.u32 %s402_s28, 2  ;;  %v2664_v19 = vld [vmem:[%s2599_s15 + $0x8] sm:$0xff]   ;;  %s3485_s17 = scalar_lea.vmem %s3594_s2, %s2234_s26 }
  0x1e   : > { %v600_v45 = vshrl.u32 %v432_v32, 16  ;;  %v577_v47 = vrot.slane %v575_v38, 7  ;;  %v603_v49 = vshll.u32 %v432_v32, 16  ;;  %v465_v50 = vsel %vm2550_vm2, 0, %v464_v37  ;;  %s2640_s21 = scalar_lea.vmem %s3593_s1, %s2230_s18  ;;  %v735_v54 = vld [vmem:[#allocation2 + $0xc] sm:$0xf]  ;;  %s3501_s16 = scalar_lea.vmem %s3600_s8, %s2234_s26 }
  0x1f   : > { %v585_v48 = vrot.slane %v583_v40, 7  ;;  %v594_v52 = vrot.slane %v592_v43, 7  ;;  %v739_v55 = vld [vmem:[#allocation2 + $0x14] sm:$0x1]  ;;  %466 = vst [vmem:[#allocation2 + $0x30] sm:$0x1] %v465_v50 }
  0x20   : > { %v602_v53 = vrot.slane %v600_v45, 7  ;;  %v445_v58 = vld [vmem:[%s2640_s21] sm:$0xf]  ;;  %v446_v59 = vld [vmem:[%s2640_s21 + $0x4] sm:$0xf]  ;;  %v580_v61 = vor.u32 %v578_v39, %v577_v47  ;;  %v581_v62 = vrot.slane %v577_v47, 4 }
  0x21   : > { %v588_v63 = vor.u32 %v586_v41, %v585_v48  ;;  %v590_v0 = vrot.slane %v585_v48, 4  ;;  %v517_v1 = vshrl.u32 %v445_v58, 16  ;;  %v520_v3 = vshll.u32 %v445_v58, 16  ;;  %v742_v6 = vld [vmem:[#allocation2 + $0x18] sm:$0xf] }
  0x22   : > { %v525_v4 = vshrl.u32 %v446_v59, 16  ;;  %v528_v5 = vshll.u32 %v446_v59, 16  ;;  %v538_v7 = vld [vmem:[#allocation2] sm:$0xf]  ;;  %v543_v8 = vld [vmem:[#allocation2 + $0x8] sm:$0x1]  ;;  %v597_v10 = vor.u32 %v595_v44, %v594_v52  ;;  %v605_v13 = vor.u32 %v603_v49, %v602_v53 }
  0x23   : > { %v589_v9 = vsel %vm2644_vm7, %v581_v62, %v588_v63  ;;  %v598_v12 = vrot.slane %v594_v52, 4  ;;  %v519_v14 = vrot.slane %v517_v1, 7  ;;  %v607_v16 = vrot.slane %v602_v53, 4  ;;  %v746_v18 = vld [vmem:[#allocation2 + $0x20] sm:$0x1] }
  0x24   : > { %v527_v15 = vrot.slane %v525_v4, 7  ;;  %v736_v17 = vsel %vm2654_vm8, %v580_v61, %v735_v54  ;;  %738 = vst.msk [vmem:[#allocation2 + $0x10] sm:$0xf] %vm536_vm6, %v589_v9  ;;  %v740_v21 = vsel %vm2550_vm2, %v590_v0, %v739_v55  ;;  %v743_v23 = vsel %vm2654_vm8, %v597_v10, %v742_v6  ;;  %v435_v24 = vld [vmem:[%s2599_s15 + $0x18] sm:$0xf] }
  0x25   : > { %v606_v20 = vsel %vm2644_vm7, %v598_v12, %v605_v13  ;;  %737 = vst [vmem:[#allocation2 + $0xc] sm:$0xf] %v736_v17  ;;  %v2674_v25 = vld [vmem:[%s2599_s15 + $0x1c] sm:$0xf]  ;;  %v2677_v31 = vld [vmem:[%s2599_s15 + $0x20] sm:$0xf]  ;;  %v522_v37 = vor.u32 %v520_v3, %v519_v14  ;;  %v747_v45 = vsel %vm2550_vm2, %v607_v16, %v746_v18 }
  0x26   : > { %v523_v38 = vrot.slane %v519_v14, 4  ;;  %v530_v39 = vor.u32 %v528_v5, %v527_v15  ;;  %v532_v40 = vrot.slane %v527_v15, 4  ;;  %741 = vst [vmem:[#allocation2 + $0x14] sm:$0x1] %v740_v21  ;;  %744 = vst [vmem:[#allocation2 + $0x18] sm:$0xf] %v743_v23 }
  0x27   : > { %745 = vst.msk [vmem:[#allocation2 + $0x1c] sm:$0xf] %vm536_vm6, %v606_v20  ;;  %v2682_v41 = vld [vmem:[%s2599_s15 + $0x24] sm:$0xf]  ;;  %v467_v43 = vld [vmem:[#allocation2 + $0x3c] sm:$0x1]  ;;  %v539_v54 = vsel %vm2654_vm8, %v522_v37, %v538_v7 }
  0x28   : > { %v470_v44 = vld [vmem:[#allocation2 + $0x48] sm:$0x1]  ;;  %v468_v47 = vsel %vm2550_vm2, 0, %v467_v43  ;;  %v496_v49 = vld [vmem:[#allocation2 + $0x38] sm:$0x1]  ;;  %v531_v53 = vsel %vm2644_vm7, %v523_v38, %v530_v39  ;;  %v544_v55 = vsel %vm2550_vm2, %v532_v40, %v543_v8  ;;  %v626_v1 = vshrl.u32 %v435_v24, 16 }
  0x29   : > { %v471_v48 = vsel %vm2550_vm2, 0, %v470_v44  ;;  %v499_v50 = vld [vmem:[#allocation2 + $0x44] sm:$0x1]  ;;  %748 = vst [vmem:[#allocation2 + $0x20] sm:$0x1] %v747_v45  ;;  %v497_v59 = vsel %vm2568_vm4, 0, %v496_v49 }
  0x2a   : > { %v2698_v58 = vld [vmem:[%s2599_s15 + $0x28] sm:$0xf]  ;;  %469 = vst [vmem:[#allocation2 + $0x3c] sm:$0x1] %v468_v47  ;;  %472 = vst [vmem:[#allocation2 + $0x48] sm:$0x1] %v471_v48 }
  0x2b   : > { %v502_v61 = vld [vmem:[#allocation2 + $0x50] sm:$0x1]  ;;  %540 = vst [vmem:[#allocation2] sm:$0xf] %v539_v54  ;;  %542 = vst.msk [vmem:[#allocation2 + $0x4] sm:$0xf] %vm536_vm6, %v531_v53 }
  0x2c   : > { %545 = vst [vmem:[#allocation2 + $0x8] sm:$0x1] %v544_v55  ;;  %v2704_v62 = vld [vmem:[%s2599_s15 + $0x2c] sm:$0xf]  ;;  %498 = vst [vmem:[#allocation2 + $0x38] sm:$0x1] %v497_v59 }
  0x2d   : > { %v500_v63 = vsel %vm2568_vm4, 0, %v499_v50  ;;  %v503_v0 = vsel %vm2568_vm4, 0, %v502_v61  ;;  %v629_v3 = vshll.u32 %v435_v24, 16  ;;  %v634_v4 = vshrl.u32 %v2674_v25, 16  ;;  %v794_v13 = vld [vmem:[#allocation2 + $0xc] sm:$0xff]  }
  0x2e   : > { %501 = vst [vmem:[#allocation2 + $0x44] sm:$0x1] %v500_v63  ;;  %504 = vst [vmem:[#allocation2 + $0x50] sm:$0x1] %v503_v0  ;;  %v637_v5 = vshll.u32 %v2674_v25, 16  ;;  %v643_v6 = vshrl.u32 %v2677_v31, 16  ;;  %v2725_v21 = vunpack.c.l.bf16 %v794_v13  ;;  %v2727_v23 = vunpack.c.h.bf16 %v794_v13 }
  0x2f   : > { %v646_v7 = vshll.u32 %v2677_v31, 16  ;;  %v2714_v8 = vrot.slane %v626_v1, 7  ;;  %v651_v9 = vshrl.u32 %v2682_v41, 16  ;;  %v2719_v14 = vrot.slane %v634_v4, 7  ;;  %v796_v18 = vld [vmem:[#allocation2 + $0x14] sm:$0x1] }
  0x30   : > { %v2721_v15 = vrot.slane %v643_v6, 7  ;;  %v2305_v20 = vld [vmem:[#allocation2 + $0x18] sm:$0xff]   ;;  %vm1062_vm10 = vcmask 1045504   ;;  %v2737_v39 = vunpack.c.l.bf16 %v796_v18  ;;  %v799_v43 = vld [vmem:[#allocation2 + $0x20] sm:$0x1]  ;;  %v1141_v44 = vmul.f32 %v2612_v27, %v2725_v21 }
  0x31   : > { %v2730_v24 = vor.u32 %v629_v3, %v2714_v8  ;;  %v632_v25 = vrot.slane %v2714_v8, 4  ;;  %v2733_v37 = vunpack.c.l.bf16 %v2305_v20  ;;  %v2735_v38 = vunpack.c.h.bf16 %v2305_v20 }
  0x32   : > { %v2740_v40 = vor.u32 %v637_v5, %v2719_v14  ;;  %v1142_v45 = vmul.f32 %v2612_v27, %v2727_v23  ;;  %v1178_v47 = vmul.f32 %v2614_v28, %v2725_v21  ;;  %v1179_v48 = vmul.f32 %v2614_v28, %v2727_v23  ;;  %v2254_v49 = vld [vmem:[#allocation2] sm:$0xff]  }
  0x33   : > { %v793_v50 = vld [vmem:[#allocation2 + $0x8] sm:$0x1]  ;;  %v2750_v53 = vunpack.c.l.bf16 %v799_v43  ;;  %v1180_v54 = vmul.f32 %v2614_v28, %v2737_v39  ;;  %v1302_v55 = vmul.f32 %v2625_v34, %v2725_v21  ;;  %v1303_v59 = vmul.f32 %v2625_v34, %v2727_v23 }
  0x34   : > { %v2255_v61 = vunpack.c.l.bf16 %v2254_v49  ;;  %v2256_v63 = vunpack.c.h.bf16 %v2254_v49  ;;  %v877_v0 = vunpack.c.l.bf16 %v793_v50  ;;  %v1226_v1 = vrot.slane %v1178_v47, 1 }
  0x35   : > { %v1227_v3 = vrot.slane %v1179_v48, 1  ;;  %v1229_v4 = vrot.slane %v1180_v54, 1  ;;  %v1304_v5 = vmul.f32 %v2625_v34, %v2737_v39  ;;  %v1350_v6 = vrot.slane %v1302_v55, 2 }
  0x36   : > { %v845_v13 = vmul.f32 %v2255_v61, %v2602_v22  ;;  %v846_v18 = vmul.f32 %v2256_v63, %v2602_v22  ;;  %v889_v20 = vmul.f32 %v2255_v61, %v2610_v26  ;;  %v890_v43 = vmul.f32 %v2256_v63, %v2610_v26 }
  0x37   : > { %v891_v52 = vmul.f32 %v2610_v26, %v877_v0  ;;  %v1014_v49 = vmul.f32 %v2255_v61, %v2623_v33  ;;  %v1015_v47 = vmul.f32 %v2256_v63, %v2623_v33  ;;  %v1016_v48 = vmul.f32 %v2623_v33, %v877_v0 }
  0x38   : > { %v938_v50 = vrot.slane %v889_v20, 1  ;;  %v939_v54 = vrot.slane %v890_v43, 1  ;;  %v1228_v55 = vsel %vm937_vm9, %v1226_v1, %v1227_v3  ;;  %v1230_v32 = vsel %vm937_vm9, %v1227_v3, %v1229_v4 }
  0x39   : > { %v941_v57 = vrot.slane %v891_v52, 1  ;;  %v1063_v56 = vrot.slane %v1014_v49, 2  ;;  %v1064_v46 = vrot.slane %v1015_v47, 2  ;;  %v1066_v16 = vrot.slane %v1016_v48, 2 }
  0x3a   : > { %v940_v10 = vsel %vm937_vm9, %v938_v50, %v939_v54  ;;  %v1351_v17 = vrot.slane %v1303_v59, 2  ;;  %v1353_v12 = vrot.slane %v1304_v5, 2  ;;  %v1428_v61 = vmul.f32 %v2733_v37, %v2616_v29 }
  0x3b   : > { %v942_v63 = vsel %vm937_vm9, %v939_v54, %v941_v57  ;;  %v994_v0 = vadd.f32 %v940_v10, %v845_v13  ;;  %v1065_v20 = vsel %vm1062_vm10, %v1063_v56, %v1064_v46  ;;  %v1067_v1 = vsel %vm1062_vm10, %v1064_v46, %v1066_v16 }
  0x3c   : > { %v995_v43 = vadd.f32 %v942_v63, %v846_v18  ;;  %v1352_v52 = vsel %vm1062_vm10, %v1350_v6, %v1351_v17  ;;  %v1354_v3 = vsel %vm1062_vm10, %v1351_v17, %v1353_v12  ;;  %v1429_v4 = vmul.f32 %v2735_v38, %v2616_v29 }
  0x3d   : > { %v1119_v59 = vadd.f32 %v1065_v20, %v994_v0  ;;  %v1465_v5 = vmul.f32 %v2733_v37, %v2627_v35  ;;  %v1466_v57 = vmul.f32 %v2735_v38, %v2627_v35  ;;  %v1467_v56 = vmul.f32 %v2627_v35, %v2750_v53 }
  0x3e   : > { %v1120_v10 = vadd.f32 %v1067_v1, %v995_v43  ;;  %v1589_v46 = vmul.f32 %v2733_v37, %v2629_v36  ;;  %v1590_v12 = vmul.f32 %v2735_v38, %v2629_v36  ;;  %v1591_v16 = vmul.f32 %v2629_v36, %v2750_v53 }
  0x3f   : > { %v1157_v17 = vadd.f32 %v1141_v44, %v1119_v59  ;;  %v1513_v6 = vrot.slane %v1465_v5, 1  ;;  %v1514_v13 = vrot.slane %v1466_v57, 1  ;;  %v1516_v18 = vrot.slane %v1467_v56, 1  ;;  %v756_v59 = vld [vmem:[#allocation2 + $0x30] sm:$0xf] }
  0x40   : > { %v1158_v49 = vadd.f32 %v1142_v45, %v1120_v10  ;;  %v1637_v47 = vrot.slane %v1589_v46, 2  ;;  %v1638_v48 = vrot.slane %v1590_v12, 2  ;;  %v1640_v50 = vrot.slane %v1591_v16, 2  ;;  %v760_v46 = vld [vmem:[#allocation2 + $0x38] sm:$0x1] }
  0x41   : > { %v1282_v54 = vadd.f32 %v1228_v55, %v1157_v17  ;;  %v1515_v63 = vsel %vm937_vm9, %v1513_v6, %v1514_v13  ;;  %v1517_v0 = vsel %vm937_vm9, %v1514_v13, %v1516_v18  ;;  %v640_v20 = vsel %vm2644_vm7, %v632_v25, %v2740_v40  ;;  %v767_v16 = vld [vmem:[#allocation2 + $0x44] sm:$0x1] }
  0x42   : > { %v1283_v1 = vadd.f32 %v1230_v32, %v1158_v49  ;;  %v1639_v44 = vsel %vm1062_vm10, %v1637_v47, %v1638_v48  ;;  %v1641_v43 = vsel %vm1062_vm10, %v1638_v48, %v1640_v50  ;;  %v641_v45 = vrot.slane %v2719_v14, 4  ;;  %759 = vst.msk [vmem:[#allocation2 + $0x34] sm:$0xf] %vm536_vm6, %v640_v20  ;;  %v774_v49 = vld [vmem:[#allocation2 + $0x50] sm:$0x1] }
  0x43   : > { %v1406_v55 = vadd.f32 %v1352_v52, %v1282_v54  ;;  %v648_v5 = vor.u32 %v646_v7, %v2721_v15  ;;  %v649_v8 = vrot.slane %v2721_v15, 4  ;;  %v653_v25 = vrot.slane %v651_v9, 7  ;;  %v461_v52 = vld [vmem:[#allocation2 + $0x24] sm:$0x1]  ;;  %v433_v50 = vld [vmem:[%s2599_s15 + $0x10] sm:$0xf] }
  0x44   : > { %v1407_v32 = vadd.f32 %v1354_v3, %v1283_v1  ;;  %v3621_v40 = vshrl.u32 %v2698_v58, 16  ;;  %v3622_v56 = vshrl.u32 %v2704_v62, 16  ;;  %v671_v10 = vshll.u32 %v2704_v62, 16  ;;  %v763_v3 = vld [vmem:[#allocation2 + $0x3c] sm:$0xf] }
  0x45   : > { %v1444_v12 = vadd.f32 %v1428_v61, %v1406_v55  ;;  %v3623_v31 = vshll.u32 %v2682_v41, 16  ;;  %v658_v15 = vrot.slane %v653_v25, 4  ;;  %v757_v9 = vsel %vm2654_vm8, %v2730_v24, %v756_v59  ;;  %v770_v61 = vld [vmem:[#allocation2 + $0x48] sm:$0xf]  ;;  %v493_v54 = vld [vmem:[#allocation2 + $0x2c] sm:$0x1] }
  0x46   : > { %v662_v57 = vrot.slane %v3621_v40, 7  ;;  %v670_v14 = vrot.slane %v3622_v56, 7  ;;  %v1445_v17 = vadd.f32 %v1429_v4, %v1407_v32  ;;  %v3624_v6 = vshll.u32 %v2698_v58, 16  ;;  %758 = vst [vmem:[#allocation2 + $0x30] sm:$0xf] %v757_v9 }
  0x47   : > { %v656_v7 = vor.u32 %v3623_v31, %v653_v25  ;;  %v1569_v41 = vadd.f32 %v1515_v63, %v1444_v12  ;;  %v761_v24 = vsel %vm2550_vm2, %v641_v45, %v760_v46  ;;  %v2829_v58 = vld [vmem:[%s3596_s4] ss:$0 sm:$0xff]  ;;  %v764_v63 = vsel %vm2654_vm8, %v648_v5, %v763_v3  ;;  %v434_v45 = vld [vmem:[%s2599_s15 + $0x14] sm:$0xf] }
  0x48   : > { %v665_v13 = vor.u32 %v3624_v6, %v662_v57  ;;  %v666_v18 = vrot.slane %v662_v57, 4  ;;  %v673_v62 = vor.u32 %v671_v10, %v670_v14  ;;  %v675_v48 = vrot.slane %v670_v14, 4  ;;  %762 = vst [vmem:[#allocation2 + $0x38] sm:$0x1] %v761_v24  ;;  %765 = vst [vmem:[#allocation2 + $0x3c] sm:$0xf] %v764_v63 }
  0x49   : > { %v657_v47 = vsel %vm2644_vm7, %v649_v8, %v656_v7  ;;  %v1570_v4 = vadd.f32 %v1517_v0, %v1445_v17  ;;  %v768_v1 = vsel %vm2550_vm2, %v658_v15, %v767_v16  ;;  %v1693_v59 = vadd.f32 %v1639_v44, %v1569_v41 }
  0x4a   : > { %v674_v20 = vsel %vm2644_vm7, %v666_v18, %v673_v62  ;;  %766 = vst.msk [vmem:[#allocation2 + $0x40] sm:$0xf] %vm536_vm6, %v657_v47  ;;  %769 = vst [vmem:[#allocation2 + $0x44] sm:$0x1] %v768_v1  ;;  %v771_v55 = vsel %vm2654_vm8, %v665_v13, %v770_v61  ;;  %v775_v0 = vsel %vm2550_vm2, %v675_v48, %v774_v49  ;;  %v462_v5 = vsel %vm2550_vm2, 0, %v461_v52 }
  0x4b   : > { %773 = vst.msk [vmem:[#allocation2 + $0x4c] sm:$0xf] %vm536_vm6, %v674_v20  ;;  %v1694_v8 = vadd.f32 %v1641_v43, %v1570_v4  ;;  %772 = vst [vmem:[#allocation2 + $0x48] sm:$0xf] %v771_v55  ;;  %v494_v44 = vsel %vm2568_vm4, 0, %v493_v54  ;;  %v609_v25 = vshrl.u32 %v433_v50, 16  ;;  %v1715_v40 = vadd.f32 %v2829_v58, %v1693_v59 }
  0x4c   : > { %776 = vst [vmem:[#allocation2 + $0x50] sm:$0x1] %v775_v0  ;;  %463 = vst [vmem:[#allocation2 + $0x24] sm:$0x1] %v462_v5  ;;  %v612_v32 = vshll.u32 %v433_v50, 16  ;;  %v617_v57 = vshrl.u32 %v434_v45, 16  ;;  %v2851_v14 = vmul.f32 %v2602_v22, %v2725_v21  ;;  %v2858_v46 = vmul.f32 %v2602_v22, %v2727_v23 }
  0x4d   : > { %495 = vst [vmem:[#allocation2 + $0x2c] sm:$0x1] %v494_v44  ;;  %v620_v56 = vshll.u32 %v434_v45, 16  ;;  %v1716_v10 = vadd.f32 %v2829_v58, %v1694_v8  ;;  %v2854_v43 = vrot.slane %v609_v25, 7  ;;  %v2862_v52 = vmul.f32 %v2610_v26, %v2725_v21  ;;  %v2306_v7 = vld [vmem:[#allocation2 + $0x30] sm:$0xff]  }
  0x4e   : > { %v2864_v12 = vmul.f32 0.5, %v1715_v40  ;;  %v1780_v31 = vmul.f32 0.70710677, %v1715_v40  ;;  %v2866_v15 = vrot.slane %v617_v57, 7  ;;  %v2870_v9 = vmul.f32 %v2610_v26, %v2727_v23 }
  0x4f   : > { %v2872_v3 = vmul.f32 0.5, %v1716_v10  ;;  %v1781_v16 = vmul.f32 0.70710677, %v1716_v10  ;;  %v2874_v17 = vunpack.c.l.bf16 %v2306_v7  ;;  %v2876_v6 = vunpack.c.h.bf16 %v2306_v7  ;;  %v805_v13 = vld [vmem:[#allocation2 + $0x38] sm:$0x1] }
  0x50   : > { %2386 = verf.f32 %v1780_v31  ;;  %v2879_v18 = vor.u32 %v612_v32, %v2854_v43  ;;  %v2883_v61 = vor.u32 %v620_v56, %v2866_v15  ;;  %v2889_v24 = vunpack.c.l.bf16 %v805_v13 }
  0x51   : > { %3625 = vst [vmem:[#allocation3_spill] sm:$0xff] %v2874_v17  ;;  %3626 = vst [vmem:[#allocation4_spill] sm:$0xff] %v2876_v6  ;;  %2388 = verf.f32 %v1781_v16  ;;  %v806_v49 = vld [vmem:[#allocation2 + $0x3c] sm:$0xff]   ;;  %v808_v41 = vld [vmem:[#allocation2 + $0x44] sm:$0x1]  ;;  %v853_v47 = vmul.f32 %v2874_v17, %v2602_v22  ;;  %v854_v48 = vmul.f32 %v2876_v6, %v2602_v22  ;;  %v901_v1 = vmul.f32 %v2874_v17, %v2610_v26 }
  0x52   : > { %3627 = vst [vmem:[#allocation5_spill] sm:$0xff] %v2889_v24  ;;  %v2307_v50 = vld [vmem:[#allocation2 + $0x48] sm:$0xff]   ;;  %v2891_v4 = vunpack.c.l.bf16 %v806_v49  ;;  %v2893_v20 = vunpack.c.h.bf16 %v806_v49  ;;  %v2895_v63 = vunpack.c.l.bf16 %v808_v41  ;;  %v902_v0 = vmul.f32 %v2876_v6, %v2610_v26 }
  0x53   : > { %v811_v54 = vld [vmem:[#allocation2 + $0x50] sm:$0x1]  ;;  %v2899_v45 = vunpack.c.l.bf16 %v2307_v50  ;;  %v2901_v59 = vunpack.c.h.bf16 %v2307_v50  ;;  %v903_v5 = vmul.f32 %v2610_v26, %v2889_v24  ;;  %v958_v8 = vrot.slane %v901_v1, 1 }
  0x54   : > { %3628 = vst [vmem:[#allocation6_spill] sm:$0xff] %v2893_v20  ;;  %3629 = vst [vmem:[#allocation7_spill] sm:$0xff] %v2895_v63  ;;  %v2903_v55 = vunpack.c.l.bf16 %v811_v54  ;;  %v1026_v44 = vmul.f32 %v2874_v17, %v2623_v33  ;;  %v1027_v25 = vmul.f32 %v2876_v6, %v2623_v33  ;;  %v959_v32 = vrot.slane %v902_v0, 1 }
  0x55   : > { %v1028_v40 = vmul.f32 %v2623_v33, %v2889_v24  ;;  %v1149_v57 = vmul.f32 %v2612_v27, %v2891_v4  ;;  %v1150_v56 = vmul.f32 %v2612_v27, %v2893_v20  ;;  %v961_v10 = vrot.slane %v903_v5, 1 }
  0x56   : > { %v1083_v31 = vrot.slane %v1026_v44, 2  ;;  %v1084_v7 = vrot.slane %v1027_v25, 2  ;;  %v1190_v16 = vmul.f32 %v2614_v28, %v2891_v4  ;;  %v960_v13 = vsel %vm937_vm9, %v958_v8, %v959_v32 }
  0x57   : > { %v1086_v49 = vrot.slane %v1028_v40, 2  ;;  %v1191_v41 = vmul.f32 %v2614_v28, %v2893_v20  ;;  %v1192_v50 = vmul.f32 %v2614_v28, %v2895_v63  ;;  %v962_v54 = vsel %vm937_vm9, %v959_v32, %v961_v10 }
  0x58   : > { %v1002_v1 = vadd.f32 %v960_v13, %v853_v47  ;;  %v1085_v0 = vsel %vm1062_vm10, %v1083_v31, %v1084_v7  ;;  %v1246_v5 = vrot.slane %v1190_v16, 1  ;;  %vm1883_vm11 = vcmask 130048  }
  0x59   : > { %v1003_v44 = vadd.f32 %v962_v54, %v854_v48  ;;  %v1087_v25 = vsel %vm1062_vm10, %v1084_v7, %v1086_v49  ;;  %v1247_v62 = vrot.slane %v1191_v41, 1  ;;  %v1249_v24 = vrot.slane %v1192_v50, 1 }
  0x5a   : > { %v2387_v8 = vpop.eup %2386  ;;  %v1127_v40 = vadd.f32 %v1085_v0, %v1002_v1  ;;  %v1314_v6 = vmul.f32 %v2625_v34, %v2891_v4  ;;  %v1315_v17 = vmul.f32 %v2625_v34, %v2893_v20  ;;  %v1316_v47 = vmul.f32 %v2625_v34, %v2895_v63 }
  0x5b   : > { %v2389_v32 = vpop.eup %2388  ;;  %v1812_v10 = vadd.f32 1.0, %v2387_v8  ;;  %v1128_v31 = vadd.f32 %v1087_v25, %v1003_v44  ;;  %v1248_v48 = vsel %vm937_vm9, %v1246_v5, %v1247_v62  ;;  %v1250_v7 = vsel %vm937_vm9, %v1247_v62, %v1249_v24 }
  0x5c   : > { %v1813_v16 = vadd.f32 1.0, %v2389_v32  ;;  %v1165_v13 = vadd.f32 %v1149_v57, %v1127_v40  ;;  %v1370_v49 = vrot.slane %v1314_v6, 2  ;;  %v1371_v41 = vrot.slane %v1315_v17, 2 }
  0x5d   : > { %v1828_v50 = vmul.f32 %v1812_v10, %v2864_v12  ;;  %v1166_v54 = vadd.f32 %v1150_v56, %v1128_v31  ;;  %v1373_v1 = vrot.slane %v1316_v47, 2  ;;  %v1436_v0 = vmul.f32 %v2899_v45, %v2616_v29 }
  0x5e   : > { %v1829_v63 = vmul.f32 %v1813_v16, %v2872_v3  ;;  %v1290_v20 = vadd.f32 %v1248_v48, %v1165_v13  ;;  %v1372_v44 = vsel %vm1062_vm10, %v1370_v49, %v1371_v41  ;;  %v1437_v5 = vmul.f32 %v2901_v59, %v2616_v29  ;;  %v749_v49 = vld [vmem:[#allocation2 + $0x24] sm:$0xf] }
  0x5f   : > { %v3630_v62 = vunpack.c.l.bf16 %v2619_v30  ;;  %v1291_v6 = vadd.f32 %v1250_v7, %v1166_v54  ;;  %v1374_v17 = vsel %vm1062_vm10, %v1371_v41, %v1373_v1  ;;  %v1477_v12 = vmul.f32 %v2899_v45, %v2627_v35  ;;  %v753_v41 = vld [vmem:[#allocation2 + $0x2c] sm:$0x1] }
  0x60   : > { %v3631_v57 = vunpack.c.h.bf16 %v2619_v30  ;;  %v1414_v25 = vadd.f32 %v1372_v44, %v1290_v20  ;;  %v1478_v3 = vmul.f32 %v2901_v59, %v2627_v35  ;;  %v1479_v8 = vmul.f32 %v2627_v35, %v2903_v55 }
  0x61   : > { %v1844_v24 = vadd.f32 %v3630_v62, %v1828_v50  ;;  %v1415_v40 = vadd.f32 %v1374_v17, %v1291_v6  ;;  %v1533_v47 = vrot.slane %v1477_v12, 1  ;;  %v1601_v32 = vmul.f32 %v2899_v45, %v2629_v36 }
  0x62   : > { %v1845_v56 = vadd.f32 %v3631_v57, %v1829_v63  ;;  %v1602_v10 = vmul.f32 %v2901_v59, %v2629_v36  ;;  %v1452_v48 = vadd.f32 %v1436_v0, %v1414_v25  ;;  %v1534_v7 = vrot.slane %v1478_v3, 1 }
  0x63   : > { %v1536_v30 = vrot.slane %v1479_v8, 1  ;;  %v1453_v63 = vadd.f32 %v1437_v5, %v1415_v40  ;;  %v1603_v20 = vmul.f32 %v2629_v36, %v2903_v55  ;;  %v1657_v16 = vrot.slane %v1601_v32, 2 }
  0x64   : > { %v1860_v31 = vpack.c.bf16 %v1845_v56, %v1844_v24  ;;  %v1658_v13 = vrot.slane %v1602_v10, 2  ;;  %v1535_v50 = vsel %vm937_vm9, %v1533_v47, %v1534_v7  ;;  %v3632_v1 = vrot.slane %v2854_v43, 4 }
  0x65   : > { %v1537_v54 = vsel %vm937_vm9, %v1534_v7, %v1536_v30  ;;  %v624_v44 = vrot.slane %v2866_v15, 4  ;;  %v1577_v5 = vadd.f32 %v1535_v50, %v1452_v48  ;;  %v1660_v6 = vrot.slane %v1603_v20, 2 }
  0x66   : > { %2327 = vmatprep.mubr.msk.bf16.mxu0 %vm1883_vm11, %v1860_v31  ;;  %v623_v0 = vsel %vm2644_vm7, %v3632_v1, %v2883_v61  ;;  %v1578_v62 = vadd.f32 %v1537_v54, %v1453_v63  ;;  %v1659_v24 = vsel %vm1062_vm10, %v1657_v16, %v1658_v13  ;;  %v750_v17 = vsel %vm2654_vm8, %v2879_v18, %v749_v49 }
  0x67   : > { %752 = vst.msk [vmem:[#allocation2 + $0x28] sm:$0xf] %vm536_vm6, %v623_v0  ;;  %v754_v12 = vsel %vm2550_vm2, %v624_v44, %v753_v41  ;;  %v894_v43 = vmul.f32 %v2610_v26, %v2737_v39  ;;  %v943_v61 = vrot.slane %v2862_v52, 1  ;;  %v1661_v15 = vsel %vm1062_vm10, %v1658_v13, %v1660_v6  ;;  %751 = vst [vmem:[#allocation2 + $0x24] sm:$0xf] %v750_v17 }
  0x68   : > { %v1701_v57 = vadd.f32 %v1659_v24, %v1577_v5  ;;  %755 = vst [vmem:[#allocation2 + $0x2c] sm:$0x1] %v754_v12  ;;  %v944_v56 = vrot.slane %v2870_v9, 1  ;;  %v1017_v25 = vmul.f32 %v2623_v33, %v2725_v21  ;;  %v1702_v3 = vadd.f32 %v1661_v15, %v1578_v62 }
  0x69   : > { %v946_v18 = vrot.slane %v894_v43, 1  ;;  %v1018_v8 = vmul.f32 %v2623_v33, %v2727_v23  ;;  %v1019_v40 = vmul.f32 %v2623_v33, %v2737_v39  ;;  %v1143_v10 = vmul.f32 %v2733_v37, %v2612_v27 }
  0x6a   : > { %v1723_v52 = vadd.f32 %v2829_v58, %v1701_v57  ;;  %v945_v47 = vsel %vm937_vm9, %v943_v61, %v944_v56  ;;  %v1068_v32 = vrot.slane %v1017_v25, 2  ;;  %v1724_v9 = vadd.f32 %v2829_v58, %v1702_v3 }
  0x6b   : > { %v947_v21 = vsel %vm937_vm9, %v944_v56, %v946_v18  ;;  %v996_v31 = vadd.f32 %v945_v47, %v2851_v14  ;;  %v1069_v48 = vrot.slane %v1018_v8, 2  ;;  %v1071_v30 = vrot.slane %v1019_v40, 2 }
  0x6c   : > { %v2995_v7 = vmul.f32 0.5, %v1723_v52  ;;  %v1788_v23 = vmul.f32 0.70710677, %v1723_v52  ;;  %v997_v39 = vadd.f32 %v947_v21, %v2858_v46  ;;  %v2998_v63 = vmul.f32 0.5, %v1724_v9 }
  0x6d   : > { %v1789_v20 = vmul.f32 0.70710677, %v1724_v9  ;;  %v1070_v16 = vsel %vm1062_vm10, %v1068_v32, %v1069_v48  ;;  %v1144_v13 = vmul.f32 %v2735_v38, %v2612_v27  ;;  %v1072_v49 = vsel %vm1062_vm10, %v1069_v48, %v1071_v30 }
  0x6e   : > { %2390 = verf.f32 %v1788_v23  ;;  %v1121_v41 = vadd.f32 %v1070_v16, %v996_v31  ;;  %v1181_v14 = vmul.f32 %v2733_v37, %v2614_v28  ;;  %v800_v50 = vld [vmem:[#allocation2 + $0x24] sm:$0xff]   ;;  %v1122_v46 = vadd.f32 %v1072_v49, %v997_v39 }
  0x6f   : > { %2392 = verf.f32 %v1789_v20  ;;  %v802_v54 = vld [vmem:[#allocation2 + $0x2c] sm:$0x1]  ;;  %v1182_v1 = vmul.f32 %v2735_v38, %v2614_v28  ;;  %v1183_v0 = vmul.f32 %v2614_v28, %v2750_v53  ;;  %v3010_v44 = vunpack.c.l.bf16 %v800_v50 }
  0x70   : > { %v3012_v5 = vunpack.c.h.bf16 %v800_v50  ;;  %v3014_v62 = vunpack.c.l.bf16 %v802_v54  ;;  %v1159_v24 = vadd.f32 %v1143_v10, %v1121_v41  ;;  %v1160_v6 = vadd.f32 %v1144_v13, %v1122_v46  ;;  %v473_v41 = vld [vmem:[#allocation2 + $0x54] sm:$0x1] }
  0x71   : > { %v1231_v17 = vrot.slane %v1181_v14, 1  ;;  %v1232_v12 = vrot.slane %v1182_v1, 1  ;;  %v1234_v43 = vrot.slane %v1183_v0, 1  ;;  %v1305_v61 = vmul.f32 %v2733_v37, %v2625_v34  ;;  %v505_v0 = vld [vmem:[#allocation2 + $0x5c] sm:$0x1] }
  0x72   : > { %v1306_v15 = vmul.f32 %v2735_v38, %v2625_v34  ;;  %v1307_v57 = vmul.f32 %v2625_v34, %v2750_v53  ;;  %v1430_v56 = vmul.f32 %v2616_v29, %v3010_v44  ;;  %v1431_v18 = vmul.f32 %v2616_v29, %v3012_v5 }
  0x73   : > { %v1233_v25 = vsel %vm937_vm9, %v1231_v17, %v1232_v12  ;;  %v1235_v3 = vsel %vm937_vm9, %v1232_v12, %v1234_v43  ;;  %v1468_v8 = vmul.f32 %v2627_v35, %v3010_v44  ;;  %v1355_v47 = vrot.slane %v1305_v61, 2  ;;  %v441_v61 = vld [vmem:[%s2599_s15 + $0x30] sm:$0xf] }
  0x74   : > { %v1284_v40 = vadd.f32 %v1233_v25, %v1159_v24  ;;  %v1285_v52 = vadd.f32 %v1235_v3, %v1160_v6  ;;  %v1356_v32 = vrot.slane %v1306_v15, 2  ;;  %v1358_v10 = vrot.slane %v1307_v57, 2 }
  0x75   : > { %v1469_v9 = vmul.f32 %v2627_v35, %v3012_v5  ;;  %v1470_v21 = vmul.f32 %v2627_v35, %v3014_v62  ;;  %v1518_v31 = vrot.slane %v1468_v8, 1  ;;  %v1592_v23 = vmul.f32 %v2629_v36, %v3010_v44  ;;  %v442_v8 = vld [vmem:[%s2599_s15 + $0x34] sm:$0xf] }
  0x76   : > { %v1357_v48 = vsel %vm1062_vm10, %v1355_v47, %v1356_v32  ;;  %v1593_v39 = vmul.f32 %v2629_v36, %v3012_v5  ;;  %v1594_v30 = vmul.f32 %v2629_v36, %v3014_v62  ;;  %v1359_v20 = vsel %vm1062_vm10, %v1356_v32, %v1358_v10 }
  0x77   : > { %v1408_v16 = vadd.f32 %v1357_v48, %v1284_v40  ;;  %v1519_v13 = vrot.slane %v1469_v9, 1  ;;  %v1521_v49 = vrot.slane %v1470_v21, 1  ;;  %v1409_v50 = vadd.f32 %v1359_v20, %v1285_v52 }
  0x78   : > { %v2391_v14 = vpop.eup %2390  ;;  %v1642_v54 = vrot.slane %v1592_v23, 2  ;;  %v1643_v46 = vrot.slane %v1593_v39, 2  ;;  %v1645_v1 = vrot.slane %v1594_v30, 2  ;;  %v474_v47 = vsel %vm2550_vm2, 0, %v473_v41 }
  0x79   : > { %v2393_v24 = vpop.eup %2392  ;;  %v1820_v6 = vadd.f32 1.0, %v2391_v14  ;;  %v1446_v17 = vadd.f32 %v1430_v56, %v1408_v16  ;;  %v1520_v12 = vsel %vm937_vm9, %v1518_v31, %v1519_v13  ;;  %v1522_v43 = vsel %vm937_vm9, %v1519_v13, %v1521_v49  ;;  %475 = vst [vmem:[#allocation2 + $0x54] sm:$0x1] %v474_v47 }
  0x7a   : > { %v1821_v15 = vadd.f32 1.0, %v2393_v24  ;;  %v1447_v57 = vadd.f32 %v1431_v18, %v1409_v50  ;;  %v1644_v25 = vsel %vm1062_vm10, %v1642_v54, %v1643_v46  ;;  %v1646_v3 = vsel %vm1062_vm10, %v1643_v46, %v1645_v1 }
  0x7b   : > { %v1836_v40 = vmul.f32 %v1820_v6, %v2995_v7  ;;  %v1571_v52 = vadd.f32 %v1520_v12, %v1446_v17  ;;  %v506_v56 = vsel %vm2568_vm4, 0, %v505_v0  ;;  %v677_v18 = vshrl.u32 %v441_v61, 16  ;;  %v3635_v6 = vld [vmem:[#allocation6_spill] sm:$0xff] }
  0x7c   : > { %v1837_v32 = vmul.f32 %v1821_v15, %v2998_v63  ;;  %v1572_v10 = vadd.f32 %v1522_v43, %v1447_v57  ;;  %507 = vst [vmem:[#allocation2 + $0x5c] sm:$0x1] %v506_v56  ;;  %v680_v9 = vshll.u32 %v441_v61, 16  ;;  %v3633_v21 = vunpack.c.l.bf16 %v2632_v42  ;;  %v3636_v15 = vld [vmem:[#allocation7_spill] sm:$0xff] }
  0x7d   : > { %v1695_v48 = vadd.f32 %v1644_v25, %v1571_v52  ;;  %v685_v23 = vshrl.u32 %v442_v8, 16  ;;  %v688_v7 = vshll.u32 %v442_v8, 16  ;;  %v3634_v39 = vunpack.c.h.bf16 %v2632_v42 }
  0x7e   : > { %v1852_v31 = vadd.f32 %v3633_v21, %v1836_v40  ;;  %v1696_v20 = vadd.f32 %v1646_v3, %v1572_v10  ;;  %v2280_v16 = vunpack.c.h.bf16 %v2664_v19  ;;  %v679_v13 = vrot.slane %v677_v18, 7 }
  0x7f   : > { %v1853_v30 = vadd.f32 %v3634_v39, %v1837_v32  ;;  %v1717_v63 = vadd.f32 %v2829_v58, %v1695_v48  ;;  %v687_v49 = vrot.slane %v685_v23, 7  ;;  %v855_v41 = vmul.f32 %v2602_v22, %v2891_v4 }
  0x80   : > { %v904_v14 = vmul.f32 %v2610_v26, %v2891_v4  ;;  %v1718_v54 = vadd.f32 %v2829_v58, %v1696_v20  ;;  %v682_v46 = vor.u32 %v680_v9, %v679_v13  ;;  %v683_v1 = vrot.slane %v679_v13, 4  ;;  %v777_v3 = vld [vmem:[#allocation2 + $0x54] sm:$0xf] }
  0x81   : > { %v1864_v50 = vpack.c.bf16 %v1853_v30, %v1852_v31  ;;  %v1782_v42 = vmul.f32 0.70710677, %v1717_v63  ;;  %v690_v0 = vor.u32 %v688_v7, %v687_v49  ;;  %v692_v24 = vrot.slane %v687_v49, 4 }
  0x82   : > { %v856_v17 = vmul.f32 %v2602_v22, %v3635_v6  ;;  %v3068_v12 = vmul.f32 0.5, %v1717_v63  ;;  %v1783_v43 = vmul.f32 0.70710677, %v1718_v54  ;;  %v905_v61 = vmul.f32 %v2610_v26, %v3635_v6 }
  0x83   : > { %2335 = vmatprep.mubr.msk.bf16.mxu1 %vm1883_vm11, %v1864_v50  ;;  %v906_v57 = vmul.f32 %v2610_v26, %v3636_v15  ;;  %2394 = verf.f32 %v1782_v42  ;;  %v691_v25 = vsel %vm2644_vm7, %v683_v1, %v690_v0  ;;  %v781_v8 = vld [vmem:[#allocation2 + $0x5c] sm:$0x1]  ;;  %v963_v40 = vrot.slane %v904_v14, 1 }
  0x84   : > { %v1029_v52 = vmul.f32 %v2623_v33, %v2891_v4  ;;  %2396 = verf.f32 %v1783_v43  ;;  %v778_v47 = vsel %vm2654_vm8, %v682_v46, %v777_v3  ;;  %780 = vst.msk [vmem:[#allocation2 + $0x58] sm:$0xf] %vm536_vm6, %v691_v25  ;;  %v782_v56 = vsel %vm2550_vm2, %v692_v24, %v781_v8 }
  0x85   : > { %v964_v32 = vrot.slane %v905_v61, 1  ;;  %779 = vst [vmem:[#allocation2 + $0x54] sm:$0xf] %v778_v47  ;;  %783 = vst [vmem:[#allocation2 + $0x5c] sm:$0x1] %v782_v56  ;;  %v966_v10 = vrot.slane %v906_v57, 1  ;;  %v1030_v18 = vmul.f32 %v2623_v33, %v3635_v6  ;;  %v1031_v9 = vmul.f32 %v2623_v33, %v3636_v15 }
  0x86   : > { %v1088_v21 = vrot.slane %v1029_v52, 2  ;;  %v1151_v48 = vmul.f32 %v2899_v45, %v2612_v27  ;;  %v1152_v23 = vmul.f32 %v2901_v59, %v2612_v27  ;;  %v1193_v7 = vmul.f32 %v2899_v45, %v2614_v28 }
  0x87   : > { %v965_v31 = vsel %vm937_vm9, %v963_v40, %v964_v32  ;;  %v967_v39 = vsel %vm937_vm9, %v964_v32, %v966_v10  ;;  %v1089_v20 = vrot.slane %v1030_v18, 2  ;;  %v1091_v13 = vrot.slane %v1031_v9, 2 }
  0x88   : > { %v1004_v30 = vadd.f32 %v965_v31, %v855_v41  ;;  %v1005_v63 = vadd.f32 %v967_v39, %v856_v17  ;;  %v1194_v49 = vmul.f32 %v2901_v59, %v2614_v28  ;;  %v1195_v14 = vmul.f32 %v2614_v28, %v2903_v55 }
  0x89   : > { %v1251_v50 = vrot.slane %v1193_v7, 1  ;;  %v1090_v46 = vsel %vm1062_vm10, %v1088_v21, %v1089_v20  ;;  %v1092_v1 = vsel %vm1062_vm10, %v1089_v20, %v1091_v13  ;;  %v1317_v42 = vmul.f32 %v2899_v45, %v2625_v34 }
  0x8a   : > { %v1318_v41 = vmul.f32 %v2901_v59, %v2625_v34  ;;  %v1129_v0 = vadd.f32 %v1090_v46, %v1004_v30  ;;  %v1130_v24 = vadd.f32 %v1092_v1, %v1005_v63  ;;  %v1252_v17 = vrot.slane %v1194_v49, 1 }
  0x8b   : > { %v1254_v43 = vrot.slane %v1195_v14, 1  ;;  %v1766_v61 = vmul.f32 0.5, %v1718_v54  ;;  %v1319_v57 = vmul.f32 %v2625_v34, %v2903_v55  ;;  %v1375_v25 = vrot.slane %v1317_v42, 2 }
  0x8c   : > { %v1376_v3 = vrot.slane %v1318_v41, 2  ;;  %v812_v8 = vld [vmem:[#allocation2 + $0x54] sm:$0xff]   ;;  %v814_v40 = vld [vmem:[#allocation2 + $0x5c] sm:$0x1]  ;;  %v1167_v52 = vadd.f32 %v1151_v48, %v1129_v0  ;;  %v1168_v47 = vadd.f32 %v1152_v23, %v1130_v24  ;;  %v1253_v56 = vsel %vm937_vm9, %v1251_v50, %v1252_v17  ;;  %v3129_v24 = vld [vmem:[%s2599_s15 + $0x28] sm:$0xff]  }
  0x8d   : > { %v1255_v32 = vsel %vm937_vm9, %v1252_v17, %v1254_v43  ;;  %v2395_v10 = vpop.eup %2394  ;;  %v3109_v18 = vunpack.c.l.bf16 %v812_v8  ;;  %v3111_v9 = vunpack.c.h.bf16 %v812_v8  ;;  %v3113_v21 = vunpack.c.l.bf16 %v814_v40 }
  0x8e   : > { %v1377_v54 = vsel %vm1062_vm10, %v1375_v25, %v1376_v3  ;;  %v2397_v31 = vpop.eup %2396  ;;  %v1814_v7 = vadd.f32 1.0, %v2395_v10  ;;  %v1292_v39 = vadd.f32 %v1253_v56, %v1167_v52  ;;  %v1293_v30 = vadd.f32 %v1255_v32, %v1168_v47 }
  0x8f   : > { %v1378_v48 = vrot.slane %v1319_v57, 2  ;;  %v1815_v23 = vadd.f32 1.0, %v2397_v31  ;;  %v1438_v20 = vmul.f32 %v2616_v29, %v3109_v18  ;;  %v1439_v13 = vmul.f32 %v2616_v29, %v3111_v9 }
  0x90   : > { %v1480_v63 = vmul.f32 %v2627_v35, %v3109_v18  ;;  %v1830_v49 = vmul.f32 %v1814_v7, %v3068_v12  ;;  %v1416_v50 = vadd.f32 %v1377_v54, %v1292_v39  ;;  %v1481_v46 = vmul.f32 %v2627_v35, %v3111_v9 }
  0x91   : > { %v1379_v14 = vsel %vm1062_vm10, %v1376_v3, %v1378_v48  ;;  %v1831_v1 = vmul.f32 %v1815_v23, %v1766_v61  ;;  %v1482_v41 = vmul.f32 %v2627_v35, %v3113_v21  ;;  %v3637_v17 = vunpack.c.l.bf16 %v2664_v19 }
  0x92   : > { %v1417_v42 = vadd.f32 %v1379_v14, %v1293_v30  ;;  %v1538_v0 = vrot.slane %v1480_v63, 1  ;;  %v1454_v57 = vadd.f32 %v1438_v20, %v1416_v50  ;;  %v1539_v25 = vrot.slane %v1481_v46, 1 }
  0x93   : > { %v1846_v43 = vadd.f32 %v3637_v17, %v1830_v49  ;;  %v1604_v12 = vmul.f32 %v2629_v36, %v3109_v18  ;;  %v1847_v3 = vadd.f32 %v2280_v16, %v1831_v1  ;;  %v1541_v61 = vrot.slane %v1482_v41, 1 }
  0x94   : > { %v1455_v8 = vadd.f32 %v1439_v13, %v1417_v42  ;;  %v1605_v40 = vmul.f32 %v2629_v36, %v3111_v9  ;;  %v1540_v52 = vsel %vm937_vm9, %v1538_v0, %v1539_v25  ;;  %v1606_v47 = vmul.f32 %v2629_v36, %v3113_v21 }
  0x95   : > { %v1662_v56 = vrot.slane %v1604_v12, 2  ;;  %v2295_v32 = vunpack.c.l.bf16 %v3129_v24  ;;  %v1861_v10 = vpack.c.bf16 %v1847_v3, %v1846_v43  ;;  %v1542_v54 = vsel %vm937_vm9, %v1539_v25, %v1541_v61 }
  0x96   : > { %v1579_v31 = vadd.f32 %v1540_v52, %v1454_v57  ;;  %v1663_v7 = vrot.slane %v1605_v40, 2  ;;  %v1580_v19 = vadd.f32 %v1542_v54, %v1455_v8  ;;  %v1665_v16 = vrot.slane %v1606_v47, 2 }
  0x97   : > { %v849_v39 = vmul.f32 %v2733_v37, %v2602_v22  ;;  %v850_v30 = vmul.f32 %v2735_v38, %v2602_v22  ;;  %2328 = vmatmul.mubr.msk.bf16.vlgmr.msra.gmra.mrb[0].mxu0 %vm1883_vm11, %v1861_v10  ;;  %v895_v23 = vmul.f32 %v2733_v37, %v2610_v26  ;;  %v896_v20 = vmul.f32 %v2735_v38, %v2610_v26 }
  0x98   : > { %v1664_v48 = vsel %vm1062_vm10, %v1662_v56, %v1663_v7  ;;  %v897_v13 = vmul.f32 %v2610_v26, %v2750_v53  ;;  %v1666_v63 = vsel %vm1062_vm10, %v1663_v7, %v1665_v16  ;;  %v1020_v14 = vmul.f32 %v2733_v37, %v2623_v33 }
  0x99   : > { %v1703_v49 = vadd.f32 %v1664_v48, %v1579_v31  ;;  %v1021_v50 = vmul.f32 %v2735_v38, %v2623_v33  ;;  %v1704_v46 = vadd.f32 %v1666_v63, %v1580_v19  ;;  %v948_v1 = vrot.slane %v895_v23, 1 }
  0x9a   : > { %v949_v42 = vrot.slane %v896_v20, 1  ;;  %v951_v41 = vrot.slane %v897_v13, 1  ;;  %v1022_v17 = vmul.f32 %v2623_v33, %v2750_v53  ;;  %v1073_v43 = vrot.slane %v1020_v14, 2 }
  0x9b   : > { %v1725_v0 = vadd.f32 %v2829_v58, %v1703_v49  ;;  %v1074_v57 = vrot.slane %v1021_v50, 2  ;;  %v1726_v25 = vadd.f32 %v2829_v58, %v1704_v46  ;;  %v2296_v12 = vunpack.c.h.bf16 %v3129_v24  ;;  %v3638_v46 = vld [vmem:[#allocation3_spill] sm:$0xff] }
  0x9c   : > { %v950_v37 = vsel %vm937_vm9, %v948_v1, %v949_v42  ;;  %v952_v3 = vsel %vm937_vm9, %v949_v42, %v951_v41  ;;  %v1145_v40 = vmul.f32 %v2612_v27, %v3010_v44  ;;  %v1076_v56 = vrot.slane %v1022_v17, 2  ;;  %v3639_v42 = vld [vmem:[#allocation4_spill] sm:$0xff] }
  0x9d   : > { %v1790_v38 = vmul.f32 0.70710677, %v1725_v0  ;;  %v998_v8 = vadd.f32 %v950_v37, %v849_v39  ;;  %v999_v61 = vadd.f32 %v952_v3, %v850_v30  ;;  %v3170_v52 = vmul.f32 0.5, %v1725_v0 }
  0x9e   : > { %v1791_v47 = vmul.f32 0.70710677, %v1726_v25  ;;  %v1075_v53 = vsel %vm1062_vm10, %v1073_v43, %v1074_v57  ;;  %v1146_v54 = vmul.f32 %v2612_v27, %v3012_v5  ;;  %v1184_v31 = vmul.f32 %v2614_v28, %v3010_v44 }
  0x9f   : > { %2398 = verf.f32 %v1790_v38  ;;  %v1123_v10 = vadd.f32 %v1075_v53, %v998_v8  ;;  %v1077_v7 = vsel %vm1062_vm10, %v1074_v57, %v1076_v56  ;;  %v1185_v19 = vmul.f32 %v2614_v28, %v3012_v5 }
  0xa0   : > { %2400 = verf.f32 %v1791_v47  ;;  %v1186_v16 = vmul.f32 %v2614_v28, %v3014_v62  ;;  %v1124_v39 = vadd.f32 %v1077_v7, %v999_v61  ;;  %v1236_v48 = vrot.slane %v1184_v31, 1  ;;  %v3640_v47 = vld [vmem:[#allocation5_spill] sm:$0xff] }
  0xa1   : > { %v1161_v30 = vadd.f32 %v1145_v40, %v1123_v10  ;;  %v1308_v23 = vmul.f32 %v2625_v34, %v3010_v44  ;;  %v1237_v20 = vrot.slane %v1185_v19, 1  ;;  %v1309_v63 = vmul.f32 %v2625_v34, %v3012_v5 }
  0xa2   : > { %v1239_v13 = vrot.slane %v1186_v16, 1  ;;  %v1310_v49 = vmul.f32 %v2625_v34, %v3014_v62  ;;  %v1162_v14 = vadd.f32 %v1146_v54, %v1124_v39  ;;  %v1432_v1 = vmul.f32 %v3638_v46, %v2616_v29 }
  0xa3   : > { %v1360_v50 = vrot.slane %v1308_v23, 2  ;;  %v1433_v41 = vmul.f32 %v3639_v42, %v2616_v29  ;;  %v1238_v0 = vsel %vm937_vm9, %v1236_v48, %v1237_v20  ;;  %v1361_v43 = vrot.slane %v1309_v63, 2  ;;  %v3209_v48 = vld [vmem:[%s2599_s15 + $0x10] sm:$0xff]  }
  0xa4   : > { %v1240_v17 = vsel %vm937_vm9, %v1237_v20, %v1239_v13  ;;  %v1363_v57 = vrot.slane %v1310_v49, 2  ;;  %v1286_v37 = vadd.f32 %v1238_v0, %v1161_v30  ;;  %v1471_v38 = vmul.f32 %v3638_v46, %v2627_v35 }
  0xa5   : > { %v1287_v3 = vadd.f32 %v1240_v17, %v1162_v14  ;;  %v1472_v8 = vmul.f32 %v3639_v42, %v2627_v35  ;;  %v1362_v61 = vsel %vm1062_vm10, %v1360_v50, %v1361_v43  ;;  %v1473_v53 = vmul.f32 %v2627_v35, %v3640_v47  ;;  %v476_v14 = vld [vmem:[#allocation2 + $0x60] sm:$0x1] }
  0xa6   : > { %v1364_v40 = vsel %vm1062_vm10, %v1361_v43, %v1363_v57  ;;  %v1595_v56 = vmul.f32 %v3638_v46, %v2629_v36  ;;  %v1410_v10 = vadd.f32 %v1362_v61, %v1286_v37  ;;  %v1523_v31 = vrot.slane %v1471_v38, 1  ;;  %v508_v37 = vld [vmem:[#allocation2 + $0x68] sm:$0x1] }
  0xa7   : > { %v1411_v54 = vadd.f32 %v1364_v40, %v1287_v3  ;;  %v1524_v7 = vrot.slane %v1472_v8, 1  ;;  %v1526_v19 = vrot.slane %v1473_v53, 1  ;;  %v1596_v16 = vmul.f32 %v3639_v42, %v2629_v36  ;;  %v443_v40 = vld [vmem:[%s2599_s15 + $0x38] sm:$0xf] }
  0xa8   : > { %v1597_v39 = vmul.f32 %v2629_v36, %v3640_v47  ;;  %v1647_v30 = vrot.slane %v1595_v56, 2  ;;  %v1774_v20 = vmul.f32 0.5, %v1726_v25  ;;  %v1448_v13 = vadd.f32 %v1432_v1, %v1410_v10  ;;  %v444_v25 = vld [vmem:[%s2599_s15 + $0x3c] sm:$0xf] }
  0xa9   : > { %v2399_v23 = vpop.eup %2398  ;;  %v1449_v63 = vadd.f32 %v1433_v41, %v1411_v54  ;;  %v1525_v49 = vsel %vm937_vm9, %v1523_v31, %v1524_v7  ;;  %v1527_v17 = vsel %vm937_vm9, %v1524_v7, %v1526_v19  ;;  %v1648_v43 = vrot.slane %v1596_v16, 2 }
  0xaa   : > { %v2401_v50 = vpop.eup %2400  ;;  %v1822_v0 = vadd.f32 1.0, %v2399_v23  ;;  %v1650_v57 = vrot.slane %v1597_v39, 2  ;;  %v1573_v38 = vadd.f32 %v1525_v49, %v1448_v13  ;;  %v2283_v61 = vunpack.c.l.bf16 %v3209_v48 }
  0xab   : > { %v1823_v3 = vadd.f32 1.0, %v2401_v50  ;;  %v1574_v8 = vadd.f32 %v1527_v17, %v1449_v63  ;;  %v1649_v41 = vsel %vm1062_vm10, %v1647_v30, %v1648_v43  ;;  %v477_v56 = vsel %vm2550_vm2, 0, %v476_v14 }
  0xac   : > { %v1838_v1 = vmul.f32 %v1822_v0, %v3170_v52  ;;  %v1651_v53 = vsel %vm1062_vm10, %v1648_v43, %v1650_v57  ;;  %v1697_v54 = vadd.f32 %v1649_v41, %v1573_v38  ;;  %478 = vst [vmem:[#allocation2 + $0x60] sm:$0x1] %v477_v56  ;;  %v509_v7 = vsel %vm2568_vm4, 0, %v508_v37 }
  0xad   : > { %v1839_v10 = vmul.f32 %v1823_v3, %v1774_v20  ;;  %v1698_v31 = vadd.f32 %v1651_v53, %v1574_v8  ;;  %510 = vst [vmem:[#allocation2 + $0x68] sm:$0x1] %v509_v7  ;;  %v694_v16 = vshrl.u32 %v443_v40, 16  ;;  %v697_v52 = vshll.u32 %v443_v40, 16 }
  0xae   : > { %v1854_v19 = vadd.f32 %v2295_v32, %v1838_v1  ;;  %v702_v39 = vshrl.u32 %v444_v25, 16  ;;  %v1719_v23 = vadd.f32 %v2829_v58, %v1697_v54  ;;  %v705_v13 = vshll.u32 %v444_v25, 16 }
  0xaf   : > { %v1855_v30 = vadd.f32 %v2296_v12, %v1839_v10  ;;  %v1720_v20 = vadd.f32 %v2829_v58, %v1698_v31  ;;  %v2284_v63 = vunpack.c.h.bf16 %v3209_v48  ;;  %v696_v49 = vrot.slane %v694_v16, 7 }
  0xb0   : > { %v704_v14 = vrot.slane %v702_v39, 7  ;;  %v857_v50 = vmul.f32 %v2899_v45, %v2602_v22  ;;  %v3232_v0 = vmul.f32 0.5, %v1719_v23  ;;  %v1784_v17 = vmul.f32 0.70710677, %v1719_v23 }
  0xb1   : > { %v1865_v32 = vpack.c.bf16 %v1855_v30, %v1854_v19  ;;  %v858_v24 = vmul.f32 %v2901_v59, %v2602_v22  ;;  %v1785_v12 = vmul.f32 0.70710677, %v1720_v20  ;;  %v699_v43 = vor.u32 %v697_v52, %v696_v49 }
  0xb2   : > { %v700_v57 = vrot.slane %v696_v49, 4  ;;  %v707_v37 = vor.u32 %v705_v13, %v704_v14  ;;  %2402 = verf.f32 %v1784_v17  ;;  %v709_v58 = vrot.slane %v704_v14, 4 }
  0xb3   : > { %2336 = vmatmul.mubr.msk.bf16.vlgmr.msra.gmra.mrb[0].mxu1 %vm1883_vm11, %v1865_v32  ;;  %v907_v3 = vmul.f32 %v2899_v45, %v2610_v26  ;;  %v908_v38 = vmul.f32 %v2901_v59, %v2610_v26  ;;  %2404 = verf.f32 %v1785_v12  ;;  %v784_v40 = vld [vmem:[#allocation2 + $0x60] sm:$0xf]  ;;  %v909_v25 = vmul.f32 %v2610_v26, %v2903_v55 }
  0xb4   : > { %v708_v8 = vsel %vm2644_vm7, %v700_v57, %v707_v37  ;;  %v1032_v1 = vmul.f32 %v2899_v45, %v2623_v33  ;;  %v785_v41 = vsel %vm2654_vm8, %v699_v43, %v784_v40  ;;  %v788_v53 = vld [vmem:[#allocation2 + $0x68] sm:$0x1]  ;;  %v1033_v54 = vmul.f32 %v2901_v59, %v2623_v33 }
  0xb5   : > { %787 = vst.msk [vmem:[#allocation2 + $0x64] sm:$0xf] %vm536_vm6, %v708_v8  ;;  %v968_v56 = vrot.slane %v907_v3, 1  ;;  %v969_v10 = vrot.slane %v908_v38, 1  ;;  %786 = vst [vmem:[#allocation2 + $0x60] sm:$0xf] %v785_v41  ;;  %v789_v31 = vsel %vm2550_vm2, %v709_v58, %v788_v53  ;;  %v1034_v19 = vmul.f32 %v2623_v33, %v2903_v55 }
  0xb6   : > { %v971_v7 = vrot.slane %v909_v25, 1  ;;  %v1093_v45 = vrot.slane %v1032_v1, 2  ;;  %790 = vst [vmem:[#allocation2 + $0x68] sm:$0x1] %v789_v31  ;;  %v1094_v52 = vrot.slane %v1033_v54, 2  ;;  %v1153_v39 = vmul.f32 %v2612_v27, %v3109_v18 }
  0xb7   : > { %v970_v16 = vsel %vm937_vm9, %v968_v56, %v969_v10  ;;  %v1154_v30 = vmul.f32 %v2612_v27, %v3111_v9  ;;  %v1096_v13 = vrot.slane %v1034_v19, 2  ;;  %v1196_v49 = vmul.f32 %v2614_v28, %v3109_v18 }
  0xb8   : > { %v972_v59 = vsel %vm937_vm9, %v969_v10, %v971_v7  ;;  %v1006_v23 = vadd.f32 %v970_v16, %v857_v50  ;;  %v1095_v55 = vsel %vm1062_vm10, %v1093_v45, %v1094_v52  ;;  %v1197_v32 = vmul.f32 %v2614_v28, %v3111_v9 }
  0xb9   : > { %v1007_v14 = vadd.f32 %v972_v59, %v858_v24  ;;  %v1198_v17 = vmul.f32 %v2614_v28, %v3113_v21  ;;  %v1097_v12 = vsel %vm1062_vm10, %v1094_v52, %v1096_v13  ;;  %v1256_v57 = vrot.slane %v1196_v49, 1 }
  0xba   : > { %v1131_v43 = vadd.f32 %v1095_v55, %v1006_v23  ;;  %v1320_v50 = vmul.f32 %v2625_v34, %v3109_v18  ;;  %v1257_v58 = vrot.slane %v1197_v32, 1  ;;  %v1321_v24 = vmul.f32 %v2625_v34, %v3111_v9 }
  0xbb   : > { %v1132_v37 = vadd.f32 %v1097_v12, %v1007_v14  ;;  %v1259_v3 = vrot.slane %v1198_v17, 1  ;;  %v1768_v38 = vmul.f32 0.5, %v1720_v20  ;;  %v1322_v40 = vmul.f32 %v2625_v34, %v3113_v21 }
  0xbc   : > { %v1169_v8 = vadd.f32 %v1153_v39, %v1131_v43  ;;  %v1380_v25 = vrot.slane %v1320_v50, 2  ;;  %v2403_v1 = vpop.eup %2402  ;;  %v2308_v41 = vld [vmem:[#allocation2 + $0x60] sm:$0xff]   ;;  %v1258_v56 = vsel %vm937_vm9, %v1256_v57, %v1257_v58  ;;  %v1381_v54 = vrot.slane %v1321_v24, 2 }
  0xbd   : > { %v1170_v53 = vadd.f32 %v1154_v30, %v1132_v37  ;;  %v1260_v10 = vsel %vm937_vm9, %v1257_v58, %v1259_v3  ;;  %v2405_v31 = vpop.eup %2404  ;;  %v1816_v7 = vadd.f32 1.0, %v2403_v1  ;;  %v3278_v19 = vunpack.c.l.bf16 %v2308_v41  ;;  %v817_v20 = vld [vmem:[#allocation2 + $0x68] sm:$0x1]  ;;  %v3300_v37 = vld [vmem:[%s2599_s15 + $0x30] sm:$0xff]  }
  0xbe   : > { %v3280_v45 = vunpack.c.h.bf16 %v2308_v41  ;;  %v1294_v16 = vadd.f32 %v1258_v56, %v1169_v8  ;;  %v1817_v52 = vadd.f32 1.0, %v2405_v31  ;;  %v3282_v39 = vunpack.c.l.bf16 %v817_v20 }
  0xbf   : > { %v1295_v59 = vadd.f32 %v1260_v10, %v1170_v53  ;;  %v1382_v30 = vsel %vm1062_vm10, %v1380_v25, %v1381_v54  ;;  %v1832_v23 = vmul.f32 %v1816_v7, %v3232_v0  ;;  %v1383_v13 = vrot.slane %v1322_v40, 2 }
  0xc0   : > { %v1418_v49 = vadd.f32 %v1382_v30, %v1294_v16  ;;  %v1440_v14 = vmul.f32 %v3278_v19, %v2616_v29  ;;  %v1833_v55 = vmul.f32 %v1817_v52, %v1768_v38  ;;  %v1441_v32 = vmul.f32 %v3280_v45, %v2616_v29 }
  0xc1   : > { %v1483_v17 = vmul.f32 %v3278_v19, %v2627_v35  ;;  %v1484_v12 = vmul.f32 %v3280_v45, %v2627_v35  ;;  %v1848_v43 = vadd.f32 %v2283_v61, %v1832_v23  ;;  %v1384_v0 = vsel %vm1062_vm10, %v1381_v54, %v1383_v13 }
  0xc2   : > { %v1456_v57 = vadd.f32 %v1440_v14, %v1418_v49  ;;  %v1485_v50 = vmul.f32 %v2627_v35, %v3282_v39  ;;  %v1849_v58 = vadd.f32 %v2284_v63, %v1833_v55  ;;  %v1419_v3 = vadd.f32 %v1384_v0, %v1295_v59  ;;  %v3333_v0 = vld [vmem:[%s3596_s4] ss:$0 sm:$0xff] }
  0xc3   : > { %v1543_v24 = vrot.slane %v1483_v17, 1  ;;  %v1544_v38 = vrot.slane %v1484_v12, 1  ;;  %v1607_v40 = vmul.f32 %v3278_v19, %v2629_v36  ;;  %v1608_v61 = vmul.f32 %v3280_v45, %v2629_v36 }
  0xc4   : > { %v1546_v8 = vrot.slane %v1485_v50, 1  ;;  %v1609_v25 = vmul.f32 %v2629_v36, %v3282_v39  ;;  %v1862_v1 = vpack.c.bf16 %v1849_v58, %v1848_v43  ;;  %v1457_v41 = vadd.f32 %v1441_v32, %v1419_v3 }
  0xc5   : > { %v1545_v53 = vsel %vm937_vm9, %v1543_v24, %v1544_v38  ;;  %v2299_v48 = vunpack.c.l.bf16 %v3300_v37  ;;  %v1667_v10 = vrot.slane %v1607_v40, 2  ;;  %v1668_v54 = vrot.slane %v1608_v61, 2 }
  0xc6   : > { %v1547_v63 = vsel %vm937_vm9, %v1544_v38, %v1546_v8  ;;  %v1581_v56 = vadd.f32 %v1545_v53, %v1456_v57  ;;  %2331 = vmatprep.mubr.msk.bf16.mxu0 %vm1883_vm11, %v1862_v1  ;;  %v1670_v7 = vrot.slane %v1609_v25, 2  ;;  %v851_v20 = vmul.f32 %v2602_v22, %v3010_v44 }
  0xc7   : > { %v1582_v31 = vadd.f32 %v1547_v63, %v1457_v41  ;;  %v852_v16 = vmul.f32 %v2602_v22, %v3012_v5  ;;  %v1669_v52 = vsel %vm1062_vm10, %v1667_v10, %v1668_v54  ;;  %v898_v59 = vmul.f32 %v2610_v26, %v3010_v44 }
  0xc8   : > { %v899_v30 = vmul.f32 %v2610_v26, %v3012_v5  ;;  %v900_v23 = vmul.f32 %v2610_v26, %v3014_v62  ;;  %v1671_v13 = vsel %vm1062_vm10, %v1668_v54, %v1670_v7  ;;  %v1705_v49 = vadd.f32 %v1669_v52, %v1581_v56 }
  0xc9   : > { %v1023_v14 = vmul.f32 %v2623_v33, %v3010_v44  ;;  %v1024_v55 = vmul.f32 %v2623_v33, %v3012_v5  ;;  %v1706_v32 = vadd.f32 %v1671_v13, %v1582_v31  ;;  %v953_v17 = vrot.slane %v898_v59, 1 }
  0xca   : > { %v954_v12 = vrot.slane %v899_v30, 1  ;;  %v956_v43 = vrot.slane %v900_v23, 1  ;;  %v1727_v57 = vadd.f32 %v3333_v0, %v1705_v49  ;;  %v1025_v50 = vmul.f32 %v2623_v33, %v3014_v62 }
  0xcb   : > { %v1078_v58 = vrot.slane %v1023_v14, 2  ;;  %v1079_v3 = vrot.slane %v1024_v55, 2  ;;  %v1728_v44 = vadd.f32 %v3333_v0, %v1706_v32  ;;  %v2300_v5 = vunpack.c.h.bf16 %v3300_v37 }
  0xcc   : > { %v955_v24 = vsel %vm937_vm9, %v953_v17, %v954_v12  ;;  %v957_v38 = vsel %vm937_vm9, %v954_v12, %v956_v43  ;;  %v1792_v8 = vmul.f32 0.70710677, %v1727_v57  ;;  %v1147_v25 = vmul.f32 %v3638_v46, %v2612_v27 }
  0xcd   : > { %v1000_v40 = vadd.f32 %v955_v24, %v851_v20  ;;  %v1001_v61 = vadd.f32 %v957_v38, %v852_v16  ;;  %v3344_v1 = vmul.f32 0.5, %v1727_v57  ;;  %v1793_v41 = vmul.f32 0.70710677, %v1728_v44 }
  0xce   : > { %v1080_v62 = vsel %vm1062_vm10, %v1078_v58, %v1079_v3  ;;  %v1081_v53 = vrot.slane %v1025_v50, 2  ;;  %2406 = verf.f32 %v1792_v8  ;;  %v1148_v56 = vmul.f32 %v3639_v42, %v2612_v27 }
  0xcf   : > { %v1125_v63 = vadd.f32 %v1080_v62, %v1000_v40  ;;  %v1187_v10 = vmul.f32 %v3638_v46, %v2614_v28  ;;  %2408 = verf.f32 %v1793_v41  ;;  %v1188_v31 = vmul.f32 %v3639_v42, %v2614_v28 }
  0xd0   : > { %v1082_v54 = vsel %vm1062_vm10, %v1079_v3, %v1081_v53  ;;  %v1189_v7 = vmul.f32 %v2614_v28, %v3640_v47  ;;  %v1311_v59 = vmul.f32 %v3638_v46, %v2625_v34  ;;  %v1312_v13 = vmul.f32 %v3639_v42, %v2625_v34 }
  0xd1   : > { %v1126_v20 = vadd.f32 %v1082_v54, %v1001_v61  ;;  %v1163_v16 = vadd.f32 %v1147_v25, %v1125_v63  ;;  %v1241_v52 = vrot.slane %v1187_v10, 1  ;;  %v1242_v30 = vrot.slane %v1188_v31, 1  ;;  %v3383_v10 = vld [vmem:[%s2599_s15 + $0x18] sm:$0xff]  }
  0xd2   : > { %v1244_v23 = vrot.slane %v1189_v7, 1  ;;  %v1313_v49 = vmul.f32 %v2625_v34, %v3640_v47  ;;  %v1365_v55 = vrot.slane %v1311_v59, 2  ;;  %v1434_v32 = vmul.f32 %v2616_v29, %v2891_v4 }
  0xd3   : > { %v1164_v14 = vadd.f32 %v1148_v56, %v1126_v20  ;;  %v1435_v17 = vmul.f32 %v2616_v29, %v3635_v6  ;;  %v1243_v12 = vsel %vm937_vm9, %v1241_v52, %v1242_v30  ;;  %v1366_v43 = vrot.slane %v1312_v13, 2  ;;  %v511_v13 = vld [vmem:[#allocation2 + $0x74] sm:$0x1] }
  0xd4   : > { %v1245_v46 = vsel %vm937_vm9, %v1242_v30, %v1244_v23  ;;  %v1368_v57 = vrot.slane %v1313_v49, 2  ;;  %v1288_v50 = vadd.f32 %v1243_v12, %v1163_v16  ;;  %v1474_v47 = vmul.f32 %v2627_v35, %v2891_v4  ;;  %v479_v16 = vld [vmem:[#allocation2 + $0x6c] sm:$0x1]  ;;  %v447_v12 = vld [vmem:[%s2640_s21 + $0x8] sm:$0xf] }
  0xd5   : > { %v1289_v42 = vadd.f32 %v1245_v46, %v1164_v14  ;;  %v1475_v58 = vmul.f32 %v2627_v35, %v3635_v6  ;;  %v1367_v3 = vsel %vm1062_vm10, %v1365_v55, %v1366_v43  ;;  %v1476_v38 = vmul.f32 %v2627_v35, %v3636_v15 }
  0xd6   : > { %v1369_v24 = vsel %vm1062_vm10, %v1366_v43, %v1368_v57  ;;  %v1598_v8 = vmul.f32 %v2629_v36, %v2891_v4  ;;  %v1412_v40 = vadd.f32 %v1367_v3, %v1288_v50  ;;  %v1528_v25 = vrot.slane %v1474_v47, 1 }
  0xd7   : > { %v1413_v61 = vadd.f32 %v1369_v24, %v1289_v42  ;;  %v1529_v41 = vrot.slane %v1475_v58, 1  ;;  %v1531_v62 = vrot.slane %v1476_v38, 1  ;;  %v1599_v53 = vmul.f32 %v2629_v36, %v3635_v6 }
  0xd8   : > { %v1600_v63 = vmul.f32 %v2629_v36, %v3636_v15  ;;  %v1652_v56 = vrot.slane %v1598_v8, 2  ;;  %v2407_v54 = vpop.eup %2406  ;;  %v1776_v31 = vmul.f32 0.5, %v1728_v44  ;;  %v1450_v7 = vadd.f32 %v1434_v32, %v1412_v40  ;;  %v448_v44 = vld [vmem:[%s2640_s21 + $0xc] sm:$0xf] }
  0xd9   : > { %v1451_v4 = vadd.f32 %v1435_v17, %v1413_v61  ;;  %v1530_v20 = vsel %vm937_vm9, %v1528_v25, %v1529_v41  ;;  %v2409_v52 = vpop.eup %2408  ;;  %v1824_v59 = vadd.f32 1.0, %v2407_v54  ;;  %v1532_v30 = vsel %vm937_vm9, %v1529_v41, %v1531_v62 }
  0xda   : > { %v1653_v6 = vrot.slane %v1599_v53, 2  ;;  %v1655_v23 = vrot.slane %v1600_v63, 2  ;;  %v1825_v15 = vadd.f32 1.0, %v2409_v52  ;;  %v1575_v49 = vadd.f32 %v1530_v20, %v1450_v7 }
  0xdb   : > { %v1576_v14 = vadd.f32 %v1532_v30, %v1451_v4  ;;  %v2287_v55 = vunpack.c.l.bf16 %v3383_v10  ;;  %v1840_v32 = vmul.f32 %v1824_v59, %v3344_v1  ;;  %v480_v43 = vsel %vm2550_vm2, 0, %v479_v16 }
  0xdc   : > { %v1654_v17 = vsel %vm1062_vm10, %v1652_v56, %v1653_v6  ;;  %v1656_v46 = vsel %vm1062_vm10, %v1653_v6, %v1655_v23  ;;  %v1841_v57 = vmul.f32 %v1825_v15, %v1776_v31  ;;  %481 = vst [vmem:[#allocation2 + $0x6c] sm:$0x1] %v480_v43  ;;  %v512_v47 = vsel %vm2568_vm4, 0, %v511_v13 }
  0xdd   : > { %v1699_v50 = vadd.f32 %v1654_v17, %v1575_v49  ;;  %v1700_v42 = vadd.f32 %v1656_v46, %v1576_v14  ;;  %v1856_v58 = vadd.f32 %v2299_v48, %v1840_v32  ;;  %513 = vst [vmem:[#allocation2 + $0x74] sm:$0x1] %v512_v47  ;;  %v547_v3 = vshrl.u32 %v447_v12, 16 }
  0xde   : > { %v550_v1 = vshll.u32 %v447_v12, 16  ;;  %v555_v24 = vshrl.u32 %v448_v44, 16  ;;  %v1857_v38 = vadd.f32 %v2300_v5, %v1841_v57  ;;  %v558_v61 = vshll.u32 %v448_v44, 16 }
  0xdf   : > { %v1721_v8 = vadd.f32 %v3333_v0, %v1699_v50  ;;  %v1722_v40 = vadd.f32 %v3333_v0, %v1700_v42  ;;  %v2288_v25 = vunpack.c.h.bf16 %v3383_v10  ;;  %v549_v41 = vrot.slane %v547_v3, 7 }
  0xe0   : > { %v557_v11 = vrot.slane %v555_v24, 7  ;;  %v859_v62 = vmul.f32 %v2602_v22, %v3109_v18  ;;  %v1866_v48 = vpack.c.bf16 %v1857_v38, %v1856_v58  ;;  %v860_v37 = vmul.f32 %v2602_v22, %v3111_v9 }
  0xe1   : > { %v3406_v53 = vmul.f32 0.5, %v1721_v8  ;;  %v1786_v63 = vmul.f32 0.70710677, %v1721_v8  ;;  %v1787_v5 = vmul.f32 0.70710677, %v1722_v40  ;;  %v552_v56 = vor.u32 %v550_v1, %v549_v41 }
  0xe2   : > { %v553_v54 = vrot.slane %v549_v41, 4  ;;  %v560_v31 = vor.u32 %v558_v61, %v557_v11  ;;  %2339 = vmatprep.mubr.msk.bf16.mxu1 %vm1883_vm11, %v1866_v48  ;;  %v562_v7 = vrot.slane %v557_v11, 4  ;;  %v910_v4 = vmul.f32 %v2610_v26, %v3109_v18 }
  0xe3   : > { %2410 = verf.f32 %v1786_v63  ;;  %v911_v20 = vmul.f32 %v2610_v26, %v3111_v9  ;;  %v567_v52 = vld [vmem:[#allocation2 + $0x6c] sm:$0xf]  ;;  %v912_v22 = vmul.f32 %v2610_v26, %v3113_v21  ;;  %v1035_v59 = vmul.f32 %v2623_v33, %v3109_v18 }
  0xe4   : > { %2412 = verf.f32 %v1787_v5  ;;  %v561_v16 = vsel %vm2644_vm7, %v553_v54, %v560_v31  ;;  %v568_v30 = vsel %vm2654_vm8, %v552_v56, %v567_v52  ;;  %v571_v6 = vld [vmem:[#allocation2 + $0x74] sm:$0x1]  ;;  %v973_v23 = vrot.slane %v910_v4, 1 }
  0xe5   : > { %570 = vst.msk [vmem:[#allocation2 + $0x70] sm:$0xf] %vm536_vm6, %v561_v16  ;;  %v974_v13 = vrot.slane %v911_v20, 1  ;;  %v1036_v15 = vmul.f32 %v2623_v33, %v3111_v9  ;;  %569 = vst [vmem:[#allocation2 + $0x6c] sm:$0xf] %v568_v30  ;;  %v572_v51 = vsel %vm2550_vm2, %v562_v7, %v571_v6  ;;  %v976_v49 = vrot.slane %v912_v22, 1 }
  0xe6   : > { %v1037_v26 = vmul.f32 %v2623_v33, %v3113_v21  ;;  %v1098_v18 = vrot.slane %v1035_v59, 2  ;;  %573 = vst [vmem:[#allocation2 + $0x74] sm:$0x1] %v572_v51  ;;  %v1155_v12 = vmul.f32 %v3278_v19, %v2612_v27  ;;  %v1156_v44 = vmul.f32 %v3280_v45, %v2612_v27 }
  0xe7   : > { %v975_v60 = vsel %vm937_vm9, %v973_v23, %v974_v13  ;;  %v1099_v14 = vrot.slane %v1036_v15, 2  ;;  %v977_v9 = vsel %vm937_vm9, %v974_v13, %v976_v49  ;;  %v1199_v17 = vmul.f32 %v3278_v19, %v2614_v28 }
  0xe8   : > { %v1008_v32 = vadd.f32 %v975_v60, %v859_v62  ;;  %v1101_v2 = vrot.slane %v1037_v26, 2  ;;  %v1009_v46 = vadd.f32 %v977_v9, %v860_v37  ;;  %v1200_v21 = vmul.f32 %v3280_v45, %v2614_v28 }
  0xe9   : > { %v1100_v33 = vsel %vm1062_vm10, %v1098_v18, %v1099_v14  ;;  %v1201_v43 = vmul.f32 %v2614_v28, %v3282_v39  ;;  %v1261_v27 = vrot.slane %v1199_v17, 1  ;;  %v1323_v42 = vmul.f32 %v3278_v19, %v2625_v34 }
  0xea   : > { %v1102_v57 = vsel %vm1062_vm10, %v1099_v14, %v1101_v2  ;;  %v1133_v50 = vadd.f32 %v1100_v33, %v1008_v32  ;;  %v1262_v58 = vrot.slane %v1200_v21, 1  ;;  %v1324_v1 = vmul.f32 %v3280_v45, %v2625_v34 }
  0xeb   : > { %v1134_v47 = vadd.f32 %v1102_v57, %v1009_v46  ;;  %v1264_v3 = vrot.slane %v1201_v43, 1  ;;  %v1770_v24 = vmul.f32 0.5, %v1722_v40  ;;  %v1325_v8 = vmul.f32 %v2625_v34, %v3282_v39 }
  0xec   : > { %v1171_v38 = vadd.f32 %v1155_v12, %v1133_v50  ;;  %v1385_v61 = vrot.slane %v1323_v42, 2  ;;  %v818_v41 = vld [vmem:[#allocation2 + $0x6c] sm:$0xff]   ;;  %v1263_v62 = vsel %vm937_vm9, %v1261_v27, %v1262_v58  ;;  %v1386_v19 = vrot.slane %v1324_v1, 2  ;;  %v2315_v27 = vld [vmem:[%s2599_s15 + $0x38] sm:$0xff]  }
  0xed   : > { %v2411_v28 = vpop.eup %2410  ;;  %v1172_v11 = vadd.f32 %v1156_v44, %v1134_v47  ;;  %v1265_v48 = vsel %vm937_vm9, %v1262_v58, %v1264_v3  ;;  %v820_v5 = vld [vmem:[#allocation2 + $0x74] sm:$0x1]  ;;  %v1388_v54 = vrot.slane %v1325_v8, 2  ;;  %v1422_v45 = vunpack.c.l.bf16 %v818_v41 }
  0xee   : > { %v2413_v63 = vpop.eup %2412  ;;  %v1818_v37 = vadd.f32 1.0, %v2411_v28  ;;  %v1296_v56 = vadd.f32 %v1263_v62, %v1171_v38  ;;  %v1387_v7 = vsel %vm1062_vm10, %v1385_v61, %v1386_v19  ;;  %v1423_v34 = vunpack.c.h.bf16 %v818_v41 }
  0xef   : > { %v1819_v40 = vadd.f32 1.0, %v2413_v63  ;;  %v1297_v31 = vadd.f32 %v1265_v48, %v1172_v11  ;;  %v1389_v4 = vsel %vm1062_vm10, %v1386_v19, %v1388_v54  ;;  %v1442_v16 = vmul.f32 %v2616_v29, %v1422_v45  ;;  %v3490_v19 = vld [vmem:[%s3599_s7] ss:$0 sm:$0xff] }
  0xf0   : > { %v1834_v39 = vmul.f32 %v1818_v37, %v3406_v53  ;;  %v1420_v20 = vadd.f32 %v1387_v7, %v1296_v56  ;;  %v1443_v59 = vmul.f32 %v2616_v29, %v1423_v34  ;;  %v1460_v30 = vunpack.c.l.bf16 %v820_v5  ;;  %v2007_v5 = vld [vmem:[%s3485_s17 + $0x10] sm:$0xff] }
  0xf1   : > { %v1835_v52 = vmul.f32 %v1819_v40, %v1770_v24  ;;  %v1421_v22 = vadd.f32 %v1389_v4, %v1297_v31  ;;  %v1486_v13 = vmul.f32 %v2627_v35, %v1422_v45  ;;  %v1487_v15 = vmul.f32 %v2627_v35, %v1423_v34  ;;  %v2005_v40 = vld [vmem:[%s3485_s17] sm:$0xff] }
  0xf2   : > { %v1850_v6 = vadd.f32 %v2287_v55, %v1834_v39  ;;  %v1458_v23 = vadd.f32 %v1442_v16, %v1420_v20  ;;  %v1488_v49 = vmul.f32 %v2627_v35, %v1460_v30  ;;  %v1610_v26 = vmul.f32 %v2629_v36, %v1422_v45  ;;  %v2008_v39 = vld [vmem:[%s3485_s17 + $0x18] sm:$0xff] }
  0xf3   : > { %v1851_v53 = vadd.f32 %v2288_v25, %v1835_v52  ;;  %v1459_v51 = vadd.f32 %v1443_v59, %v1421_v22  ;;  %v1548_v18 = vrot.slane %v1486_v13, 1  ;;  %v1549_v60 = vrot.slane %v1487_v15, 1  ;;  %v2006_v52 = vld [vmem:[%s3485_s17 + $0x8] sm:$0xff] }
  0xf4   : > { %v1611_v29 = vmul.f32 %v2629_v36, %v1423_v34  ;;  %v1612_v14 = vmul.f32 %v2629_v36, %v1460_v30  ;;  %v1551_v12 = vrot.slane %v1488_v49, 1  ;;  %v1672_v44 = vrot.slane %v1610_v26, 2 }
  0xf5   : > { %v1863_v55 = vpack.c.bf16 %v1851_v53, %v1850_v6  ;;  %v1550_v9 = vsel %vm937_vm9, %v1548_v18, %v1549_v60  ;;  %v2303_v1 = vunpack.c.l.bf16 %v2315_v27  ;;  %v2304_v38 = vunpack.c.h.bf16 %v2315_v27  ;;  %v2015_v53 = vld [vmem:[%s3485_s17 + $0x50] sm:$0xff]  ;;  %v2013_v18 = vld [vmem:[%s3485_s17 + $0x40] sm:$0xff] }
  0xf6   : > { %v1673_v32 = vrot.slane %v1611_v29, 2  ;;  %v1675_v10 = vrot.slane %v1612_v14, 2  ;;  %v1552_v35 = vsel %vm937_vm9, %v1549_v60, %v1551_v12  ;;  %v1583_v25 = vadd.f32 %v1550_v9, %v1458_v23 }
  0xf7   : > { %2332 = vmatmul.mubr.msk.bf16.gmra.mrb[4].mxu0 %vm1883_vm11, %v1863_v55  ;;  %v1584_v2 = vadd.f32 %v1552_v35, %v1459_v51  ;;  %vm2060_vm12 = vcmask 31744   ;;  %v2016_v55 = vld [vmem:[%s3485_s17 + $0x58] sm:$0xff] }
  0xf8   : > { %v1674_v17 = vsel %vm1062_vm10, %v1672_v44, %v1673_v32  ;;  %v1676_v46 = vsel %vm1062_vm10, %v1673_v32, %v1675_v10  ;;  %v2014_v32 = vld [vmem:[%s3485_s17 + $0x48] sm:$0xff] }
  0xf9   : > { %v1707_v33 = vadd.f32 %v1674_v17, %v1583_v25  ;;  %v1708_v36 = vadd.f32 %v1676_v46, %v1584_v2 }
  0xfb   : > { %v1729_v21 = vadd.f32 %v3333_v0, %v1707_v33  ;;  %v1730_v43 = vadd.f32 %v3333_v0, %v1708_v36  ;;  %v3480_v0 = vld [vmem:[%s3598_s6] ss:$0 sm:$0xff]  ;;  %v2011_v36 = vld [vmem:[%s3485_s17 + $0x30] sm:$0xff] }
  0xfd   : > { %v1794_v57 = vmul.f32 0.70710677, %v1729_v21  ;;  %v1795_v50 = vmul.f32 0.70710677, %v1730_v43  ;;  %v1777_v42 = vmul.f32 0.5, %v1729_v21  ;;  %v1778_v58 = vmul.f32 0.5, %v1730_v43 }
  0xff   : > { %2414 = verf.f32 %v1794_v57 }
 0x100   : > { %2416 = verf.f32 %v1795_v50  ;;  %v2009_v50 = vld [vmem:[%s3485_s17 + $0x20] sm:$0xff] }
 0x109   : > { %v2415_v47 = vpop.eup %2414 }
 0x10a   : > { %v2417_v3 = vpop.eup %2416  ;;  %v1826_v24 = vadd.f32 1.0, %v2415_v47 }
 0x10b   : > { %v1827_v8 = vadd.f32 1.0, %v2417_v3 }
 0x10c   : > { %v1842_v61 = vmul.f32 %v1826_v24, %v1777_v42 }
 0x10d   : > { %v1843_v28 = vmul.f32 %v1827_v8, %v1778_v58  ;;  %v2012_v58 = vld [vmem:[%s3485_s17 + $0x38] sm:$0xff] }
 0x10e   : > { %v1858_v41 = vadd.f32 %v2303_v1, %v1842_v61 }
 0x10f   : > { %v1859_v11 = vadd.f32 %v2304_v38, %v1843_v28  ;;  %v2010_v38 = vld [vmem:[%s3485_s17 + $0x28] sm:$0xff] }
 0x111   : > { %v1867_v62 = vpack.c.bf16 %v1859_v11, %v1858_v41 }
 0x113   : > { %2340 = vmatmul.mubr.msk.bf16.gmra.mrb[4].mxu1 %vm1883_vm11, %v1867_v62 }
 0x16a   : > { %v2329_v48 = vpop.f32.mrb[0].mxu0 }
 0x16b   : > { %v1951_v63 = vadd.f32 %v2329_v48, %v3480_v0  ;;  %v1942_v37 = vpop.f32.mrb[1].mxu0 }
 0x16c   : > { %v1943_v56 = vadd.f32 %v3480_v0, %v1942_v37  ;;  %v2330_v54 = vpop.f32.mrb[2].mxu0 }
 0x16d   : > { %v2030_v45 = vmul.f32 %v3490_v19, %v1951_v63  ;;  %v1954_v31 = vadd.f32 %v2330_v54, %v3480_v0  ;;  %v1945_v7 = vpop.f32.mrb[3].mxu0  ;;  %v2019_v63 = vld [vmem:[%s3485_s17 + $0x70] sm:$0xff]  ;;  %v2017_v54 = vld [vmem:[%s3485_s17 + $0x60] sm:$0xff] }
 0x16e   : > { %v2028_v34 = vmul.f32 %v3490_v19, %v1943_v56  ;;  %v1946_v4 = vadd.f32 %v3480_v0, %v1945_v7  ;;  %v2020_v7 = vld [vmem:[%s3485_s17 + $0x78] sm:$0xff] }
 0x16f   : > { %v2046_v20 = vadd.f32 %v2030_v45, %v2007_v5  ;;  %v2031_v16 = vmul.f32 %v3490_v19, %v1954_v31 }
 0x170   : > { %v2044_v22 = vadd.f32 %v2028_v34, %v2005_v40  ;;  %v2029_v59 = vmul.f32 %v3490_v19, %v1946_v4 }
 0x171   : > { %2063 = vst.msk [vmem:[%s3501_s16 + $0x10] sm:$0xff] %vm2060_vm12, %v2046_v20  ;;  %v2047_v30 = vadd.f32 %v2031_v16, %v2008_v39  ;;  %v2018_v20 = vld [vmem:[%s3485_s17 + $0x68] sm:$0xff] }
 0x172   : > { %2061 = vst.msk [vmem:[%s3501_s16] sm:$0xff] %vm2060_vm12, %v2044_v22  ;;  %v2045_v6 = vadd.f32 %v2029_v59, %v2006_v52 }
 0x173   : > { %2064 = vst.msk [vmem:[%s3501_s16 + $0x18] sm:$0xff] %vm2060_vm12, %v2047_v30 }
 0x174   : > { %2062 = vst.msk [vmem:[%s3501_s16 + $0x8] sm:$0xff] %vm2060_vm12, %v2045_v6 }
 0x186   : > { %v2337_v23 = vpop.f32.mrb[0].mxu1 }
 0x187   : > { %v1983_v13 = vadd.f32 %v2337_v23, %v3480_v0  ;;  %v1974_v15 = vpop.f32.mrb[1].mxu1 }
 0x188   : > { %v1975_v51 = vadd.f32 %v3480_v0, %v1974_v15  ;;  %v2338_v49 = vpop.f32.mrb[2].mxu1 }
 0x189   : > { %v2038_v26 = vmul.f32 %v3490_v19, %v1983_v13  ;;  %v1986_v60 = vadd.f32 %v2338_v49, %v3480_v0  ;;  %v1977_v29 = vpop.f32.mrb[3].mxu1 }
 0x18a   : > { %v2036_v14 = vmul.f32 %v3490_v19, %v1975_v51  ;;  %v1978_v12 = vadd.f32 %v3480_v0, %v1977_v29 }
 0x18b   : > { %v2054_v44 = vadd.f32 %v2038_v26, %v2015_v53  ;;  %v2039_v9 = vmul.f32 %v3490_v19, %v1986_v60 }
 0x18c   : > { %v2052_v10 = vadd.f32 %v2036_v14, %v2013_v18  ;;  %v2037_v35 = vmul.f32 %v3490_v19, %v1978_v12 }
 0x18d   : > { %2071 = vst.msk [vmem:[%s3501_s16 + $0x50] sm:$0xff] %vm2060_vm12, %v2054_v44  ;;  %v2055_v25 = vadd.f32 %v2039_v9, %v2016_v55 }
 0x18e   : > { %2069 = vst.msk [vmem:[%s3501_s16 + $0x40] sm:$0xff] %vm2060_vm12, %v2052_v10  ;;  %v2053_v2 = vadd.f32 %v2037_v35, %v2014_v32 }
 0x18f   : > { %2072 = vst.msk [vmem:[%s3501_s16 + $0x58] sm:$0xff] %vm2060_vm12, %v2055_v25 }
 0x190   : > { %2070 = vst.msk [vmem:[%s3501_s16 + $0x48] sm:$0xff] %vm2060_vm12, %v2053_v2 }
 0x1ca   : > { %v2333_v17 = vpop.f32.mrb[4].mxu0 }
 0x1cb   : > { %v1967_v46 = vadd.f32 %v2333_v17, %v3480_v0  ;;  %v1958_v33 = vpop.f32.mrb[5].mxu0 }
 0x1cc   : > { %v1959_v21 = vadd.f32 %v3480_v0, %v1958_v33  ;;  %v2334_v43 = vpop.f32.mrb[6].mxu0 }
 0x1cd   : > { %v2034_v57 = vmul.f32 %v3490_v19, %v1967_v46  ;;  %v1970_v27 = vadd.f32 %v2334_v43, %v3480_v0  ;;  %v1961_v42 = vpop.f32.mrb[7].mxu0 }
 0x1ce   : > { %v2032_v47 = vmul.f32 %v3490_v19, %v1959_v21  ;;  %v1962_v3 = vadd.f32 %v3480_v0, %v1961_v42 }
 0x1cf   : > { %v2050_v1 = vadd.f32 %v2034_v57, %v2011_v36  ;;  %v2035_v24 = vmul.f32 %v3490_v19, %v1970_v27 }
 0x1d0   : > { %v2048_v8 = vadd.f32 %v2032_v47, %v2009_v50  ;;  %v2033_v61 = vmul.f32 %v3490_v19, %v1962_v3 }
 0x1d1   : > { %2067 = vst.msk [vmem:[%s3501_s16 + $0x30] sm:$0xff] %vm2060_vm12, %v2050_v1  ;;  %v2051_v28 = vadd.f32 %v2035_v24, %v2012_v58 }
 0x1d2   : > { %2065 = vst.msk [vmem:[%s3501_s16 + $0x20] sm:$0xff] %vm2060_vm12, %v2048_v8  ;;  %v2049_v41 = vadd.f32 %v2033_v61, %v2010_v38 }
 0x1d3   : > { %2068 = vst.msk [vmem:[%s3501_s16 + $0x38] sm:$0xff] %vm2060_vm12, %v2051_v28 }
 0x1d4   : > { %2066 = vst.msk [vmem:[%s3501_s16 + $0x28] sm:$0xff] %vm2060_vm12, %v2049_v41 }
 0x1e6   : > { %v2341_v11 = vpop.f32.mrb[4].mxu1 }
 0x1e7   : > { %v1999_v62 = vadd.f32 %v2341_v11, %v3480_v0  ;;  %v1990_v48 = vpop.f32.mrb[5].mxu1 }
 0x1e8   : > { %v1991_v37 = vadd.f32 %v3480_v0, %v1990_v48  ;;  %v2342_v5 = vpop.f32.mrb[6].mxu1 }
 0x1e9   : > { %v2042_v56 = vmul.f32 %v3490_v19, %v1999_v62  ;;  %v2002_v45 = vadd.f32 %v2342_v5, %v3480_v0  ;;  %v1993_v40 = vpop.f32.mrb[7].mxu1 }
 0x1ea   : > { %v2040_v31 = vmul.f32 %v3490_v19, %v1991_v37  ;;  %v1994_v34 = vadd.f32 %v3480_v0, %v1993_v40 }
 0x1eb   : > { %v2058_v39 = vadd.f32 %v2042_v56, %v2019_v63  ;;  %v2043_v4 = vmul.f32 %v3490_v19, %v2002_v45 }
 0x1ec   : > { %v2056_v16 = vadd.f32 %v2040_v31, %v2017_v54  ;;  %v2041_v52 = vmul.f32 %v3490_v19, %v1994_v34 }
 0x1ed   : > { %2075 = vst.msk [vmem:[%s3501_s16 + $0x70] sm:$0xff] %vm2060_vm12, %v2058_v39  ;;  %v2059_v22 = vadd.f32 %v2043_v4, %v2020_v7 }
 0x1ee   : > { %2073 = vst.msk [vmem:[%s3501_s16 + $0x60] sm:$0xff] %vm2060_vm12, %v2056_v16  ;;  %v2057_v59 = vadd.f32 %v2041_v52, %v2018_v20 }
 0x1ef   : > { %2076 = vst.msk [vmem:[%s3501_s16 + $0x78] sm:$0xff] %vm2060_vm12, %v2059_v22 }
 0x1f0   : > { %2074 = vst.msk [vmem:[%s3501_s16 + $0x68] sm:$0xff] %vm2060_vm12, %v2057_v59 }
 0x1f1 PF: > { %s18_s9 = sadd.s32 1, %s2457_s9   ;;  %s3641_s27 = smov %s2449_s29 }
 0x1f2   : > { %p15_p8 = scmp.ge.s32.totalorder %s18_s9, 6   ;;  %s3642_s28 = smov %s2453_s30 }
 0x1f3   : > { %s3643_s29 = smov %s3646_s10  ;;  %s3644_s30 = smov %s3650_s11 }
 0x1f4   :  { %17 = sbr.rel (!%p15_p8) target bundleno = 3 (0x3), region = 90 }

// kernel: block_forward.4
= control target key start
LH: loop header
LB: loop body
LE: loop exit
PB: predicated region body
PF: predicated region fallthrough
CT: control target
= control target key end

     0   :  { %s5101_s29 = smov 0   ;;  %s5103_s30 = smov 0   ;;  %s7341_s0 = inlined_call_operand.vmem [shape: bf16[2,16,16,4], index: 0, kind: input, shape index: {}]   ;;  %s7342_s1 = inlined_call_operand.vmem [shape: bf16[2,8,16,4], index: 1, kind: input, shape index: {}]   ;;  %s7343_s2 = inlined_call_operand.vmem [shape: bf16[2,16,16,4], index: 2, kind: input, shape index: {}]   ;;  %s7344_s3 = inlined_call_operand.vmem [shape: f32[2,16,16,4], index: 3, kind: input, shape index: {}]   ;;  %s7345_s4 = inlined_call_operand.vmem [shape: f32[5,5,4], index: 4, kind: input, shape index: {}]   ;;  %s7346_s5 = inlined_call_operand.vmem [shape: f32[1,4], index: 5, kind: input, shape index: {}]   ;;  %s7347_s6 = inlined_call_operand.vmem [shape: bf16[4,4], index: 6, kind: input, shape index: {}]   ;;  %s7348_s7 = inlined_call_operand.vmem [shape: f32[1,4], index: 7, kind: input, shape index: {}]   ;;  %s7349_s8 = inlined_call_operand.vmem [shape: f32[1,4], index: 8, kind: input, shape index: {}]   ;;  %s7350_s9 = inlined_call_operand.vmem [shape: f32[1,4], index: 9, kind: input, shape index: {}]   ;;  %s7351_s10 = inlined_call_operand.vmem [shape: f32[1,4], index: 10, kind: input, shape index: {}]   ;;  %s7352_s11 = inlined_call_operand.vmem [shape: bf16[4,16], index: 11, kind: input, shape index: {}]   ;;  %s7353_s12 = inlined_call_operand.vmem [shape: f32[1,16], index: 12, kind: input, shape index: {}]   ;;  %s7354_s13 = inlined_call_operand.vmem [shape: f32[2,16,16,4], index: 13, kind: output, shape index: {0}]   ;;  %s7355_s14 = inlined_call_operand.vmem [shape: bf16[2,16,16,16], index: 14, kind: output, shape index: {1}]  }
   0x1   :  { %7377 = sst [smem:[#allocation21_spill]] %s7341_s0  ;;  %s5105_s15 = smov 0  }
   0x2   :  { %7378 = sst [smem:[#allocation22_spill]] %s7347_s6  ;;  %s5107_s16 = smov 0  }
   0x3   :  { %s5109_s17 = smov 0  }
   0x4 LB: > { %s34_s18 = sadd.s32 1, %s5015_s15  ;;  %s37_s19 = sadd.s32 1, %s5019_s16  ;;  %s5023_s17 = sphi %s5109_s17, %s25_s17   ;;  %s5019_s16 = sphi %s5107_s16, %s7434_s16   ;;  %s5015_s15 = sphi %s5105_s15, %s7433_s15   ;;  %s5011_s30 = sphi %s5103_s30, %s7432_s30   ;;  %s5007_s29 = sphi %s5101_s29, %s7431_s29  }
   0x5   : > { %p35_p0 = scmp.ge.s32.totalorder %s34_s18, 2  ;;  %p4673_p1 = scmp.ge.s32.totalorder %s5023_s17, 1 }
   0x6   : > { %p493_p2 = scmp.lt.s32.totalorder %s5023_s17, 5 }
   0x7   : > { %s7436_s18 = smov (%p35_p0, %s34_s18), 0  ;;  %s7438_s19 = smov (!%p35_p0, %s37_s19), %s5019_s16 }
   0x8   : > { %p494_p3 = pnand %p4673_p1, %p493_p2  ;;  %p39_p4 = scmp.ge.s32.totalorder %s7438_s19, 2 }
   0xa   : > { %s7440_s19 = smov (%p39_p4, %s7438_s19), 0  ;;  %497 = sbr.rel (%p494_p3) target bundleno = 1304 (0x518), region = 72 }
   0xb   : > { %7379 = sst [smem:[#allocation3_spill]] %s7440_s19 }
  0x11   : > { %s7380_s6 = sld [smem:[#allocation22_spill]]  ;;  %vm3722_vm0 = vcmask 1041408   ;;  %s4674_s22 = sshll.u32 %s5007_s29, 3  ;;  %vm680_vm1 = vcmask 24576   ;;  %v927_v1 = vlaneseq  ;;  %vm693_vm2 = vcmask 25601  }
  0x12   : > { %p590_p5 = scmp.lt.s32.totalorder %s5011_s30, 1  ;;  %p5141_p6 = scmp.lt.s32.totalorder %s4674_s22, 15  ;;  %v5025_v3 = vmov 0   ;;  %v905_v8 = vld [vmem:[%s7345_s4] sm:$0x1f]  ;;  %vm710_vm3 = vcmask 1040384  }
  0x13   : > { %s4678_s24 = sshll.u32 %s5007_s29, 2  ;;  %681 = vst.msk [vmem:[#allocation2] sm:$0x1] %vm680_vm1, %v5025_v3  ;;  %682 = vst.msk [vmem:[#allocation2 + $0xc] sm:$0x1] %vm680_vm1, %v5025_v3  ;;  %v928_v4 = vshrl.u32 %v927_v1, 7 }
  0x14   : > { %s7442_s30 = smov (!%p590_p5, %s5011_s30), 1  ;;  %683 = vst.msk [vmem:[#allocation2 + $0x18] sm:$0x1] %vm680_vm1, %v5025_v3  ;;  %684 = vst.msk [vmem:[#allocation2 + $0x24] sm:$0x1] %vm680_vm1, %v5025_v3  ;;  %s7444_s22 = smov (!%p5141_p6, %s4674_s22), 15 }
  0x15   : > { %685 = vst.msk [vmem:[#allocation2 + $0x30] sm:$0x1] %vm680_vm1, %v5025_v3  ;;  %686 = vst.msk [vmem:[#allocation2 + $0x3c] sm:$0x1] %vm680_vm1, %v5025_v3  ;;  %s4676_s25 = sshll.u32 %s7442_s30, 5  ;;  %s4675_s26 = sshll.u32 %s7444_s22, 1 }
  0x16   : > { %687 = vst.msk [vmem:[#allocation2 + $0x48] sm:$0x1] %vm680_vm1, %v5025_v3  ;;  %688 = vst.msk [vmem:[#allocation2 + $0x54] sm:$0x1] %vm680_vm1, %v5025_v3  ;;  %p603_p7 = scmp.lt.s32.totalorder %s4678_s24, 7  ;;  %s5179_s27 = sadd.s32 %s4676_s25, %s4675_s26  ;;  %v929_v5 = vsub.s32 0, %v928_v4 }
  0x17   : > { %v3689_v0 = vld [vmem:[%s7380_s6] sm:$0x3]  ;;  %689 = vst.msk [vmem:[#allocation2 + $0x60] sm:$0x1] %vm680_vm1, %v5025_v3  ;;  %690 = vst.msk [vmem:[#allocation2 + $0x6c] sm:$0x1] %vm680_vm1, %v5025_v3 }
  0x18   : > { %4876 = vmatprep.subr.msk.bf16.mxu0 %vm3722_vm0, %v3689_v0  ;;  %v3724_v2 = vsel %vm3722_vm0, %v3689_v0, 0  ;;  %694 = vst.msk [vmem:[#allocation2 + $0x8] sm:$0x2] %vm693_vm2, %v5025_v3  ;;  %695 = vst.msk [vmem:[#allocation2 + $0x14] sm:$0x2] %vm693_vm2, %v5025_v3  ;;  %s5182_s28 = sshll.u32 %s5179_s27, 2  ;;  %v5209_v15 = vrot.slane %v905_v8, %v929_v5 }
  0x19   : > { %4841 = vmatpush3.bf16.msra.mxu0 %v3724_v2  ;;  %696 = vst.msk [vmem:[#allocation2 + $0x20] sm:$0x2] %vm693_vm2, %v5025_v3  ;;  %697 = vst.msk [vmem:[#allocation2 + $0x2c] sm:$0x2] %vm693_vm2, %v5025_v3  ;;  %v973_v6 = vsub.s32 1, %v928_v4  ;;  %v1098_v7 = vsub.s32 2, %v928_v4  ;;  %s5207_s22 = scalar_lea.vmem %s7343_s2, %s5182_s28 }
  0x1a   : > { %698 = vst.msk [vmem:[#allocation2 + $0x38] sm:$0x2] %vm693_vm2, %v5025_v3  ;;  %699 = vst.msk [vmem:[#allocation2 + $0x44] sm:$0x2] %vm693_vm2, %v5025_v3  ;;  %s7382_s0 = sld [smem:[#allocation21_spill]]  ;;  %s4680_s6 = sshll.u32 %s7442_s30, 4 }
  0x1b   : > { %700 = vst.msk [vmem:[#allocation2 + $0x50] sm:$0x2] %vm693_vm2, %v5025_v3  ;;  %701 = vst.msk [vmem:[#allocation2 + $0x5c] sm:$0x2] %vm693_vm2, %v5025_v3  ;;  %v1223_v9 = vsub.s32 3, %v928_v4  ;;  %v1348_v10 = vsub.s32 4, %v928_v4  ;;  %v5211_v16 = vrot.slane %v905_v8, %v973_v6  ;;  %v5213_v17 = vrot.slane %v905_v8, %v1098_v7 }
  0x1c   : > { %702 = vst.msk [vmem:[#allocation2 + $0x68] sm:$0x2] %vm693_vm2, %v5025_v3  ;;  %703 = vst.msk [vmem:[#allocation2 + $0x74] sm:$0x2] %vm693_vm2, %v5025_v3  ;;  %s7446_s24 = smov (!%p603_p7, %s4678_s24), 7  ;;  %vm711_vm4 = vcmask 1044484  }
  0x1d   : > { %691 = vst.msk [vmem:[#allocation2 + $0x78] sm:$0x1] %vm680_vm1, %v5025_v3  ;;  %692 = vst.msk [vmem:[#allocation2 + $0x84] sm:$0x1] %vm680_vm1, %v5025_v3  ;;  %v906_v12 = vld [vmem:[%s7345_s4 + $0x8] sm:$0x1f]  ;;  %v5218_v19 = vrot.slane %v905_v8, %v1223_v9  ;;  %v5220_v20 = vrot.slane %v905_v8, %v1348_v10 }
  0x1e   : > { %704 = vst.msk [vmem:[#allocation2 + $0x80] sm:$0x2] %vm693_vm2, %v5025_v3  ;;  %705 = vst.msk [vmem:[#allocation2 + $0x8c] sm:$0x2] %vm693_vm2, %v5025_v3  ;;  %vm729_vm5 = vcmask 27649   ;;  %s4679_s30 = sshll.u32 %s7446_s24, 1  ;;  %v5222_v21 = vrot.slane %v906_v12, %v929_v5  ;;  %v5224_v22 = vrot.slane %v906_v12, %v973_v6  ;;  %v5230_v24 = vrot.slane %v906_v12, %v1098_v7 }
  0x1f   : > { %v907_v13 = vld [vmem:[%s7345_s4 + $0x10] sm:$0x1f]  ;;  %7383 = vst [vmem:[#allocation4_spill] sm:$0xff] %v5211_v16  ;;  %7384 = vst [vmem:[#allocation5_spill] sm:$0xff] %v5213_v17  ;;  %s607_s29 = sadd.s32 %s4680_s6, %s4679_s30  ;;  %vm731_vm6 = vcmask 27648   ;;  %v5232_v25 = vrot.slane %v906_v12, %v1223_v9  ;;  %v5234_v26 = vrot.slane %v906_v12, %v1348_v10  ;;  %v5250_v32 = vld [vmem:[%s5207_s22] sm:$0xff]  }
  0x20   : > { %s5188_s23 = scalar_lea.vmem %s7382_s0, %s5182_s28  ;;  %v908_v18 = vld [vmem:[%s7345_s4 + $0x18] sm:$0x1f]  ;;  %s4681_s0 = sshll.u32 %s607_s29, 2  ;;  %v909_v23 = vld [vmem:[%s7345_s4 + $0x20] sm:$0x1f]  ;;  %v5236_v27 = vrot.slane %v907_v13, %v929_v5  ;;  %v5241_v28 = vrot.slane %v907_v13, %v973_v6  ;;  %v5243_v29 = vrot.slane %v907_v13, %v1098_v7  ;;  %v5245_v30 = vrot.slane %v907_v13, %v1223_v9  ;;  %7385 = vst [vmem:[#allocation6_spill] sm:$0xff] %v5250_v32  ;;  %vm5282_vm7 = vmor %vm710_vm3, %vm711_vm4 }
  0x21   : > { %v656_v11 = vld [vmem:[%s5188_s23] sm:$0xf]  ;;  %s609_s30 = scalar_lea.vmem %s7342_s1, %s4681_s0  ;;  %v5247_v31 = vrot.slane %v907_v13, %v1348_v10  ;;  %v5254_v36 = vrot.slane %v908_v18, %v929_v5  ;;  %v5256_v37 = vrot.slane %v908_v18, %v973_v6  ;;  %v5258_v38 = vrot.slane %v908_v18, %v1098_v7  ;;  %v657_v46 = vld [vmem:[%s5188_s23 + $0x4] sm:$0xf]  ;;  %v658_v47 = vld [vmem:[%s5188_s23 + $0x8] sm:$0xf]  ;;  %s7284_s29 = scalar_lea.vmem %s7355_s14, %s5182_s28 }
  0x22   : > { %v780_v14 = vrot.slane %v656_v11, 7  ;;  %v672_v33 = vld [vmem:[%s609_s30] sm:$0xf]  ;;  %v673_v34 = vld [vmem:[%s609_s30 + $0x4] sm:$0xf]  ;;  %v5260_v42 = vrot.slane %v908_v18, %v1223_v9  ;;  %v5262_v43 = vrot.slane %v908_v18, %v1348_v10  ;;  %v5264_v44 = vrot.slane %v909_v23, %v929_v5  ;;  %s4689_s24 = sshll.u32 %s5179_s27, 3 }
  0x23   : > { %v674_v39 = vld [vmem:[%s609_s30 + $0x8] sm:$0xf]  ;;  %v675_v40 = vld [vmem:[%s609_s30 + $0xc] sm:$0xf]  ;;  %v676_v41 = vld [vmem:[%s609_s30 + $0x10] sm:$0xf]  ;;  %v5266_v45 = vrot.slane %v909_v23, %v973_v6  ;;  %v5270_v51 = vrot.slane %v909_v23, %v1098_v7  ;;  %v5272_v52 = vrot.slane %v909_v23, %v1223_v9  ;;  %v5274_v53 = vrot.slane %v909_v23, %v1348_v10  ;;  %s6948_s26 = scalar_lea.vmem %s7354_s13, %s4689_s24 }
  0x24   : > { %845 = vst.msk [vmem:[#allocation2 + $0x18] sm:$0xe] %vm729_vm5, %v780_v14  ;;  %v5252_v35 = vrot.slane %v780_v14, 4  ;;  %v677_v48 = vld [vmem:[%s609_s30 + $0x14] sm:$0xf]  ;;  %v713_v57 = vrot.slane %v672_v33, 7 }
  0x25   : > { %v678_v49 = vld [vmem:[%s609_s30 + $0x18] sm:$0xf]  ;;  %v679_v50 = vld [vmem:[%s609_s30 + $0x1c] sm:$0xf]  ;;  %v659_v55 = vld [vmem:[%s5188_s23 + $0xc] sm:$0xf]  ;;  %s6915_s30 = scalar_lea.vmem %s7344_s3, %s4689_s24 }
  0x26   : > { %v660_v56 = vld [vmem:[%s5188_s23 + $0x10] sm:$0xf]  ;;  %v715_v58 = vrot.slane %v673_v34, 7  ;;  %v718_v59 = vrot.slane %v674_v39, 7  ;;  %v720_v60 = vrot.slane %v675_v40, 7  ;;  %v741_v63 = vrot.slane %v676_v41, 7 }
  0x27   : > { %v661_v61 = vld [vmem:[%s5188_s23 + $0x14] sm:$0xf]  ;;  %v743_v0 = vrot.slane %v677_v48, 7  ;;  %v746_v1 = vrot.slane %v678_v49, 7  ;;  %v748_v2 = vrot.slane %v679_v50, 7  ;;  %v714_v4 = vrot.slane %v713_v57, 4 }
  0x28   : > { %v662_v3 = vld [vmem:[%s5188_s23 + $0x18] sm:$0xf]  ;;  %v717_v5 = vrot.slane %v715_v58, 4  ;;  %v719_v6 = vrot.slane %v718_v59, 4  ;;  %v722_v7 = vrot.slane %v720_v60, 4  ;;  %v742_v9 = vrot.slane %v741_v63, 4 }
  0x29   : > { %730 = vst.msk [vmem:[#allocation2] sm:$0xe] %vm729_vm5, %v713_v57  ;;  %734 = vst.msk [vmem:[#allocation2 + $0xc] sm:$0xe] %vm729_vm5, %v718_v59  ;;  %v5290_v8 = vld [vmem:[%s5188_s23 + $0x1c] sm:$0xf]  ;;  %v716_v18 = vsel %vm5282_vm7, %v714_v4, %v715_v58 }
  0x2a   : > { %v745_v10 = vrot.slane %v743_v0, 4  ;;  %v747_v11 = vrot.slane %v746_v1, 4  ;;  %v750_v12 = vrot.slane %v748_v2, 4  ;;  %758 = vst.msk [vmem:[#allocation2 + $0x78] sm:$0xe] %vm729_vm5, %v741_v63  ;;  %v721_v23 = vsel %vm5282_vm7, %v719_v6, %v720_v60 }
  0x2b   : > { %761 = vst.msk [vmem:[#allocation2 + $0x84] sm:$0xe] %vm729_vm5, %v746_v1  ;;  %v664_v13 = vld [vmem:[%s5188_s23 + $0x20] sm:$0xf]  ;;  %v665_v14 = vld [vmem:[%s5188_s23 + $0x24] sm:$0xf]  ;;  %v744_v41 = vsel %vm5282_vm7, %v742_v9, %v743_v0 }
  0x2c   : > { %733 = vst.msk [vmem:[#allocation2 + $0x8] sm:$0x1] %vm680_vm1, %v717_v5  ;;  %736 = vst.msk [vmem:[#allocation2 + $0x14] sm:$0x1] %vm680_vm1, %v722_v7  ;;  %v782_v33 = vrot.slane %v657_v46, 7  ;;  %v785_v34 = vrot.slane %v658_v47, 7  ;;  %v749_v48 = vsel %vm5282_vm7, %v747_v11, %v748_v2 }
  0x2d   : > { %v666_v39 = vld [vmem:[%s5188_s23 + $0x28] sm:$0xf]  ;;  %v5304_v40 = vld [vmem:[%s5188_s23 + $0x2c] sm:$0xf]  ;;  %732 = vst.msk [vmem:[#allocation2 + $0x4] sm:$0xf] %vm731_vm6, %v716_v18 }
  0x2e   : > { %735 = vst.msk [vmem:[#allocation2 + $0x10] sm:$0xf] %vm731_vm6, %v721_v23  ;;  %v787_v46 = vrot.slane %v659_v55, 7  ;;  %v790_v47 = vrot.slane %v660_v56, 7  ;;  %v668_v49 = vld [vmem:[%s5188_s23 + $0x30] sm:$0xf]  ;;  %v783_v50 = vsel %vm5282_vm7, %v5252_v35, %v782_v33 }
  0x2f   : > { %760 = vst.msk [vmem:[#allocation2 + $0x80] sm:$0x1] %vm680_vm1, %v745_v10  ;;  %763 = vst.msk [vmem:[#allocation2 + $0x8c] sm:$0x1] %vm680_vm1, %v750_v12  ;;  %v784_v57 = vrot.slane %v782_v33, 4  ;;  %v786_v58 = vrot.slane %v785_v34, 4 }
  0x30   : > { %759 = vst.msk [vmem:[#allocation2 + $0x7c] sm:$0xf] %vm731_vm6, %v744_v41  ;;  %762 = vst.msk [vmem:[#allocation2 + $0x88] sm:$0xf] %vm731_vm6, %v749_v48  ;;  %v792_v59 = vrot.slane %v661_v61, 7  ;;  %v789_v63 = vrot.slane %v787_v46, 4 }
  0x31   : > { %848 = vst.msk [vmem:[#allocation2 + $0x24] sm:$0xe] %vm729_vm5, %v785_v34  ;;  %v669_v60 = vld [vmem:[%s5188_s23 + $0x34] sm:$0xf]  ;;  %v791_v55 = vrot.slane %v790_v47, 4  ;;  %v795_v56 = vrot.slane %v662_v3, 7  ;;  %v788_v35 = vsel %vm5282_vm7, %v786_v58, %v787_v46 }
  0x32   : > { %v797_v0 = vrot.slane %v5290_v8, 7  ;;  %846 = vst.msk [vmem:[#allocation2 + $0x1c] sm:$0xf] %vm731_vm6, %v783_v50  ;;  %v670_v1 = vld [vmem:[%s5188_s23 + $0x38] sm:$0xf]  ;;  %v794_v2 = vrot.slane %v792_v59, 4 }
  0x33   : > { %851 = vst.msk [vmem:[#allocation2 + $0x30] sm:$0xe] %vm729_vm5, %v790_v47  ;;  %v800_v4 = vrot.slane %v664_v13, 7  ;;  %v802_v5 = vrot.slane %v665_v14, 7  ;;  %v671_v61 = vld [vmem:[%s5188_s23 + $0x3c] sm:$0xf]  ;;  %v793_v6 = vsel %vm5282_vm7, %v791_v55, %v792_v59 }
  0x34   : > { %847 = vst.msk [vmem:[#allocation2 + $0x20] sm:$0x1] %vm680_vm1, %v784_v57  ;;  %v796_v3 = vrot.slane %v795_v56, 4  ;;  %v799_v7 = vrot.slane %v797_v0, 4  ;;  %v805_v8 = vrot.slane %v666_v39, 7  ;;  %v807_v11 = vrot.slane %v5304_v40, 7 }
  0x35   : > { %849 = vst.msk [vmem:[#allocation2 + $0x28] sm:$0xf] %vm731_vm6, %v788_v35  ;;  %v801_v9 = vrot.slane %v800_v4, 4  ;;  %v804_v10 = vrot.slane %v802_v5, 4  ;;  %v810_v12 = vrot.slane %v668_v49, 7  ;;  %v812_v18 = vrot.slane %v669_v60, 7 }
  0x36   : > { %850 = vst.msk [vmem:[#allocation2 + $0x2c] sm:$0x1] %vm680_vm1, %v789_v63  ;;  %853 = vst.msk [vmem:[#allocation2 + $0x38] sm:$0x1] %vm680_vm1, %v794_v2  ;;  %v798_v13 = vsel %vm5282_vm7, %v796_v3, %v797_v0  ;;  %v806_v14 = vrot.slane %v805_v8, 4  ;;  %v815_v23 = vrot.slane %v670_v1, 7 }
  0x37   : > { %854 = vst.msk [vmem:[#allocation2 + $0x3c] sm:$0xe] %vm729_vm5, %v795_v56  ;;  %857 = vst.msk [vmem:[#allocation2 + $0x48] sm:$0xe] %vm729_vm5, %v800_v4  ;;  %v803_v33 = vsel %vm5282_vm7, %v801_v9, %v802_v5  ;;  %v809_v34 = vrot.slane %v807_v11, 4  ;;  %v811_v39 = vrot.slane %v810_v12, 4 }
  0x38   : > { %852 = vst.msk [vmem:[#allocation2 + $0x34] sm:$0xf] %vm731_vm6, %v793_v6  ;;  %v817_v40 = vrot.slane %v671_v61, 7  ;;  %855 = vst.msk [vmem:[#allocation2 + $0x40] sm:$0xf] %vm731_vm6, %v798_v13  ;;  %v4755_v41 = vld [vmem:[#allocation2] sm:$0xff]   ;;  %v808_v46 = vsel %vm5282_vm7, %v806_v14, %v807_v11 }
  0x39   : > { %856 = vst.msk [vmem:[#allocation2 + $0x44] sm:$0x1] %vm680_vm1, %v799_v7  ;;  %859 = vst.msk [vmem:[#allocation2 + $0x50] sm:$0x1] %vm680_vm1, %v804_v10  ;;  %v872_v48 = vld [vmem:[#allocation2 + $0xc] sm:$0xff]   ;;  %vm1023_vm8 = vcmask 1046528   ;;  %v813_v58 = vsel %vm5282_vm7, %v811_v39, %v812_v18  ;;  %v5357_v60 = vunpack.c.l.bf16 %v4755_v41  ;;  %v5359_v63 = vunpack.c.h.bf16 %v4755_v41 }
  0x3a   : > { %860 = vst.msk [vmem:[#allocation2 + $0x54] sm:$0xe] %vm729_vm5, %v805_v8  ;;  %863 = vst.msk [vmem:[#allocation2 + $0x60] sm:$0xe] %vm729_vm5, %v810_v12  ;;  %v814_v47 = vrot.slane %v812_v18, 4  ;;  %v816_v49 = vrot.slane %v815_v23, 4  ;;  %v5369_v4 = vunpack.c.l.bf16 %v872_v48  ;;  %v5373_v6 = vunpack.c.h.bf16 %v872_v48 }
  0x3b   : > { %858 = vst.msk [vmem:[#allocation2 + $0x4c] sm:$0xf] %vm731_vm6, %v803_v33  ;;  %v871_v50 = vld [vmem:[#allocation2 + $0x8] sm:$0x3]  ;;  %v819_v59 = vrot.slane %v817_v40, 4  ;;  %v4810_v56 = vld [vmem:[#allocation2 + $0x18] sm:$0xff]   ;;  %v931_v62 = vmul.f32 %v5357_v60, %v5209_v15  ;;  %v932_v3 = vmul.f32 %v5359_v63, %v5209_v15 }
  0x3c   : > { %866 = vst.msk [vmem:[#allocation2 + $0x6c] sm:$0xe] %vm729_vm5, %v815_v23  ;;  %v874_v55 = vld [vmem:[#allocation2 + $0x14] sm:$0x3]  ;;  %v818_v0 = vsel %vm5282_vm7, %v816_v49, %v817_v40  ;;  %v5365_v1 = vunpack.c.l.bf16 %v4810_v56  ;;  %v5367_v35 = vunpack.c.h.bf16 %v4810_v56  ;;  %v877_v2 = vld [vmem:[#allocation2 + $0x20] sm:$0x3]  ;;  %v963_v7 = vunpack.c.l.bf16 %v871_v50 }
  0x3d   : > { %861 = vst.msk [vmem:[#allocation2 + $0x58] sm:$0xf] %vm731_vm6, %v808_v46  ;;  %864 = vst.msk [vmem:[#allocation2 + $0x64] sm:$0xf] %vm731_vm6, %v813_v58  ;;  %v878_v5 = vld [vmem:[#allocation2 + $0x24] sm:$0xff]   ;;  %vm1148_vm9 = vcmask 1045504   ;;  %v5383_v12 = vunpack.c.l.bf16 %v874_v55  ;;  %v5385_v13 = vunpack.c.l.bf16 %v877_v2  ;;  %v976_v46 = vmul.f32 %v5359_v63, %v5211_v16 }
  0x3e   : > { %862 = vst.msk [vmem:[#allocation2 + $0x5c] sm:$0x1] %vm680_vm1, %v809_v34  ;;  %865 = vst.msk [vmem:[#allocation2 + $0x68] sm:$0x1] %vm680_vm1, %v814_v47  ;;  %v880_v61 = vld [vmem:[#allocation2 + $0x2c] sm:$0x3]  ;;  %v5379_v10 = vunpack.c.l.bf16 %v878_v5  ;;  %v5381_v11 = vunpack.c.h.bf16 %v878_v5  ;;  %v975_v34 = vmul.f32 %v5357_v60, %v5211_v16  ;;  %v977_v47 = vmul.f32 %v5211_v16, %v963_v7 }
  0x3f   : > { %867 = vst.msk [vmem:[#allocation2 + $0x70] sm:$0xf] %vm731_vm6, %v818_v0  ;;  %v4811_v8 = vld [vmem:[#allocation2 + $0x30] sm:$0xff]   ;;  %v883_v9 = vld [vmem:[#allocation2 + $0x38] sm:$0x3]  ;;  %v5391_v33 = vunpack.c.l.bf16 %v880_v61  ;;  %vm1273_vm10 = vcmask 1044480   ;;  %v1100_v55 = vmul.f32 %v5357_v60, %v5213_v17 }
  0x40   : > { %868 = vst.msk [vmem:[#allocation2 + $0x74] sm:$0x1] %vm680_vm1, %v819_v59  ;;  %v5387_v14 = vunpack.c.l.bf16 %v4811_v8  ;;  %v5389_v18 = vunpack.c.h.bf16 %v4811_v8  ;;  %v886_v23 = vld [vmem:[#allocation2 + $0x44] sm:$0x3]  ;;  %v884_v39 = vld [vmem:[#allocation2 + $0x3c] sm:$0xff]   ;;  %v5395_v41 = vunpack.c.l.bf16 %v883_v9  ;;  %vm1398_vm11 = vcmask 1043456  }
  0x41   : > { %v889_v40 = vld [vmem:[#allocation2 + $0x50] sm:$0x3]  ;;  %v5397_v48 = vunpack.c.l.bf16 %v886_v23  ;;  %v5402_v50 = vunpack.c.l.bf16 %v884_v39  ;;  %v5404_v58 = vunpack.c.h.bf16 %v884_v39  ;;  %v1024_v59 = vrot.slane %v975_v34, 1 }
  0x42   : > { %v4812_v49 = vld [vmem:[#allocation2 + $0x48] sm:$0xff]   ;;  %v5410_v5 = vunpack.c.l.bf16 %v889_v40  ;;  %v1025_v61 = vrot.slane %v976_v46, 1  ;;  %v1027_v8 = vrot.slane %v977_v47, 1  ;;  %v1101_v34 = vmul.f32 %v5359_v63, %v5213_v17 }
  0x43   : > { %7388 = vst [vmem:[#allocation7_spill] sm:$0xff] %v5397_v48  ;;  %7389 = vst [vmem:[#allocation8_spill] sm:$0xff] %v5402_v50  ;;  %v5408_v56 = vunpack.c.l.bf16 %v4812_v49  ;;  %v5412_v9 = vunpack.c.h.bf16 %v4812_v49  ;;  %v1102_v49 = vmul.f32 %v5213_v17, %v963_v7  ;;  %vm3697_vm12 = vcmask 31744  }
  0x44   : > { %7390 = vst [vmem:[#allocation9_spill] sm:$0xff] %v5404_v58  ;;  %v890_v0 = vld [vmem:[#allocation2 + $0x54] sm:$0xff]   ;;  %7392 = vst [vmem:[#allocation11_spill] sm:$0xff] %v5410_v5  ;;  %v4813_v23 = vld [vmem:[#allocation2 + $0x60] sm:$0xff]   ;;  %v1028_v40 = vsel %vm1023_vm8, %v1025_v61, %v1027_v8  ;;  %v1149_v5 = vrot.slane %v1100_v55, 2  ;;  %vm4434_vm13 = vcmask 125952  }
  0x45   : > { %7391 = vst [vmem:[#allocation10_spill] sm:$0xff] %v5408_v56  ;;  %v892_v2 = vld [vmem:[#allocation2 + $0x5c] sm:$0x3]  ;;  %7393 = vst [vmem:[#allocation12_spill] sm:$0xff] %v5412_v9  ;;  %v5414_v57 = vunpack.c.l.bf16 %v890_v0  ;;  %v5416_v54 = vunpack.c.h.bf16 %v890_v0  ;;  %v5420_v39 = vunpack.c.l.bf16 %v4813_v23  ;;  %v1026_v56 = vsel %vm1023_vm8, %v1024_v59, %v1025_v61 }
  0x46   : > { %v5422_v48 = vunpack.c.l.bf16 %v892_v2  ;;  %v1080_v46 = vadd.f32 %v1026_v56, %v931_v62  ;;  %v1081_v47 = vadd.f32 %v1028_v40, %v932_v3  ;;  %v1150_v9 = vrot.slane %v1101_v34, 2 }
  0x47   : > { %7394 = vst [vmem:[#allocation13_spill] sm:$0xff] %v5414_v57  ;;  %7395 = vst [vmem:[#allocation14_spill] sm:$0xff] %v5416_v54  ;;  %v1225_v0 = vmul.f32 %v5357_v60, %v5218_v19  ;;  %v1226_v54 = vmul.f32 %v5359_v63, %v5218_v19  ;;  %v1152_v2 = vrot.slane %v1102_v49, 2  ;;  %v1350_v59 = vmul.f32 %v5357_v60, %v5220_v20 }
  0x48   : > { %7396 = vst [vmem:[#allocation15_spill] sm:$0xff] %v5420_v39  ;;  %7397 = vst [vmem:[#allocation16_spill] sm:$0xff] %v5422_v48  ;;  %v1227_v39 = vmul.f32 %v5218_v19, %v963_v7  ;;  %v1351_v62 = vmul.f32 %v5359_v63, %v5220_v20  ;;  %v1352_v3 = vmul.f32 %v5220_v20, %v963_v7  ;;  %v5441_v32 = vunpack.c.h.bf16 %v4813_v23 }
  0x49   : > { %v1151_v55 = vsel %vm1148_vm9, %v1149_v5, %v1150_v9  ;;  %v1274_v56 = vrot.slane %v1225_v0, 3  ;;  %v1275_v61 = vrot.slane %v1226_v54, 3  ;;  %v1153_v34 = vsel %vm1148_vm9, %v1150_v9, %v1152_v2 }
  0x4a   : > { %v1277_v8 = vrot.slane %v1227_v39, 3  ;;  %v1205_v40 = vadd.f32 %v1151_v55, %v1080_v46  ;;  %v1399_v48 = vrot.slane %v1350_v59, 4  ;;  %v1400_v57 = vrot.slane %v1351_v62, 4  ;;  %7398 = vst [vmem:[#allocation17_spill] sm:$0xff] %v5441_v32 }
  0x4b   : > { %v1206_v58 = vadd.f32 %v1153_v34, %v1081_v47  ;;  %v1276_v49 = vsel %vm1273_vm10, %v1274_v56, %v1275_v61  ;;  %v1402_v50 = vrot.slane %v1352_v3, 4  ;;  %v1477_v54 = vmul.f32 %v5222_v21, %v5369_v4 }
  0x4c   : > { %v1278_v60 = vsel %vm1273_vm10, %v1275_v61, %v1277_v8  ;;  %v1330_v63 = vadd.f32 %v1276_v49, %v1205_v40  ;;  %v1401_v7 = vsel %vm1398_vm11, %v1399_v48, %v1400_v57  ;;  %v1478_v39 = vmul.f32 %v5222_v21, %v5373_v6 }
  0x4d   : > { %v1331_v5 = vadd.f32 %v1278_v60, %v1206_v58  ;;  %v1403_v9 = vsel %vm1398_vm11, %v1400_v57, %v1402_v50  ;;  %v1514_v46 = vmul.f32 %v5224_v22, %v5369_v4  ;;  %v1515_v23 = vmul.f32 %v5224_v22, %v5373_v6 }
  0x4e   : > { %v1455_v47 = vadd.f32 %v1401_v7, %v1330_v63  ;;  %v1516_v0 = vmul.f32 %v5224_v22, %v5383_v12  ;;  %v1638_v48 = vmul.f32 %v5230_v24, %v5369_v4  ;;  %v1639_v57 = vmul.f32 %v5230_v24, %v5373_v6  ;;  %v895_v7 = vld [vmem:[#allocation2 + $0x68] sm:$0x3] }
  0x4f   : > { %v1456_v2 = vadd.f32 %v1403_v9, %v1331_v5  ;;  %v1562_v58 = vrot.slane %v1514_v46, 1  ;;  %v1640_v50 = vmul.f32 %v5230_v24, %v5383_v12  ;;  %v1563_v62 = vrot.slane %v1515_v23, 1 }
  0x50   : > { %v1493_v59 = vadd.f32 %v1477_v54, %v1455_v47  ;;  %v1565_v3 = vrot.slane %v1516_v0, 1  ;;  %v1686_v55 = vrot.slane %v1638_v48, 2  ;;  %v1687_v61 = vrot.slane %v1639_v57, 2  ;;  %v5473_v48 = vld [vmem:[#allocation2 + $0x6c] sm:$0xff]  }
  0x51   : > { %v1494_v56 = vadd.f32 %v1478_v39, %v1456_v2  ;;  %v1689_v8 = vrot.slane %v1640_v50, 2  ;;  %v1762_v34 = vmul.f32 %v5232_v25, %v5369_v4  ;;  %v1564_v40 = vsel %vm1023_vm8, %v1562_v58, %v1563_v62 }
  0x52   : > { %v1566_v49 = vsel %vm1023_vm8, %v1563_v62, %v1565_v3  ;;  %v1763_v60 = vmul.f32 %v5232_v25, %v5373_v6  ;;  %v1764_v63 = vmul.f32 %v5232_v25, %v5383_v12  ;;  %v1618_v54 = vadd.f32 %v1564_v40, %v1493_v59 }
  0x53   : > { %v1619_v5 = vadd.f32 %v1566_v49, %v1494_v56  ;;  %v1688_v9 = vsel %vm1148_vm9, %v1686_v55, %v1687_v61  ;;  %v1690_v39 = vsel %vm1148_vm9, %v1687_v61, %v1689_v8  ;;  %v1810_v46 = vrot.slane %v1762_v34, 3 }
  0x54   : > { %v1811_v47 = vrot.slane %v1763_v60, 3  ;;  %v1813_v23 = vrot.slane %v1764_v63, 3  ;;  %v1886_v0 = vmul.f32 %v5234_v26, %v5369_v4  ;;  %v1742_v2 = vadd.f32 %v1688_v9, %v1618_v54 }
  0x55   : > { %v1743_v58 = vadd.f32 %v1690_v39, %v1619_v5  ;;  %v1887_v57 = vmul.f32 %v5234_v26, %v5373_v6  ;;  %v1888_v50 = vmul.f32 %v5234_v26, %v5383_v12  ;;  %v5479_v59 = vunpack.c.l.bf16 %v895_v7 }
  0x56   : > { %v1812_v62 = vsel %vm1273_vm10, %v1810_v46, %v1811_v47  ;;  %v1814_v3 = vsel %vm1273_vm10, %v1811_v47, %v1813_v23  ;;  %v1934_v55 = vrot.slane %v1886_v0, 4  ;;  %v5484_v40 = vunpack.c.l.bf16 %v5473_v48 }
  0x57   : > { %7399 = vst [vmem:[#allocation18_spill] sm:$0xff] %v5479_v59  ;;  %v1866_v56 = vadd.f32 %v1812_v62, %v1742_v2  ;;  %v1867_v61 = vadd.f32 %v1814_v3, %v1743_v58  ;;  %v1935_v8 = vrot.slane %v1887_v57, 4  ;;  %v1937_v34 = vrot.slane %v1888_v50, 4 }
  0x58   : > { %7400 = vst [vmem:[#allocation19_spill] sm:$0xff] %v5484_v40  ;;  %v2012_v49 = vmul.f32 %v5365_v1, %v5236_v27  ;;  %v2013_v60 = vmul.f32 %v5367_v35, %v5236_v27  ;;  %v2049_v63 = vmul.f32 %v5365_v1, %v5241_v28  ;;  %v2050_v5 = vmul.f32 %v5367_v35, %v5241_v28 }
  0x59   : > { %v1936_v7 = vsel %vm1398_vm11, %v1934_v55, %v1935_v8  ;;  %v1938_v54 = vsel %vm1398_vm11, %v1935_v8, %v1937_v34  ;;  %v2051_v9 = vmul.f32 %v5241_v28, %v5385_v13  ;;  %v2173_v23 = vmul.f32 %v5365_v1, %v5243_v29 }
  0x5a   : > { %v1990_v39 = vadd.f32 %v1936_v7, %v1866_v56  ;;  %v1991_v46 = vadd.f32 %v1938_v54, %v1867_v61  ;;  %v2097_v47 = vrot.slane %v2049_v63, 1  ;;  %v2098_v0 = vrot.slane %v2050_v5, 1 }
  0x5b   : > { %v2100_v2 = vrot.slane %v2051_v9, 1  ;;  %v2174_v58 = vmul.f32 %v5367_v35, %v5243_v29  ;;  %v2175_v57 = vmul.f32 %v5243_v29, %v5385_v13  ;;  %v2221_v3 = vrot.slane %v2173_v23, 2 }
  0x5c   : > { %v2028_v50 = vadd.f32 %v2012_v49, %v1990_v39  ;;  %v2029_v62 = vadd.f32 %v2013_v60, %v1991_v46  ;;  %v2297_v55 = vmul.f32 %v5365_v1, %v5245_v30  ;;  %v2099_v56 = vsel %vm1023_vm8, %v2097_v47, %v2098_v0 }
  0x5d   : > { %v2101_v61 = vsel %vm1023_vm8, %v2098_v0, %v2100_v2  ;;  %v2222_v8 = vrot.slane %v2174_v58, 2  ;;  %v2224_v34 = vrot.slane %v2175_v57, 2  ;;  %v2298_v54 = vmul.f32 %v5367_v35, %v5245_v30 }
  0x5e   : > { %v2153_v63 = vadd.f32 %v2099_v56, %v2028_v50  ;;  %v2154_v7 = vadd.f32 %v2101_v61, %v2029_v62  ;;  %v2299_v5 = vmul.f32 %v5245_v30, %v5385_v13  ;;  %v2345_v9 = vrot.slane %v2297_v55, 3 }
  0x5f   : > { %v2223_v49 = vsel %vm1148_vm9, %v2221_v3, %v2222_v8  ;;  %v2225_v60 = vsel %vm1148_vm9, %v2222_v8, %v2224_v34  ;;  %v2421_v39 = vmul.f32 %v5365_v1, %v5247_v31  ;;  %v2346_v23 = vrot.slane %v2298_v54, 3 }
  0x60   : > { %v2277_v46 = vadd.f32 %v2223_v49, %v2153_v63  ;;  %v2278_v47 = vadd.f32 %v2225_v60, %v2154_v7  ;;  %v2348_v0 = vrot.slane %v2299_v5, 3  ;;  %v2422_v2 = vmul.f32 %v5367_v35, %v5247_v31 }
  0x61   : > { %v2423_v58 = vmul.f32 %v5247_v31, %v5385_v13  ;;  %v2469_v57 = vrot.slane %v2421_v39, 4  ;;  %v2547_v50 = vmul.f32 %v5254_v36, %v5379_v10  ;;  %v2347_v62 = vsel %vm1273_vm10, %v2345_v9, %v2346_v23 }
  0x62   : > { %v2349_v3 = vsel %vm1273_vm10, %v2346_v23, %v2348_v0  ;;  %v2548_v55 = vmul.f32 %v5254_v36, %v5381_v11  ;;  %v2584_v56 = vmul.f32 %v5256_v37, %v5379_v10  ;;  %v2401_v61 = vadd.f32 %v2347_v62, %v2277_v46 }
  0x63   : > { %v2402_v8 = vadd.f32 %v2349_v3, %v2278_v47  ;;  %v2470_v34 = vrot.slane %v2422_v2, 4  ;;  %v2472_v63 = vrot.slane %v2423_v58, 4  ;;  %v2585_v7 = vmul.f32 %v5256_v37, %v5381_v11 }
  0x64   : > { %v2586_v54 = vmul.f32 %v5256_v37, %v5391_v33  ;;  %v2632_v5 = vrot.slane %v2584_v56, 1  ;;  %v2708_v49 = vmul.f32 %v5258_v38, %v5379_v10  ;;  %v2709_v39 = vmul.f32 %v5258_v38, %v5381_v11 }
  0x65   : > { %v2471_v60 = vsel %vm1398_vm11, %v2469_v57, %v2470_v34  ;;  %v2473_v9 = vsel %vm1398_vm11, %v2470_v34, %v2472_v63  ;;  %v2710_v46 = vmul.f32 %v5258_v38, %v5391_v33  ;;  %v2633_v0 = vrot.slane %v2585_v7, 1 }
  0x66   : > { %v2525_v47 = vadd.f32 %v2471_v60, %v2401_v61  ;;  %v2526_v23 = vadd.f32 %v2473_v9, %v2402_v8  ;;  %v2635_v2 = vrot.slane %v2586_v54, 1  ;;  %v2756_v58 = vrot.slane %v2708_v49, 2 }
  0x67   : > { %v2757_v62 = vrot.slane %v2709_v39, 2  ;;  %v2759_v3 = vrot.slane %v2710_v46, 2  ;;  %v2832_v56 = vmul.f32 %v5260_v42, %v5379_v10  ;;  %v2634_v34 = vsel %vm1023_vm8, %v2632_v5, %v2633_v0 }
  0x68   : > { %v2563_v40 = vadd.f32 %v2547_v50, %v2525_v47  ;;  %v2564_v57 = vadd.f32 %v2548_v55, %v2526_v23  ;;  %v2636_v63 = vsel %vm1023_vm8, %v2633_v0, %v2635_v2  ;;  %v2833_v61 = vmul.f32 %v5260_v42, %v5381_v11 }
  0x69   : > { %v2758_v59 = vsel %vm1148_vm9, %v2756_v58, %v2757_v62  ;;  %v2760_v32 = vsel %vm1148_vm9, %v2757_v62, %v2759_v3  ;;  %v2834_v8 = vmul.f32 %v5260_v42, %v5391_v33  ;;  %v2880_v49 = vrot.slane %v2832_v56, 3 }
  0x6a   : > { %v2688_v7 = vadd.f32 %v2634_v34, %v2563_v40  ;;  %v2689_v54 = vadd.f32 %v2636_v63, %v2564_v57  ;;  %v2956_v50 = vmul.f32 %v5262_v43, %v5379_v10  ;;  %v2881_v55 = vrot.slane %v2833_v61, 3 }
  0x6b   : > { %v2883_v5 = vrot.slane %v2834_v8, 3  ;;  %v2957_v60 = vmul.f32 %v5262_v43, %v5381_v11  ;;  %v2958_v9 = vmul.f32 %v5262_v43, %v5391_v33  ;;  %v3082_v23 = vmul.f32 %v5387_v14, %v5264_v44 }
  0x6c   : > { %v2812_v39 = vadd.f32 %v2758_v59, %v2688_v7  ;;  %v2813_v46 = vadd.f32 %v2760_v32, %v2689_v54  ;;  %v3004_v47 = vrot.slane %v2956_v50, 4  ;;  %v2882_v40 = vsel %vm1273_vm10, %v2880_v49, %v2881_v55 }
  0x6d   : > { %v2884_v0 = vsel %vm1273_vm10, %v2881_v55, %v2883_v5  ;;  %v3005_v2 = vrot.slane %v2957_v60, 4  ;;  %v3007_v58 = vrot.slane %v2958_v9, 4  ;;  %v3083_v56 = vmul.f32 %v5389_v18, %v5264_v44 }
  0x6e   : > { %v2936_v62 = vadd.f32 %v2882_v40, %v2812_v39  ;;  %v2937_v3 = vadd.f32 %v2884_v0, %v2813_v46  ;;  %v3119_v57 = vmul.f32 %v5387_v14, %v5266_v45  ;;  %v3120_v34 = vmul.f32 %v5389_v18, %v5266_v45 }
  0x6f   : > { %v3006_v32 = vsel %vm1398_vm11, %v3004_v47, %v3005_v2  ;;  %v3008_v59 = vsel %vm1398_vm11, %v3005_v2, %v3007_v58  ;;  %v3121_v63 = vmul.f32 %v5266_v45, %v5395_v41  ;;  %v3243_v54 = vmul.f32 %v5387_v14, %v5270_v51 }
  0x70   : > { %v3060_v61 = vadd.f32 %v3006_v32, %v2936_v62  ;;  %v3061_v8 = vadd.f32 %v3008_v59, %v2937_v3  ;;  %v3167_v7 = vrot.slane %v3119_v57, 1  ;;  %v3168_v49 = vrot.slane %v3120_v34, 1 }
  0x71   : > { %v3170_v50 = vrot.slane %v3121_v63, 1  ;;  %v3244_v55 = vmul.f32 %v5389_v18, %v5270_v51  ;;  %v3245_v5 = vmul.f32 %v5270_v51, %v5395_v41  ;;  %v3291_v39 = vrot.slane %v3243_v54, 2 }
  0x72   : > { %v3098_v60 = vadd.f32 %v3082_v23, %v3060_v61  ;;  %v3099_v9 = vadd.f32 %v3083_v56, %v3061_v8  ;;  %v3367_v46 = vmul.f32 %v5387_v14, %v5272_v52  ;;  %v3169_v47 = vsel %vm1023_vm8, %v3167_v7, %v3168_v49 }
  0x73   : > { %v3171_v40 = vsel %vm1023_vm8, %v3168_v49, %v3170_v50  ;;  %v3292_v0 = vrot.slane %v3244_v55, 2  ;;  %v3294_v2 = vrot.slane %v3245_v5, 2  ;;  %v3368_v3 = vmul.f32 %v5389_v18, %v5272_v52 }
  0x74   : > { %v3223_v58 = vadd.f32 %v3169_v47, %v3098_v60  ;;  %v3224_v62 = vadd.f32 %v3171_v40, %v3099_v9  ;;  %v3369_v57 = vmul.f32 %v5272_v52, %v5395_v41  ;;  %v3415_v32 = vrot.slane %v3367_v46, 3 }
  0x75   : > { %v3293_v23 = vsel %vm1148_vm9, %v3291_v39, %v3292_v0  ;;  %v3295_v56 = vsel %vm1148_vm9, %v3292_v0, %v3294_v2  ;;  %v3491_v59 = vmul.f32 %v5387_v14, %v5274_v53  ;;  %v3416_v61 = vrot.slane %v3368_v3, 3 }
  0x76   : > { %v3347_v34 = vadd.f32 %v3293_v23, %v3223_v58  ;;  %v3348_v63 = vadd.f32 %v3295_v56, %v3224_v62  ;;  %v3418_v8 = vrot.slane %v3369_v57, 3  ;;  %v5589_v7 = vunpack.c.h.bf16 %v5473_v48  ;;  %v5612_v62 = vld [vmem:[%s7346_s5] ss:$0 sm:$0xff] }
  0x77   : > { %v3492_v54 = vmul.f32 %v5389_v18, %v5274_v53  ;;  %v3493_v49 = vmul.f32 %v5274_v53, %v5395_v41  ;;  %v3539_v50 = vrot.slane %v3491_v59, 4  ;;  %v3417_v55 = vsel %vm1273_vm10, %v3415_v32, %v3416_v61 }
  0x78   : > { %7401 = vst [vmem:[#allocation20_spill] sm:$0xff] %v5589_v7  ;;  %v3419_v5 = vsel %vm1273_vm10, %v3416_v61, %v3418_v8  ;;  %v933_v60 = vmul.f32 %v5209_v15, %v5369_v4  ;;  %v934_v9 = vmul.f32 %v5209_v15, %v5373_v6  ;;  %v3471_v39 = vadd.f32 %v3417_v55, %v3347_v34 }
  0x79   : > { %v3472_v48 = vadd.f32 %v3419_v5, %v3348_v63  ;;  %v3540_v46 = vrot.slane %v3492_v54, 4  ;;  %v3542_v47 = vrot.slane %v3493_v49, 4  ;;  %v978_v40 = vmul.f32 %v5211_v16, %v5369_v4 }
  0x7a   : > { %v979_v0 = vmul.f32 %v5211_v16, %v5373_v6  ;;  %v980_v2 = vmul.f32 %v5211_v16, %v5383_v12  ;;  %v1103_v58 = vmul.f32 %v5213_v17, %v5369_v4  ;;  %v1104_v23 = vmul.f32 %v5213_v17, %v5373_v6 }
  0x7b   : > { %v3541_v3 = vsel %vm1398_vm11, %v3539_v50, %v3540_v46  ;;  %v3543_v57 = vsel %vm1398_vm11, %v3540_v46, %v3542_v47  ;;  %v1105_v56 = vmul.f32 %v5213_v17, %v5383_v12  ;;  %v1029_v34 = vrot.slane %v978_v40, 1  ;;  %v7402_v40 = vld [vmem:[#allocation6_spill] sm:$0xff] }
  0x7c   : > { %v3595_v32 = vadd.f32 %v3541_v3, %v3471_v39  ;;  %v3596_v59 = vadd.f32 %v3543_v57, %v3472_v48  ;;  %v1030_v63 = vrot.slane %v979_v0, 1  ;;  %v1032_v61 = vrot.slane %v980_v2, 1 }
  0x7d   : > { %v1154_v8 = vrot.slane %v1103_v58, 2  ;;  %v1155_v54 = vrot.slane %v1104_v23, 2  ;;  %v1157_v49 = vrot.slane %v1105_v56, 2  ;;  %v1228_v46 = vmul.f32 %v5218_v19, %v5369_v4 }
  0x7e   : > { %v3617_v55 = vadd.f32 %v5612_v62, %v3595_v32  ;;  %v3618_v50 = vadd.f32 %v5612_v62, %v3596_v59  ;;  %v1031_v5 = vsel %vm1023_vm8, %v1029_v34, %v1030_v63  ;;  %v1033_v47 = vsel %vm1023_vm8, %v1030_v63, %v1032_v61 }
  0x7f   : > { %v1082_v7 = vadd.f32 %v1031_v5, %v933_v60  ;;  %v1156_v39 = vsel %vm1148_vm9, %v1154_v8, %v1155_v54  ;;  %v1158_v48 = vsel %vm1148_vm9, %v1155_v54, %v1157_v49  ;;  %v7403_v0 = vunpack.c.l.bf16 %v7402_v40 }
  0x80   : > { %v7404_v58 = vunpack.c.h.bf16 %v7402_v40  ;;  %v1083_v57 = vadd.f32 %v1033_v47, %v934_v9  ;;  %v1229_v23 = vmul.f32 %v5218_v19, %v5373_v6  ;;  %v1230_v32 = vmul.f32 %v5218_v19, %v5383_v12 }
  0x81   : > { %v3665_v2 = vmul.f32 %v7403_v0, %v3617_v55  ;;  %v1207_v56 = vadd.f32 %v1156_v39, %v1082_v7  ;;  %v1279_v59 = vrot.slane %v1228_v46, 3  ;;  %v1353_v60 = vmul.f32 %v5220_v20, %v5369_v4 }
  0x82   : > { %v3666_v3 = vmul.f32 %v7404_v58, %v3618_v50  ;;  %v1208_v63 = vadd.f32 %v1158_v48, %v1083_v57  ;;  %v1280_v61 = vrot.slane %v1229_v23, 3  ;;  %v1354_v8 = vmul.f32 %v5220_v20, %v5373_v6 }
  0x83   : > { %v1282_v54 = vrot.slane %v1230_v32, 3  ;;  %v1355_v9 = vmul.f32 %v5220_v20, %v5383_v12  ;;  %v1404_v49 = vrot.slane %v1353_v60, 4  ;;  %v1479_v7 = vmul.f32 %v5365_v1, %v5222_v21 }
  0x84   : > { %v3681_v34 = vpack.c.bf16 %v3666_v3, %v3665_v2  ;;  %v1281_v55 = vsel %vm1273_vm10, %v1279_v59, %v1280_v61  ;;  %v1405_v50 = vrot.slane %v1354_v8, 4  ;;  %v1480_v4 = vmul.f32 %v5367_v35, %v5222_v21 }
  0x85   : > { %v1517_v5 = vmul.f32 %v5365_v1, %v5224_v22  ;;  %v1283_v6 = vsel %vm1273_vm10, %v1280_v61, %v1282_v54  ;;  %v1332_v46 = vadd.f32 %v1281_v55, %v1207_v56  ;;  %v1407_v47 = vrot.slane %v1355_v9, 4 }
  0x86   : > { %4842 = vmatprep.mubr.msk.bf16.mxu0 %vm3697_vm12, %v3681_v34  ;;  %v1518_v12 = vmul.f32 %v5367_v35, %v5224_v22  ;;  %v1333_v39 = vadd.f32 %v1283_v6, %v1208_v63  ;;  %v1406_v48 = vsel %vm1398_vm11, %v1404_v49, %v1405_v50  ;;  %v1519_v40 = vmul.f32 %v5224_v22, %v5385_v13 }
  0x87   : > { %v1567_v0 = vrot.slane %v1517_v5, 1  ;;  %v1408_v2 = vsel %vm1398_vm11, %v1405_v50, %v1407_v47  ;;  %v1457_v58 = vadd.f32 %v1406_v48, %v1332_v46  ;;  %v1641_v57 = vmul.f32 %v5365_v1, %v5230_v24 }
  0x88   : > { %v1568_v3 = vrot.slane %v1518_v12, 1  ;;  %v1458_v23 = vadd.f32 %v1408_v2, %v1333_v39  ;;  %v1570_v56 = vrot.slane %v1519_v40, 1  ;;  %v1642_v32 = vmul.f32 %v5367_v35, %v5230_v24 }
  0x89   : > { %v1643_v59 = vmul.f32 %v5230_v24, %v5385_v13  ;;  %v1495_v60 = vadd.f32 %v1479_v7, %v1457_v58  ;;  %v1691_v63 = vrot.slane %v1641_v57, 2  ;;  %v1765_v61 = vmul.f32 %v5365_v1, %v5232_v25 }
  0x8a   : > { %v1569_v34 = vsel %vm1023_vm8, %v1567_v0, %v1568_v3  ;;  %v1496_v8 = vadd.f32 %v1480_v4, %v1458_v23  ;;  %v1571_v54 = vsel %vm1023_vm8, %v1568_v3, %v1570_v56  ;;  %v1692_v9 = vrot.slane %v1642_v32, 2 }
  0x8b   : > { %v1694_v49 = vrot.slane %v1643_v59, 2  ;;  %v1620_v55 = vadd.f32 %v1569_v34, %v1495_v60  ;;  %v1766_v50 = vmul.f32 %v5367_v35, %v5232_v25  ;;  %v1767_v5 = vmul.f32 %v5232_v25, %v5385_v13 }
  0x8c   : > { %v1815_v6 = vrot.slane %v1765_v61, 3  ;;  %v1621_v7 = vadd.f32 %v1571_v54, %v1496_v8  ;;  %v1693_v46 = vsel %vm1148_vm9, %v1691_v63, %v1692_v9  ;;  %v1889_v4 = vmul.f32 %v5365_v1, %v5234_v26 }
  0x8d   : > { %v1695_v47 = vsel %vm1148_vm9, %v1692_v9, %v1694_v49  ;;  %v1744_v12 = vadd.f32 %v1693_v46, %v1620_v55  ;;  %v1816_v39 = vrot.slane %v1766_v50, 3  ;;  %v1818_v48 = vrot.slane %v1767_v5, 3 }
  0x8e   : > { %v1890_v40 = vmul.f32 %v5367_v35, %v5234_v26  ;;  %v1745_v0 = vadd.f32 %v1695_v47, %v1621_v7  ;;  %v1891_v2 = vmul.f32 %v5234_v26, %v5385_v13  ;;  %v1939_v58 = vrot.slane %v1889_v4, 4 }
  0x8f   : > { %v2014_v3 = vmul.f32 %v5236_v27, %v5379_v10  ;;  %v1817_v57 = vsel %vm1273_vm10, %v1815_v6, %v1816_v39  ;;  %v1819_v23 = vsel %vm1273_vm10, %v1816_v39, %v1818_v48  ;;  %v2015_v32 = vmul.f32 %v5236_v27, %v5381_v11 }
  0x90   : > { %v1940_v56 = vrot.slane %v1890_v40, 4  ;;  %v1868_v59 = vadd.f32 %v1817_v57, %v1744_v12  ;;  %v1869_v60 = vadd.f32 %v1819_v23, %v1745_v0  ;;  %v1942_v34 = vrot.slane %v1891_v2, 4 }
  0x91   : > { %v2052_v63 = vmul.f32 %v5241_v28, %v5379_v10  ;;  %v2053_v8 = vmul.f32 %v5241_v28, %v5381_v11  ;;  %v2054_v54 = vmul.f32 %v5241_v28, %v5391_v33  ;;  %v2176_v9 = vmul.f32 %v5243_v29, %v5379_v10 }
  0x92   : > { %v1941_v61 = vsel %vm1398_vm11, %v1939_v58, %v1940_v56  ;;  %v1943_v49 = vsel %vm1398_vm11, %v1940_v56, %v1942_v34  ;;  %v2177_v5 = vmul.f32 %v5243_v29, %v5381_v11  ;;  %v2178_v47 = vmul.f32 %v5243_v29, %v5391_v33 }
  0x93   : > { %v1992_v55 = vadd.f32 %v1941_v61, %v1868_v59  ;;  %v2102_v50 = vrot.slane %v2052_v63, 1  ;;  %v1993_v6 = vadd.f32 %v1943_v49, %v1869_v60  ;;  %v2103_v7 = vrot.slane %v2053_v8, 1 }
  0x94   : > { %v2105_v46 = vrot.slane %v2054_v54, 1  ;;  %v2226_v12 = vrot.slane %v2176_v9, 2  ;;  %v2227_v39 = vrot.slane %v2177_v5, 2  ;;  %v2300_v48 = vmul.f32 %v5245_v30, %v5379_v10 }
  0x95   : > { %v2030_v4 = vadd.f32 %v2014_v3, %v1992_v55  ;;  %v2031_v40 = vadd.f32 %v2015_v32, %v1993_v6  ;;  %v2104_v0 = vsel %vm1023_vm8, %v2102_v50, %v2103_v7  ;;  %v2229_v58 = vrot.slane %v2178_v47, 2 }
  0x96   : > { %v2106_v2 = vsel %vm1023_vm8, %v2103_v7, %v2105_v46  ;;  %v2228_v23 = vsel %vm1148_vm9, %v2226_v12, %v2227_v39  ;;  %v2301_v56 = vmul.f32 %v5245_v30, %v5381_v11  ;;  %v2302_v3 = vmul.f32 %v5245_v30, %v5391_v33 }
  0x97   : > { %v2155_v57 = vadd.f32 %v2104_v0, %v2030_v4  ;;  %v2156_v59 = vadd.f32 %v2106_v2, %v2031_v40  ;;  %v2230_v60 = vsel %vm1148_vm9, %v2227_v39, %v2229_v58  ;;  %v2350_v34 = vrot.slane %v2300_v48, 3 }
  0x98   : > { %v2424_v32 = vmul.f32 %v5247_v31, %v5379_v10  ;;  %v2351_v61 = vrot.slane %v2301_v56, 3  ;;  %v2353_v8 = vrot.slane %v2302_v3, 3  ;;  %v2425_v54 = vmul.f32 %v5247_v31, %v5381_v11 }
  0x99   : > { %v2279_v63 = vadd.f32 %v2228_v23, %v2155_v57  ;;  %v2280_v9 = vadd.f32 %v2230_v60, %v2156_v59  ;;  %v2426_v49 = vmul.f32 %v5247_v31, %v5391_v33  ;;  %v2549_v50 = vmul.f32 %v5387_v14, %v5254_v36 }
  0x9a   : > { %v2474_v55 = vrot.slane %v2424_v32, 4  ;;  %v2352_v5 = vsel %vm1273_vm10, %v2350_v34, %v2351_v61  ;;  %v2354_v6 = vsel %vm1273_vm10, %v2351_v61, %v2353_v8  ;;  %v2475_v7 = vrot.slane %v2425_v54, 4 }
  0x9b   : > { %v2550_v46 = vmul.f32 %v5389_v18, %v5254_v36  ;;  %v2403_v47 = vadd.f32 %v2352_v5, %v2279_v63  ;;  %v2404_v4 = vadd.f32 %v2354_v6, %v2280_v9  ;;  %v2477_v12 = vrot.slane %v2426_v49, 4 }
  0x9c   : > { %v2587_v39 = vmul.f32 %v5387_v14, %v5256_v37  ;;  %v2476_v48 = vsel %vm1398_vm11, %v2474_v55, %v2475_v7  ;;  %v2588_v40 = vmul.f32 %v5389_v18, %v5256_v37  ;;  %v2589_v0 = vmul.f32 %v5256_v37, %v5395_v41 }
  0x9d   : > { %v2711_v2 = vmul.f32 %v5387_v14, %v5258_v38  ;;  %v2478_v58 = vsel %vm1398_vm11, %v2475_v7, %v2477_v12  ;;  %v2527_v57 = vadd.f32 %v2476_v48, %v2403_v47  ;;  %v2712_v56 = vmul.f32 %v5389_v18, %v5258_v38 }
  0x9e   : > { %v2637_v23 = vrot.slane %v2587_v39, 1  ;;  %v2528_v3 = vadd.f32 %v2478_v58, %v2404_v4  ;;  %v2638_v59 = vrot.slane %v2588_v40, 1  ;;  %v2640_v60 = vrot.slane %v2589_v0, 1 }
  0x9f   : > { %v2713_v34 = vmul.f32 %v5258_v38, %v5395_v41  ;;  %v2565_v32 = vadd.f32 %v2549_v50, %v2527_v57  ;;  %v2761_v63 = vrot.slane %v2711_v2, 2  ;;  %v2762_v61 = vrot.slane %v2712_v56, 2 }
  0xa0   : > { %v2835_v8 = vmul.f32 %v5387_v14, %v5260_v42  ;;  %v2566_v54 = vadd.f32 %v2550_v46, %v2528_v3  ;;  %v2639_v9 = vsel %vm1023_vm8, %v2637_v23, %v2638_v59  ;;  %v2641_v49 = vsel %vm1023_vm8, %v2638_v59, %v2640_v60  ;;  %v7405_v23 = vld [vmem:[#allocation8_spill] sm:$0xff] }
  0xa1   : > { %v2764_v55 = vrot.slane %v2713_v34, 2  ;;  %v2690_v5 = vadd.f32 %v2639_v9, %v2565_v32  ;;  %v2763_v6 = vsel %vm1148_vm9, %v2761_v63, %v2762_v61  ;;  %v2836_v7 = vmul.f32 %v5389_v18, %v5260_v42  ;;  %v7406_v34 = vld [vmem:[#allocation9_spill] sm:$0xff] }
  0xa2   : > { %v2837_v50 = vmul.f32 %v5260_v42, %v5395_v41  ;;  %v2691_v47 = vadd.f32 %v2641_v49, %v2566_v54  ;;  %v2885_v12 = vrot.slane %v2835_v8, 3  ;;  %v2959_v46 = vmul.f32 %v5387_v14, %v5262_v43 }
  0xa3   : > { %v2765_v4 = vsel %vm1148_vm9, %v2762_v61, %v2764_v55  ;;  %v2814_v39 = vadd.f32 %v2763_v6, %v2690_v5  ;;  %v2886_v48 = vrot.slane %v2836_v7, 3  ;;  %v2960_v0 = vmul.f32 %v5389_v18, %v5262_v43  ;;  %v7407_v55 = vld [vmem:[#allocation7_spill] sm:$0xff] }
  0xa4   : > { %v2888_v40 = vrot.slane %v2837_v50, 3  ;;  %v2815_v2 = vadd.f32 %v2765_v4, %v2691_v47  ;;  %v2961_v58 = vmul.f32 %v5262_v43, %v5395_v41  ;;  %v3009_v57 = vrot.slane %v2959_v46, 4 }
  0xa5   : > { %v3084_v56 = vmul.f32 %v5264_v44, %v7405_v23  ;;  %v2887_v3 = vsel %vm1273_vm10, %v2885_v12, %v2886_v48  ;;  %v3010_v60 = vrot.slane %v2960_v0, 4  ;;  %v3085_v32 = vmul.f32 %v5264_v44, %v7406_v34 }
  0xa6   : > { %v2889_v59 = vsel %vm1273_vm10, %v2886_v48, %v2888_v40  ;;  %v2938_v63 = vadd.f32 %v2887_v3, %v2814_v39  ;;  %v3012_v8 = vrot.slane %v2961_v58, 4  ;;  %v3122_v54 = vmul.f32 %v5266_v45, %v7405_v23 }
  0xa7   : > { %v2939_v61 = vadd.f32 %v2889_v59, %v2815_v2  ;;  %v3011_v9 = vsel %vm1398_vm11, %v3009_v57, %v3010_v60  ;;  %v3123_v49 = vmul.f32 %v5266_v45, %v7406_v34  ;;  %v3124_v5 = vmul.f32 %v5266_v45, %v7407_v55 }
  0xa8   : > { %v3246_v6 = vmul.f32 %v5270_v51, %v7405_v23  ;;  %v3013_v7 = vsel %vm1398_vm11, %v3010_v60, %v3012_v8  ;;  %v3062_v50 = vadd.f32 %v3011_v9, %v2938_v63  ;;  %v3172_v47 = vrot.slane %v3122_v54, 1  ;;  %v4815_v54 = vld [vmem:[%s5207_s22 + $0x8] sm:$0xff]  }
  0xa9   : > { %v3247_v4 = vmul.f32 %v5270_v51, %v7406_v34  ;;  %v3063_v12 = vadd.f32 %v3013_v7, %v2939_v61  ;;  %v3173_v46 = vrot.slane %v3123_v49, 1  ;;  %v3175_v39 = vrot.slane %v3124_v5, 1 }
  0xaa   : > { %v3248_v48 = vmul.f32 %v5270_v51, %v7407_v55  ;;  %v3100_v40 = vadd.f32 %v3084_v56, %v3062_v50  ;;  %v3296_v0 = vrot.slane %v3246_v6, 2  ;;  %v3370_v58 = vmul.f32 %v5272_v52, %v7405_v23 }
  0xab   : > { %v3297_v2 = vrot.slane %v3247_v4, 2  ;;  %v3101_v57 = vadd.f32 %v3085_v32, %v3063_v12  ;;  %v3174_v3 = vsel %vm1023_vm8, %v3172_v47, %v3173_v46  ;;  %v3176_v59 = vsel %vm1023_vm8, %v3173_v46, %v3175_v39 }
  0xac   : > { %v3299_v60 = vrot.slane %v3248_v48, 2  ;;  %v3225_v63 = vadd.f32 %v3174_v3, %v3100_v40  ;;  %v3371_v8 = vmul.f32 %v5272_v52, %v7406_v34  ;;  %v3372_v56 = vmul.f32 %v5272_v52, %v7407_v55 }
  0xad   : > { %v3298_v61 = vsel %vm1148_vm9, %v3296_v0, %v3297_v2  ;;  %v3226_v9 = vadd.f32 %v3176_v59, %v3101_v57  ;;  %v3420_v5 = vrot.slane %v3370_v58, 3  ;;  %v3494_v32 = vmul.f32 %v5274_v53, %v7405_v23 }
  0xae   : > { %v3300_v49 = vsel %vm1148_vm9, %v3297_v2, %v3299_v60  ;;  %v3349_v6 = vadd.f32 %v3298_v61, %v3225_v63  ;;  %v3421_v7 = vrot.slane %v3371_v8, 3  ;;  %v3423_v50 = vrot.slane %v3372_v56, 3 }
  0xaf   : > { %v3495_v47 = vmul.f32 %v5274_v53, %v7406_v34  ;;  %v3350_v4 = vadd.f32 %v3300_v49, %v3226_v9  ;;  %v3496_v12 = vmul.f32 %v5274_v53, %v7407_v55  ;;  %v3544_v46 = vrot.slane %v3494_v32, 4 }
  0xb0   : > { %v4784_v39 = vunpack.c.l.bf16 %v4815_v54  ;;  %v3422_v48 = vsel %vm1273_vm10, %v3420_v5, %v3421_v7  ;;  %v3424_v40 = vsel %vm1273_vm10, %v3421_v7, %v3423_v50  ;;  %v4785_v2 = vunpack.c.h.bf16 %v4815_v54 }
  0xb1   : > { %v3545_v0 = vrot.slane %v3495_v47, 4  ;;  %v3473_v58 = vadd.f32 %v3422_v48, %v3349_v6  ;;  %v3474_v57 = vadd.f32 %v3424_v40, %v3350_v4  ;;  %v3547_v3 = vrot.slane %v3496_v12, 4 }
  0xb2   : > { %v935_v59 = vmul.f32 %v5365_v1, %v5209_v15  ;;  %v936_v63 = vmul.f32 %v5367_v35, %v5209_v15  ;;  %v981_v61 = vmul.f32 %v5365_v1, %v5211_v16  ;;  %v982_v8 = vmul.f32 %v5367_v35, %v5211_v16 }
  0xb3   : > { %v3546_v60 = vsel %vm1398_vm11, %v3544_v46, %v3545_v0  ;;  %v3548_v56 = vsel %vm1398_vm11, %v3545_v0, %v3547_v3  ;;  %v983_v9 = vmul.f32 %v5211_v16, %v5385_v13  ;;  %v1106_v49 = vmul.f32 %v5365_v1, %v5213_v17 }
  0xb4   : > { %v3597_v54 = vadd.f32 %v3546_v60, %v3473_v58  ;;  %v3598_v5 = vadd.f32 %v3548_v56, %v3474_v57  ;;  %v1034_v32 = vrot.slane %v981_v61, 1  ;;  %v1035_v6 = vrot.slane %v982_v8, 1 }
  0xb5   : > { %v1107_v7 = vmul.f32 %v5367_v35, %v5213_v17  ;;  %v1037_v47 = vrot.slane %v983_v9, 1  ;;  %v1108_v4 = vmul.f32 %v5213_v17, %v5385_v13  ;;  %v1159_v12 = vrot.slane %v1106_v49, 2 }
  0xb6   : > { %v3619_v50 = vadd.f32 %v5612_v62, %v3597_v54  ;;  %v3620_v46 = vadd.f32 %v5612_v62, %v3598_v5  ;;  %v1036_v48 = vsel %vm1023_vm8, %v1034_v32, %v1035_v6  ;;  %v1231_v0 = vmul.f32 %v5365_v1, %v5218_v19 }
  0xb7   : > { %v1160_v40 = vrot.slane %v1107_v7, 2  ;;  %v1038_v57 = vsel %vm1023_vm8, %v1035_v6, %v1037_v47  ;;  %v1084_v3 = vadd.f32 %v1036_v48, %v935_v59  ;;  %v1162_v60 = vrot.slane %v1108_v4, 2 }
  0xb8   : > { %v3667_v58 = vmul.f32 %v4784_v39, %v3619_v50  ;;  %v3668_v61 = vmul.f32 %v4785_v2, %v3620_v46  ;;  %v1085_v8 = vadd.f32 %v1038_v57, %v936_v63  ;;  %v1232_v54 = vmul.f32 %v5367_v35, %v5218_v19 }
  0xb9   : > { %v1161_v56 = vsel %vm1148_vm9, %v1159_v12, %v1160_v40  ;;  %v1163_v9 = vsel %vm1148_vm9, %v1160_v40, %v1162_v60  ;;  %v1233_v5 = vmul.f32 %v5218_v19, %v5385_v13  ;;  %v1284_v32 = vrot.slane %v1231_v0, 3 }
  0xba   : > { %v1209_v49 = vadd.f32 %v1161_v56, %v1084_v3  ;;  %v3682_v7 = vpack.c.bf16 %v3668_v61, %v3667_v58  ;;  %v1210_v39 = vadd.f32 %v1163_v9, %v1085_v8  ;;  %v1285_v50 = vrot.slane %v1232_v54, 3 }
  0xbb   : > { %v1356_v59 = vmul.f32 %v5365_v1, %v5220_v20  ;;  %v1287_v2 = vrot.slane %v1233_v5, 3  ;;  %v1357_v63 = vmul.f32 %v5367_v35, %v5220_v20  ;;  %v1358_v6 = vmul.f32 %v5220_v20, %v5385_v13 }
  0xbc   : > { %v1481_v47 = vmul.f32 %v5222_v21, %v5379_v10  ;;  %4843 = vmatmul.mubr.msk.bf16.vlgmr.msra.gmra.mrb[0].mxu0 %vm3697_vm12, %v3682_v7  ;;  %v1286_v4 = vsel %vm1273_vm10, %v1284_v32, %v1285_v50  ;;  %v1482_v46 = vmul.f32 %v5222_v21, %v5381_v11  ;;  %v1520_v1 = vmul.f32 %v5224_v22, %v5379_v10 }
  0xbd   : > { %v1409_v12 = vrot.slane %v1356_v59, 4  ;;  %v1288_v48 = vsel %vm1273_vm10, %v1285_v50, %v1287_v2  ;;  %v1334_v35 = vadd.f32 %v1286_v4, %v1209_v49  ;;  %v1410_v40 = vrot.slane %v1357_v63, 4 }
  0xbe   : > { %v1412_v0 = vrot.slane %v1358_v6, 4  ;;  %v1335_v13 = vadd.f32 %v1288_v48, %v1210_v39  ;;  %v1521_v58 = vmul.f32 %v5224_v22, %v5381_v11  ;;  %v1522_v57 = vmul.f32 %v5224_v22, %v5391_v33 }
  0xbf   : > { %v1572_v3 = vrot.slane %v1520_v1, 1  ;;  %v1411_v60 = vsel %vm1398_vm11, %v1409_v12, %v1410_v40  ;;  %v1644_v8 = vmul.f32 %v5230_v24, %v5379_v10  ;;  %v1645_v56 = vmul.f32 %v5230_v24, %v5381_v11 }
  0xc0   : > { %v1413_v61 = vsel %vm1398_vm11, %v1410_v40, %v1412_v0  ;;  %v1459_v54 = vadd.f32 %v1411_v60, %v1334_v35  ;;  %v1573_v49 = vrot.slane %v1521_v58, 1  ;;  %v1575_v5 = vrot.slane %v1522_v57, 1 }
  0xc1   : > { %v1460_v9 = vadd.f32 %v1413_v61, %v1335_v13  ;;  %v1646_v32 = vmul.f32 %v5230_v24, %v5391_v33  ;;  %v1696_v7 = vrot.slane %v1644_v8, 2  ;;  %v1697_v39 = vrot.slane %v1645_v56, 2 }
  0xc2   : > { %v1768_v50 = vmul.f32 %v5232_v25, %v5379_v10  ;;  %v1497_v59 = vadd.f32 %v1481_v47, %v1459_v54  ;;  %v1574_v63 = vsel %vm1023_vm8, %v1572_v3, %v1573_v49  ;;  %v1576_v6 = vsel %vm1023_vm8, %v1573_v49, %v1575_v5 }
  0xc3   : > { %v1498_v2 = vadd.f32 %v1482_v46, %v1460_v9  ;;  %v1698_v4 = vsel %vm1148_vm9, %v1696_v7, %v1697_v39  ;;  %v1699_v12 = vrot.slane %v1646_v32, 2  ;;  %v1769_v1 = vmul.f32 %v5232_v25, %v5381_v11 }
  0xc4   : > { %v1770_v48 = vmul.f32 %v5232_v25, %v5391_v33  ;;  %v1622_v35 = vadd.f32 %v1574_v63, %v1497_v59  ;;  %v1820_v0 = vrot.slane %v1768_v50, 3  ;;  %v1892_v47 = vmul.f32 %v5234_v26, %v5379_v10 }
  0xc5   : > { %v1623_v40 = vadd.f32 %v1576_v6, %v1498_v2  ;;  %v1700_v46 = vsel %vm1148_vm9, %v1697_v39, %v1699_v12  ;;  %v1821_v13 = vrot.slane %v1769_v1, 3  ;;  %v1893_v57 = vmul.f32 %v5234_v26, %v5381_v11 }
  0xc6   : > { %v1823_v58 = vrot.slane %v1770_v48, 3  ;;  %v1746_v3 = vadd.f32 %v1698_v4, %v1622_v35  ;;  %v1894_v61 = vmul.f32 %v5234_v26, %v5391_v33  ;;  %v1944_v8 = vrot.slane %v1892_v47, 4 }
  0xc7   : > { %v1747_v60 = vadd.f32 %v1700_v46, %v1623_v40  ;;  %v1822_v56 = vsel %vm1273_vm10, %v1820_v0, %v1821_v13  ;;  %v1945_v9 = vrot.slane %v1893_v57, 4  ;;  %v2016_v49 = vmul.f32 %v5387_v14, %v5236_v27 }
  0xc8   : > { %v1824_v54 = vsel %vm1273_vm10, %v1821_v13, %v1823_v58  ;;  %v1870_v5 = vadd.f32 %v1822_v56, %v1746_v3  ;;  %v1947_v7 = vrot.slane %v1894_v61, 4  ;;  %v2017_v39 = vmul.f32 %v5389_v18, %v5236_v27 }
  0xc9   : > { %v1871_v32 = vadd.f32 %v1824_v54, %v1747_v60  ;;  %v1946_v50 = vsel %vm1398_vm11, %v1944_v8, %v1945_v9  ;;  %v2055_v59 = vmul.f32 %v5387_v14, %v5241_v28  ;;  %v2056_v2 = vmul.f32 %v5389_v18, %v5241_v28 }
  0xca   : > { %v2057_v63 = vmul.f32 %v5241_v28, %v5395_v41  ;;  %v1948_v6 = vsel %vm1398_vm11, %v1945_v9, %v1947_v7  ;;  %v1994_v4 = vadd.f32 %v1946_v50, %v1870_v5  ;;  %v2179_v12 = vmul.f32 %v5387_v14, %v5243_v29 }
  0xcb   : > { %v2180_v1 = vmul.f32 %v5389_v18, %v5243_v29  ;;  %v1995_v48 = vadd.f32 %v1948_v6, %v1871_v32  ;;  %v2107_v35 = vrot.slane %v2055_v59, 1  ;;  %v2108_v40 = vrot.slane %v2056_v2, 1 }
  0xcc   : > { %v2110_v0 = vrot.slane %v2057_v63, 1  ;;  %v2032_v47 = vadd.f32 %v2016_v49, %v1994_v4  ;;  %v2181_v46 = vmul.f32 %v5243_v29, %v5395_v41  ;;  %v2231_v13 = vrot.slane %v2179_v12, 2 }
  0xcd   : > { %v2232_v58 = vrot.slane %v2180_v1, 2  ;;  %v2033_v57 = vadd.f32 %v2017_v39, %v1995_v48  ;;  %v2109_v3 = vsel %vm1023_vm8, %v2107_v35, %v2108_v40  ;;  %v2303_v61 = vmul.f32 %v5387_v14, %v5245_v30 }
  0xce   : > { %v2111_v60 = vsel %vm1023_vm8, %v2108_v40, %v2110_v0  ;;  %v2157_v8 = vadd.f32 %v2109_v3, %v2032_v47  ;;  %v2234_v54 = vrot.slane %v2181_v46, 2  ;;  %v2304_v9 = vmul.f32 %v5389_v18, %v5245_v30 }
  0xcf   : > { %v2233_v56 = vsel %vm1148_vm9, %v2231_v13, %v2232_v58  ;;  %v2158_v49 = vadd.f32 %v2111_v60, %v2033_v57  ;;  %v2305_v5 = vmul.f32 %v5245_v30, %v5395_v41  ;;  %v2355_v32 = vrot.slane %v2303_v61, 3 }
  0xd0   : > { %v2427_v7 = vmul.f32 %v5387_v14, %v5247_v31  ;;  %v2235_v39 = vsel %vm1148_vm9, %v2232_v58, %v2234_v54  ;;  %v2281_v50 = vadd.f32 %v2233_v56, %v2157_v8  ;;  %v2356_v59 = vrot.slane %v2304_v9, 3 }
  0xd1   : > { %v2428_v2 = vmul.f32 %v5389_v18, %v5247_v31  ;;  %v2282_v63 = vadd.f32 %v2235_v39, %v2158_v49  ;;  %v2358_v6 = vrot.slane %v2305_v5, 3  ;;  %v2429_v4 = vmul.f32 %v5247_v31, %v5395_v41 }
  0xd2   : > { %v2479_v12 = vrot.slane %v2427_v7, 4  ;;  %v2357_v1 = vsel %vm1273_vm10, %v2355_v32, %v2356_v59  ;;  %v2551_v35 = vmul.f32 %v5254_v36, %v7405_v23  ;;  %v2552_v40 = vmul.f32 %v5254_v36, %v7406_v34 }
  0xd3   : > { %v2480_v48 = vrot.slane %v2428_v2, 4  ;;  %v2359_v0 = vsel %vm1273_vm10, %v2356_v59, %v2358_v6  ;;  %v2405_v47 = vadd.f32 %v2357_v1, %v2281_v50  ;;  %v2482_v46 = vrot.slane %v2429_v4, 4 }
  0xd4   : > { %v2590_v13 = vmul.f32 %v5256_v37, %v7405_v23  ;;  %v2406_v58 = vadd.f32 %v2359_v0, %v2282_v63  ;;  %v2591_v3 = vmul.f32 %v5256_v37, %v7406_v34  ;;  %v2592_v60 = vmul.f32 %v5256_v37, %v7407_v55 }
  0xd5   : > { %v2481_v57 = vsel %vm1398_vm11, %v2479_v12, %v2480_v48  ;;  %v2483_v61 = vsel %vm1398_vm11, %v2480_v48, %v2482_v46  ;;  %v2714_v54 = vmul.f32 %v5258_v38, %v7405_v23  ;;  %v2715_v32 = vmul.f32 %v5258_v38, %v7406_v34 }
  0xd6   : > { %v2529_v8 = vadd.f32 %v2481_v57, %v2405_v47  ;;  %v2642_v56 = vrot.slane %v2590_v13, 1  ;;  %v2530_v9 = vadd.f32 %v2483_v61, %v2406_v58  ;;  %v2643_v49 = vrot.slane %v2591_v3, 1 }
  0xd7   : > { %v2645_v5 = vrot.slane %v2592_v60, 1  ;;  %v2716_v39 = vmul.f32 %v5258_v38, %v7407_v55  ;;  %v2766_v50 = vrot.slane %v2714_v54, 2  ;;  %v2838_v59 = vmul.f32 %v5260_v42, %v7405_v23 }
  0xd8   : > { %v2567_v7 = vadd.f32 %v2551_v35, %v2529_v8  ;;  %v2568_v2 = vadd.f32 %v2552_v40, %v2530_v9  ;;  %v2644_v63 = vsel %vm1023_vm8, %v2642_v56, %v2643_v49  ;;  %v2767_v4 = vrot.slane %v2715_v32, 2  ;;  %v7409_v32 = vld [vmem:[#allocation12_spill] sm:$0xff] }
  0xd9   : > { %v2646_v6 = vsel %vm1023_vm8, %v2643_v49, %v2645_v5  ;;  %v2769_v1 = vrot.slane %v2716_v39, 2  ;;  %v2839_v48 = vmul.f32 %v5260_v42, %v7406_v34  ;;  %v2840_v35 = vmul.f32 %v5260_v42, %v7407_v55  ;;  %v7408_v49 = vld [vmem:[#allocation10_spill] sm:$0xff] }
  0xda   : > { %v2692_v12 = vadd.f32 %v2644_v63, %v2567_v7  ;;  %v2693_v0 = vadd.f32 %v2646_v6, %v2568_v2  ;;  %v2768_v47 = vsel %vm1148_vm9, %v2766_v50, %v2767_v4  ;;  %v2890_v46 = vrot.slane %v2838_v59, 3 }
  0xdb   : > { %v2962_v40 = vmul.f32 %v5262_v43, %v7405_v23  ;;  %v2770_v13 = vsel %vm1148_vm9, %v2767_v4, %v2769_v1  ;;  %v2891_v57 = vrot.slane %v2839_v48, 3  ;;  %v2893_v3 = vrot.slane %v2840_v35, 3  ;;  %v7410_v4 = vld [vmem:[#allocation11_spill] sm:$0xff] }
  0xdc   : > { %v2816_v58 = vadd.f32 %v2768_v47, %v2692_v12  ;;  %v2817_v60 = vadd.f32 %v2770_v13, %v2693_v0  ;;  %v2963_v61 = vmul.f32 %v5262_v43, %v7406_v34  ;;  %v2964_v8 = vmul.f32 %v5262_v43, %v7407_v55 }
  0xdd   : > { %v3014_v56 = vrot.slane %v2962_v40, 4  ;;  %v2892_v54 = vsel %vm1273_vm10, %v2890_v46, %v2891_v57  ;;  %v2894_v9 = vsel %vm1273_vm10, %v2891_v57, %v2893_v3  ;;  %v3086_v5 = vmul.f32 %v7408_v49, %v5264_v44 }
  0xde   : > { %v3087_v7 = vmul.f32 %v7409_v32, %v5264_v44  ;;  %v2940_v39 = vadd.f32 %v2892_v54, %v2816_v58  ;;  %v2941_v50 = vadd.f32 %v2894_v9, %v2817_v60  ;;  %v3015_v59 = vrot.slane %v2963_v61, 4 }
  0xdf   : > { %v3017_v2 = vrot.slane %v2964_v8, 4  ;;  %v3125_v63 = vmul.f32 %v7408_v49, %v5266_v45  ;;  %v3126_v6 = vmul.f32 %v7409_v32, %v5266_v45  ;;  %v3127_v12 = vmul.f32 %v5266_v45, %v7410_v4 }
  0xe0   : > { %v3249_v1 = vmul.f32 %v7408_v49, %v5270_v51  ;;  %v3016_v48 = vsel %vm1398_vm11, %v3014_v56, %v3015_v59  ;;  %v3250_v0 = vmul.f32 %v7409_v32, %v5270_v51  ;;  %v3251_v47 = vmul.f32 %v5270_v51, %v7410_v4 }
  0xe1   : > { %v3018_v35 = vsel %vm1398_vm11, %v3015_v59, %v3017_v2  ;;  %v3064_v46 = vadd.f32 %v3016_v48, %v2940_v39  ;;  %v3177_v13 = vrot.slane %v3125_v63, 1  ;;  %v3178_v58 = vrot.slane %v3126_v6, 1  ;;  %v4816_v63 = vld [vmem:[%s5207_s22 + $0x10] sm:$0xff]  }
  0xe2   : > { %v3065_v40 = vadd.f32 %v3018_v35, %v2941_v50  ;;  %v3180_v57 = vrot.slane %v3127_v12, 1  ;;  %v3301_v3 = vrot.slane %v3249_v1, 2  ;;  %v3302_v60 = vrot.slane %v3250_v0, 2 }
  0xe3   : > { %v3304_v61 = vrot.slane %v3251_v47, 2  ;;  %v3102_v8 = vadd.f32 %v3086_v5, %v3064_v46  ;;  %v3179_v56 = vsel %vm1023_vm8, %v3177_v13, %v3178_v58  ;;  %v3373_v9 = vmul.f32 %v7408_v49, %v5272_v52 }
  0xe4   : > { %v3103_v54 = vadd.f32 %v3087_v7, %v3065_v40  ;;  %v3181_v59 = vsel %vm1023_vm8, %v3178_v58, %v3180_v57  ;;  %v3303_v2 = vsel %vm1148_vm9, %v3301_v3, %v3302_v60  ;;  %v3374_v50 = vmul.f32 %v7409_v32, %v5272_v52 }
  0xe5   : > { %v3305_v39 = vsel %vm1148_vm9, %v3302_v60, %v3304_v61  ;;  %v3227_v6 = vadd.f32 %v3179_v56, %v3102_v8  ;;  %v3375_v5 = vmul.f32 %v5272_v52, %v7410_v4  ;;  %v3425_v7 = vrot.slane %v3373_v9, 3 }
  0xe6   : > { %v3228_v12 = vadd.f32 %v3181_v59, %v3103_v54  ;;  %v3426_v1 = vrot.slane %v3374_v50, 3  ;;  %v3497_v48 = vmul.f32 %v7408_v49, %v5274_v53  ;;  %v3498_v35 = vmul.f32 %v7409_v32, %v5274_v53 }
  0xe7   : > { %v3499_v0 = vmul.f32 %v5274_v53, %v7410_v4  ;;  %v3351_v47 = vadd.f32 %v3303_v2, %v3227_v6  ;;  %v3428_v40 = vrot.slane %v3375_v5, 3  ;;  %v4788_v13 = vunpack.c.l.bf16 %v4816_v63 }
  0xe8   : > { %v3352_v46 = vadd.f32 %v3305_v39, %v3228_v12  ;;  %v3427_v58 = vsel %vm1273_vm10, %v3425_v7, %v3426_v1  ;;  %v3549_v57 = vrot.slane %v3497_v48, 4  ;;  %v3550_v3 = vrot.slane %v3498_v35, 4 }
  0xe9   : > { %v3552_v60 = vrot.slane %v3499_v0, 4  ;;  %v3429_v61 = vsel %vm1273_vm10, %v3426_v1, %v3428_v40  ;;  %v3475_v8 = vadd.f32 %v3427_v58, %v3351_v47  ;;  %v4789_v54 = vunpack.c.h.bf16 %v4816_v63 }
  0xea   : > { %v937_v56 = vmul.f32 %v5209_v15, %v5379_v10  ;;  %v3476_v9 = vadd.f32 %v3429_v61, %v3352_v46  ;;  %v3551_v59 = vsel %vm1398_vm11, %v3549_v57, %v3550_v3  ;;  %v938_v39 = vmul.f32 %v5209_v15, %v5381_v11 }
  0xeb   : > { %v3553_v2 = vsel %vm1398_vm11, %v3550_v3, %v3552_v60  ;;  %v3599_v50 = vadd.f32 %v3551_v59, %v3475_v8  ;;  %v984_v6 = vmul.f32 %v5211_v16, %v5379_v10  ;;  %v985_v12 = vmul.f32 %v5211_v16, %v5381_v11 }
  0xec   : > { %v986_v63 = vmul.f32 %v5211_v16, %v5391_v33  ;;  %v3600_v5 = vadd.f32 %v3553_v2, %v3476_v9  ;;  %v1109_v7 = vmul.f32 %v5213_v17, %v5379_v10  ;;  %v1110_v1 = vmul.f32 %v5213_v17, %v5381_v11 }
  0xed   : > { %v1111_v48 = vmul.f32 %v5213_v17, %v5391_v33  ;;  %v3621_v35 = vadd.f32 %v5612_v62, %v3599_v50  ;;  %v1039_v0 = vrot.slane %v984_v6, 1  ;;  %v1040_v47 = vrot.slane %v985_v12, 1 }
  0xee   : > { %v1042_v46 = vrot.slane %v986_v63, 1  ;;  %v3622_v40 = vadd.f32 %v5612_v62, %v3600_v5  ;;  %v1164_v58 = vrot.slane %v1109_v7, 2  ;;  %v1165_v57 = vrot.slane %v1110_v1, 2 }
  0xef   : > { %v1167_v3 = vrot.slane %v1111_v48, 2  ;;  %v3669_v60 = vmul.f32 %v4788_v13, %v3621_v35  ;;  %v1041_v61 = vsel %vm1023_vm8, %v1039_v0, %v1040_v47  ;;  %v1234_v9 = vmul.f32 %v5218_v19, %v5379_v10 }
  0xf0   : > { %v1043_v8 = vsel %vm1023_vm8, %v1040_v47, %v1042_v46  ;;  %v3670_v59 = vmul.f32 %v4789_v54, %v3622_v40  ;;  %v1086_v2 = vadd.f32 %v1041_v61, %v937_v56  ;;  %v1166_v50 = vsel %vm1148_vm9, %v1164_v58, %v1165_v57 }
  0xf1   : > { %v1087_v17 = vadd.f32 %v1043_v8, %v938_v39  ;;  %v1168_v6 = vsel %vm1148_vm9, %v1165_v57, %v1167_v3  ;;  %v1235_v62 = vmul.f32 %v5218_v19, %v5381_v11  ;;  %v1236_v13 = vmul.f32 %v5218_v19, %v5391_v33 }
  0xf2   : > { %v1289_v12 = vrot.slane %v1234_v9, 3  ;;  %v3683_v63 = vpack.c.bf16 %v3670_v59, %v3669_v60  ;;  %v1211_v5 = vadd.f32 %v1166_v50, %v1086_v2  ;;  %v1359_v1 = vmul.f32 %v5220_v20, %v5379_v10 }
  0xf3   : > { %v1212_v7 = vadd.f32 %v1168_v6, %v1087_v17  ;;  %v1290_v54 = vrot.slane %v1235_v62, 3  ;;  %v1292_v56 = vrot.slane %v1236_v13, 3  ;;  %v1360_v39 = vmul.f32 %v5220_v20, %v5381_v11 }
  0xf4   : > { %v1361_v48 = vmul.f32 %v5220_v20, %v5391_v33  ;;  %4846 = vmatprep.mubr.msk.bf16.mxu0 %vm3697_vm12, %v3683_v63  ;;  %v1414_v35 = vrot.slane %v1359_v1, 4  ;;  %v1483_v0 = vmul.f32 %v5387_v14, %v5222_v21  ;;  %v1484_v17 = vmul.f32 %v5389_v18, %v5222_v21 }
  0xf5   : > { %v1523_v10 = vmul.f32 %v5387_v14, %v5224_v22  ;;  %v1291_v47 = vsel %vm1273_vm10, %v1289_v12, %v1290_v54  ;;  %v1293_v46 = vsel %vm1273_vm10, %v1290_v54, %v1292_v56  ;;  %v1415_v11 = vrot.slane %v1360_v39, 4 }
  0xf6   : > { %v1417_v40 = vrot.slane %v1361_v48, 4  ;;  %v1336_v58 = vadd.f32 %v1291_v47, %v1211_v5  ;;  %v1337_v33 = vadd.f32 %v1293_v46, %v1212_v7  ;;  %v1524_v57 = vmul.f32 %v5389_v18, %v5224_v22 }
  0xf7   : > { %v1525_v3 = vmul.f32 %v5224_v22, %v5395_v41  ;;  %v1416_v60 = vsel %vm1398_vm11, %v1414_v35, %v1415_v11  ;;  %v1577_v8 = vrot.slane %v1523_v10, 1  ;;  %v1647_v9 = vmul.f32 %v5387_v14, %v5230_v24 }
  0xf8   : > { %v1418_v61 = vsel %vm1398_vm11, %v1415_v11, %v1417_v40  ;;  %v1461_v59 = vadd.f32 %v1416_v60, %v1336_v58  ;;  %v1578_v50 = vrot.slane %v1524_v57, 1  ;;  %v1648_v62 = vmul.f32 %v5389_v18, %v5230_v24 }
  0xf9   : > { %v1462_v2 = vadd.f32 %v1418_v61, %v1337_v33  ;;  %v1580_v6 = vrot.slane %v1525_v3, 1  ;;  %v1649_v13 = vmul.f32 %v5230_v24, %v5395_v41  ;;  %v1701_v12 = vrot.slane %v1647_v9, 2 }
  0xfa   : > { %v1771_v63 = vmul.f32 %v5387_v14, %v5232_v25  ;;  %v1499_v5 = vadd.f32 %v1483_v0, %v1461_v59  ;;  %v1579_v1 = vsel %vm1023_vm8, %v1577_v8, %v1578_v50  ;;  %v1702_v56 = vrot.slane %v1648_v62, 2 }
  0xfb   : > { %v1500_v7 = vadd.f32 %v1484_v17, %v1462_v2  ;;  %v1581_v54 = vsel %vm1023_vm8, %v1578_v50, %v1580_v6  ;;  %v1704_v39 = vrot.slane %v1649_v13, 2  ;;  %v1772_v48 = vmul.f32 %v5389_v18, %v5232_v25 }
  0xfc   : > { %v1773_v35 = vmul.f32 %v5232_v25, %v5395_v41  ;;  %v1624_v10 = vadd.f32 %v1579_v1, %v1499_v5  ;;  %v1825_v46 = vrot.slane %v1771_v63, 3  ;;  %v1895_v11 = vmul.f32 %v5387_v14, %v5234_v26 }
  0xfd   : > { %v1625_v47 = vadd.f32 %v1581_v54, %v1500_v7  ;;  %v1703_v0 = vsel %vm1148_vm9, %v1701_v12, %v1702_v56  ;;  %v1705_v17 = vsel %vm1148_vm9, %v1702_v56, %v1704_v39  ;;  %v1826_v40 = vrot.slane %v1772_v48, 3 }
  0xfe   : > { %v1828_v58 = vrot.slane %v1773_v35, 3  ;;  %v1748_v33 = vadd.f32 %v1703_v0, %v1624_v10  ;;  %v1896_v3 = vmul.f32 %v5389_v18, %v5234_v26  ;;  %v1897_v60 = vmul.f32 %v5234_v26, %v5395_v41 }
  0xff   : > { %v1749_v57 = vadd.f32 %v1705_v17, %v1625_v47  ;;  %v1827_v61 = vsel %vm1273_vm10, %v1825_v46, %v1826_v40  ;;  %v1949_v9 = vrot.slane %v1895_v11, 4  ;;  %v2018_v59 = vmul.f32 %v5236_v27, %v7405_v23 }
 0x100   : > { %v1829_v8 = vsel %vm1273_vm10, %v1826_v40, %v1828_v58  ;;  %v1872_v2 = vadd.f32 %v1827_v61, %v1748_v33  ;;  %v1950_v6 = vrot.slane %v1896_v3, 4  ;;  %v1952_v62 = vrot.slane %v1897_v60, 4 }
 0x101   : > { %v1873_v50 = vadd.f32 %v1829_v8, %v1749_v57  ;;  %v2019_v13 = vmul.f32 %v5236_v27, %v7406_v34  ;;  %v2058_v12 = vmul.f32 %v5241_v28, %v7405_v23  ;;  %v2059_v63 = vmul.f32 %v5241_v28, %v7406_v34 }
 0x102   : > { %v2060_v5 = vmul.f32 %v5241_v28, %v7407_v55  ;;  %v1951_v7 = vsel %vm1398_vm11, %v1949_v9, %v1950_v6  ;;  %v1953_v1 = vsel %vm1398_vm11, %v1950_v6, %v1952_v62  ;;  %v2182_v54 = vmul.f32 %v5243_v29, %v7405_v23 }
 0x103   : > { %v2183_v56 = vmul.f32 %v5243_v29, %v7406_v34  ;;  %v1996_v39 = vadd.f32 %v1951_v7, %v1872_v2  ;;  %v1997_v48 = vadd.f32 %v1953_v1, %v1873_v50  ;;  %v2112_v35 = vrot.slane %v2058_v12, 1 }
 0x104   : > { %v2113_v10 = vrot.slane %v2059_v63, 1  ;;  %v2115_v47 = vrot.slane %v2060_v5, 1  ;;  %v2184_v46 = vmul.f32 %v5243_v29, %v7407_v55  ;;  %v2236_v11 = vrot.slane %v2182_v54, 2 }
 0x105   : > { %v2237_v0 = vrot.slane %v2183_v56, 2  ;;  %v2034_v17 = vadd.f32 %v2018_v59, %v1996_v39  ;;  %v2035_v40 = vadd.f32 %v2019_v13, %v1997_v48  ;;  %v2306_v33 = vmul.f32 %v5245_v30, %v7405_v23 }
 0x106   : > { %v2114_v58 = vsel %vm1023_vm8, %v2112_v35, %v2113_v10  ;;  %v2116_v57 = vsel %vm1023_vm8, %v2113_v10, %v2115_v47  ;;  %v2239_v60 = vrot.slane %v2184_v46, 2  ;;  %v2307_v61 = vmul.f32 %v5245_v30, %v7406_v34 }
 0x107   : > { %v2238_v3 = vsel %vm1148_vm9, %v2236_v11, %v2237_v0  ;;  %v2159_v8 = vadd.f32 %v2114_v58, %v2034_v17  ;;  %v2160_v9 = vadd.f32 %v2116_v57, %v2035_v40  ;;  %v2308_v2 = vmul.f32 %v5245_v30, %v7407_v55 }
 0x108   : > { %v2360_v59 = vrot.slane %v2306_v33, 3  ;;  %v2240_v50 = vsel %vm1148_vm9, %v2237_v0, %v2239_v60  ;;  %v2361_v6 = vrot.slane %v2307_v61, 3  ;;  %v2430_v62 = vmul.f32 %v5247_v31, %v7405_v23 }
 0x109   : > { %v2431_v13 = vmul.f32 %v5247_v31, %v7406_v34  ;;  %v2283_v12 = vadd.f32 %v2238_v3, %v2159_v8  ;;  %v2284_v63 = vadd.f32 %v2240_v50, %v2160_v9  ;;  %v2363_v5 = vrot.slane %v2308_v2, 3 }
 0x10a   : > { %v2432_v7 = vmul.f32 %v5247_v31, %v7407_v55  ;;  %v2362_v1 = vsel %vm1273_vm10, %v2360_v59, %v2361_v6  ;;  %v2484_v54 = vrot.slane %v2430_v62, 4  ;;  %v2553_v39 = vmul.f32 %v7408_v49, %v5254_v36 }
 0x10b   : > { %v2485_v56 = vrot.slane %v2431_v13, 4  ;;  %v2364_v48 = vsel %vm1273_vm10, %v2361_v6, %v2363_v5  ;;  %v2407_v35 = vadd.f32 %v2362_v1, %v2283_v12  ;;  %v2554_v47 = vmul.f32 %v7409_v32, %v5254_v36 }
 0x10c   : > { %v2487_v10 = vrot.slane %v2432_v7, 4  ;;  %v2408_v46 = vadd.f32 %v2364_v48, %v2284_v63  ;;  %v2593_v0 = vmul.f32 %v7408_v49, %v5256_v37  ;;  %v2594_v17 = vmul.f32 %v7409_v32, %v5256_v37 }
 0x10d   : > { %v2486_v11 = vsel %vm1398_vm11, %v2484_v54, %v2485_v56  ;;  %v2595_v33 = vmul.f32 %v5256_v37, %v7410_v4  ;;  %v2717_v57 = vmul.f32 %v7408_v49, %v5258_v38  ;;  %v2718_v8 = vmul.f32 %v7409_v32, %v5258_v38 }
 0x10e   : > { %v2488_v40 = vsel %vm1398_vm11, %v2485_v56, %v2487_v10  ;;  %v2531_v58 = vadd.f32 %v2486_v11, %v2407_v35  ;;  %v2647_v60 = vrot.slane %v2593_v0, 1  ;;  %v2648_v61 = vrot.slane %v2594_v17, 1 }
 0x10f   : > { %v2532_v3 = vadd.f32 %v2488_v40, %v2408_v46  ;;  %v2650_v2 = vrot.slane %v2595_v33, 1  ;;  %v2719_v59 = vmul.f32 %v5258_v38, %v7410_v4  ;;  %v2771_v50 = vrot.slane %v2717_v57, 2  ;;  %v7411_v57 = vld [vmem:[#allocation13_spill] sm:$0xff] }
 0x110   : > { %v2569_v9 = vadd.f32 %v2553_v39, %v2531_v58  ;;  %v2649_v62 = vsel %vm1023_vm8, %v2647_v60, %v2648_v61  ;;  %v2772_v13 = vrot.slane %v2718_v8, 2  ;;  %v2841_v12 = vmul.f32 %v7408_v49, %v5260_v42  ;;  %v7412_v60 = vld [vmem:[#allocation14_spill] sm:$0xff] }
 0x111   : > { %v2570_v6 = vadd.f32 %v2554_v47, %v2532_v3  ;;  %v2651_v63 = vsel %vm1023_vm8, %v2648_v61, %v2650_v2  ;;  %v2774_v7 = vrot.slane %v2719_v59, 2  ;;  %v2842_v1 = vmul.f32 %v7409_v32, %v5260_v42 }
 0x112   : > { %v2694_v5 = vadd.f32 %v2649_v62, %v2569_v9  ;;  %v2773_v56 = vsel %vm1148_vm9, %v2771_v50, %v2772_v13  ;;  %v2843_v39 = vmul.f32 %v5260_v42, %v7410_v4  ;;  %v2895_v48 = vrot.slane %v2841_v12, 3 }
 0x113   : > { %v2695_v54 = vadd.f32 %v2651_v63, %v2570_v6  ;;  %v2775_v35 = vsel %vm1148_vm9, %v2772_v13, %v2774_v7  ;;  %v2896_v47 = vrot.slane %v2842_v1, 3  ;;  %v2965_v46 = vmul.f32 %v7408_v49, %v5262_v43  ;;  %v7413_v13 = vld [vmem:[#allocation16_spill] sm:$0xff] }
 0x114   : > { %v2818_v10 = vadd.f32 %v2773_v56, %v2694_v5  ;;  %v2898_v0 = vrot.slane %v2843_v39, 3  ;;  %v2966_v17 = vmul.f32 %v7409_v32, %v5262_v43  ;;  %v2967_v40 = vmul.f32 %v5262_v43, %v7410_v4 }
 0x115   : > { %v2819_v11 = vadd.f32 %v2775_v35, %v2695_v54  ;;  %v2897_v58 = vsel %vm1273_vm10, %v2895_v48, %v2896_v47  ;;  %v3019_v33 = vrot.slane %v2965_v46, 4  ;;  %v3088_v3 = vmul.f32 %v5264_v44, %v7411_v57 }
 0x116   : > { %v3089_v61 = vmul.f32 %v5264_v44, %v7412_v60  ;;  %v2899_v8 = vsel %vm1273_vm10, %v2896_v47, %v2898_v0  ;;  %v2942_v9 = vadd.f32 %v2897_v58, %v2818_v10  ;;  %v3020_v2 = vrot.slane %v2966_v17, 4 }
 0x117   : > { %v3022_v59 = vrot.slane %v2967_v40, 4  ;;  %v2943_v50 = vadd.f32 %v2899_v8, %v2819_v11  ;;  %v3128_v6 = vmul.f32 %v5266_v45, %v7411_v57  ;;  %v3129_v62 = vmul.f32 %v5266_v45, %v7412_v60 }
 0x118   : > { %v3130_v12 = vmul.f32 %v5266_v45, %v7413_v13  ;;  %v3021_v63 = vsel %vm1398_vm11, %v3019_v33, %v3020_v2  ;;  %v3252_v7 = vmul.f32 %v5270_v51, %v7411_v57  ;;  %v3253_v1 = vmul.f32 %v5270_v51, %v7412_v60 }
 0x119   : > { %v3023_v5 = vsel %vm1398_vm11, %v3020_v2, %v3022_v59  ;;  %v3066_v54 = vadd.f32 %v3021_v63, %v2942_v9  ;;  %v3182_v39 = vrot.slane %v3128_v6, 1  ;;  %v3183_v48 = vrot.slane %v3129_v62, 1 }
 0x11a   : > { %v3067_v56 = vadd.f32 %v3023_v5, %v2943_v50  ;;  %v3185_v35 = vrot.slane %v3130_v12, 1  ;;  %v3254_v10 = vmul.f32 %v5270_v51, %v7413_v13  ;;  %v3306_v47 = vrot.slane %v3252_v7, 2 }
 0x11b   : > { %v3307_v46 = vrot.slane %v3253_v1, 2  ;;  %v3104_v11 = vadd.f32 %v3088_v3, %v3066_v54  ;;  %v3184_v17 = vsel %vm1023_vm8, %v3182_v39, %v3183_v48  ;;  %v3376_v40 = vmul.f32 %v5272_v52, %v7411_v57 }
 0x11c   : > { %v3105_v0 = vadd.f32 %v3089_v61, %v3067_v56  ;;  %v3186_v58 = vsel %vm1023_vm8, %v3183_v48, %v3185_v35  ;;  %v3309_v8 = vrot.slane %v3254_v10, 2  ;;  %v3377_v9 = vmul.f32 %v5272_v52, %v7412_v60  ;;  %v4817_v61 = vld [vmem:[%s5207_s22 + $0x18] sm:$0xff]  }
 0x11d   : > { %v3308_v33 = vsel %vm1148_vm9, %v3306_v47, %v3307_v46  ;;  %v3229_v2 = vadd.f32 %v3184_v17, %v3104_v11  ;;  %v3378_v50 = vmul.f32 %v5272_v52, %v7413_v13  ;;  %v3430_v3 = vrot.slane %v3376_v40, 3 }
 0x11e   : > { %v3230_v59 = vadd.f32 %v3186_v58, %v3105_v0  ;;  %v3310_v6 = vsel %vm1148_vm9, %v3307_v46, %v3309_v8  ;;  %v3431_v62 = vrot.slane %v3377_v9, 3  ;;  %v3500_v12 = vmul.f32 %v5274_v53, %v7411_v57 }
 0x11f   : > { %v3501_v63 = vmul.f32 %v5274_v53, %v7412_v60  ;;  %v3353_v5 = vadd.f32 %v3308_v33, %v3229_v2  ;;  %v3433_v1 = vrot.slane %v3378_v50, 3  ;;  %v3502_v54 = vmul.f32 %v5274_v53, %v7413_v13 }
 0x120   : > { %v3354_v7 = vadd.f32 %v3310_v6, %v3230_v59  ;;  %v3432_v56 = vsel %vm1273_vm10, %v3430_v3, %v3431_v62  ;;  %v3554_v39 = vrot.slane %v3500_v12, 4  ;;  %v4792_v35 = vunpack.c.l.bf16 %v4817_v61  ;;  %v7414_v3 = vld [vmem:[#allocation5_spill] sm:$0xff] }
 0x121   : > { %v3555_v48 = vrot.slane %v3501_v63, 4  ;;  %v3434_v10 = vsel %vm1273_vm10, %v3431_v62, %v3433_v1  ;;  %v3477_v47 = vadd.f32 %v3432_v56, %v3353_v5  ;;  %v3557_v46 = vrot.slane %v3502_v54, 4  ;;  %v6177_v62 = vld [vmem:[%s7346_s5] ss:$0 sm:$0xff] }
 0x122   : > { %v4793_v11 = vunpack.c.h.bf16 %v4817_v61  ;;  %v3478_v0 = vadd.f32 %v3434_v10, %v3354_v7  ;;  %v939_v40 = vmul.f32 %v5387_v14, %v5209_v15  ;;  %v940_v58 = vmul.f32 %v5389_v18, %v5209_v15 }
 0x123   : > { %v3556_v17 = vsel %vm1398_vm11, %v3554_v39, %v3555_v48  ;;  %v3558_v33 = vsel %vm1398_vm11, %v3555_v48, %v3557_v46  ;;  %v987_v9 = vmul.f32 %v5387_v14, %v5211_v16  ;;  %v988_v2 = vmul.f32 %v5389_v18, %v5211_v16 }
 0x124   : > { %v3601_v8 = vadd.f32 %v3556_v17, %v3477_v47  ;;  %v3602_v59 = vadd.f32 %v3558_v33, %v3478_v0  ;;  %v989_v50 = vmul.f32 %v5211_v16, %v5395_v41  ;;  %v1112_v61 = vmul.f32 %v5387_v14, %v7414_v3 }
 0x125   : > { %v1113_v6 = vmul.f32 %v5389_v18, %v7414_v3  ;;  %v1044_v63 = vrot.slane %v987_v9, 1  ;;  %v1045_v5 = vrot.slane %v988_v2, 1  ;;  %v1114_v7 = vmul.f32 %v7414_v3, %v5395_v41 }
 0x126   : > { %v3623_v12 = vadd.f32 %v6177_v62, %v3601_v8  ;;  %v3624_v1 = vadd.f32 %v6177_v62, %v3602_v59  ;;  %v1047_v54 = vrot.slane %v989_v50, 1  ;;  %v1169_v56 = vrot.slane %v1112_v61, 2 }
 0x127   : > { %v1170_v39 = vrot.slane %v1113_v6, 2  ;;  %v1046_v10 = vsel %vm1023_vm8, %v1044_v63, %v1045_v5  ;;  %v1172_v47 = vrot.slane %v1114_v7, 2  ;;  %v1237_v46 = vmul.f32 %v5387_v14, %v5218_v19 }
 0x128   : > { %v3671_v48 = vmul.f32 %v4792_v35, %v3623_v12  ;;  %v3672_v0 = vmul.f32 %v4793_v11, %v3624_v1  ;;  %v1048_v17 = vsel %vm1023_vm8, %v1045_v5, %v1047_v54  ;;  %v1088_v33 = vadd.f32 %v1046_v10, %v939_v40 }
 0x129   : > { %v1171_v8 = vsel %vm1148_vm9, %v1169_v56, %v1170_v39  ;;  %v1089_v9 = vadd.f32 %v1048_v17, %v940_v58  ;;  %v1173_v2 = vsel %vm1148_vm9, %v1170_v39, %v1172_v47  ;;  %v1238_v59 = vmul.f32 %v5389_v18, %v5218_v19 }
 0x12a   : > { %v1239_v35 = vmul.f32 %v5218_v19, %v5395_v41  ;;  %v3684_v50 = vpack.c.bf16 %v3672_v0, %v3671_v48  ;;  %v1213_v61 = vadd.f32 %v1171_v8, %v1088_v33  ;;  %v1294_v6 = vrot.slane %v1237_v46, 3 }
 0x12b   : > { %v1362_v11 = vmul.f32 %v5387_v14, %v5220_v20  ;;  %v1214_v12 = vadd.f32 %v1173_v2, %v1089_v9  ;;  %v1295_v63 = vrot.slane %v1238_v59, 3  ;;  %v1363_v58 = vmul.f32 %v5389_v18, %v5220_v20 }
 0x12c   : > { %v1297_v40 = vrot.slane %v1239_v35, 3  ;;  %4847 = vmatmul.mubr.msk.bf16.gmra.mrb[4].mxu0 %vm3697_vm12, %v3684_v50  ;;  %v1364_v5 = vmul.f32 %v5220_v20, %v5395_v41  ;;  %v1485_v1 = vmul.f32 %v5222_v21, %v7405_v23  ;;  %v1486_v54 = vmul.f32 %v5222_v21, %v7406_v34 }
 0x12d   : > { %v1419_v7 = vrot.slane %v1362_v11, 4  ;;  %v1296_v14 = vsel %vm1273_vm10, %v1294_v6, %v1295_v63  ;;  %v1420_v39 = vrot.slane %v1363_v58, 4  ;;  %v1526_v18 = vmul.f32 %v5224_v22, %v7405_v23 }
 0x12e   : > { %v1298_v56 = vsel %vm1273_vm10, %v1295_v63, %v1297_v40  ;;  %v1338_v48 = vadd.f32 %v1296_v14, %v1213_v61  ;;  %v1422_v47 = vrot.slane %v1364_v5, 4  ;;  %v1527_v41 = vmul.f32 %v5224_v22, %v7406_v34 }
 0x12f   : > { %v1339_v10 = vadd.f32 %v1298_v56, %v1214_v12  ;;  %v1421_v46 = vsel %vm1398_vm11, %v1419_v7, %v1420_v39  ;;  %v1528_v0 = vmul.f32 %v5224_v22, %v7407_v55  ;;  %v1582_v17 = vrot.slane %v1526_v18, 1 }
 0x130   : > { %v1650_v33 = vmul.f32 %v5230_v24, %v7405_v23  ;;  %v1423_v8 = vsel %vm1398_vm11, %v1420_v39, %v1422_v47  ;;  %v1463_v9 = vadd.f32 %v1421_v46, %v1338_v48  ;;  %v1583_v2 = vrot.slane %v1527_v41, 1 }
 0x131   : > { %v1651_v59 = vmul.f32 %v5230_v24, %v7406_v34  ;;  %v1464_v35 = vadd.f32 %v1423_v8, %v1339_v10  ;;  %v1585_v50 = vrot.slane %v1528_v0, 1  ;;  %v1652_v61 = vmul.f32 %v5230_v24, %v7407_v55 }
 0x132   : > { %v1706_v6 = vrot.slane %v1650_v33, 2  ;;  %v1501_v11 = vadd.f32 %v1485_v1, %v1463_v9  ;;  %v1584_v12 = vsel %vm1023_vm8, %v1582_v17, %v1583_v2  ;;  %v1774_v40 = vmul.f32 %v5232_v25, %v7405_v23 }
 0x133   : > { %v1707_v63 = vrot.slane %v1651_v59, 2  ;;  %v1502_v58 = vadd.f32 %v1486_v54, %v1464_v35  ;;  %v1586_v5 = vsel %vm1023_vm8, %v1583_v2, %v1585_v50  ;;  %v1709_v7 = vrot.slane %v1652_v61, 2 }
 0x134   : > { %v1775_v14 = vmul.f32 %v5232_v25, %v7406_v34  ;;  %v1626_v56 = vadd.f32 %v1584_v12, %v1501_v11  ;;  %v1776_v18 = vmul.f32 %v5232_v25, %v7407_v55  ;;  %v1830_v1 = vrot.slane %v1774_v40, 3 }
 0x135   : > { %v1708_v39 = vsel %vm1148_vm9, %v1706_v6, %v1707_v63  ;;  %v1627_v48 = vadd.f32 %v1586_v5, %v1502_v58  ;;  %v1710_v10 = vsel %vm1148_vm9, %v1707_v63, %v1709_v7  ;;  %v1898_v54 = vmul.f32 %v5234_v26, %v7405_v23 }
 0x136   : > { %v1831_v47 = vrot.slane %v1775_v14, 3  ;;  %v1750_v41 = vadd.f32 %v1708_v39, %v1626_v56  ;;  %v1833_v46 = vrot.slane %v1776_v18, 3  ;;  %v1899_v0 = vmul.f32 %v5234_v26, %v7406_v34 }
 0x137   : > { %v1900_v17 = vmul.f32 %v5234_v26, %v7407_v55  ;;  %v1751_v33 = vadd.f32 %v1710_v10, %v1627_v48  ;;  %v1954_v9 = vrot.slane %v1898_v54, 4  ;;  %v2020_v2 = vmul.f32 %v7408_v49, %v5236_v27 }
 0x138   : > { %v1832_v8 = vsel %vm1273_vm10, %v1830_v1, %v1831_v47  ;;  %v1834_v59 = vsel %vm1273_vm10, %v1831_v47, %v1833_v46  ;;  %v1955_v50 = vrot.slane %v1899_v0, 4  ;;  %v2021_v11 = vmul.f32 %v7409_v32, %v5236_v27 }
 0x139   : > { %v1874_v35 = vadd.f32 %v1832_v8, %v1750_v41  ;;  %v1957_v61 = vrot.slane %v1900_v17, 4  ;;  %v1875_v6 = vadd.f32 %v1834_v59, %v1751_v33  ;;  %v2061_v12 = vmul.f32 %v7408_v49, %v5241_v28 }
 0x13a   : > { %v2062_v63 = vmul.f32 %v7409_v32, %v5241_v28  ;;  %v1956_v40 = vsel %vm1398_vm11, %v1954_v9, %v1955_v50  ;;  %v2063_v5 = vmul.f32 %v5241_v28, %v7410_v4  ;;  %v2185_v7 = vmul.f32 %v7408_v49, %v5243_v29 }
 0x13b   : > { %v1958_v58 = vsel %vm1398_vm11, %v1955_v50, %v1957_v61  ;;  %v1998_v14 = vadd.f32 %v1956_v40, %v1874_v35  ;;  %v2117_v39 = vrot.slane %v2061_v12, 1  ;;  %v2186_v48 = vmul.f32 %v7409_v32, %v5243_v29 }
 0x13c   : > { %v1999_v56 = vadd.f32 %v1958_v58, %v1875_v6  ;;  %v2118_v18 = vrot.slane %v2062_v63, 1  ;;  %v2120_v1 = vrot.slane %v2063_v5, 1  ;;  %v2187_v10 = vmul.f32 %v5243_v29, %v7410_v4 }
 0x13d   : > { %v2241_v47 = vrot.slane %v2185_v7, 2  ;;  %v2036_v54 = vadd.f32 %v2020_v2, %v1998_v14  ;;  %v2309_v0 = vmul.f32 %v7408_v49, %v5245_v30  ;;  %v2242_v33 = vrot.slane %v2186_v48, 2 }
 0x13e   : > { %v2037_v41 = vadd.f32 %v2021_v11, %v1999_v56  ;;  %v2119_v46 = vsel %vm1023_vm8, %v2117_v39, %v2118_v18  ;;  %v2121_v17 = vsel %vm1023_vm8, %v2118_v18, %v2120_v1  ;;  %v2244_v8 = vrot.slane %v2187_v10, 2 }
 0x13f   : > { %v2310_v9 = vmul.f32 %v7409_v32, %v5245_v30  ;;  %v2161_v59 = vadd.f32 %v2119_v46, %v2036_v54  ;;  %v2311_v50 = vmul.f32 %v5245_v30, %v7410_v4  ;;  %v2365_v61 = vrot.slane %v2309_v0, 3 }
 0x140   : > { %v2162_v35 = vadd.f32 %v2121_v17, %v2037_v41  ;;  %v2243_v2 = vsel %vm1148_vm9, %v2241_v47, %v2242_v33  ;;  %v2245_v6 = vsel %vm1148_vm9, %v2242_v33, %v2244_v8  ;;  %v2433_v12 = vmul.f32 %v7408_v49, %v5247_v31 }
 0x141   : > { %v2366_v11 = vrot.slane %v2310_v9, 3  ;;  %v2285_v63 = vadd.f32 %v2243_v2, %v2161_v59  ;;  %v2368_v58 = vrot.slane %v2311_v50, 3  ;;  %v2434_v5 = vmul.f32 %v7409_v32, %v5247_v31 }
 0x142   : > { %v2286_v40 = vadd.f32 %v2245_v6, %v2162_v35  ;;  %v2435_v14 = vmul.f32 %v5247_v31, %v7410_v4  ;;  %v2489_v56 = vrot.slane %v2433_v12, 4  ;;  %v2555_v39 = vmul.f32 %v5254_v36, %v7411_v57 }
 0x143   : > { %v2367_v7 = vsel %vm1273_vm10, %v2365_v61, %v2366_v11  ;;  %v2369_v18 = vsel %vm1273_vm10, %v2366_v11, %v2368_v58  ;;  %v2490_v48 = vrot.slane %v2434_v5, 4  ;;  %v2556_v10 = vmul.f32 %v5254_v36, %v7412_v60 }
 0x144   : > { %v2409_v1 = vadd.f32 %v2367_v7, %v2285_v63  ;;  %v2410_v47 = vadd.f32 %v2369_v18, %v2286_v40  ;;  %v2492_v54 = vrot.slane %v2435_v14, 4  ;;  %v2596_v41 = vmul.f32 %v5256_v37, %v7411_v57 }
 0x145   : > { %v2597_v46 = vmul.f32 %v5256_v37, %v7412_v60  ;;  %v2491_v0 = vsel %vm1398_vm11, %v2489_v56, %v2490_v48  ;;  %v2598_v17 = vmul.f32 %v5256_v37, %v7413_v13  ;;  %v2720_v33 = vmul.f32 %v5258_v38, %v7411_v57 }
 0x146   : > { %v2721_v8 = vmul.f32 %v5258_v38, %v7412_v60  ;;  %v2493_v9 = vsel %vm1398_vm11, %v2490_v48, %v2492_v54  ;;  %v2533_v59 = vadd.f32 %v2491_v0, %v2409_v1  ;;  %v2652_v35 = vrot.slane %v2596_v41, 1 }
 0x147   : > { %v2653_v50 = vrot.slane %v2597_v46, 1  ;;  %v2534_v61 = vadd.f32 %v2493_v9, %v2410_v47  ;;  %v2655_v2 = vrot.slane %v2598_v17, 1  ;;  %v2722_v6 = vmul.f32 %v5258_v38, %v7413_v13 }
 0x148   : > { %v2776_v11 = vrot.slane %v2720_v33, 2  ;;  %v2571_v12 = vadd.f32 %v2555_v39, %v2533_v59  ;;  %v2777_v40 = vrot.slane %v2721_v8, 2  ;;  %v2844_v58 = vmul.f32 %v5260_v42, %v7411_v57 }
 0x149   : > { %v2654_v63 = vsel %vm1023_vm8, %v2652_v35, %v2653_v50  ;;  %v2572_v5 = vadd.f32 %v2556_v10, %v2534_v61  ;;  %v2656_v7 = vsel %vm1023_vm8, %v2653_v50, %v2655_v2  ;;  %v2779_v14 = vrot.slane %v2722_v6, 2  ;;  %v7415_v35 = vld [vmem:[#allocation15_spill] sm:$0xff] }
 0x14a   : > { %v2845_v56 = vmul.f32 %v5260_v42, %v7412_v60  ;;  %v2696_v18 = vadd.f32 %v2654_v63, %v2571_v12  ;;  %v2778_v1 = vsel %vm1148_vm9, %v2776_v11, %v2777_v40  ;;  %v2846_v48 = vmul.f32 %v5260_v42, %v7413_v13  ;;  %v7416_v63 = vld [vmem:[#allocation17_spill] sm:$0xff] }
 0x14b   : > { %v2900_v39 = vrot.slane %v2844_v58, 3  ;;  %v2697_v47 = vadd.f32 %v2656_v7, %v2572_v5  ;;  %v2780_v54 = vsel %vm1148_vm9, %v2777_v40, %v2779_v14  ;;  %v2968_v10 = vmul.f32 %v5262_v43, %v7411_v57 }
 0x14c   : > { %v2901_v41 = vrot.slane %v2845_v56, 3  ;;  %v2820_v46 = vadd.f32 %v2778_v1, %v2696_v18  ;;  %v2903_v0 = vrot.slane %v2846_v48, 3  ;;  %v2969_v17 = vmul.f32 %v5262_v43, %v7412_v60  ;;  %v7417_v56 = vld [vmem:[#allocation18_spill] sm:$0xff] }
 0x14d   : > { %v2970_v33 = vmul.f32 %v5262_v43, %v7413_v13  ;;  %v2821_v8 = vadd.f32 %v2780_v54, %v2697_v47  ;;  %v3024_v59 = vrot.slane %v2968_v10, 4  ;;  %v3090_v50 = vmul.f32 %v7415_v35, %v5264_v44 }
 0x14e   : > { %v2902_v9 = vsel %vm1273_vm10, %v2900_v39, %v2901_v41  ;;  %v2904_v61 = vsel %vm1273_vm10, %v2901_v41, %v2903_v0  ;;  %v3025_v6 = vrot.slane %v2969_v17, 4  ;;  %v3091_v40 = vmul.f32 %v7416_v63, %v5264_v44 }
 0x14f   : > { %v2944_v2 = vadd.f32 %v2902_v9, %v2820_v46  ;;  %v3027_v11 = vrot.slane %v2970_v33, 4  ;;  %v2945_v12 = vadd.f32 %v2904_v61, %v2821_v8  ;;  %v3131_v58 = vmul.f32 %v7415_v35, %v5266_v45 }
 0x150   : > { %v3132_v5 = vmul.f32 %v7416_v63, %v5266_v45  ;;  %v3026_v7 = vsel %vm1398_vm11, %v3024_v59, %v3025_v6  ;;  %v3133_v18 = vmul.f32 %v5266_v45, %v7417_v56  ;;  %v3255_v1 = vmul.f32 %v7415_v35, %v5270_v51 }
 0x151   : > { %v3028_v14 = vsel %vm1398_vm11, %v3025_v6, %v3027_v11  ;;  %v3068_v48 = vadd.f32 %v3026_v7, %v2944_v2  ;;  %v3187_v47 = vrot.slane %v3131_v58, 1  ;;  %v3256_v10 = vmul.f32 %v7416_v63, %v5270_v51 }
 0x152   : > { %v3069_v39 = vadd.f32 %v3028_v14, %v2945_v12  ;;  %v3188_v54 = vrot.slane %v3132_v5, 1  ;;  %v3190_v41 = vrot.slane %v3133_v18, 1  ;;  %v3257_v46 = vmul.f32 %v5270_v51, %v7417_v56 }
 0x153   : > { %v3311_v0 = vrot.slane %v3255_v1, 2  ;;  %v3106_v17 = vadd.f32 %v3090_v50, %v3068_v48  ;;  %v3379_v9 = vmul.f32 %v7415_v35, %v5272_v52  ;;  %v3312_v61 = vrot.slane %v3256_v10, 2  ;;  %v4818_v50 = vld [vmem:[%s5207_s22 + $0x20] sm:$0xff]  }
 0x154   : > { %v3107_v33 = vadd.f32 %v3091_v40, %v3069_v39  ;;  %v3189_v8 = vsel %vm1023_vm8, %v3187_v47, %v3188_v54  ;;  %v3191_v59 = vsel %vm1023_vm8, %v3188_v54, %v3190_v41  ;;  %v3314_v2 = vrot.slane %v3257_v46, 2 }
 0x155   : > { %v3380_v6 = vmul.f32 %v7416_v63, %v5272_v52  ;;  %v3231_v11 = vadd.f32 %v3189_v8, %v3106_v17  ;;  %v3381_v58 = vmul.f32 %v5272_v52, %v7417_v56  ;;  %v3435_v5 = vrot.slane %v3379_v9, 3 }
 0x156   : > { %v3232_v12 = vadd.f32 %v3191_v59, %v3107_v33  ;;  %v3313_v40 = vsel %vm1148_vm9, %v3311_v0, %v3312_v61  ;;  %v3315_v7 = vsel %vm1148_vm9, %v3312_v61, %v3314_v2  ;;  %v3503_v18 = vmul.f32 %v7415_v35, %v5274_v53 }
 0x157   : > { %v3436_v14 = vrot.slane %v3380_v6, 3  ;;  %v3355_v1 = vadd.f32 %v3313_v40, %v3231_v11  ;;  %v3438_v39 = vrot.slane %v3381_v58, 3  ;;  %v3504_v47 = vmul.f32 %v7416_v63, %v5274_v53 }
 0x158   : > { %v3356_v48 = vadd.f32 %v3315_v7, %v3232_v12  ;;  %v3505_v41 = vmul.f32 %v5274_v53, %v7417_v56  ;;  %v3559_v10 = vrot.slane %v3503_v18, 4  ;;  %v4796_v46 = vunpack.c.l.bf16 %v4818_v50 }
 0x159   : > { %v3437_v54 = vsel %vm1273_vm10, %v3435_v5, %v3436_v14  ;;  %v3439_v0 = vsel %vm1273_vm10, %v3436_v14, %v3438_v39  ;;  %v3560_v33 = vrot.slane %v3504_v47, 4  ;;  %v4797_v8 = vunpack.c.h.bf16 %v4818_v50 }
 0x15a   : > { %v3479_v17 = vadd.f32 %v3437_v54, %v3355_v1  ;;  %v3480_v9 = vadd.f32 %v3439_v0, %v3356_v48  ;;  %v3562_v59 = vrot.slane %v3505_v41, 4  ;;  %v941_v61 = vmul.f32 %v5209_v15, %v7405_v23 }
 0x15b   : > { %v942_v2 = vmul.f32 %v5209_v15, %v7406_v34  ;;  %v3561_v6 = vsel %vm1398_vm11, %v3559_v10, %v3560_v33  ;;  %v990_v11 = vmul.f32 %v5211_v16, %v7405_v23  ;;  %v991_v12 = vmul.f32 %v5211_v16, %v7406_v34 }
 0x15c   : > { %v992_v58 = vmul.f32 %v5211_v16, %v7407_v55  ;;  %v3563_v5 = vsel %vm1398_vm11, %v3560_v33, %v3562_v59  ;;  %v3603_v50 = vadd.f32 %v3561_v6, %v3479_v17  ;;  %v1115_v40 = vmul.f32 %v7414_v3, %v7405_v23 }
 0x15d   : > { %v1116_v7 = vmul.f32 %v7414_v3, %v7406_v34  ;;  %v3604_v14 = vadd.f32 %v3563_v5, %v3480_v9  ;;  %v1049_v18 = vrot.slane %v990_v11, 1  ;;  %v1050_v1 = vrot.slane %v991_v12, 1 }
 0x15e   : > { %v1052_v48 = vrot.slane %v992_v58, 1  ;;  %v3625_v39 = vadd.f32 %v6177_v62, %v3603_v50  ;;  %v1117_v47 = vmul.f32 %v7414_v3, %v7407_v55  ;;  %v1174_v54 = vrot.slane %v1115_v40, 2 }
 0x15f   : > { %v1175_v41 = vrot.slane %v1116_v7, 2  ;;  %v3626_v10 = vadd.f32 %v6177_v62, %v3604_v14  ;;  %v1051_v0 = vsel %vm1023_vm8, %v1049_v18, %v1050_v1  ;;  %v1240_v33 = vmul.f32 %v5218_v19, %v7405_v23 }
 0x160   : > { %v1053_v17 = vsel %vm1023_vm8, %v1050_v1, %v1052_v48  ;;  %v3673_v9 = vmul.f32 %v4796_v46, %v3625_v39  ;;  %v1090_v59 = vadd.f32 %v1051_v0, %v941_v61  ;;  %v1177_v58 = vrot.slane %v1117_v47, 2 }
 0x161   : > { %v1091_v6 = vadd.f32 %v1053_v17, %v942_v2  ;;  %v1176_v11 = vsel %vm1148_vm9, %v1174_v54, %v1175_v41  ;;  %v3674_v12 = vmul.f32 %v4797_v8, %v3626_v10  ;;  %v1241_v5 = vmul.f32 %v5218_v19, %v7406_v34 }
 0x162   : > { %v1242_v50 = vmul.f32 %v5218_v19, %v7407_v55  ;;  %v1215_v40 = vadd.f32 %v1176_v11, %v1090_v59  ;;  %v1299_v7 = vrot.slane %v1240_v33, 3  ;;  %v1365_v14 = vmul.f32 %v5220_v20, %v7405_v23 }
 0x163   : > { %v1366_v46 = vmul.f32 %v5220_v20, %v7406_v34  ;;  %v3685_v61 = vpack.c.bf16 %v3674_v12, %v3673_v9  ;;  %v1178_v2 = vsel %vm1148_vm9, %v1175_v41, %v1177_v58  ;;  %v1300_v18 = vrot.slane %v1241_v5, 3 }
 0x164   : > { %v1302_v8 = vrot.slane %v1242_v50, 3  ;;  %v1216_v1 = vadd.f32 %v1178_v2, %v1091_v6  ;;  %v1367_v48 = vmul.f32 %v5220_v20, %v7407_v55  ;;  %v1424_v39 = vrot.slane %v1365_v14, 4 }
 0x165   : > { %v1425_v47 = vrot.slane %v1366_v46, 4  ;;  %4850 = vmatprep.mubr.msk.bf16.mxu0 %vm3697_vm12, %v3685_v61  ;;  %v1301_v54 = vsel %vm1273_vm10, %v1299_v7, %v1300_v18  ;;  %v1487_v34 = vmul.f32 %v7408_v49, %v5222_v21  ;;  %v1488_v41 = vmul.f32 %v7409_v32, %v5222_v21 }
 0x166   : > { %v1303_v23 = vsel %vm1273_vm10, %v1300_v18, %v1302_v8  ;;  %v1340_v10 = vadd.f32 %v1301_v54, %v1215_v40  ;;  %v1427_v33 = vrot.slane %v1367_v48, 4  ;;  %v1529_v55 = vmul.f32 %v7408_v49, %v5224_v22 }
 0x167   : > { %v1341_v0 = vadd.f32 %v1303_v23, %v1216_v1  ;;  %v1426_v17 = vsel %vm1398_vm11, %v1424_v39, %v1425_v47  ;;  %v1530_v9 = vmul.f32 %v7409_v32, %v5224_v22  ;;  %v1531_v59 = vmul.f32 %v5224_v22, %v7410_v4 }
 0x168   : > { %v1653_v6 = vmul.f32 %v7408_v49, %v5230_v24  ;;  %v1428_v11 = vsel %vm1398_vm11, %v1425_v47, %v1427_v33  ;;  %v1465_v12 = vadd.f32 %v1426_v17, %v1340_v10  ;;  %v1654_v58 = vmul.f32 %v7409_v32, %v5230_v24  ;;  %v898_v33 = vld [vmem:[#allocation2 + $0x74] sm:$0x3] }
 0x169   : > { %v1655_v5 = vmul.f32 %v5230_v24, %v7410_v4  ;;  %v1466_v50 = vadd.f32 %v1428_v11, %v1341_v0  ;;  %v1587_v40 = vrot.slane %v1529_v55, 1  ;;  %v1588_v7 = vrot.slane %v1530_v9, 1 }
 0x16a   : > { %v1590_v14 = vrot.slane %v1531_v59, 1  ;;  %v1503_v46 = vadd.f32 %v1487_v34, %v1465_v12  ;;  %v1711_v61 = vrot.slane %v1653_v6, 2  ;;  %v1712_v2 = vrot.slane %v1654_v58, 2 }
 0x16b   : > { %v1714_v18 = vrot.slane %v1655_v5, 2  ;;  %v1504_v8 = vadd.f32 %v1488_v41, %v1466_v50  ;;  %v1589_v1 = vsel %vm1023_vm8, %v1587_v40, %v1588_v7  ;;  %v1777_v39 = vmul.f32 %v7408_v49, %v5232_v25 }
 0x16c   : > { %v1591_v48 = vsel %vm1023_vm8, %v1588_v7, %v1590_v14  ;;  %v1628_v47 = vadd.f32 %v1589_v1, %v1503_v46  ;;  %v1713_v54 = vsel %vm1148_vm9, %v1711_v61, %v1712_v2  ;;  %v1778_v10 = vmul.f32 %v7409_v32, %v5232_v25 }
 0x16d   : > { %v1715_v23 = vsel %vm1148_vm9, %v1712_v2, %v1714_v18  ;;  %v1629_v34 = vadd.f32 %v1591_v48, %v1504_v8  ;;  %v1779_v0 = vmul.f32 %v5232_v25, %v7410_v4  ;;  %v1835_v41 = vrot.slane %v1777_v39, 3 }
 0x16e   : > { %v1901_v17 = vmul.f32 %v7408_v49, %v5234_v26  ;;  %v1752_v55 = vadd.f32 %v1713_v54, %v1628_v47  ;;  %v1836_v9 = vrot.slane %v1778_v10, 3  ;;  %v1902_v59 = vmul.f32 %v7409_v32, %v5234_v26 }
 0x16f   : > { %v1903_v6 = vmul.f32 %v5234_v26, %v7410_v4  ;;  %v1753_v11 = vadd.f32 %v1715_v23, %v1629_v34  ;;  %v1838_v12 = vrot.slane %v1779_v0, 3  ;;  %v2022_v5 = vmul.f32 %v5236_v27, %v7411_v57 }
 0x170   : > { %v1959_v58 = vrot.slane %v1901_v17, 4  ;;  %v1837_v50 = vsel %vm1273_vm10, %v1835_v41, %v1836_v9  ;;  %v1960_v40 = vrot.slane %v1902_v59, 4  ;;  %v2023_v14 = vmul.f32 %v5236_v27, %v7412_v60 }
 0x171   : > { %v1962_v7 = vrot.slane %v1903_v6, 4  ;;  %v1839_v46 = vsel %vm1273_vm10, %v1836_v9, %v1838_v12  ;;  %v1876_v61 = vadd.f32 %v1837_v50, %v1752_v55  ;;  %v6426_v2 = vunpack.c.l.bf16 %v898_v33 }
 0x172   : > { %v2064_v18 = vmul.f32 %v5241_v28, %v7411_v57  ;;  %v1877_v8 = vadd.f32 %v1839_v46, %v1753_v11  ;;  %v1961_v1 = vsel %vm1398_vm11, %v1959_v58, %v1960_v40  ;;  %v2065_v39 = vmul.f32 %v5241_v28, %v7412_v60 }
 0x173   : > { %v1963_v48 = vsel %vm1398_vm11, %v1960_v40, %v1962_v7  ;;  %v2000_v47 = vadd.f32 %v1961_v1, %v1876_v61  ;;  %v2066_v54 = vmul.f32 %v5241_v28, %v7413_v13  ;;  %v2188_v10 = vmul.f32 %v5243_v29, %v7411_v57 }
 0x174   : > { %v2122_v23 = vrot.slane %v2064_v18, 1  ;;  %v2001_v34 = vadd.f32 %v1963_v48, %v1877_v8  ;;  %v2123_v0 = vrot.slane %v2065_v39, 1  ;;  %v2189_v41 = vmul.f32 %v5243_v29, %v7412_v60 }
 0x175   : > { %v2190_v17 = vmul.f32 %v5243_v29, %v7413_v13  ;;  %v2038_v33 = vadd.f32 %v2022_v5, %v2000_v47  ;;  %v2125_v55 = vrot.slane %v2066_v54, 1  ;;  %v2246_v9 = vrot.slane %v2188_v10, 2 }
 0x176   : > { %v2312_v59 = vmul.f32 %v5245_v30, %v7411_v57  ;;  %v2039_v6 = vadd.f32 %v2023_v14, %v2001_v34  ;;  %v2124_v11 = vsel %vm1023_vm8, %v2122_v23, %v2123_v0  ;;  %v2247_v12 = vrot.slane %v2189_v41, 2 }
 0x177   : > { %v2249_v58 = vrot.slane %v2190_v17, 2  ;;  %v2126_v50 = vsel %vm1023_vm8, %v2123_v0, %v2125_v55  ;;  %v2163_v40 = vadd.f32 %v2124_v11, %v2038_v33  ;;  %v2313_v7 = vmul.f32 %v5245_v30, %v7412_v60 }
 0x178   : > { %v2314_v46 = vmul.f32 %v5245_v30, %v7413_v13  ;;  %v2164_v5 = vadd.f32 %v2126_v50, %v2039_v6  ;;  %v2248_v61 = vsel %vm1148_vm9, %v2246_v9, %v2247_v12  ;;  %v2370_v8 = vrot.slane %v2312_v59, 3 }
 0x179   : > { %v2250_v18 = vsel %vm1148_vm9, %v2247_v12, %v2249_v58  ;;  %v2287_v14 = vadd.f32 %v2248_v61, %v2163_v40  ;;  %v2371_v1 = vrot.slane %v2313_v7, 3  ;;  %v2436_v39 = vmul.f32 %v5247_v31, %v7411_v57 }
 0x17a   : > { %v2373_v48 = vrot.slane %v2314_v46, 3  ;;  %v2288_v47 = vadd.f32 %v2250_v18, %v2164_v5  ;;  %v2437_v54 = vmul.f32 %v5247_v31, %v7412_v60  ;;  %v2438_v23 = vmul.f32 %v5247_v31, %v7413_v13 }
 0x17b   : > { %v2557_v10 = vmul.f32 %v7415_v35, %v5254_v36  ;;  %v2372_v34 = vsel %vm1273_vm10, %v2370_v8, %v2371_v1  ;;  %v2494_v41 = vrot.slane %v2436_v39, 4  ;;  %v2558_v17 = vmul.f32 %v7416_v63, %v5254_v36 }
 0x17c   : > { %v2374_v0 = vsel %vm1273_vm10, %v2371_v1, %v2373_v48  ;;  %v2411_v33 = vadd.f32 %v2372_v34, %v2287_v14  ;;  %v2495_v9 = vrot.slane %v2437_v54, 4  ;;  %v2497_v59 = vrot.slane %v2438_v23, 4 }
 0x17d   : > { %v2412_v55 = vadd.f32 %v2374_v0, %v2288_v47  ;;  %v2599_v6 = vmul.f32 %v7415_v35, %v5256_v37  ;;  %v2600_v11 = vmul.f32 %v7416_v63, %v5256_v37  ;;  %v2601_v12 = vmul.f32 %v5256_v37, %v7417_v56 }
 0x17e   : > { %v2723_v58 = vmul.f32 %v7415_v35, %v5258_v38  ;;  %v2496_v50 = vsel %vm1398_vm11, %v2494_v41, %v2495_v9  ;;  %v2498_v40 = vsel %vm1398_vm11, %v2495_v9, %v2497_v59  ;;  %v2724_v7 = vmul.f32 %v7416_v63, %v5258_v38 }
 0x17f   : > { %v2725_v46 = vmul.f32 %v5258_v38, %v7417_v56  ;;  %v2535_v5 = vadd.f32 %v2496_v50, %v2411_v33  ;;  %v2536_v61 = vadd.f32 %v2498_v40, %v2412_v55  ;;  %v2657_v18 = vrot.slane %v2599_v6, 1 }
 0x180   : > { %v2658_v8 = vrot.slane %v2600_v11, 1  ;;  %v2660_v14 = vrot.slane %v2601_v12, 1  ;;  %v2781_v1 = vrot.slane %v2723_v58, 2  ;;  %v2782_v48 = vrot.slane %v2724_v7, 2 }
 0x181   : > { %v2784_v39 = vrot.slane %v2725_v46, 2  ;;  %v2573_v47 = vadd.f32 %v2557_v10, %v2535_v5  ;;  %v2574_v54 = vadd.f32 %v2558_v17, %v2536_v61  ;;  %v2847_v34 = vmul.f32 %v7415_v35, %v5260_v42  ;;  %v7418_v46 = vld [vmem:[#allocation19_spill] sm:$0xff] }
 0x182   : > { %v2659_v23 = vsel %vm1023_vm8, %v2657_v18, %v2658_v8  ;;  %v2661_v0 = vsel %vm1023_vm8, %v2658_v8, %v2660_v14  ;;  %v2783_v41 = vsel %vm1148_vm9, %v2781_v1, %v2782_v48  ;;  %v2848_v55 = vmul.f32 %v7416_v63, %v5260_v42 }
 0x183   : > { %v2785_v33 = vsel %vm1148_vm9, %v2782_v48, %v2784_v39  ;;  %v2698_v9 = vadd.f32 %v2659_v23, %v2573_v47  ;;  %v2699_v59 = vadd.f32 %v2661_v0, %v2574_v54  ;;  %v2849_v10 = vmul.f32 %v5260_v42, %v7417_v56  ;;  %v7419_v39 = vld [vmem:[#allocation20_spill] sm:$0xff] }
 0x184   : > { %v2905_v17 = vrot.slane %v2847_v34, 3  ;;  %v2906_v6 = vrot.slane %v2848_v55, 3  ;;  %v2971_v11 = vmul.f32 %v7415_v35, %v5262_v43  ;;  %v2972_v12 = vmul.f32 %v7416_v63, %v5262_v43 }
 0x185   : > { %v2973_v58 = vmul.f32 %v5262_v43, %v7417_v56  ;;  %v2822_v50 = vadd.f32 %v2783_v41, %v2698_v9  ;;  %v2823_v40 = vadd.f32 %v2785_v33, %v2699_v59  ;;  %v2908_v7 = vrot.slane %v2849_v10, 3 }
 0x186   : > { %v3092_v5 = vmul.f32 %v5264_v44, %v7418_v46  ;;  %v2907_v61 = vsel %vm1273_vm10, %v2905_v17, %v2906_v6  ;;  %v3029_v18 = vrot.slane %v2971_v11, 4  ;;  %v3030_v8 = vrot.slane %v2972_v12, 4 }
 0x187   : > { %v3032_v14 = vrot.slane %v2973_v58, 4  ;;  %v2909_v1 = vsel %vm1273_vm10, %v2906_v6, %v2908_v7  ;;  %v2946_v48 = vadd.f32 %v2907_v61, %v2822_v50  ;;  %v3093_v47 = vmul.f32 %v5264_v44, %v7419_v39 }
 0x188   : > { %v3134_v54 = vmul.f32 %v5266_v45, %v7418_v46  ;;  %v2947_v23 = vadd.f32 %v2909_v1, %v2823_v40  ;;  %v3031_v34 = vsel %vm1398_vm11, %v3029_v18, %v3030_v8  ;;  %v3135_v41 = vmul.f32 %v5266_v45, %v7419_v39 }
 0x189   : > { %v3033_v0 = vsel %vm1398_vm11, %v3030_v8, %v3032_v14  ;;  %v3070_v33 = vadd.f32 %v3031_v34, %v2946_v48  ;;  %v3136_v55 = vmul.f32 %v5266_v45, %v6426_v2  ;;  %v3258_v59 = vmul.f32 %v5270_v51, %v7418_v46 }
 0x18a   : > { %v3192_v9 = vrot.slane %v3134_v54, 1  ;;  %v3071_v10 = vadd.f32 %v3033_v0, %v2947_v23  ;;  %v3193_v17 = vrot.slane %v3135_v41, 1  ;;  %v3259_v6 = vmul.f32 %v5270_v51, %v7419_v39 }
 0x18b   : > { %v3260_v11 = vmul.f32 %v5270_v51, %v6426_v2  ;;  %v3108_v12 = vadd.f32 %v3092_v5, %v3070_v33  ;;  %v3195_v58 = vrot.slane %v3136_v55, 1  ;;  %v3316_v50 = vrot.slane %v3258_v59, 2  ;;  %v4819_v5 = vld [vmem:[%s5207_s22 + $0x28] sm:$0xff]  }
 0x18c   : > { %v3382_v40 = vmul.f32 %v5272_v52, %v7418_v46  ;;  %v3109_v7 = vadd.f32 %v3093_v47, %v3071_v10  ;;  %v3194_v61 = vsel %vm1023_vm8, %v3192_v9, %v3193_v17  ;;  %v3317_v18 = vrot.slane %v3259_v6, 2 }
 0x18d   : > { %v3319_v8 = vrot.slane %v3260_v11, 2  ;;  %v3196_v14 = vsel %vm1023_vm8, %v3193_v17, %v3195_v58  ;;  %v3233_v1 = vadd.f32 %v3194_v61, %v3108_v12  ;;  %v3383_v48 = vmul.f32 %v5272_v52, %v7419_v39  ;;  %v4814_v12 = vld [vmem:[#allocation2 + $0x78] sm:$0xff]  }
 0x18e   : > { %v3384_v54 = vmul.f32 %v5272_v52, %v6426_v2  ;;  %v3234_v23 = vadd.f32 %v3196_v14, %v3109_v7  ;;  %v3318_v34 = vsel %vm1148_vm9, %v3316_v50, %v3317_v18  ;;  %v3440_v47 = vrot.slane %v3382_v40, 3 }
 0x18f   : > { %v3320_v0 = vsel %vm1148_vm9, %v3317_v18, %v3319_v8  ;;  %v3357_v41 = vadd.f32 %v3318_v34, %v3233_v1  ;;  %v3441_v33 = vrot.slane %v3383_v48, 3  ;;  %v3506_v9 = vmul.f32 %v5274_v53, %v7418_v46  ;;  %v6527_v59 = vpop.f32.mrb[0].mxu0 }
 0x190   : > { %v3443_v55 = vrot.slane %v3384_v54, 3  ;;  %7420 = vst [vmem:[#allocation6_spill] sm:$0xff] %v6527_v59  ;;  %v3358_v10 = vadd.f32 %v3320_v0, %v3234_v23  ;;  %v3507_v17 = vmul.f32 %v5274_v53, %v7419_v39  ;;  %v3508_v6 = vmul.f32 %v5274_v53, %v6426_v2  ;;  %v6533_v58 = vpop.f32.mrb[1].mxu0 }
 0x191   : > { %v4800_v11 = vunpack.c.l.bf16 %v4819_v5  ;;  %7421 = vst [vmem:[#allocation8_spill] sm:$0xff] %v6533_v58  ;;  %v3442_v50 = vsel %vm1273_vm10, %v3440_v47, %v3441_v33  ;;  %v3564_v7 = vrot.slane %v3506_v9, 4  ;;  %v4801_v61 = vunpack.c.h.bf16 %v4819_v5  ;;  %v6537_v18 = vpop.f32.mrb[2].mxu0 }
 0x192   : > { %v3444_v40 = vsel %vm1273_vm10, %v3441_v33, %v3443_v55  ;;  %7422 = vst [vmem:[#allocation9_spill] sm:$0xff] %v6537_v18  ;;  %v3481_v8 = vadd.f32 %v3442_v50, %v3357_v41  ;;  %v3565_v1 = vrot.slane %v3507_v17, 4  ;;  %v3567_v48 = vrot.slane %v3508_v6, 4  ;;  %v6539_v54 = vpop.f32.mrb[3].mxu0 }
 0x193   : > { %v3482_v14 = vadd.f32 %v3444_v40, %v3358_v10  ;;  %7423 = vst [vmem:[#allocation7_spill] sm:$0xff] %v6539_v54  ;;  %v6541_v23 = vunpack.c.l.bf16 %v4814_v12  ;;  %v6543_v34 = vunpack.c.h.bf16 %v4814_v12  ;;  %v943_v0 = vmul.f32 %v7408_v49, %v5209_v15 }
 0x194   : > { %v944_v47 = vmul.f32 %v7409_v32, %v5209_v15  ;;  %v3566_v5 = vsel %vm1398_vm11, %v3564_v7, %v3565_v1  ;;  %v3568_v33 = vsel %vm1398_vm11, %v3565_v1, %v3567_v48  ;;  %v993_v41 = vmul.f32 %v7408_v49, %v5211_v16 }
 0x195   : > { %v994_v55 = vmul.f32 %v7409_v32, %v5211_v16  ;;  %v3605_v9 = vadd.f32 %v3566_v5, %v3481_v8  ;;  %v3606_v10 = vadd.f32 %v3568_v33, %v3482_v14  ;;  %v995_v17 = vmul.f32 %v5211_v16, %v7410_v4 }
 0x196   : > { %v1118_v6 = vmul.f32 %v7408_v49, %v7414_v3  ;;  %v1054_v12 = vrot.slane %v993_v41, 1  ;;  %v1119_v40 = vmul.f32 %v7409_v32, %v7414_v3  ;;  %v1120_v7 = vmul.f32 %v7414_v3, %v7410_v4 }
 0x197   : > { %v1055_v50 = vrot.slane %v994_v55, 1  ;;  %v3627_v1 = vadd.f32 %v6177_v62, %v3605_v9  ;;  %v3628_v48 = vadd.f32 %v6177_v62, %v3606_v10  ;;  %v1057_v8 = vrot.slane %v995_v17, 1 }
 0x198   : > { %v1179_v14 = vrot.slane %v1118_v6, 2  ;;  %v1180_v33 = vrot.slane %v1119_v40, 2  ;;  %v1182_v54 = vrot.slane %v1120_v7, 2  ;;  %v1243_v41 = vmul.f32 %v7408_v49, %v5218_v19 }
 0x199   : > { %v1056_v5 = vsel %vm1023_vm8, %v1054_v12, %v1055_v50  ;;  %v3675_v55 = vmul.f32 %v4800_v11, %v3627_v1  ;;  %v3676_v18 = vmul.f32 %v4801_v61, %v3628_v48  ;;  %v1058_v58 = vsel %vm1023_vm8, %v1055_v50, %v1057_v8 }
 0x19a   : > { %v1092_v59 = vadd.f32 %v1056_v5, %v943_v0  ;;  %v1093_v16 = vadd.f32 %v1058_v58, %v944_v47  ;;  %v1181_v3 = vsel %vm1148_vm9, %v1179_v14, %v1180_v33  ;;  %v1183_v9 = vsel %vm1148_vm9, %v1180_v33, %v1182_v54 }
 0x19b   : > { %v1244_v62 = vmul.f32 %v7409_v32, %v5218_v19  ;;  %v3686_v10 = vpack.c.bf16 %v3676_v18, %v3675_v55  ;;  %v1245_v6 = vmul.f32 %v5218_v19, %v7410_v4  ;;  %v1304_v12 = vrot.slane %v1243_v41, 3 }
 0x19c   : > { %v1217_v17 = vadd.f32 %v1181_v3, %v1092_v59  ;;  %v1218_v40 = vadd.f32 %v1183_v9, %v1093_v16  ;;  %v1368_v61 = vmul.f32 %v7408_v49, %v5220_v20  ;;  %v1369_v58 = vmul.f32 %v7409_v32, %v5220_v20 }
 0x19d   : > { %v1305_v11 = vrot.slane %v1244_v62, 3  ;;  %4851 = vmatmul.mubr.msk.bf16.gmra.mrb[8].mxu0 %vm3697_vm12, %v3686_v10  ;;  %v1307_v54 = vrot.slane %v1245_v6, 3  ;;  %v1370_v0 = vmul.f32 %v5220_v20, %v7410_v4  ;;  %v1489_v3 = vmul.f32 %v5222_v21, %v7411_v57 }
 0x19e   : > { %v1490_v59 = vmul.f32 %v5222_v21, %v7412_v60  ;;  %v1429_v18 = vrot.slane %v1368_v61, 4  ;;  %v1430_v47 = vrot.slane %v1369_v58, 4  ;;  %v1532_v49 = vmul.f32 %v5224_v22, %v7411_v57 }
 0x19f   : > { %v1306_v16 = vsel %vm1273_vm10, %v1304_v12, %v1305_v11  ;;  %v1308_v32 = vsel %vm1273_vm10, %v1305_v11, %v1307_v54  ;;  %v1432_v7 = vrot.slane %v1370_v0, 4  ;;  %v1533_v4 = vmul.f32 %v5224_v22, %v7412_v60 }
 0x1a0   : > { %v1342_v50 = vadd.f32 %v1306_v16, %v1217_v17  ;;  %v1343_v1 = vadd.f32 %v1308_v32, %v1218_v40  ;;  %v1431_v48 = vsel %vm1398_vm11, %v1429_v18, %v1430_v47  ;;  %v1534_v8 = vmul.f32 %v5224_v22, %v7413_v13 }
 0x1a1   : > { %v1592_v14 = vrot.slane %v1532_v49, 1  ;;  %v1433_v5 = vsel %vm1398_vm11, %v1430_v47, %v1432_v7  ;;  %v1593_v41 = vrot.slane %v1533_v4, 1  ;;  %v1656_v55 = vmul.f32 %v5230_v24, %v7411_v57 }
 0x1a2   : > { %v1467_v33 = vadd.f32 %v1431_v48, %v1342_v50  ;;  %v1468_v9 = vadd.f32 %v1433_v5, %v1343_v1  ;;  %v1595_v62 = vrot.slane %v1534_v8, 1  ;;  %v1657_v10 = vmul.f32 %v5230_v24, %v7412_v60 }
 0x1a3   : > { %v1658_v17 = vmul.f32 %v5230_v24, %v7413_v13  ;;  %v1594_v12 = vsel %vm1023_vm8, %v1592_v14, %v1593_v41  ;;  %v1716_v40 = vrot.slane %v1656_v55, 2  ;;  %v1780_v11 = vmul.f32 %v5232_v25, %v7411_v57 }
 0x1a4   : > { %v1505_v6 = vadd.f32 %v1489_v3, %v1467_v33  ;;  %v1506_v61 = vadd.f32 %v1490_v59, %v1468_v9  ;;  %v1596_v58 = vsel %vm1023_vm8, %v1593_v41, %v1595_v62  ;;  %v1717_v54 = vrot.slane %v1657_v10, 2 }
 0x1a5   : > { %v1719_v0 = vrot.slane %v1658_v17, 2  ;;  %v1781_v18 = vmul.f32 %v5232_v25, %v7412_v60  ;;  %v1782_v47 = vmul.f32 %v5232_v25, %v7413_v13  ;;  %v1840_v49 = vrot.slane %v1780_v11, 3 }
 0x1a6   : > { %v1630_v16 = vadd.f32 %v1594_v12, %v1505_v6  ;;  %v1631_v3 = vadd.f32 %v1596_v58, %v1506_v61  ;;  %v1718_v32 = vsel %vm1148_vm9, %v1716_v40, %v1717_v54  ;;  %v1904_v59 = vmul.f32 %v5234_v26, %v7411_v57 }
 0x1a7   : > { %v1720_v50 = vsel %vm1148_vm9, %v1717_v54, %v1719_v0  ;;  %v1841_v4 = vrot.slane %v1781_v18, 3  ;;  %v1843_v1 = vrot.slane %v1782_v47, 3  ;;  %v1905_v48 = vmul.f32 %v5234_v26, %v7412_v60 }
 0x1a8   : > { %v1754_v7 = vadd.f32 %v1718_v32, %v1630_v16  ;;  %v1755_v8 = vadd.f32 %v1720_v50, %v1631_v3  ;;  %v1906_v14 = vmul.f32 %v5234_v26, %v7413_v13  ;;  %v1964_v5 = vrot.slane %v1904_v59, 4 }
 0x1a9   : > { %v2024_v33 = vmul.f32 %v7415_v35, %v5236_v27  ;;  %v1842_v41 = vsel %vm1273_vm10, %v1840_v49, %v1841_v4  ;;  %v1844_v55 = vsel %vm1273_vm10, %v1841_v4, %v1843_v1  ;;  %v1965_v9 = vrot.slane %v1905_v48, 4 }
 0x1aa   : > { %v2025_v62 = vmul.f32 %v7416_v63, %v5236_v27  ;;  %v1878_v10 = vadd.f32 %v1842_v41, %v1754_v7  ;;  %v1879_v17 = vadd.f32 %v1844_v55, %v1755_v8  ;;  %v1967_v6 = vrot.slane %v1906_v14, 4 }
 0x1ab   : > { %v2067_v12 = vmul.f32 %v7415_v35, %v5241_v28  ;;  %v1966_v40 = vsel %vm1398_vm11, %v1964_v5, %v1965_v9  ;;  %v2068_v11 = vmul.f32 %v7416_v63, %v5241_v28  ;;  %v2069_v61 = vmul.f32 %v5241_v28, %v7417_v56 }
 0x1ac   : > { %v2191_v58 = vmul.f32 %v7415_v35, %v5243_v29  ;;  %v1968_v54 = vsel %vm1398_vm11, %v1965_v9, %v1967_v6  ;;  %v2002_v0 = vadd.f32 %v1966_v40, %v1878_v10  ;;  %v2192_v18 = vmul.f32 %v7416_v63, %v5243_v29  ;;  %v901_v6 = vld [vmem:[#allocation2 + $0x80] sm:$0x3] }
 0x1ad   : > { %v2127_v16 = vrot.slane %v2067_v12, 1  ;;  %v2003_v47 = vadd.f32 %v1968_v54, %v1879_v17  ;;  %v2128_v49 = vrot.slane %v2068_v11, 1  ;;  %v2130_v3 = vrot.slane %v2069_v61, 1 }
 0x1ae   : > { %v2193_v32 = vmul.f32 %v5243_v29, %v7417_v56  ;;  %v2040_v50 = vadd.f32 %v2024_v33, %v2002_v0  ;;  %v2251_v59 = vrot.slane %v2191_v58, 2  ;;  %v2252_v7 = vrot.slane %v2192_v18, 2 }
 0x1af   : > { %v2315_v4 = vmul.f32 %v7415_v35, %v5245_v30  ;;  %v2041_v1 = vadd.f32 %v2025_v62, %v2003_v47  ;;  %v2129_v48 = vsel %vm1023_vm8, %v2127_v16, %v2128_v49  ;;  %v2131_v8 = vsel %vm1023_vm8, %v2128_v49, %v2130_v3 }
 0x1b0   : > { %v2254_v14 = vrot.slane %v2193_v32, 2  ;;  %v2165_v5 = vadd.f32 %v2129_v48, %v2040_v50  ;;  %v2253_v41 = vsel %vm1148_vm9, %v2251_v59, %v2252_v7  ;;  %v2316_v55 = vmul.f32 %v7416_v63, %v5245_v30 }
 0x1b1   : > { %v2317_v33 = vmul.f32 %v5245_v30, %v7417_v56  ;;  %v2166_v9 = vadd.f32 %v2131_v8, %v2041_v1  ;;  %v2375_v17 = vrot.slane %v2315_v4, 3  ;;  %v2439_v62 = vmul.f32 %v7415_v35, %v5247_v31 }
 0x1b2   : > { %v2255_v10 = vsel %vm1148_vm9, %v2252_v7, %v2254_v14  ;;  %v2289_v12 = vadd.f32 %v2253_v41, %v2165_v5  ;;  %v2376_v40 = vrot.slane %v2316_v55, 3  ;;  %v2440_v61 = vmul.f32 %v7416_v63, %v5247_v31 }
 0x1b3   : > { %v2378_v11 = vrot.slane %v2317_v33, 3  ;;  %v2290_v58 = vadd.f32 %v2255_v10, %v2166_v9  ;;  %v2441_v54 = vmul.f32 %v5247_v31, %v7417_v56  ;;  %v2499_v0 = vrot.slane %v2439_v62, 4 }
 0x1b4   : > { %v2559_v16 = vmul.f32 %v5254_v36, %v7418_v46  ;;  %v2377_v18 = vsel %vm1273_vm10, %v2375_v17, %v2376_v40  ;;  %v2500_v49 = vrot.slane %v2440_v61, 4  ;;  %v2560_v3 = vmul.f32 %v5254_v36, %v7419_v39 }
 0x1b5   : > { %v2379_v47 = vsel %vm1273_vm10, %v2376_v40, %v2378_v11  ;;  %v2413_v32 = vadd.f32 %v2377_v18, %v2289_v12  ;;  %v2502_v59 = vrot.slane %v2441_v54, 4  ;;  %v6660_v7 = vunpack.c.l.bf16 %v901_v6 }
 0x1b6   : > { %v2414_v50 = vadd.f32 %v2379_v47, %v2290_v58  ;;  %v2501_v4 = vsel %vm1398_vm11, %v2499_v0, %v2500_v49  ;;  %v2602_v1 = vmul.f32 %v5256_v37, %v7418_v46  ;;  %v2603_v48 = vmul.f32 %v5256_v37, %v7419_v39 }
 0x1b7   : > { %v2604_v8 = vmul.f32 %v5256_v37, %v6426_v2  ;;  %v2503_v14 = vsel %vm1398_vm11, %v2500_v49, %v2502_v59  ;;  %v2537_v5 = vadd.f32 %v2501_v4, %v2413_v32  ;;  %v2726_v41 = vmul.f32 %v5258_v38, %v7418_v46 }
 0x1b8   : > { %v2727_v55 = vmul.f32 %v5258_v38, %v7419_v39  ;;  %v2538_v33 = vadd.f32 %v2503_v14, %v2414_v50  ;;  %v2662_v9 = vrot.slane %v2602_v1, 1  ;;  %v2663_v10 = vrot.slane %v2603_v48, 1 }
 0x1b9   : > { %v2665_v17 = vrot.slane %v2604_v8, 1  ;;  %v2575_v62 = vadd.f32 %v2559_v16, %v2537_v5  ;;  %v2728_v6 = vmul.f32 %v5258_v38, %v6426_v2  ;;  %v2786_v12 = vrot.slane %v2726_v41, 2 }
 0x1ba   : > { %v2787_v40 = vrot.slane %v2727_v55, 2  ;;  %v2576_v11 = vadd.f32 %v2560_v3, %v2538_v33  ;;  %v2664_v61 = vsel %vm1023_vm8, %v2662_v9, %v2663_v10  ;;  %v2850_v54 = vmul.f32 %v5260_v42, %v7418_v46 }
 0x1bb   : > { %v2666_v58 = vsel %vm1023_vm8, %v2663_v10, %v2665_v17  ;;  %v2700_v0 = vadd.f32 %v2664_v61, %v2575_v62  ;;  %v2789_v47 = vrot.slane %v2728_v6, 2  ;;  %v2851_v16 = vmul.f32 %v5260_v42, %v7419_v39 }
 0x1bc   : > { %v2788_v18 = vsel %vm1148_vm9, %v2786_v12, %v2787_v40  ;;  %v2701_v49 = vadd.f32 %v2666_v58, %v2576_v11  ;;  %v2852_v32 = vmul.f32 %v5260_v42, %v6426_v2  ;;  %v2910_v50 = vrot.slane %v2850_v54, 3 }
 0x1bd   : > { %v2974_v3 = vmul.f32 %v5262_v43, %v7418_v46  ;;  %v2790_v59 = vsel %vm1148_vm9, %v2787_v40, %v2789_v47  ;;  %v2824_v4 = vadd.f32 %v2788_v18, %v2700_v0  ;;  %v2911_v1 = vrot.slane %v2851_v16, 3 }
 0x1be   : > { %v2975_v48 = vmul.f32 %v5262_v43, %v7419_v39  ;;  %v2825_v8 = vadd.f32 %v2790_v59, %v2701_v49  ;;  %v2913_v14 = vrot.slane %v2852_v32, 3  ;;  %v2976_v5 = vmul.f32 %v5262_v43, %v6426_v2 }
 0x1bf   : > { %v3034_v41 = vrot.slane %v2974_v3, 4  ;;  %v2912_v55 = vsel %vm1273_vm10, %v2910_v50, %v2911_v1  ;;  %v3094_v9 = vmul.f32 %v6541_v23, %v5264_v44  ;;  %v3095_v10 = vmul.f32 %v6543_v34, %v5264_v44 }
 0x1c0   : > { %v3035_v33 = vrot.slane %v2975_v48, 4  ;;  %v2914_v17 = vsel %vm1273_vm10, %v2911_v1, %v2913_v14  ;;  %v2948_v62 = vadd.f32 %v2912_v55, %v2824_v4  ;;  %v3037_v6 = vrot.slane %v2976_v5, 4 }
 0x1c1   : > { %v3137_v12 = vmul.f32 %v6541_v23, %v5266_v45  ;;  %v2949_v40 = vadd.f32 %v2914_v17, %v2825_v8  ;;  %v3138_v61 = vmul.f32 %v6543_v34, %v5266_v45  ;;  %v3139_v58 = vmul.f32 %v5266_v45, %v6660_v7 }
 0x1c2   : > { %v3036_v11 = vsel %vm1398_vm11, %v3034_v41, %v3035_v33  ;;  %v3038_v54 = vsel %vm1398_vm11, %v3035_v33, %v3037_v6  ;;  %v3261_v47 = vmul.f32 %v6541_v23, %v5270_v51  ;;  %v3262_v50 = vmul.f32 %v6543_v34, %v5270_v51 }
 0x1c3   : > { %v3072_v0 = vadd.f32 %v3036_v11, %v2948_v62  ;;  %v3197_v18 = vrot.slane %v3137_v12, 1  ;;  %v3073_v16 = vadd.f32 %v3038_v54, %v2949_v40  ;;  %v3198_v49 = vrot.slane %v3138_v61, 1  ;;  %v4820_v12 = vld [vmem:[%s5207_s22 + $0x30] sm:$0xff]  }
 0x1c4   : > { %v3200_v32 = vrot.slane %v3139_v58, 1  ;;  %v3263_v59 = vmul.f32 %v5270_v51, %v6660_v7  ;;  %v3321_v4 = vrot.slane %v3261_v47, 2  ;;  %v3385_v1 = vmul.f32 %v6541_v23, %v5272_v52 }
 0x1c5   : > { %v3110_v3 = vadd.f32 %v3094_v9, %v3072_v0  ;;  %v3111_v48 = vadd.f32 %v3095_v10, %v3073_v16  ;;  %v3199_v8 = vsel %vm1023_vm8, %v3197_v18, %v3198_v49  ;;  %v3322_v5 = vrot.slane %v3262_v50, 2 }
 0x1c6   : > { %v3201_v14 = vsel %vm1023_vm8, %v3198_v49, %v3200_v32  ;;  %v3324_v55 = vrot.slane %v3263_v59, 2  ;;  %v3386_v33 = vmul.f32 %v6543_v34, %v5272_v52  ;;  %v3387_v9 = vmul.f32 %v5272_v52, %v6660_v7 }
 0x1c7   : > { %v3235_v41 = vadd.f32 %v3199_v8, %v3110_v3  ;;  %v3236_v17 = vadd.f32 %v3201_v14, %v3111_v48  ;;  %v3323_v62 = vsel %vm1148_vm9, %v3321_v4, %v3322_v5  ;;  %v3445_v6 = vrot.slane %v3385_v1, 3  ;;  %v7424_v14 = vld [vmem:[#allocation4_spill] sm:$0xff] }
 0x1c8   : > { %v3509_v10 = vmul.f32 %v6541_v23, %v5274_v53  ;;  %v3325_v40 = vsel %vm1148_vm9, %v3322_v5, %v3324_v55  ;;  %v3446_v61 = vrot.slane %v3386_v33, 3  ;;  %v3448_v58 = vrot.slane %v3387_v9, 3 }
 0x1c9   : > { %v3359_v11 = vadd.f32 %v3323_v62, %v3235_v41  ;;  %v3360_v54 = vadd.f32 %v3325_v40, %v3236_v17  ;;  %v3510_v0 = vmul.f32 %v6543_v34, %v5274_v53  ;;  %v3511_v18 = vmul.f32 %v5274_v53, %v6660_v7  ;;  %v7425_v17 = vld [vmem:[#allocation5_spill] sm:$0xff] }
 0x1ca   : > { %v3569_v47 = vrot.slane %v3509_v10, 4  ;;  %v3447_v16 = vsel %vm1273_vm10, %v3445_v6, %v3446_v61  ;;  %v3449_v49 = vsel %vm1273_vm10, %v3446_v61, %v3448_v58  ;;  %v4804_v32 = vunpack.c.l.bf16 %v4820_v12 }
 0x1cb   : > { %v4805_v50 = vunpack.c.h.bf16 %v4820_v12  ;;  %v3483_v3 = vadd.f32 %v3447_v16, %v3359_v11  ;;  %v3484_v59 = vadd.f32 %v3449_v49, %v3360_v54  ;;  %v3570_v4 = vrot.slane %v3510_v0, 4  ;;  %v6752_v54 = vld [vmem:[%s7346_s5] ss:$0 sm:$0xff] }
 0x1cc   : > { %v3572_v1 = vrot.slane %v3511_v18, 4  ;;  %v945_v48 = vmul.f32 %v5209_v15, %v7411_v57  ;;  %v946_v8 = vmul.f32 %v5209_v15, %v7412_v60  ;;  %v996_v5 = vmul.f32 %v7424_v14, %v7411_v57 }
 0x1cd   : > { %v997_v41 = vmul.f32 %v7424_v14, %v7412_v60  ;;  %v3571_v55 = vsel %vm1398_vm11, %v3569_v47, %v3570_v4  ;;  %v998_v9 = vmul.f32 %v7424_v14, %v7413_v13  ;;  %v1121_v62 = vmul.f32 %v7425_v17, %v7411_v57 }
 0x1ce   : > { %v3573_v33 = vsel %vm1398_vm11, %v3570_v4, %v3572_v1  ;;  %v3607_v6 = vadd.f32 %v3571_v55, %v3483_v3  ;;  %v1059_v12 = vrot.slane %v996_v5, 1  ;;  %v1122_v11 = vmul.f32 %v7425_v17, %v7412_v60 }
 0x1cf   : > { %v3608_v10 = vadd.f32 %v3573_v33, %v3484_v59  ;;  %v1060_v15 = vrot.slane %v997_v41, 1  ;;  %v1062_v40 = vrot.slane %v998_v9, 1  ;;  %v1123_v61 = vmul.f32 %v7425_v17, %v7413_v13 }
 0x1d0   : > { %v1184_v58 = vrot.slane %v1121_v62, 2  ;;  %v3629_v0 = vadd.f32 %v6752_v54, %v3607_v6  ;;  %v1246_v16 = vmul.f32 %v5218_v19, %v7411_v57  ;;  %v1185_v59 = vrot.slane %v1122_v11, 2 }
 0x1d1   : > { %v3630_v18 = vadd.f32 %v6752_v54, %v3608_v10  ;;  %v1061_v47 = vsel %vm1023_vm8, %v1059_v12, %v1060_v15  ;;  %v1063_v49 = vsel %vm1023_vm8, %v1060_v15, %v1062_v40  ;;  %v1187_v4 = vrot.slane %v1123_v61, 2 }
 0x1d2   : > { %v1094_v3 = vadd.f32 %v1061_v47, %v945_v48  ;;  %v3677_v1 = vmul.f32 %v4804_v32, %v3629_v0  ;;  %v1095_v5 = vadd.f32 %v1063_v49, %v946_v8  ;;  %v1247_v41 = vmul.f32 %v5218_v19, %v7412_v60 }
 0x1d3   : > { %v3678_v14 = vmul.f32 %v4805_v50, %v3630_v18  ;;  %v1186_v55 = vsel %vm1148_vm9, %v1184_v58, %v1185_v59  ;;  %v1188_v33 = vsel %vm1148_vm9, %v1185_v59, %v1187_v4  ;;  %v1248_v9 = vmul.f32 %v5218_v19, %v7413_v13 }
 0x1d4   : > { %v1309_v17 = vrot.slane %v1246_v16, 3  ;;  %v1219_v6 = vadd.f32 %v1186_v55, %v1094_v3  ;;  %v1220_v10 = vadd.f32 %v1188_v33, %v1095_v5  ;;  %v1310_v48 = vrot.slane %v1247_v41, 3 }
 0x1d5   : > { %v3687_v62 = vpack.c.bf16 %v3678_v14, %v3677_v1  ;;  %v1312_v12 = vrot.slane %v1248_v9, 3  ;;  %v1371_v32 = vmul.f32 %v5220_v20, %v7411_v57  ;;  %v1372_v50 = vmul.f32 %v5220_v20, %v7412_v60 }
 0x1d6   : > { %v1373_v8 = vmul.f32 %v5220_v20, %v7413_v13  ;;  %v1311_v15 = vsel %vm1273_vm10, %v1309_v17, %v1310_v48  ;;  %v1491_v19 = vmul.f32 %v7415_v35, %v5222_v21  ;;  %v1492_v40 = vmul.f32 %v7416_v63, %v5222_v21 }
 0x1d7   : > { %4854 = vmatprep.mubr.msk.bf16.mxu0 %vm3697_vm12, %v3687_v62  ;;  %v1535_v11 = vmul.f32 %v7415_v35, %v5224_v22  ;;  %v1313_v57 = vsel %vm1273_vm10, %v1310_v48, %v1312_v12  ;;  %v1344_v61 = vadd.f32 %v1311_v15, %v1219_v6  ;;  %v1434_v60 = vrot.slane %v1371_v32, 4 }
 0x1d8   : > { %v1435_v58 = vrot.slane %v1372_v50, 4  ;;  %v1345_v0 = vadd.f32 %v1313_v57, %v1220_v10  ;;  %v1437_v20 = vrot.slane %v1373_v8, 4  ;;  %v1536_v13 = vmul.f32 %v7416_v63, %v5224_v22 }
 0x1d9   : > { %v1537_v18 = vmul.f32 %v5224_v22, %v7417_v56  ;;  %v1597_v16 = vrot.slane %v1535_v11, 1  ;;  %v1659_v21 = vmul.f32 %v7415_v35, %v5230_v24  ;;  %v1660_v49 = vmul.f32 %v7416_v63, %v5230_v24 }
 0x1da   : > { %v1436_v47 = vsel %vm1398_vm11, %v1434_v60, %v1435_v58  ;;  %v1438_v3 = vsel %vm1398_vm11, %v1435_v58, %v1437_v20  ;;  %v1598_v4 = vrot.slane %v1536_v13, 1  ;;  %v1661_v5 = vmul.f32 %v5230_v24, %v7417_v56 }
 0x1db   : > { %v1469_v59 = vadd.f32 %v1436_v47, %v1344_v61  ;;  %v1600_v1 = vrot.slane %v1537_v18, 1  ;;  %v1470_v14 = vadd.f32 %v1438_v3, %v1345_v0  ;;  %v1721_v41 = vrot.slane %v1659_v21, 2 }
 0x1dc   : > { %v1722_v22 = vrot.slane %v1660_v49, 2  ;;  %v1599_v33 = vsel %vm1023_vm8, %v1597_v16, %v1598_v4  ;;  %v1783_v17 = vmul.f32 %v7415_v35, %v5232_v25  ;;  %v1724_v10 = vrot.slane %v1661_v5, 2 }
 0x1dd   : > { %v1507_v55 = vadd.f32 %v1491_v19, %v1469_v59  ;;  %v1601_v9 = vsel %vm1023_vm8, %v1598_v4, %v1600_v1  ;;  %v1508_v62 = vadd.f32 %v1492_v40, %v1470_v14  ;;  %v1784_v48 = vmul.f32 %v7416_v63, %v5232_v25 }
 0x1de   : > { %v1723_v6 = vsel %vm1148_vm9, %v1721_v41, %v1722_v22  ;;  %v1785_v24 = vmul.f32 %v5232_v25, %v7417_v56  ;;  %v1845_v32 = vrot.slane %v1783_v17, 3  ;;  %v1907_v50 = vmul.f32 %v7415_v35, %v5234_v26 }
 0x1df   : > { %v1632_v12 = vadd.f32 %v1599_v33, %v1507_v55  ;;  %v1633_v8 = vadd.f32 %v1601_v9, %v1508_v62  ;;  %v1725_v15 = vsel %vm1148_vm9, %v1722_v22, %v1724_v10  ;;  %v1846_v19 = vrot.slane %v1784_v48, 3 }
 0x1e0   : > { %v1908_v40 = vmul.f32 %v7416_v63, %v5234_v26  ;;  %v1848_v57 = vrot.slane %v1785_v24, 3  ;;  %v1909_v61 = vmul.f32 %v5234_v26, %v7417_v56  ;;  %v1969_v60 = vrot.slane %v1907_v50, 4 }
 0x1e1   : > { %v1756_v11 = vadd.f32 %v1723_v6, %v1632_v12  ;;  %v1757_v58 = vadd.f32 %v1725_v15, %v1633_v8  ;;  %v1847_v25 = vsel %vm1273_vm10, %v1845_v32, %v1846_v19  ;;  %v2026_v35 = vmul.f32 %v5236_v27, %v7418_v46 }
 0x1e2   : > { %v1970_v0 = vrot.slane %v1908_v40, 4  ;;  %v1849_v20 = vsel %vm1273_vm10, %v1846_v19, %v1848_v57  ;;  %v1972_v18 = vrot.slane %v1909_v61, 4  ;;  %v2027_v63 = vmul.f32 %v5236_v27, %v7419_v39 }
 0x1e3   : > { %v1880_v13 = vadd.f32 %v1847_v25, %v1756_v11  ;;  %v1881_v47 = vadd.f32 %v1849_v20, %v1757_v58  ;;  %v2070_v26 = vmul.f32 %v5241_v28, %v7418_v46  ;;  %v2071_v56 = vmul.f32 %v5241_v28, %v7419_v39 }
 0x1e4   : > { %v1971_v16 = vsel %vm1398_vm11, %v1969_v60, %v1970_v0  ;;  %v1973_v21 = vsel %vm1398_vm11, %v1970_v0, %v1972_v18  ;;  %v2072_v3 = vmul.f32 %v5241_v28, %v6426_v2  ;;  %v2194_v59 = vmul.f32 %v5243_v29, %v7418_v46 }
 0x1e5   : > { %v2004_v49 = vadd.f32 %v1971_v16, %v1880_v13  ;;  %v2005_v4 = vadd.f32 %v1973_v21, %v1881_v47  ;;  %v2132_v27 = vrot.slane %v2070_v26, 1  ;;  %v2133_v1 = vrot.slane %v2071_v56, 1 }
 0x1e6   : > { %v2195_v14 = vmul.f32 %v5243_v29, %v7419_v39  ;;  %v2135_v41 = vrot.slane %v2072_v3, 1  ;;  %v2196_v22 = vmul.f32 %v5243_v29, %v6426_v2  ;;  %v2256_v55 = vrot.slane %v2194_v59, 2 }
 0x1e7   : > { %v2042_v5 = vadd.f32 %v2026_v35, %v2004_v49  ;;  %v2043_v33 = vadd.f32 %v2027_v63, %v2005_v4  ;;  %v2134_v9 = vsel %vm1023_vm8, %v2132_v27, %v2133_v1  ;;  %v2318_v28 = vmul.f32 %v5245_v30, %v7418_v46 }
 0x1e8   : > { %v2257_v17 = vrot.slane %v2195_v14, 2  ;;  %v2136_v62 = vsel %vm1023_vm8, %v2133_v1, %v2135_v41  ;;  %v2259_v10 = vrot.slane %v2196_v22, 2  ;;  %v2319_v48 = vmul.f32 %v5245_v30, %v7419_v39 }
 0x1e9   : > { %v2167_v6 = vadd.f32 %v2134_v9, %v2042_v5  ;;  %v2168_v12 = vadd.f32 %v2136_v62, %v2043_v33  ;;  %v2320_v29 = vmul.f32 %v5245_v30, %v6426_v2  ;;  %v2380_v32 = vrot.slane %v2318_v28, 3  ;;  %v902_v33 = vld [vmem:[#allocation2 + $0x84] sm:$0xff]  }
 0x1ea   : > { %v2258_v24 = vsel %vm1148_vm9, %v2256_v55, %v2257_v17  ;;  %v2260_v50 = vsel %vm1148_vm9, %v2257_v17, %v2259_v10  ;;  %v2381_v15 = vrot.slane %v2319_v48, 3  ;;  %v2442_v19 = vmul.f32 %v5247_v31, %v7418_v46 }
 0x1eb   : > { %v2291_v8 = vadd.f32 %v2258_v24, %v2167_v6  ;;  %v2292_v40 = vadd.f32 %v2260_v50, %v2168_v12  ;;  %v2383_v11 = vrot.slane %v2320_v29, 3  ;;  %v2443_v57 = vmul.f32 %v5247_v31, %v7419_v39  ;;  %v904_v12 = vld [vmem:[#allocation2 + $0x8c] sm:$0x3] }
 0x1ec   : > { %v2444_v61 = vmul.f32 %v5247_v31, %v6426_v2  ;;  %v2382_v60 = vsel %vm1273_vm10, %v2380_v32, %v2381_v15  ;;  %v2504_v58 = vrot.slane %v2442_v19, 4  ;;  %v2561_v30 = vmul.f32 %v6541_v23, %v5254_v36 }
 0x1ed   : > { %v2562_v25 = vmul.f32 %v6543_v34, %v5254_v36  ;;  %v2384_v0 = vsel %vm1273_vm10, %v2381_v15, %v2383_v11  ;;  %v2415_v46 = vadd.f32 %v2382_v60, %v2291_v8  ;;  %v2505_v35 = vrot.slane %v2443_v57, 4 }
 0x1ee   : > { %v2507_v20 = vrot.slane %v2444_v61, 4  ;;  %v2416_v13 = vadd.f32 %v2384_v0, %v2292_v40  ;;  %v2605_v39 = vmul.f32 %v6541_v23, %v5256_v37  ;;  %v2606_v31 = vmul.f32 %v6543_v34, %v5256_v37 }
 0x1ef   : > { %v2607_v2 = vmul.f32 %v5256_v37, %v6660_v7  ;;  %v2506_v18 = vsel %vm1398_vm11, %v2504_v58, %v2505_v35  ;;  %v2729_v36 = vmul.f32 %v6541_v23, %v5258_v38  ;;  %v2730_v47 = vmul.f32 %v6543_v34, %v5258_v38 }
 0x1f0   : > { %v2508_v63 = vsel %vm1398_vm11, %v2505_v35, %v2507_v20  ;;  %v2539_v16 = vadd.f32 %v2506_v18, %v2415_v46  ;;  %v2667_v56 = vrot.slane %v2605_v39, 1  ;;  %v2668_v21 = vrot.slane %v2606_v31, 1 }
 0x1f1   : > { %v2540_v26 = vadd.f32 %v2508_v63, %v2416_v13  ;;  %v2670_v49 = vrot.slane %v2607_v2, 1  ;;  %v2731_v3 = vmul.f32 %v5258_v38, %v6660_v7  ;;  %v2791_v59 = vrot.slane %v2729_v36, 2 }
 0x1f2   : > { %v2792_v37 = vrot.slane %v2730_v47, 2  ;;  %v2577_v4 = vadd.f32 %v2561_v30, %v2539_v16  ;;  %v2669_v1 = vsel %vm1023_vm8, %v2667_v56, %v2668_v21  ;;  %v2853_v14 = vmul.f32 %v6541_v23, %v5260_v42 }
 0x1f3   : > { %v2578_v27 = vadd.f32 %v2562_v25, %v2540_v26  ;;  %v2671_v5 = vsel %vm1023_vm8, %v2668_v21, %v2670_v49  ;;  %v2794_v22 = vrot.slane %v2731_v3, 2  ;;  %v2854_v55 = vmul.f32 %v6543_v34, %v5260_v42 }
 0x1f4   : > { %v2793_v41 = vsel %vm1148_vm9, %v2791_v59, %v2792_v37  ;;  %v2702_v9 = vadd.f32 %v2669_v1, %v2577_v4  ;;  %v2855_v17 = vmul.f32 %v5260_v42, %v6660_v7  ;;  %v2915_v28 = vrot.slane %v2853_v14, 3  ;;  %v4821_v1 = vld [vmem:[%s5207_s22 + $0x38] sm:$0xff]  }
 0x1f5   : > { %v2703_v38 = vadd.f32 %v2671_v5, %v2578_v27  ;;  %v2795_v62 = vsel %vm1148_vm9, %v2792_v37, %v2794_v22  ;;  %v2916_v6 = vrot.slane %v2854_v55, 3  ;;  %v2977_v10 = vmul.f32 %v6541_v23, %v5262_v43 }
 0x1f6   : > { %v2978_v48 = vmul.f32 %v6543_v34, %v5262_v43  ;;  %v2826_v24 = vadd.f32 %v2793_v41, %v2702_v9  ;;  %v2918_v32 = vrot.slane %v2855_v17, 3  ;;  %v2979_v50 = vmul.f32 %v5262_v43, %v6660_v7 }
 0x1f7   : > { %v2827_v29 = vadd.f32 %v2795_v62, %v2703_v38  ;;  %v2917_v8 = vsel %vm1273_vm10, %v2915_v28, %v2916_v6  ;;  %v3039_v42 = vrot.slane %v2977_v10, 4  ;;  %v3076_v19 = vunpack.c.l.bf16 %v902_v33  ;;  %v6908_v28 = vld [vmem:[%s7348_s7] ss:$0 sm:$0xff] }
 0x1f8   : > { %v3040_v15 = vrot.slane %v2978_v48, 4  ;;  %v2919_v40 = vsel %vm1273_vm10, %v2916_v6, %v2918_v32  ;;  %v2950_v11 = vadd.f32 %v2917_v8, %v2826_v24  ;;  %v3042_v57 = vrot.slane %v2979_v50, 4  ;;  %v6922_v50 = vld [vmem:[%s7349_s8] ss:$0 sm:$0xff] }
 0x1f9   : > { %v3077_v23 = vunpack.c.h.bf16 %v902_v33  ;;  %v2951_v61 = vadd.f32 %v2919_v40, %v2827_v29  ;;  %v3096_v60 = vmul.f32 %v5264_v44, %v3076_v19  ;;  %v3114_v58 = vunpack.c.l.bf16 %v904_v12 }
 0x1fa   : > { %v3041_v34 = vsel %vm1398_vm11, %v3039_v42, %v3040_v15  ;;  %v3043_v30 = vsel %vm1398_vm11, %v3040_v15, %v3042_v57  ;;  %v3140_v7 = vmul.f32 %v5266_v45, %v3076_v19  ;;  %v3264_v20 = vmul.f32 %v5270_v51, %v3076_v19  ;;  %v7426_v42 = vld [vmem:[#allocation6_spill] sm:$0xff] }
 0x1fb   : > { %v3074_v25 = vadd.f32 %v3041_v34, %v2950_v11  ;;  %v3097_v43 = vmul.f32 %v5264_v44, %v3077_v23  ;;  %v3075_v0 = vadd.f32 %v3043_v30, %v2951_v61  ;;  %v3141_v46 = vmul.f32 %v5266_v45, %v3077_v23  ;;  %v7428_v11 = vld [vmem:[#allocation9_spill] sm:$0xff]  ;;  %v3825_v30 = vld [vmem:[%s6915_s30 + $0x10] sm:$0xff] }
 0x1fc   : > { %v3142_v35 = vmul.f32 %v5266_v45, %v3114_v58  ;;  %v3202_v39 = vrot.slane %v3140_v7, 1  ;;  %v3265_v31 = vmul.f32 %v5270_v51, %v3077_v23  ;;  %v3266_v2 = vmul.f32 %v5270_v51, %v3114_v58  ;;  %v3826_v34 = vld [vmem:[%s6915_s30 + $0x18] sm:$0xff] }
 0x1fd   : > { %v3112_v13 = vadd.f32 %v3096_v60, %v3074_v25  ;;  %v3113_v18 = vadd.f32 %v3097_v43, %v3075_v0  ;;  %v3203_v63 = vrot.slane %v3141_v46, 1  ;;  %v3326_v44 = vrot.slane %v3264_v20, 2  ;;  %v7429_v60 = vld [vmem:[#allocation7_spill] sm:$0xff]  ;;  %v3823_v43 = vld [vmem:[%s6915_s30] sm:$0xff] }
 0x1fe   : > { %v3205_v36 = vrot.slane %v3142_v35, 1  ;;  %v3327_v47 = vrot.slane %v3265_v31, 2  ;;  %v3329_v16 = vrot.slane %v3266_v2, 2  ;;  %v3388_v26 = vmul.f32 %v5272_v52, %v3076_v19  ;;  %v3824_v20 = vld [vmem:[%s6915_s30 + $0x8] sm:$0xff] }
 0x1ff   : > { %v3389_v45 = vmul.f32 %v5272_v52, %v3077_v23  ;;  %v3204_v56 = vsel %vm1023_vm8, %v3202_v39, %v3203_v63  ;;  %v3390_v49 = vmul.f32 %v5272_v52, %v3114_v58  ;;  %v3512_v3 = vmul.f32 %v5274_v53, %v3076_v19  ;;  %v4848_v51 = vpop.f32.mrb[4].mxu0  ;;  %v7427_v19 = vld [vmem:[#allocation8_spill] sm:$0xff] }
 0x200   : > { %v3206_v21 = vsel %vm1023_vm8, %v3203_v63, %v3205_v36  ;;  %v3237_v59 = vadd.f32 %v3204_v56, %v3112_v13  ;;  %v3328_v4 = vsel %vm1148_vm9, %v3326_v44, %v3327_v47  ;;  %v3330_v27 = vsel %vm1148_vm9, %v3327_v47, %v3329_v16  ;;  %v3776_v14 = vpop.f32.mrb[5].mxu0  ;;  %v3829_v13 = vld [vmem:[%s6915_s30 + $0x30] sm:$0xff]  ;;  %v3827_v16 = vld [vmem:[%s6915_s30 + $0x20] sm:$0xff] }
 0x201   : > { %v3238_v37 = vadd.f32 %v3206_v21, %v3113_v18  ;;  %v3450_v5 = vrot.slane %v3388_v26, 3  ;;  %v3451_v41 = vrot.slane %v3389_v45, 3  ;;  %v3453_v22 = vrot.slane %v3390_v49, 3  ;;  %v4849_v33 = vpop.f32.mrb[6].mxu0 }
 0x202   : > { %v3513_v55 = vmul.f32 %v5274_v53, %v3077_v23  ;;  %v3361_v52 = vadd.f32 %v3328_v4, %v3237_v59  ;;  %v3514_v38 = vmul.f32 %v5274_v53, %v3114_v58  ;;  %v3574_v17 = vrot.slane %v3512_v3, 4  ;;  %v3779_v62 = vpop.f32.mrb[7].mxu0 }
 0x203   : > { %v3362_v9 = vadd.f32 %v3330_v27, %v3238_v37  ;;  %v3452_v6 = vsel %vm1273_vm10, %v3450_v5, %v3451_v41  ;;  %v3454_v10 = vsel %vm1273_vm10, %v3451_v41, %v3453_v22  ;;  %v4808_v48 = vunpack.c.l.bf16 %v4821_v1  ;;  %v3830_v37 = vld [vmem:[%s6915_s30 + $0x38] sm:$0xff] }
 0x204   : > { %v3575_v53 = vrot.slane %v3513_v55, 4  ;;  %v3485_v12 = vadd.f32 %v3452_v6, %v3361_v52  ;;  %v3577_v29 = vrot.slane %v3514_v38, 4  ;;  %v4809_v32 = vunpack.c.h.bf16 %v4821_v1 }
 0x205   : > { %v3486_v24 = vadd.f32 %v3454_v10, %v3362_v9  ;;  %v3769_v15 = vadd.f32 %v7426_v42, %v6908_v28  ;;  %v3761_v40 = vadd.f32 %v6908_v28, %v7427_v19  ;;  %v3772_v57 = vadd.f32 %v7428_v11, %v6908_v28 }
 0x206   : > { %v3576_v8 = vsel %vm1398_vm11, %v3574_v17, %v3575_v53  ;;  %v3578_v23 = vsel %vm1398_vm11, %v3575_v53, %v3577_v29  ;;  %v3764_v58 = vadd.f32 %v6908_v28, %v7429_v60  ;;  %v3785_v25 = vadd.f32 %v4848_v51, %v6908_v28  ;;  %v3833_v53 = vld [vmem:[%s6915_s30 + $0x50] sm:$0xff]  ;;  %v3831_v29 = vld [vmem:[%s6915_s30 + $0x40] sm:$0xff] }
 0x207   : > { %v3609_v61 = vadd.f32 %v3576_v8, %v3485_v12  ;;  %v3610_v7 = vadd.f32 %v3578_v23, %v3486_v24  ;;  %v3848_v0 = vmul.f32 %v6922_v50, %v3769_v15  ;;  %v3846_v46 = vmul.f32 %v6922_v50, %v3761_v40  ;;  %v3834_v15 = vld [vmem:[%s6915_s30 + $0x58] sm:$0xff] }
 0x208   : > { %v3849_v35 = vmul.f32 %v6922_v50, %v3772_v57  ;;  %v3847_v31 = vmul.f32 %v6922_v50, %v3764_v58  ;;  %v3852_v2 = vmul.f32 %v6922_v50, %v3785_v25  ;;  %v3777_v18 = vadd.f32 %v6908_v28, %v3776_v14  ;;  %v3828_v14 = vld [vmem:[%s6915_s30 + $0x28] sm:$0xff] }
 0x209   : > { %v3631_v39 = vadd.f32 %v6752_v54, %v3609_v61  ;;  %v3632_v63 = vadd.f32 %v6752_v54, %v3610_v7  ;;  %v6957_v44 = vadd.f32 %v3848_v0, %v3825_v30  ;;  %v6959_v47 = vadd.f32 %v3846_v46, %v3823_v43  ;;  %v3832_v57 = vld [vmem:[%s6915_s30 + $0x48] sm:$0xff] }
 0x20a   : > { %v6955_v36 = vadd.f32 %v3849_v35, %v3826_v34  ;;  %v6962_v45 = vadd.f32 %v3847_v31, %v3824_v20  ;;  %v6964_v56 = vadd.f32 %v3852_v2, %v3829_v13  ;;  %v3850_v21 = vmul.f32 %v6922_v50, %v3777_v18  ;;  %v3837_v31 = vld [vmem:[%s6915_s30 + $0x70] sm:$0xff] }
 0x20b   : > { %v3679_v26 = vmul.f32 %v4808_v48, %v3631_v39  ;;  %v3680_v49 = vmul.f32 %v4809_v32, %v3632_v63  ;;  %v3900_v54 = vsel %vm3697_vm12, %v6957_v44, 0.0  ;;  %3880 = vst.msk [vmem:[%s6948_s26 + $0x10] sm:$0xff] %vm3697_vm12, %v6957_v44  ;;  %v3894_v3 = vsel %vm3697_vm12, %v6959_v47, 0.0  ;;  %3878 = vst.msk [vmem:[%s6948_s26] sm:$0xff] %vm3697_vm12, %v6959_v47 }
 0x20c   : > { %3881 = vst.msk [vmem:[%s6948_s26 + $0x18] sm:$0xff] %vm3697_vm12, %v6955_v36  ;;  %v3788_v51 = vadd.f32 %v4849_v33, %v6908_v28  ;;  %3879 = vst.msk [vmem:[%s6948_s26 + $0x8] sm:$0xff] %vm3697_vm12, %v6962_v45  ;;  %3901 = vadd.xlane.f32.xlu1 %v3900_v54  ;;  %3895 = vadd.xlane.f32.xlu0 %v3894_v3  ;;  %v6987_v59 = vadd.f32 %v3850_v21, %v3827_v16  ;;  %v3903_v22 = vsel %vm3697_vm12, %v6955_v36, 0.0  ;;  %v3835_v16 = vld [vmem:[%s6915_s30 + $0x60] sm:$0xff]  ;;  %v3838_v54 = vld [vmem:[%s6915_s30 + $0x78] sm:$0xff] }
 0x20d   : > { %3884 = vst.msk [vmem:[%s6948_s26 + $0x30] sm:$0xff] %vm3697_vm12, %v6964_v56  ;;  %v3780_v4 = vadd.f32 %v6908_v28, %v3779_v62  ;;  %v3688_v27 = vpack.c.bf16 %v3680_v49, %v3679_v26  ;;  %v3897_v55 = vsel %vm3697_vm12, %v6962_v45, 0.0  ;;  %v3912_v38 = vsel %vm3697_vm12, %v6964_v56, 0.0 }
 0x20e   : > { %v3853_v1 = vmul.f32 %v6922_v50, %v3788_v51  ;;  %3882 = vst.msk [vmem:[%s6948_s26 + $0x20] sm:$0xff] %vm3697_vm12, %v6987_v59  ;;  %v3906_v52 = vsel %vm3697_vm12, %v6987_v59, 0.0 }
 0x20f   : > { %v3851_v5 = vmul.f32 %v6922_v50, %v3780_v4  ;;  %4855 = vmatmul.mubr.msk.bf16.gmra.mrb[12].mxu0 %vm3697_vm12, %v3688_v27  ;;  %v3836_v27 = vld [vmem:[%s6915_s30 + $0x68] sm:$0xff] }
 0x210   : > { %v6998_v41 = vadd.f32 %v3853_v1, %v3830_v37  ;;  %3904 = vadd.xlane.f32.xlu1 %v3903_v22  ;;  %3898 = vadd.xlane.f32.xlu0 %v3897_v55 }
 0x211   : > { %v7004_v33 = vadd.f32 %v3851_v5, %v3828_v14 }
 0x212   : > { %3885 = vst.msk [vmem:[%s6948_s26 + $0x38] sm:$0xff] %vm3697_vm12, %v6998_v41  ;;  %v3915_v17 = vsel %vm3697_vm12, %v6998_v41, 0.0 }
 0x213   : > { %3883 = vst.msk [vmem:[%s6948_s26 + $0x28] sm:$0xff] %vm3697_vm12, %v7004_v33  ;;  %v3909_v9 = vsel %vm3697_vm12, %v7004_v33, 0.0 }
 0x214   : > { %3907 = vadd.xlane.f32.xlu0 %v3906_v52  ;;  %3910 = vadd.xlane.f32.xlu1 %v3909_v9 }
 0x218   : > { %3913 = vadd.xlane.f32.xlu0 %v3912_v38  ;;  %3916 = vadd.xlane.f32.xlu1 %v3915_v17 }
 0x270   : > { %v4852_v62 = vpop.f32.mrb[8].mxu0 }
 0x271   : > { %v3801_v6 = vadd.f32 %v4852_v62, %v6908_v28  ;;  %v3792_v10 = vpop.f32.mrb[9].mxu0 }
 0x272   : > { %v3793_v48 = vadd.f32 %v6908_v28, %v3792_v10  ;;  %v4853_v12 = vpop.f32.mrb[10].mxu0 }
 0x273   : > { %v3856_v24 = vmul.f32 %v6922_v50, %v3801_v6  ;;  %v3804_v32 = vadd.f32 %v4853_v12, %v6908_v28  ;;  %v3795_v8 = vpop.f32.mrb[11].mxu0 }
 0x274   : > { %v3854_v42 = vmul.f32 %v6922_v50, %v3793_v48  ;;  %v3796_v19 = vadd.f32 %v6908_v28, %v3795_v8 }
 0x275   : > { %v7029_v40 = vadd.f32 %v3856_v24, %v3833_v53  ;;  %v3857_v11 = vmul.f32 %v6922_v50, %v3804_v32 }
 0x276   : > { %v7033_v23 = vadd.f32 %v3854_v42, %v3831_v29  ;;  %v3855_v61 = vmul.f32 %v6922_v50, %v3796_v19 }
 0x277   : > { %3888 = vst.msk [vmem:[%s6948_s26 + $0x50] sm:$0xff] %vm3697_vm12, %v7029_v40  ;;  %v7039_v34 = vadd.f32 %v3857_v11, %v3834_v15  ;;  %v3924_v25 = vsel %vm3697_vm12, %v7029_v40, 0.0 }
 0x278   : > { %3886 = vst.msk [vmem:[%s6948_s26 + $0x40] sm:$0xff] %vm3697_vm12, %v7033_v23  ;;  %v7044_v60 = vadd.f32 %v3855_v61, %v3832_v57  ;;  %v3918_v58 = vsel %vm3697_vm12, %v7033_v23, 0.0 }
 0x279   : > { %3889 = vst.msk [vmem:[%s6948_s26 + $0x58] sm:$0xff] %vm3697_vm12, %v7039_v34  ;;  %3919 = vadd.xlane.f32.xlu0 %v3918_v58  ;;  %v3927_v43 = vsel %vm3697_vm12, %v7039_v34, 0.0 }
 0x27a   : > { %3887 = vst.msk [vmem:[%s6948_s26 + $0x48] sm:$0xff] %vm3697_vm12, %v7044_v60  ;;  %v3921_v30 = vsel %vm3697_vm12, %v7044_v60, 0.0 }
 0x27b   : > { %3922 = vadd.xlane.f32.xlu1 %v3921_v30 }
 0x27d   : > { %3925 = vadd.xlane.f32.xlu0 %v3924_v25 }
 0x27f   : > { %3928 = vadd.xlane.f32.xlu1 %v3927_v43 }
 0x299   : > { %v3896_v7 = vpop.xlane.xlu0 %3895  ;;  %v3902_v0 = vpop.xlane.xlu1 %3901 }
 0x29a   : > { %v3943_v39 = vmul.f32 0.25, %v3896_v7  ;;  %v3945_v9 = vmul.f32 0.25, %v3902_v0 }
 0x29c   : > { %v7074_v1 = vsub.f32 %v6959_v47, %v3943_v39  ;;  %v7107_v48 = vsub.f32 %v6957_v44, %v3945_v9 }
 0x29d   : > { %v3899_v46 = vpop.xlane.xlu0 %3898  ;;  %v3905_v14 = vpop.xlane.xlu1 %3904 }
 0x29e   : > { %v3944_v51 = vmul.f32 0.25, %v3899_v46  ;;  %v3975_v17 = vmul.f32 %v7074_v1, %v7074_v1  ;;  %v3977_v11 = vmul.f32 %v7107_v48, %v7107_v48 }
 0x2a0   : > { %v7092_v38 = vsub.f32 %v6962_v45, %v3944_v51  ;;  %v3991_v29 = vsel %vm3697_vm12, %v3975_v17, 0.0  ;;  %v3997_v30 = vsel %vm3697_vm12, %v3977_v11, 0.0 }
 0x2a1   : > { %v3908_v5 = vpop.xlane.xlu0 %3907  ;;  %v3911_v62 = vpop.xlane.xlu1 %3910 }
 0x2a2   : > { %v3947_v10 = vmul.f32 0.25, %v3908_v5  ;;  %v3976_v12 = vmul.f32 %v7092_v38, %v7092_v38  ;;  %v3948_v42 = vmul.f32 0.25, %v3911_v62 }
 0x2a4   : > { %v7118_v8 = vsub.f32 %v6987_v59, %v3947_v10  ;;  %v3994_v19 = vsel %vm3697_vm12, %v3976_v12, 0.0  ;;  %v7126_v57 = vsub.f32 %v7004_v33, %v3948_v42 }
 0x2a5   : > { %v3914_v53 = vpop.xlane.xlu0 %3913  ;;  %v3917_v44 = vpop.xlane.xlu1 %3916 }
 0x2a6   : > { %v3949_v15 = vmul.f32 0.25, %v3914_v53  ;;  %v3950_v59 = vmul.f32 0.25, %v3917_v44  ;;  %v3979_v58 = vmul.f32 %v7118_v8, %v7118_v8  ;;  %v3980_v33 = vmul.f32 %v7126_v57, %v7126_v57 }
 0x2a8   : > { %v7129_v61 = vsub.f32 %v6964_v56, %v3949_v15  ;;  %v7136_v43 = vsub.f32 %v6998_v41, %v3950_v59  ;;  %v4003_v7 = vsel %vm3697_vm12, %v3979_v58, 0.0  ;;  %v4006_v0 = vsel %vm3697_vm12, %v3980_v33, 0.0 }
 0x2aa   : > { %v3981_v56 = vmul.f32 %v7129_v61, %v7129_v61 }
 0x2ac   : > { %v4009_v46 = vsel %vm3697_vm12, %v3981_v56, 0.0 }
 0x2e2   : > { %v4856_v35 = vpop.f32.mrb[12].mxu0 }
 0x2e3   : > { %v3817_v20 = vadd.f32 %v4856_v35, %v6908_v28  ;;  %v3808_v13 = vpop.f32.mrb[13].mxu0  ;;  %v3982_v35 = vmul.f32 %v7136_v43, %v7136_v43 }
 0x2e4   : > { %v3809_v2 = vadd.f32 %v6908_v28, %v3808_v13  ;;  %v4857_v18 = vpop.f32.mrb[14].mxu0 }
 0x2e5   : > { %v3860_v63 = vmul.f32 %v6922_v50, %v3817_v20  ;;  %v3820_v26 = vadd.f32 %v4857_v18, %v6908_v28  ;;  %v3811_v21 = vpop.f32.mrb[15].mxu0  ;;  %v4012_v41 = vsel %vm3697_vm12, %v3982_v35, 0.0 }
 0x2e6   : > { %v3858_v49 = vmul.f32 %v6922_v50, %v3809_v2  ;;  %v3812_v3 = vadd.f32 %v6908_v28, %v3811_v21 }
 0x2e7   : > { %v7069_v37 = vadd.f32 %v3860_v63, %v3837_v31  ;;  %v3861_v4 = vmul.f32 %v6922_v50, %v3820_v26 }
 0x2e8   : > { %v7076_v22 = vadd.f32 %v3858_v49, %v3835_v16  ;;  %v3859_v55 = vmul.f32 %v6922_v50, %v3812_v3  ;;  %v3946_v50 = vmul.f32 0.25, %v3905_v14 }
 0x2e9   : > { %3892 = vst.msk [vmem:[%s6948_s26 + $0x70] sm:$0xff] %vm3697_vm12, %v7069_v37  ;;  %v7082_v28 = vadd.f32 %v3861_v4, %v3838_v54  ;;  %v3936_v45 = vsel %vm3697_vm12, %v7069_v37, 0.0 }
 0x2ea   : > { %3890 = vst.msk [vmem:[%s6948_s26 + $0x60] sm:$0xff] %vm3697_vm12, %v7076_v22  ;;  %v7087_v52 = vadd.f32 %v3859_v55, %v3836_v27  ;;  %v3930_v47 = vsel %vm3697_vm12, %v7076_v22, 0.0  ;;  %v7112_v24 = vsub.f32 %v6955_v36, %v3946_v50 }
 0x2eb   : > { %3893 = vst.msk [vmem:[%s6948_s26 + $0x78] sm:$0xff] %vm3697_vm12, %v7082_v28  ;;  %3931 = vadd.xlane.f32.xlu0 %v3930_v47  ;;  %v3939_v32 = vsel %vm3697_vm12, %v7082_v28, 0.0 }
 0x2ec   : > { %3891 = vst.msk [vmem:[%s6948_s26 + $0x68] sm:$0xff] %vm3697_vm12, %v7087_v52  ;;  %v3933_v6 = vsel %vm3697_vm12, %v7087_v52, 0.0  ;;  %v3978_v36 = vmul.f32 %v7112_v24, %v7112_v24 }
 0x2ed   : > { %3934 = vadd.xlane.f32.xlu1 %v3933_v6 }
 0x2ee   : > { %v4000_v25 = vsel %vm3697_vm12, %v3978_v36, 0.0 }
 0x2ef   : > { %3937 = vadd.xlane.f32.xlu0 %v3936_v45 }
 0x2f1   : > { %3940 = vadd.xlane.f32.xlu1 %v3939_v32 }
 0x2f3   : > { %3992 = vadd.xlane.f32.xlu0 %v3991_v29 }
 0x2f5   : > { %3995 = vadd.xlane.f32.xlu1 %v3994_v19 }
 0x2f7   : > { %3998 = vadd.xlane.f32.xlu0 %v3997_v30 }
 0x2f9   : > { %4001 = vadd.xlane.f32.xlu1 %v4000_v25 }
 0x2fb   : > { %4004 = vadd.xlane.f32.xlu0 %v4003_v7 }
 0x2fd   : > { %4007 = vadd.xlane.f32.xlu1 %v4006_v0 }
 0x2ff   : > { %4010 = vadd.xlane.f32.xlu0 %v4009_v46 }
 0x301   : > { %4013 = vadd.xlane.f32.xlu1 %v4012_v41 }
 0x306   : > { %v3920_v20 = vpop.xlane.xlu0 %3919 }
 0x307   : > { %v3951_v13 = vmul.f32 0.25, %v3920_v20 }
 0x308   : > { %v3923_v39 = vpop.xlane.xlu1 %3922 }
 0x309   : > { %v7149_v31 = vsub.f32 %v7033_v23, %v3951_v13  ;;  %v3952_v2 = vmul.f32 0.25, %v3923_v39 }
 0x30a   : > { %v3926_v18 = vpop.xlane.xlu0 %3925 }
 0x30b   : > { %v7152_v63 = vsub.f32 %v7044_v60, %v3952_v2  ;;  %v3953_v16 = vmul.f32 0.25, %v3926_v18  ;;  %v3983_v26 = vmul.f32 %v7149_v31, %v7149_v31 }
 0x30c   : > { %v3929_v21 = vpop.xlane.xlu1 %3928 }
 0x30d   : > { %v7157_v49 = vsub.f32 %v7029_v40, %v3953_v16  ;;  %v3954_v54 = vmul.f32 0.25, %v3929_v21  ;;  %v4015_v3 = vsel %vm3697_vm12, %v3983_v26, 0.0  ;;  %v3984_v23 = vmul.f32 %v7152_v63, %v7152_v63 }
 0x30e   : > { %4016 = vadd.xlane.f32.xlu0 %v4015_v3  ;;  %v4157_v3 = vld [vmem:[%s7352_s11] sm:$0x3] }
 0x30f   : > { %v7163_v51 = vsub.f32 %v7039_v34, %v3954_v54  ;;  %v4018_v60 = vsel %vm3697_vm12, %v3984_v23, 0.0  ;;  %v3985_v4 = vmul.f32 %v7157_v49, %v7157_v49  ;;  %v7199_v54 = vld [vmem:[%s7350_s9] ss:$0 sm:$0xff]  ;;  %4877 = vmatprep.subr.msk.bf16.mxu1 %vm3722_vm0, %v4157_v3 }
 0x310   : > { %4019 = vadd.xlane.f32.xlu1 %v4018_v60 }
 0x311   : > { %v4021_v27 = vsel %vm3697_vm12, %v3985_v4, 0.0  ;;  %v3986_v40 = vmul.f32 %v7163_v51, %v7163_v51 }
 0x312   : > { %4022 = vadd.xlane.f32.xlu0 %v4021_v27  ;;  %v4190_v27 = vsel %vm3722_vm0, %v4157_v3, 0 }
 0x313   : > { %v4024_v14 = vsel %vm3697_vm12, %v3986_v40, 0.0  ;;  %4859 = vmatpush3.bf16.msra.mxu1 %v4190_v27 }
 0x314   : > { %4025 = vadd.xlane.f32.xlu1 %v4024_v14 }
 0x378   : > { %v3932_v5 = vpop.xlane.xlu0 %3931 }
 0x379   : > { %v3955_v55 = vmul.f32 0.25, %v3932_v5 }
 0x37a   : > { %v3935_v47 = vpop.xlane.xlu1 %3934 }
 0x37b   : > { %v7173_v34 = vsub.f32 %v7076_v22, %v3955_v55  ;;  %v3956_v9 = vmul.f32 0.25, %v3935_v47  ;;  %v7212_v55 = vld [vmem:[%s7351_s10] ss:$0 sm:$0xff] }
 0x37c   : > { %v3938_v50 = vpop.xlane.xlu0 %3937 }
 0x37d   : > { %v7176_v17 = vsub.f32 %v7087_v52, %v3956_v9  ;;  %v3957_v62 = vmul.f32 0.25, %v3938_v50  ;;  %v3987_v6 = vmul.f32 %v7173_v34, %v7173_v34 }
 0x37e   : > { %v3941_v10 = vpop.xlane.xlu1 %3940 }
 0x37f   : > { %v7181_v53 = vsub.f32 %v7069_v37, %v3957_v62  ;;  %v3958_v45 = vmul.f32 0.25, %v3941_v10  ;;  %v4027_v12 = vsel %vm3697_vm12, %v3987_v6, 0.0  ;;  %v3988_v22 = vmul.f32 %v7176_v17, %v7176_v17 }
 0x380   : > { %4028 = vadd.xlane.f32.xlu0 %v4027_v12  ;;  %v3993_v29 = vpop.xlane.xlu0 %3992 }
 0x381   : > { %v7187_v32 = vsub.f32 %v7082_v28, %v3958_v45  ;;  %v4030_v52 = vsel %vm3697_vm12, %v3988_v22, 0.0  ;;  %v3989_v42 = vmul.f32 %v7181_v53, %v7181_v53  ;;  %v4039_v15 = vmul.f32 0.25, %v3993_v29 }
 0x382   : > { %4031 = vadd.xlane.f32.xlu1 %v4030_v52  ;;  %v3996_v37 = vpop.xlane.xlu1 %3995 }
 0x383   : > { %v4033_v44 = vsel %vm3697_vm12, %v3989_v42, 0.0  ;;  %v3990_v19 = vmul.f32 %v7187_v32, %v7187_v32  ;;  %v4055_v11 = vadd.f32 1e-06, %v4039_v15  ;;  %v4040_v36 = vmul.f32 0.25, %v3996_v37 }
 0x384   : > { %4034 = vadd.xlane.f32.xlu0 %v4033_v44  ;;  %v3999_v59 = vpop.xlane.xlu0 %3998 }
 0x385   : > { %v4036_v28 = vsel %vm3697_vm12, %v3990_v19, 0.0  ;;  %4919 = vrsqrt.f32 %v4055_v11  ;;  %v4056_v58 = vadd.f32 1e-06, %v4040_v36  ;;  %v4041_v30 = vmul.f32 0.25, %v3999_v59 }
 0x386   : > { %4037 = vadd.xlane.f32.xlu1 %v4036_v28  ;;  %v4002_v25 = vpop.xlane.xlu1 %4001 }
 0x387   : > { %4921 = vrsqrt.f32 %v4056_v58  ;;  %v4057_v7 = vadd.f32 1e-06, %v4041_v30  ;;  %v4042_v33 = vmul.f32 0.25, %v4002_v25 }
 0x388   : > { %v4005_v56 = vpop.xlane.xlu0 %4004 }
 0x389   : > { %4923 = vrsqrt.f32 %v4057_v7  ;;  %v4058_v0 = vadd.f32 1e-06, %v4042_v33  ;;  %v4043_v46 = vmul.f32 0.25, %v4005_v56 }
 0x38a   : > { %v4008_v35 = vpop.xlane.xlu1 %4007 }
 0x38b   : > { %4925 = vrsqrt.f32 %v4058_v0  ;;  %v4059_v41 = vadd.f32 1e-06, %v4043_v46  ;;  %v4044_v20 = vmul.f32 0.25, %v4008_v35 }
 0x38c   : > { %v4011_v13 = vpop.xlane.xlu0 %4010 }
 0x38d   : > { %4927 = vrsqrt.f32 %v4059_v41  ;;  %v4060_v39 = vadd.f32 1e-06, %v4044_v20  ;;  %v4045_v2 = vmul.f32 0.25, %v4011_v13 }
 0x38e   : > { %v4014_v18 = vpop.xlane.xlu1 %4013 }
 0x38f   : > { %v4920_v16 = vpop.eup %4919  ;;  %4929 = vrsqrt.f32 %v4060_v39  ;;  %v4061_v26 = vadd.f32 1e-06, %v4045_v2  ;;  %v4046_v21 = vmul.f32 0.25, %v4014_v18 }
 0x390   : > { %v4087_v23 = vmul.f32 %v4920_v16, %v7074_v1 }
 0x391   : > { %v4922_v60 = vpop.eup %4921  ;;  %4931 = vrsqrt.f32 %v4061_v26  ;;  %v4062_v4 = vadd.f32 1e-06, %v4046_v21 }
 0x392   : > { %v4088_v40 = vmul.f32 %v4922_v60, %v7092_v38  ;;  %v4110_v14 = vmul.f32 %v7199_v54, %v4087_v23 }
 0x393   : > { %v4924_v5 = vpop.eup %4923  ;;  %4933 = vrsqrt.f32 %v4062_v4 }
 0x394   : > { %v4089_v1 = vmul.f32 %v4924_v5, %v7107_v48  ;;  %v4111_v47 = vmul.f32 %v7199_v54, %v4088_v40  ;;  %v4133_v62 = vadd.f32 %v7212_v55, %v4110_v14 }
 0x395   : > { %v4926_v9 = vpop.eup %4925 }
 0x396   : > { %v4090_v50 = vmul.f32 %v4926_v9, %v7112_v24  ;;  %v4134_v38 = vadd.f32 %v7212_v55, %v4111_v47  ;;  %v4112_v6 = vmul.f32 %v7199_v54, %v4089_v1 }
 0x397   : > { %v4928_v10 = vpop.eup %4927 }
 0x398   : > { %v4091_v45 = vmul.f32 %v4928_v10, %v7118_v8  ;;  %v4149_v12 = vpack.c.bf16 %v4134_v38, %v4133_v62  ;;  %v4113_v22 = vmul.f32 %v7199_v54, %v4090_v50  ;;  %v4135_v52 = vadd.f32 %v7212_v55, %v4112_v6 }
 0x399   : > { %v4930_v29 = vpop.eup %4929 }
 0x39a   : > { %v4092_v48 = vmul.f32 %v4930_v29, %v7126_v57  ;;  %4860 = vmatprep.mubr.msk.bf16.mxu1 %vm3697_vm12, %v4149_v12  ;;  %v4136_v24 = vadd.f32 %v7212_v55, %v4113_v22  ;;  %v4114_v42 = vmul.f32 %v7199_v54, %v4091_v45 }
 0x39b   : > { %v4932_v15 = vpop.eup %4931  ;;  %v4017_v37 = vpop.xlane.xlu0 %4016 }
 0x39c   : > { %v4093_v44 = vmul.f32 %v4932_v15, %v7129_v61  ;;  %v4047_v19 = vmul.f32 0.25, %v4017_v37  ;;  %v4150_v8 = vpack.c.bf16 %v4136_v24, %v4135_v52  ;;  %v4115_v11 = vmul.f32 %v7199_v54, %v4092_v48 }
 0x39d   : > { %v4934_v36 = vpop.eup %4933  ;;  %v4020_v59 = vpop.xlane.xlu1 %4019  ;;  %v4137_v57 = vadd.f32 %v7212_v55, %v4114_v42 }
 0x39e   : > { %v4094_v28 = vmul.f32 %v4934_v36, %v7136_v43  ;;  %v4063_v58 = vadd.f32 1e-06, %v4047_v19  ;;  %v4048_v30 = vmul.f32 0.25, %v4020_v59  ;;  %4861 = vmatmul.mubr.msk.bf16.vlgmr.msra.gmra.mrb[0].mxu1 %vm3697_vm12, %v4150_v8  ;;  %v4138_v25 = vadd.f32 %v7212_v55, %v4115_v11 }
 0x39f   : > { %v4023_v7 = vpop.xlane.xlu0 %4022  ;;  %v4116_v33 = vmul.f32 %v7199_v54, %v4093_v44 }
 0x3a0   : > { %4935 = vrsqrt.f32 %v4063_v58  ;;  %v4064_v61 = vadd.f32 1e-06, %v4048_v30  ;;  %v4049_v56 = vmul.f32 0.25, %v4023_v7  ;;  %v4151_v0 = vpack.c.bf16 %v4138_v25, %v4137_v57 }
 0x3a1   : > { %v4026_v46 = vpop.xlane.xlu1 %4025  ;;  %v4117_v35 = vmul.f32 %v7199_v54, %v4094_v28  ;;  %v4139_v43 = vadd.f32 %v7212_v55, %v4116_v33 }
 0x3a2   : > { %4937 = vrsqrt.f32 %v4064_v61  ;;  %v4065_v41 = vadd.f32 1e-06, %v4049_v56  ;;  %v4050_v20 = vmul.f32 0.25, %v4026_v46  ;;  %4864 = vmatprep.mubr.msk.bf16.mxu1 %vm3697_vm12, %v4151_v0 }
 0x3a3   : > { %v4140_v13 = vadd.f32 %v7212_v55, %v4117_v35 }
 0x3a4   : > { %4939 = vrsqrt.f32 %v4065_v41  ;;  %v4066_v39 = vadd.f32 1e-06, %v4050_v20 }
 0x3a5   : > { %v4152_v2 = vpack.c.bf16 %v4140_v13, %v4139_v43 }
 0x3a6   : > { %4941 = vrsqrt.f32 %v4066_v39 }
 0x3a7   : > { %4865 = vmatmul.mubr.msk.bf16.gmra.mrb[4].mxu1 %vm3697_vm12, %v4152_v2 }
 0x3aa   : > { %v4936_v18 = vpop.eup %4935 }
 0x3ab   : > { %v4095_v16 = vmul.f32 %v4936_v18, %v7149_v31 }
 0x3ac   : > { %v4938_v26 = vpop.eup %4937 }
 0x3ad   : > { %v4096_v21 = vmul.f32 %v4938_v26, %v7152_v63  ;;  %v4118_v3 = vmul.f32 %v7199_v54, %v4095_v16 }
 0x3ae   : > { %v4940_v23 = vpop.eup %4939 }
 0x3af   : > { %v4097_v60 = vmul.f32 %v4940_v23, %v7157_v49  ;;  %v4119_v4 = vmul.f32 %v7199_v54, %v4096_v21  ;;  %v4141_v14 = vadd.f32 %v7212_v55, %v4118_v3 }
 0x3b0   : > { %v4942_v27 = vpop.eup %4941 }
 0x3b1   : > { %v4098_v40 = vmul.f32 %v4942_v27, %v7163_v51  ;;  %v4142_v5 = vadd.f32 %v7212_v55, %v4119_v4  ;;  %v4120_v1 = vmul.f32 %v7199_v54, %v4097_v60 }
 0x3b3   : > { %v4153_v31 = vpack.c.bf16 %v4142_v5, %v4141_v14  ;;  %v4121_v47 = vmul.f32 %v7199_v54, %v4098_v40  ;;  %v4143_v63 = vadd.f32 %v7212_v55, %v4120_v1 }
 0x3b5   : > { %4868 = vmatprep.mubr.msk.bf16.mxu1 %vm3697_vm12, %v4153_v31  ;;  %v4144_v49 = vadd.f32 %v7212_v55, %v4121_v47 }
 0x3b7   : > { %v4154_v9 = vpack.c.bf16 %v4144_v49, %v4143_v63 }
 0x3b9   : > { %4869 = vmatmul.mubr.msk.bf16.gmra.mrb[8].mxu1 %vm3697_vm12, %v4154_v9 }
 0x40d   : > { %v4029_v50 = vpop.xlane.xlu0 %4028 }
 0x40e   : > { %v4051_v51 = vmul.f32 0.25, %v4029_v50 }
 0x40f   : > { %v4032_v62 = vpop.xlane.xlu1 %4031 }
 0x410   : > { %v4067_v38 = vadd.f32 1e-06, %v4051_v51  ;;  %v4052_v6 = vmul.f32 0.25, %v4032_v62 }
 0x411   : > { %v4035_v10 = vpop.xlane.xlu0 %4034 }
 0x412   : > { %4943 = vrsqrt.f32 %v4067_v38  ;;  %v4068_v45 = vadd.f32 1e-06, %v4052_v6  ;;  %v4053_v12 = vmul.f32 0.25, %v4035_v10 }
 0x413   : > { %v4038_v22 = vpop.xlane.xlu1 %4037 }
 0x414   : > { %4945 = vrsqrt.f32 %v4068_v45  ;;  %v4069_v29 = vadd.f32 1e-06, %v4053_v12  ;;  %v4054_v48 = vmul.f32 0.25, %v4038_v22 }
 0x416   : > { %4947 = vrsqrt.f32 %v4069_v29  ;;  %v4070_v52 = vadd.f32 1e-06, %v4054_v48 }
 0x418   : > { %4949 = vrsqrt.f32 %v4070_v52 }
 0x41c   : > { %v4944_v24 = vpop.eup %4943 }
 0x41d   : > { %v4099_v42 = vmul.f32 %v4944_v24, %v7173_v34 }
 0x41e   : > { %v4946_v15 = vpop.eup %4945 }
 0x41f   : > { %v4100_v37 = vmul.f32 %v4946_v15, %v7176_v17  ;;  %v4122_v44 = vmul.f32 %v7199_v54, %v4099_v42 }
 0x420   : > { %v4948_v19 = vpop.eup %4947 }
 0x421   : > { %v4101_v8 = vmul.f32 %v4948_v19, %v7181_v53  ;;  %v4123_v11 = vmul.f32 %v7199_v54, %v4100_v37  ;;  %v4145_v57 = vadd.f32 %v7212_v55, %v4122_v44 }
 0x422   : > { %v4950_v36 = vpop.eup %4949 }
 0x423   : > { %v4102_v59 = vmul.f32 %v4950_v36, %v7187_v32  ;;  %v4146_v28 = vadd.f32 %v7212_v55, %v4123_v11  ;;  %v4124_v58 = vmul.f32 %v7199_v54, %v4101_v8  ;;  %v7270_v32 = vld [vmem:[%s7353_s12] ss:$0 sm:$0xff] }
 0x425   : > { %v4155_v34 = vpack.c.bf16 %v4146_v28, %v4145_v57  ;;  %v4125_v30 = vmul.f32 %v7199_v54, %v4102_v59  ;;  %v4147_v17 = vadd.f32 %v7212_v55, %v4124_v58 }
 0x427   : > { %4872 = vmatprep.mubr.msk.bf16.mxu1 %vm3697_vm12, %v4155_v34  ;;  %v4148_v53 = vadd.f32 %v7212_v55, %v4125_v30 }
 0x429   : > { %v4156_v25 = vpack.c.bf16 %v4148_v53, %v4147_v17 }
 0x42b   : > { %4873 = vmatmul.mubr.msk.bf16.gmra.mrb[12].mxu1 %vm3697_vm12, %v4156_v25 }
 0x471   : > { %v4862_v7 = vpop.f32.mrb[0].mxu1 }
 0x472   : > { %v4235_v33 = vadd.f32 %v4862_v7, %v7270_v32  ;;  %v4226_v61 = vpop.f32.mrb[1].mxu1 }
 0x473   : > { %v4227_v54 = vadd.f32 %v7270_v32, %v4226_v61  ;;  %v4863_v56 = vpop.f32.mrb[2].mxu1 }
 0x474   : > { %v4308_v0 = vmul.f32 0.70710677, %v4235_v33  ;;  %v4238_v46 = vadd.f32 %v4863_v56, %v7270_v32  ;;  %v4229_v35 = vpop.f32.mrb[3].mxu1  ;;  %v4291_v5 = vmul.f32 0.5, %v4235_v33 }
 0x475   : > { %v4306_v55 = vmul.f32 0.70710677, %v4227_v54  ;;  %v4230_v41 = vadd.f32 %v7270_v32, %v4229_v35  ;;  %v4289_v47 = vmul.f32 0.5, %v4227_v54 }
 0x476   : > { %4951 = verf.f32 %v4308_v0  ;;  %v4309_v20 = vmul.f32 0.70710677, %v4238_v46  ;;  %v4292_v50 = vmul.f32 0.5, %v4238_v46 }
 0x477   : > { %4953 = verf.f32 %v4306_v55  ;;  %v4307_v43 = vmul.f32 0.70710677, %v4230_v41  ;;  %v4290_v38 = vmul.f32 0.5, %v4230_v41 }
 0x478   : > { %4955 = verf.f32 %v4309_v20 }
 0x479   : > { %4957 = verf.f32 %v4307_v43 }
 0x47a   : > { %v4866_v13 = vpop.f32.mrb[4].mxu1 }
 0x47b   : > { %v4251_v39 = vadd.f32 %v4866_v13, %v7270_v32  ;;  %v4242_v2 = vpop.f32.mrb[5].mxu1 }
 0x47c   : > { %v4243_v18 = vadd.f32 %v7270_v32, %v4242_v2  ;;  %v4867_v16 = vpop.f32.mrb[6].mxu1 }
 0x47d   : > { %v4312_v26 = vmul.f32 0.70710677, %v4251_v39  ;;  %v4254_v21 = vadd.f32 %v4867_v16, %v7270_v32  ;;  %v4245_v3 = vpop.f32.mrb[7].mxu1  ;;  %v4295_v42 = vmul.f32 0.5, %v4251_v39 }
 0x47e   : > { %v4310_v23 = vmul.f32 0.70710677, %v4243_v18  ;;  %v4246_v60 = vadd.f32 %v7270_v32, %v4245_v3  ;;  %v4293_v44 = vmul.f32 0.5, %v4243_v18 }
 0x47f   : > { %4959 = verf.f32 %v4312_v26  ;;  %v4313_v4 = vmul.f32 0.70710677, %v4254_v21  ;;  %v4296_v36 = vmul.f32 0.5, %v4254_v21 }
 0x480   : > { %v4952_v27 = vpop.eup %4951  ;;  %4961 = verf.f32 %v4310_v23  ;;  %v4311_v40 = vmul.f32 0.70710677, %v4246_v60  ;;  %v4294_v58 = vmul.f32 0.5, %v4246_v60 }
 0x481   : > { %v4954_v14 = vpop.eup %4953  ;;  %v4340_v1 = vadd.f32 1.0, %v4952_v27  ;;  %4963 = verf.f32 %v4313_v4 }
 0x482   : > { %v4956_v31 = vpop.eup %4955  ;;  %v4338_v63 = vadd.f32 1.0, %v4954_v14  ;;  %4965 = verf.f32 %v4311_v40 }
 0x483   : > { %v4958_v49 = vpop.eup %4957  ;;  %v4356_v9 = vmul.f32 %v4340_v1, %v4291_v5  ;;  %v4341_v51 = vadd.f32 1.0, %v4956_v31 }
 0x484   : > { %v4354_v62 = vmul.f32 %v4338_v63, %v4289_v47  ;;  %v4339_v6 = vadd.f32 1.0, %v4958_v49 }
 0x485   : > { %v4740_v10 = vpack.c.bf16 %v4356_v9, %v4356_v9  ;;  %v4357_v45 = vmul.f32 %v4341_v51, %v4292_v50 }
 0x486   : > { %v4738_v12 = vpack.c.bf16 %v4354_v62, %v4354_v62  ;;  %v4355_v22 = vmul.f32 %v4339_v6, %v4290_v38 }
 0x487   : > { %4437 = vst.msk [vmem:[%s7284_s29 + $0x8] sm:$0xf] %vm4434_vm13, %v4740_v10  ;;  %v4741_v29 = vpack.c.bf16 %v4357_v45, %v4357_v45 }
 0x488   : > { %4435 = vst.msk [vmem:[%s7284_s29] sm:$0xf] %vm4434_vm13, %v4738_v12  ;;  %v4739_v48 = vpack.c.bf16 %v4355_v22, %v4355_v22 }
 0x489   : > { %v4960_v52 = vpop.eup %4959  ;;  %4438 = vst.msk [vmem:[%s7284_s29 + $0xc] sm:$0xf] %vm4434_vm13, %v4741_v29 }
 0x48a   : > { %v4962_v24 = vpop.eup %4961  ;;  %4436 = vst.msk [vmem:[%s7284_s29 + $0x4] sm:$0xf] %vm4434_vm13, %v4739_v48  ;;  %v4344_v15 = vadd.f32 1.0, %v4960_v52 }
 0x48b   : > { %v4964_v37 = vpop.eup %4963  ;;  %v4342_v19 = vadd.f32 1.0, %v4962_v24 }
 0x48c   : > { %v4966_v8 = vpop.eup %4965  ;;  %v4360_v11 = vmul.f32 %v4344_v15, %v4295_v42  ;;  %v4345_v59 = vadd.f32 1.0, %v4964_v37  ;;  %v4870_v57 = vpop.f32.mrb[8].mxu1 }
 0x48d   : > { %v4358_v28 = vmul.f32 %v4342_v19, %v4293_v44  ;;  %v4343_v34 = vadd.f32 1.0, %v4966_v8  ;;  %v4267_v30 = vadd.f32 %v4870_v57, %v7270_v32  ;;  %v4258_v17 = vpop.f32.mrb[9].mxu1 }
 0x48e   : > { %v4744_v53 = vpack.c.bf16 %v4360_v11, %v4360_v11  ;;  %v4361_v25 = vmul.f32 %v4345_v59, %v4296_v36  ;;  %v4259_v7 = vadd.f32 %v7270_v32, %v4258_v17  ;;  %v4871_v33 = vpop.f32.mrb[10].mxu1 }
 0x48f   : > { %v4742_v61 = vpack.c.bf16 %v4358_v28, %v4358_v28  ;;  %v4359_v54 = vmul.f32 %v4343_v34, %v4294_v58  ;;  %v4316_v56 = vmul.f32 0.70710677, %v4267_v30  ;;  %v4261_v0 = vpop.f32.mrb[11].mxu1  ;;  %v4270_v55 = vadd.f32 %v4871_v33, %v7270_v32 }
 0x490   : > { %4441 = vst.msk [vmem:[%s7284_s29 + $0x18] sm:$0xf] %vm4434_vm13, %v4744_v53  ;;  %v4745_v46 = vpack.c.bf16 %v4361_v25, %v4361_v25  ;;  %v4314_v35 = vmul.f32 0.70710677, %v4259_v7  ;;  %v4262_v20 = vadd.f32 %v7270_v32, %v4261_v0  ;;  %v4299_v18 = vmul.f32 0.5, %v4267_v30 }
 0x491   : > { %4439 = vst.msk [vmem:[%s7284_s29 + $0x10] sm:$0xf] %vm4434_vm13, %v4742_v61  ;;  %v4743_v41 = vpack.c.bf16 %v4359_v54, %v4359_v54  ;;  %4967 = verf.f32 %v4316_v56  ;;  %v4317_v43 = vmul.f32 0.70710677, %v4270_v55  ;;  %v4297_v26 = vmul.f32 0.5, %v4259_v7 }
 0x492   : > { %4442 = vst.msk [vmem:[%s7284_s29 + $0x1c] sm:$0xf] %vm4434_vm13, %v4745_v46  ;;  %4969 = verf.f32 %v4314_v35  ;;  %v4315_v13 = vmul.f32 0.70710677, %v4262_v20  ;;  %v4300_v27 = vmul.f32 0.5, %v4270_v55  ;;  %v4298_v5 = vmul.f32 0.5, %v4262_v20 }
 0x493   : > { %4440 = vst.msk [vmem:[%s7284_s29 + $0x14] sm:$0xf] %vm4434_vm13, %v4743_v41  ;;  %4971 = verf.f32 %v4317_v43 }
 0x494   : > { %4973 = verf.f32 %v4315_v13 }
 0x49b   : > { %v4968_v39 = vpop.eup %4967 }
 0x49c   : > { %v4970_v2 = vpop.eup %4969  ;;  %v4348_v16 = vadd.f32 1.0, %v4968_v39 }
 0x49d   : > { %v4346_v21 = vadd.f32 1.0, %v4970_v2  ;;  %v4972_v3 = vpop.eup %4971 }
 0x49e   : > { %v4364_v23 = vmul.f32 %v4348_v16, %v4299_v18  ;;  %v4974_v60 = vpop.eup %4973  ;;  %v4349_v40 = vadd.f32 1.0, %v4972_v3 }
 0x49f   : > { %v4362_v4 = vmul.f32 %v4346_v21, %v4297_v26  ;;  %v4347_v1 = vadd.f32 1.0, %v4974_v60 }
 0x4a0   : > { %v4748_v14 = vpack.c.bf16 %v4364_v23, %v4364_v23  ;;  %v4365_v47 = vmul.f32 %v4349_v40, %v4300_v27 }
 0x4a1   : > { %v4746_v31 = vpack.c.bf16 %v4362_v4, %v4362_v4  ;;  %v4363_v63 = vmul.f32 %v4347_v1, %v4298_v5 }
 0x4a2   : > { %4445 = vst.msk [vmem:[%s7284_s29 + $0x28] sm:$0xf] %vm4434_vm13, %v4748_v14  ;;  %v4749_v49 = vpack.c.bf16 %v4365_v47, %v4365_v47 }
 0x4a3   : > { %4443 = vst.msk [vmem:[%s7284_s29 + $0x20] sm:$0xf] %vm4434_vm13, %v4746_v31  ;;  %v4747_v9 = vpack.c.bf16 %v4363_v63, %v4363_v63 }
 0x4a4   : > { %4446 = vst.msk [vmem:[%s7284_s29 + $0x2c] sm:$0xf] %vm4434_vm13, %v4749_v49 }
 0x4a5   : > { %4444 = vst.msk [vmem:[%s7284_s29 + $0x24] sm:$0xf] %vm4434_vm13, %v4747_v9 }
 0x4fe   : > { %v4874_v50 = vpop.f32.mrb[12].mxu1 }
 0x4ff   : > { %v4283_v51 = vadd.f32 %v4874_v50, %v7270_v32  ;;  %v4274_v62 = vpop.f32.mrb[13].mxu1 }
 0x500   : > { %v4275_v38 = vadd.f32 %v7270_v32, %v4274_v62  ;;  %v4875_v6 = vpop.f32.mrb[14].mxu1 }
 0x501   : > { %v4320_v10 = vmul.f32 0.70710677, %v4283_v51  ;;  %v4286_v45 = vadd.f32 %v4875_v6, %v7270_v32  ;;  %v4277_v12 = vpop.f32.mrb[15].mxu1  ;;  %v4303_v15 = vmul.f32 0.5, %v4283_v51 }
 0x502   : > { %v4318_v22 = vmul.f32 0.70710677, %v4275_v38  ;;  %v4278_v29 = vadd.f32 %v7270_v32, %v4277_v12  ;;  %v4301_v19 = vmul.f32 0.5, %v4275_v38 }
 0x503   : > { %4975 = verf.f32 %v4320_v10  ;;  %v4321_v48 = vmul.f32 0.70710677, %v4286_v45  ;;  %v4304_v32 = vmul.f32 0.5, %v4286_v45 }
 0x504   : > { %4977 = verf.f32 %v4318_v22  ;;  %v4319_v52 = vmul.f32 0.70710677, %v4278_v29  ;;  %v4302_v28 = vmul.f32 0.5, %v4278_v29 }
 0x505   : > { %4979 = verf.f32 %v4321_v48 }
 0x506   : > { %4981 = verf.f32 %v4319_v52 }
 0x50d   : > { %v4976_v24 = vpop.eup %4975 }
 0x50e   : > { %v4978_v42 = vpop.eup %4977  ;;  %v4352_v37 = vadd.f32 1.0, %v4976_v24 }
 0x50f   : > { %v4980_v44 = vpop.eup %4979  ;;  %v4350_v8 = vadd.f32 1.0, %v4978_v42 }
 0x510   : > { %v4982_v11 = vpop.eup %4981  ;;  %v4368_v36 = vmul.f32 %v4352_v37, %v4303_v15  ;;  %v4353_v59 = vadd.f32 1.0, %v4980_v44 }
 0x511   : > { %v4366_v57 = vmul.f32 %v4350_v8, %v4301_v19  ;;  %v4351_v58 = vadd.f32 1.0, %v4982_v11 }
 0x512   : > { %v4752_v34 = vpack.c.bf16 %v4368_v36, %v4368_v36  ;;  %v4369_v30 = vmul.f32 %v4353_v59, %v4304_v32 }
 0x513   : > { %v4750_v17 = vpack.c.bf16 %v4366_v57, %v4366_v57  ;;  %v4367_v53 = vmul.f32 %v4351_v58, %v4302_v28 }
 0x514   : > { %4449 = vst.msk [vmem:[%s7284_s29 + $0x38] sm:$0xf] %vm4434_vm13, %v4752_v34  ;;  %v4753_v25 = vpack.c.bf16 %v4369_v30, %v4369_v30 }
 0x515   : > { %4447 = vst.msk [vmem:[%s7284_s29 + $0x30] sm:$0xf] %vm4434_vm13, %v4750_v17  ;;  %v4751_v7 = vpack.c.bf16 %v4367_v53, %v4367_v53 }
 0x516   : > { %4450 = vst.msk [vmem:[%s7284_s29 + $0x3c] sm:$0xf] %vm4434_vm13, %v4753_v25 }
 0x517   : > { %4448 = vst.msk [vmem:[%s7284_s29 + $0x34] sm:$0xf] %vm4434_vm13, %v4751_v7 }
 0x518 PF: > { %s25_s17 = sadd.s32 1, %s5023_s17   ;;  %s7430_s28 = sld [smem:[#allocation3_spill]] }
 0x519   : > { %p22_p8 = scmp.ge.s32.totalorder %s25_s17, 6   ;;  %s7431_s29 = smov %s5015_s15 }
 0x51a   : > { %s7432_s30 = smov %s5019_s16  ;;  %s7433_s15 = smov %s7436_s18 }
 0x51b   :  { %24 = sbr.rel (!%p22_p8) target bundleno = 4 (0x4), region = 125 }
 0x51e   : > { %s7434_s16 = smov %s7430_s28 }

</bundles_post_ra>
